<compile_context>
chip_gen: v5e
topology: v5e:2x2
jax: 0.10.0
libtpu: 0.0.40
codegen_flags: <defaults>
</compile_context>

<pallas_src>
import jax
import jax.numpy as jnp
from jax import lax
from jax.experimental import pallas as pl
from jax.experimental.pallas import tpu as pltpu

F32 = jnp.float32
BF16 = jnp.bfloat16
EPS_AGG = 1e-6   # DGL SymGatedGCN aggregation epsilon
EPS_LN = 1e-5    # nn.LayerNorm default epsilon
LANES = 128

_VMEM = pltpu.MemorySpace.VMEM


def _layer_norm(x, gamma, beta):
    mu = jnp.mean(x, axis=-1, keepdims=True)
    var = jnp.mean((x - mu) ** 2, axis=-1, keepdims=True)
    return (x - mu) * lax.rsqrt(var + EPS_LN) * gamma + beta


def _vmem_limit_bytes():
    # Per-generation scoped-VMEM budget (~108 MiB on v5e/v6e, ~54 MiB on v7x).
    try:
        cap = pltpu.get_tpu_info().vmem_capacity_bytes
    except Exception:
        cap = 64 * 1024 * 1024   # conservative fallback (v7x per-core size)
    return int(cap * 0.85)


# ---------------------------------------------------------------------------
# One fused kernel: encoders + num_layers SymGatedGCN layers + ScorePredictor
# ---------------------------------------------------------------------------
def model_kernel(
    S_ref, D_ref, pe_ref, ef_ref,
    l1n_w_ref, l1n_b_ref, l2n_w_ref, l2n_b_ref,
    l1e_w_ref, l1e_b_ref, l2e_w_ref, l2e_b_ref,
    wn_ref, bn_ref, wb3_ref, bb3_ref,
    gh_ref, bh_ref, ge_ref, be_ref,
    w1ab_ref, w1c_ref, b1_ref, w2t_ref, b2_ref,
    score_ref,
):
    H = wb3_ref.shape[-1]
    num_layers = wn_ref.shape[0]

    # Default (single-pass bf16) MXU precision, f32 accumulate.
    def mm(a, b):
        return jnp.dot(a, b, preferred_element_type=F32)

    # One-hot gather of node rows onto edges.  S/D stay bf16 (never upcast into a
    # kernel-lifetime f32 copy); the value operand is cast to bf16 at the call site so the
    # dot takes the native single-pass bf16 MXU path with f32 accumulation.
    def gather(inc_ref, node_vals):
        return jnp.dot(inc_ref[...], node_vals.astype(BF16),
                       preferred_element_type=F32)

    # Scatter-add of edge rows onto nodes: contract the edge axis of the bf16 incidence
    # matrix against the bf16-cast edge values (no [N, E] transpose materialized).
    def scatter(inc_ref, edge_vals):
        return lax.dot_general(inc_ref[...], edge_vals.astype(BF16),
                               (((0,), (0,)), ((), ())),
                               preferred_element_type=F32)

    # ---- fused node / edge encoders (2-layer MLPs) ----
    x = mm(jnp.maximum(mm(pe_ref[...], l1n_w_ref[...]) + l1n_b_ref[...], 0.0),
           l2n_w_ref[...]) + l2n_b_ref[...]                        # [N, H]
    e = mm(jnp.maximum(mm(ef_ref[...], l1e_w_ref[...]) + l1e_b_ref[...], 0.0),
           l2e_w_ref[...]) + l2e_b_ref[...]                        # [E, H]

    # ---- SymGatedGCN layers; graph stays resident in VMEM across layers ----
    # TODO(synk): switch to lax.fori_loop with dynamic wn_ref[l] indexing for num_layers>4.
    for l in range(num_layers):
        # One wide matmul for the 5 node-side linears, lane layout [A2 | B1 | A3 | B2 | A1]:
        # src gather = lanes [0,2H), dst gather = lanes [2H,4H), A1 starts at lane 4H=128
        # (tile-aligned for H=32) so no slice crosses a 128-lane vreg tile boundary.
        P = mm(x, wn_ref[l]) + bn_ref[l]                           # [N, 5H]
        B3e = mm(e, wb3_ref[l]) + bb3_ref[l]                       # [E, H]

        G_src = gather(S_ref, P[:, 0:2 * H])                       # [E, 2H] = [A2h|B1h]@src
        G_dst = gather(D_ref, P[:, 2 * H:4 * H])                   # [E, 2H] = [A3h|B2h]@dst

        e_ji = G_src[:, H:] + G_dst[:, H:] + B3e                   # gate pre-activation
        sigma = jax.nn.sigmoid(e_ji)

        # Fused numerator|denominator scatters: one K=E MXU op per direction.
        agg_f = scatter(D_ref, jnp.concatenate([sigma * G_src[:, :H], sigma], axis=1))
        agg_b = scatter(S_ref, jnp.concatenate([sigma * G_dst[:, :H], sigma], axis=1))

        h_new = (P[:, 4 * H:]
                 + agg_f[:, :H] / (agg_f[:, H:] + EPS_AGG)
                 + agg_b[:, :H] / (agg_b[:, H:] + EPS_AGG))        # [N, H]

        x = x + jnp.maximum(_layer_norm(h_new, gh_ref[l], bh_ref[l]), 0.0)  # residual
        e = e + jnp.maximum(_layer_norm(e_ji, ge_ref[l], be_ref[l]), 0.0)

    # ---- ScorePredictor: W2(relu(W1(cat(x[src], x[dst], e)))) ----
    s_hid = w1c_ref.shape[1]
    xw = mm(x, w1ab_ref[...])                                      # [N, 2*s_hid]
    hdn = jnp.maximum(
        gather(S_ref, xw[:, :s_hid]) + gather(D_ref, xw[:, s_hid:])
        + mm(e, w1c_ref[...]) + b1_ref[...], 0.0)                  # [E, s_hid]

    # Lane-dense [1, E_pad] score row via trans-rhs dot_general (no w2 lane replication,
    # 4 B/edge output writeback).
    score_ref[...] = lax.dot_general(
        w2t_ref[...], hdn, (((1,), (1,)), ((), ())),
        preferred_element_type=F32) + b2_ref[...]                  # [1, E_pad]


def model_forward(packed, pe, e_feat_pad, S_bf16, D_bf16):
    E_pad = S_bf16.shape[0]
    args = (
        S_bf16, D_bf16, pe, e_feat_pad,
        packed["l1n_w"], packed["l1n_b"], packed["l2n_w"], packed["l2n_b"],
        packed["l1e_w"], packed["l1e_b"], packed["l2e_w"], packed["l2e_b"],
        packed["wn"], packed["bn"], packed["wb3"], packed["bb3"],
        packed["gh"], packed["bh"], packed["ge"], packed["be"],
        packed["w1ab"], packed["w1c"], packed["b1"], packed["w2t"], packed["b2"],
    )
    return pl.pallas_call(
        model_kernel,
        out_shape=jax.ShapeDtypeStruct((1, E_pad), F32),
        in_specs=[pl.BlockSpec(memory_space=_VMEM) for _ in range(len(args))],
        out_specs=pl.BlockSpec(memory_space=_VMEM),
        compiler_params=pltpu.CompilerParams(vmem_limit_bytes=_vmem_limit_bytes()),
    )(*args)                                                       # [1, E_pad]


# ---------------------------------------------------------------------------
# Parameter init (PyTorch nn.Linear default: U(-1/sqrt(fan_in), 1/sqrt(fan_in)))
# ---------------------------------------------------------------------------
def init_linear(key, fan_in, fan_out):
    kw, kb = jax.random.split(key)
    bound = 1.0 / float(fan_in) ** 0.5
    w = jax.random.uniform(kw, (fan_in, fan_out), F32, -bound, bound)
    b = jax.random.uniform(kb, (1, fan_out), F32, -bound, bound)
    return w, b


def init_params(key, node_features, edge_features, hidden_features,
                hidden_edge_features, num_layers, hidden_edge_scores):
    hidden_node_features = hidden_edge_features
    keys = iter(jax.random.split(key, 4 + 6 * num_layers + 2))
    p = {}
    p["l1n_w"], p["l1n_b"] = init_linear(next(keys), node_features, hidden_node_features)
    p["l2n_w"], p["l2n_b"] = init_linear(next(keys), hidden_node_features, hidden_features)
    p["l1e_w"], p["l1e_b"] = init_linear(next(keys), edge_features, hidden_edge_features)
    p["l2e_w"], p["l2e_b"] = init_linear(next(keys), hidden_edge_features, hidden_features)

    gnn = []
    for _ in range(num_layers):
        lp = {}
        for name in ("a1", "a2", "a3", "b1", "b2", "b3"):
            w, b = init_linear(next(keys), hidden_features, hidden_features)
            lp["w" + name] = w
            lp["b" + name] = b
        lp["gamma_h"] = jnp.ones((1, hidden_features), F32)
        lp["beta_h"] = jnp.zeros((1, hidden_features), F32)
        lp["gamma_e"] = jnp.ones((1, hidden_features), F32)
        lp["beta_e"] = jnp.zeros((1, hidden_features), F32)
        gnn.append(lp)
    p["gnn"] = gnn

    H = hidden_features
    w1, b1 = init_linear(next(keys), 3 * H, hidden_edge_scores)
    w2, b2 = init_linear(next(keys), hidden_edge_scores, 1)
    p["pred"] = {"w1a": w1[:H], "w1b": w1[H:2 * H], "w1c": w1[2 * H:],
                 "b1": b1, "w2": w2, "b2": b2}
    return p


def pack_params(p):
    """Fuse / stack parameters into the kernel-ready layout."""
    gnn = p["gnn"]
    packed = {k: p[k] for k in ("l1n_w", "l1n_b", "l2n_w", "l2n_b",
                                "l1e_w", "l1e_b", "l2e_w", "l2e_b")}
    # Fused node-side weights, lane layout [A2 | B1 | A3 | B2 | A1] (A1 tile-aligned).
    packed["wn"] = jnp.stack(
        [jnp.concatenate([lp["wa2"], lp["wb1"], lp["wa3"], lp["wb2"], lp["wa1"]], axis=1)
         for lp in gnn])
    packed["bn"] = jnp.stack(
        [jnp.concatenate([lp["ba2"], lp["bb1"], lp["ba3"], lp["bb2"], lp["ba1"]], axis=1)
         for lp in gnn])
    packed["wb3"] = jnp.stack([lp["wb3"] for lp in gnn])
    packed["bb3"] = jnp.stack([lp["bb3"] for lp in gnn])
    packed["gh"] = jnp.stack([lp["gamma_h"] for lp in gnn])
    packed["bh"] = jnp.stack([lp["beta_h"] for lp in gnn])
    packed["ge"] = jnp.stack([lp["gamma_e"] for lp in gnn])
    packed["be"] = jnp.stack([lp["beta_e"] for lp in gnn])
    pp = p["pred"]
    packed["w1ab"] = jnp.concatenate([pp["w1a"], pp["w1b"]], axis=1)
    packed["w1c"] = pp["w1c"]
    packed["b1"] = pp["b1"]
    packed["w2t"] = pp["w2"].T            # [1, s_hid] — contracted trans-rhs in-kernel
    packed["b2"] = pp["b2"]               # [1, 1]
    return packed


# ---------------------------------------------------------------------------
# Pure-JAX reference for the correctness check (default matmul precision)
# ---------------------------------------------------------------------------
def reference_forward(params, pe, e_feat, S, D):
    relu = jax.nn.relu

    def ln(x, g, b):
        mu = jnp.mean(x, -1, keepdims=True)
        var = jnp.mean((x - mu) ** 2, -1, keepdims=True)
        return (x - mu) / jnp.sqrt(var + EPS_LN) * g + b

    x = relu(pe @ params["l1n_w"] + params["l1n_b"]) @ params["l2n_w"] + params["l2n_b"]
    e = relu(e_feat @ params["l1e_w"] + params["l1e_b"]) @ params["l2e_w"] + params["l2e_b"]
    for lp in params["gnn"]:
        A1h = x @ lp["wa1"] + lp["ba1"]
        A2h = x @ lp["wa2"] + lp["ba2"]
        A3h = x @ lp["wa3"] + lp["ba3"]
        B1h = x @ lp["wb1"] + lp["bb1"]
        B2h = x @ lp["wb2"] + lp["bb2"]
        B3e = e @ lp["wb3"] + lp["bb3"]
        e_ji = S @ B1h + D @ B2h + B3e
        sig = jax.nn.sigmoid(e_ji)
        h_fwd = (D.T @ (sig * (S @ A2h))) / (D.T @ sig + EPS_AGG)
        h_bwd = (S.T @ (sig * (D @ A3h))) / (S.T @ sig + EPS_AGG)
        h_new = A1h + h_fwd + h_bwd
        x = x + relu(ln(h_new, lp["gamma_h"], lp["beta_h"]))
        e = e + relu(ln(e_ji, lp["gamma_e"], lp["beta_e"]))
    pp = params["pred"]
    hdn = relu((S @ x) @ pp["w1a"] + (D @ x) @ pp["w1b"] + e @ pp["w1c"] + pp["b1"])
    return hdn @ pp["w2"] + pp["b2"]


if __name__ == "__main__":
    # model config (small, consistent with the module's __init__)
    node_features = 4
    edge_features = 2
    hidden_features = 32
    hidden_edge_features = 16
    num_layers = 2
    hidden_edge_scores = 32
    # normalization='layer', nb_pos_enc=node_features, dropout=None

    N, E = 16, 48

    key = jax.random.PRNGKey(0)
    k_src, k_dst, k_pe, k_e, k_par = jax.random.split(key, 5)
    src = jax.random.randint(k_src, (E,), 0, N)
    dst = jax.random.randint(k_dst, (E,), 0, N)
    pe = jax.random.normal(k_pe, (N, node_features), F32)
    e_feat = jax.random.normal(k_e, (E, edge_features), F32)

    S = jax.nn.one_hot(src, N, dtype=F32)     # [E, N] source selector
    D = jax.nn.one_hot(dst, N, dtype=F32)     # [E, N] destination selector

    # Pad the edge axis to a 128-lane multiple: padded edges have all-zero incidence
    # rows (inert for node aggregation), their scores are computed and discarded.
    E_pad = ((E + LANES - 1) // LANES) * LANES
    pad = E_pad - E
    S_p = jnp.pad(S, ((0, pad), (0, 0))).astype(BF16)   # 0/1 exact in bf16, half the DMA
    D_p = jnp.pad(D, ((0, pad), (0, 0))).astype(BF16)   # (int8 would halve it again)
    ef_p = jnp.pad(e_feat, ((0, pad), (0, 0)))

    params = init_params(k_par, node_features, edge_features, hidden_features,
                         hidden_edge_features, num_layers, hidden_edge_scores)
    packed = pack_params(params)

    score_row = jax.jit(model_forward)(packed, pe, ef_p, S_p, D_p)
    score_row = jax.block_until_ready(score_row)
    scores = score_row[0, :E][:, None]                  # [E, 1]

    ref = reference_forward(params, pe, e_feat, S, D)

    assert scores.shape == (E, 1)
    assert bool(jnp.all(jnp.isfinite(scores)))
    # Default (single-pass bf16, f32-accumulate) MXU precision in both kernel and
    # reference: 1e-2 tolerance covers the remaining fusion-order rounding differences.
    assert bool(jnp.allclose(scores, ref, atol=1e-2, rtol=1e-2)), (
        f"max abs diff {float(jnp.max(jnp.abs(scores - ref)))}")
    print("KERNEL_OK")
</pallas_src>

<mosaic_0001>
module attributes {stable_mosaic.version = 11 : i64} {
  func.func @model_kernel(%arg0: memref<128x16xbf16, #tpu.memory_space<vmem>>, %arg1: memref<128x16xbf16, #tpu.memory_space<vmem>>, %arg2: memref<16x4xf32, #tpu.memory_space<vmem>>, %arg3: memref<128x2xf32, #tpu.memory_space<vmem>>, %arg4: memref<4x16xf32, #tpu.memory_space<vmem>>, %arg5: memref<1x16xf32, #tpu.memory_space<vmem>>, %arg6: memref<16x32xf32, #tpu.memory_space<vmem>>, %arg7: memref<1x32xf32, #tpu.memory_space<vmem>>, %arg8: memref<2x16xf32, #tpu.memory_space<vmem>>, %arg9: memref<1x16xf32, #tpu.memory_space<vmem>>, %arg10: memref<16x32xf32, #tpu.memory_space<vmem>>, %arg11: memref<1x32xf32, #tpu.memory_space<vmem>>, %arg12: memref<2x32x160xf32, #tpu.memory_space<vmem>>, %arg13: memref<2x1x160xf32, #tpu.memory_space<vmem>>, %arg14: memref<2x32x32xf32, #tpu.memory_space<vmem>>, %arg15: memref<2x1x32xf32, #tpu.memory_space<vmem>>, %arg16: memref<2x1x32xf32, #tpu.memory_space<vmem>>, %arg17: memref<2x1x32xf32, #tpu.memory_space<vmem>>, %arg18: memref<2x1x32xf32, #tpu.memory_space<vmem>>, %arg19: memref<2x1x32xf32, #tpu.memory_space<vmem>>, %arg20: memref<32x64xf32, #tpu.memory_space<vmem>>, %arg21: memref<32x32xf32, #tpu.memory_space<vmem>>, %arg22: memref<1x32xf32, #tpu.memory_space<vmem>>, %arg23: memref<1x32xf32, #tpu.memory_space<vmem>>, %arg24: memref<1x1xf32, #tpu.memory_space<vmem>>, %arg25: memref<1x128xf32, #tpu.memory_space<vmem>>) attributes {dimension_semantics = [], scalar_prefetch = 0 : i64, scratch_operands = 0 : i64, tpu.core_type = #tpu.core_type<tc>} {
    %c0 = arith.constant 0 : index
    %c0_0 = arith.constant 0 : index
    %0 = vector.load %arg2[%c0, %c0_0] : memref<16x4xf32, #tpu.memory_space<vmem>>, vector<16x4xf32>
    %c0_1 = arith.constant 0 : index
    %c0_2 = arith.constant 0 : index
    %1 = vector.load %arg4[%c0_1, %c0_2] : memref<4x16xf32, #tpu.memory_space<vmem>>, vector<4x16xf32>
    %cst = arith.constant dense<0.000000e+00> : vector<16x16xf32>
    %2 = tpu.matmul %0, %1, %cst {dimension_numbers = #tpu.dot_dimension_numbers<[1], [0], [0], [1], [0, 0, 1, 1], [], []>} : vector<16x4xf32>, vector<4x16xf32>, vector<16x16xf32> -> vector<16x16xf32>
    %c0_3 = arith.constant 0 : index
    %c0_4 = arith.constant 0 : index
    %3 = vector.load %arg5[%c0_3, %c0_4] : memref<1x16xf32, #tpu.memory_space<vmem>>, vector<1x16xf32>
    %4 = vector.broadcast %3 : vector<1x16xf32> to vector<16x16xf32>
    %5 = arith.addf %2, %4 : vector<16x16xf32>
    %cst_5 = arith.constant 0.000000e+00 : f32
    %6 = vector.broadcast %cst_5 : f32 to vector<16x16xf32>
    %7 = arith.maximumf %5, %6 : vector<16x16xf32>
    %c0_6 = arith.constant 0 : index
    %c0_7 = arith.constant 0 : index
    %8 = vector.load %arg6[%c0_6, %c0_7] : memref<16x32xf32, #tpu.memory_space<vmem>>, vector<16x32xf32>
    %cst_8 = arith.constant dense<0.000000e+00> : vector<16x32xf32>
    %9 = tpu.matmul %7, %8, %cst_8 {dimension_numbers = #tpu.dot_dimension_numbers<[1], [0], [0], [1], [0, 0, 1, 1], [], []>} : vector<16x16xf32>, vector<16x32xf32>, vector<16x32xf32> -> vector<16x32xf32>
    %c0_9 = arith.constant 0 : index
    %c0_10 = arith.constant 0 : index
    %10 = vector.load %arg7[%c0_9, %c0_10] : memref<1x32xf32, #tpu.memory_space<vmem>>, vector<1x32xf32>
    %11 = vector.broadcast %10 : vector<1x32xf32> to vector<16x32xf32>
    %12 = arith.addf %9, %11 : vector<16x32xf32>
    %c0_11 = arith.constant 0 : index
    %c0_12 = arith.constant 0 : index
    %13 = vector.load %arg3[%c0_11, %c0_12] : memref<128x2xf32, #tpu.memory_space<vmem>>, vector<128x2xf32>
    %c0_13 = arith.constant 0 : index
    %c0_14 = arith.constant 0 : index
    %14 = vector.load %arg8[%c0_13, %c0_14] : memref<2x16xf32, #tpu.memory_space<vmem>>, vector<2x16xf32>
    %cst_15 = arith.constant dense<0.000000e+00> : vector<128x16xf32>
    %15 = tpu.matmul %13, %14, %cst_15 {dimension_numbers = #tpu.dot_dimension_numbers<[1], [0], [0], [1], [0, 0, 1, 1], [], []>} : vector<128x2xf32>, vector<2x16xf32>, vector<128x16xf32> -> vector<128x16xf32>
    %c0_16 = arith.constant 0 : index
    %c0_17 = arith.constant 0 : index
    %16 = vector.load %arg9[%c0_16, %c0_17] : memref<1x16xf32, #tpu.memory_space<vmem>>, vector<1x16xf32>
    %17 = vector.broadcast %16 : vector<1x16xf32> to vector<128x16xf32>
    %18 = arith.addf %15, %17 : vector<128x16xf32>
    %cst_18 = arith.constant 0.000000e+00 : f32
    %19 = vector.broadcast %cst_18 : f32 to vector<128x16xf32>
    %20 = arith.maximumf %18, %19 : vector<128x16xf32>
    %c0_19 = arith.constant 0 : index
    %c0_20 = arith.constant 0 : index
    %21 = vector.load %arg10[%c0_19, %c0_20] : memref<16x32xf32, #tpu.memory_space<vmem>>, vector<16x32xf32>
    %cst_21 = arith.constant dense<0.000000e+00> : vector<128x32xf32>
    %22 = tpu.matmul %20, %21, %cst_21 {dimension_numbers = #tpu.dot_dimension_numbers<[1], [0], [0], [1], [0, 0, 1, 1], [], []>} : vector<128x16xf32>, vector<16x32xf32>, vector<128x32xf32> -> vector<128x32xf32>
    %c0_22 = arith.constant 0 : index
    %c0_23 = arith.constant 0 : index
    %23 = vector.load %arg11[%c0_22, %c0_23] : memref<1x32xf32, #tpu.memory_space<vmem>>, vector<1x32xf32>
    %24 = vector.broadcast %23 : vector<1x32xf32> to vector<128x32xf32>
    %25 = arith.addf %22, %24 : vector<128x32xf32>
    %c0_24 = arith.constant 0 : index
    %c0_25 = arith.constant 0 : index
    %c0_26 = arith.constant 0 : index
    %26 = vector.load %arg12[%c0_24, %c0_25, %c0_26] : memref<2x32x160xf32, #tpu.memory_space<vmem>>, vector<1x32x160xf32>
    %27 = vector.shape_cast %26 : vector<1x32x160xf32> to vector<32x160xf32>
    %cst_27 = arith.constant dense<0.000000e+00> : vector<16x160xf32>
    %28 = tpu.matmul %12, %27, %cst_27 {dimension_numbers = #tpu.dot_dimension_numbers<[1], [0], [0], [1], [0, 0, 1, 1], [], []>} : vector<16x32xf32>, vector<32x160xf32>, vector<16x160xf32> -> vector<16x160xf32>
    %c0_28 = arith.constant 0 : index
    %c0_29 = arith.constant 0 : index
    %c0_30 = arith.constant 0 : index
    %29 = vector.load %arg13[%c0_28, %c0_29, %c0_30] : memref<2x1x160xf32, #tpu.memory_space<vmem>>, vector<1x1x160xf32>
    %30 = vector.shape_cast %29 : vector<1x1x160xf32> to vector<1x160xf32>
    %31 = vector.broadcast %30 : vector<1x160xf32> to vector<16x160xf32>
    %32 = arith.addf %28, %31 : vector<16x160xf32>
    %c0_31 = arith.constant 0 : index
    %c0_32 = arith.constant 0 : index
    %c0_33 = arith.constant 0 : index
    %33 = vector.load %arg14[%c0_31, %c0_32, %c0_33] : memref<2x32x32xf32, #tpu.memory_space<vmem>>, vector<1x32x32xf32>
    %34 = vector.shape_cast %33 : vector<1x32x32xf32> to vector<32x32xf32>
    %cst_34 = arith.constant dense<0.000000e+00> : vector<128x32xf32>
    %35 = tpu.matmul %25, %34, %cst_34 {dimension_numbers = #tpu.dot_dimension_numbers<[1], [0], [0], [1], [0, 0, 1, 1], [], []>} : vector<128x32xf32>, vector<32x32xf32>, vector<128x32xf32> -> vector<128x32xf32>
    %c0_35 = arith.constant 0 : index
    %c0_36 = arith.constant 0 : index
    %c0_37 = arith.constant 0 : index
    %36 = vector.load %arg15[%c0_35, %c0_36, %c0_37] : memref<2x1x32xf32, #tpu.memory_space<vmem>>, vector<1x1x32xf32>
    %37 = vector.shape_cast %36 : vector<1x1x32xf32> to vector<1x32xf32>
    %38 = vector.broadcast %37 : vector<1x32xf32> to vector<128x32xf32>
    %39 = arith.addf %35, %38 : vector<128x32xf32>
    %40 = vector.extract_strided_slice %32 {offsets = [0, 0], sizes = [16, 64], strides = [1, 1]} : vector<16x160xf32> to vector<16x64xf32>
    %c0_38 = arith.constant 0 : index
    %c0_39 = arith.constant 0 : index
    %41 = vector.load %arg0[%c0_38, %c0_39] : memref<128x16xbf16, #tpu.memory_space<vmem>>, vector<128x16xbf16>
    %42 = arith.truncf %40 : vector<16x64xf32> to vector<16x64xbf16>
    %cst_40 = arith.constant dense<0.000000e+00> : vector<128x64xf32>
    %43 = tpu.matmul %41, %42, %cst_40 {dimension_numbers = #tpu.dot_dimension_numbers<[1], [0], [0], [1], [0, 0, 1, 1], [], []>} : vector<128x16xbf16>, vector<16x64xbf16>, vector<128x64xf32> -> vector<128x64xf32>
    %44 = vector.extract_strided_slice %32 {offsets = [0, 64], sizes = [16, 64], strides = [1, 1]} : vector<16x160xf32> to vector<16x64xf32>
    %c0_41 = arith.constant 0 : index
    %c0_42 = arith.constant 0 : index
    %45 = vector.load %arg1[%c0_41, %c0_42] : memref<128x16xbf16, #tpu.memory_space<vmem>>, vector<128x16xbf16>
    %46 = arith.truncf %44 : vector<16x64xf32> to vector<16x64xbf16>
    %cst_43 = arith.constant dense<0.000000e+00> : vector<128x64xf32>
    %47 = tpu.matmul %45, %46, %cst_43 {dimension_numbers = #tpu.dot_dimension_numbers<[1], [0], [0], [1], [0, 0, 1, 1], [], []>} : vector<128x16xbf16>, vector<16x64xbf16>, vector<128x64xf32> -> vector<128x64xf32>
    %48 = vector.extract_strided_slice %43 {offsets = [0, 32], sizes = [128, 32], strides = [1, 1]} : vector<128x64xf32> to vector<128x32xf32>
    %49 = vector.extract_strided_slice %47 {offsets = [0, 32], sizes = [128, 32], strides = [1, 1]} : vector<128x64xf32> to vector<128x32xf32>
    %50 = arith.addf %48, %49 : vector<128x32xf32>
    %51 = arith.addf %50, %39 : vector<128x32xf32>
    %52 = arith.negf %51 : vector<128x32xf32>
    %53 = math.exp %52 : vector<128x32xf32>
    %cst_44 = arith.constant 1.000000e+00 : f32
    %54 = vector.broadcast %cst_44 : f32 to vector<128x32xf32>
    %55 = arith.addf %54, %53 : vector<128x32xf32>
    %56 = arith.divf %54, %55 : vector<128x32xf32>
    %57 = vector.extract_strided_slice %43 {offsets = [0, 0], sizes = [128, 32], strides = [1, 1]} : vector<128x64xf32> to vector<128x32xf32>
    %58 = arith.mulf %56, %57 : vector<128x32xf32>
    %59 = tpu.concatenate %58, %56 in 1 : vector<128x32xf32>, vector<128x32xf32> -> vector<128x64xf32>
    %c0_45 = arith.constant 0 : index
    %c0_46 = arith.constant 0 : index
    %60 = vector.load %arg1[%c0_45, %c0_46] : memref<128x16xbf16, #tpu.memory_space<vmem>>, vector<128x16xbf16>
    %61 = arith.truncf %59 : vector<128x64xf32> to vector<128x64xbf16>
    %cst_47 = arith.constant dense<0.000000e+00> : vector<16x64xf32>
    %62 = tpu.matmul %60, %61, %cst_47 {dimension_numbers = #tpu.dot_dimension_numbers<[0], [0], [1], [1], [0, 1, 1, 1], [], []>} : vector<128x16xbf16>, vector<128x64xbf16>, vector<16x64xf32> -> vector<16x64xf32>
    %63 = vector.extract_strided_slice %47 {offsets = [0, 0], sizes = [128, 32], strides = [1, 1]} : vector<128x64xf32> to vector<128x32xf32>
    %64 = arith.mulf %56, %63 : vector<128x32xf32>
    %65 = tpu.concatenate %64, %56 in 1 : vector<128x32xf32>, vector<128x32xf32> -> vector<128x64xf32>
    %c0_48 = arith.constant 0 : index
    %c0_49 = arith.constant 0 : index
    %66 = vector.load %arg0[%c0_48, %c0_49] : memref<128x16xbf16, #tpu.memory_space<vmem>>, vector<128x16xbf16>
    %67 = arith.truncf %65 : vector<128x64xf32> to vector<128x64xbf16>
    %cst_50 = arith.constant dense<0.000000e+00> : vector<16x64xf32>
    %68 = tpu.matmul %66, %67, %cst_50 {dimension_numbers = #tpu.dot_dimension_numbers<[0], [0], [1], [1], [0, 1, 1, 1], [], []>} : vector<128x16xbf16>, vector<128x64xbf16>, vector<16x64xf32> -> vector<16x64xf32>
    %69 = vector.extract_strided_slice %32 {offsets = [0, 128], sizes = [16, 32], strides = [1, 1]} : vector<16x160xf32> to vector<16x32xf32>
    %70 = vector.extract_strided_slice %62 {offsets = [0, 0], sizes = [16, 32], strides = [1, 1]} : vector<16x64xf32> to vector<16x32xf32>
    %71 = vector.extract_strided_slice %62 {offsets = [0, 32], sizes = [16, 32], strides = [1, 1]} : vector<16x64xf32> to vector<16x32xf32>
    %cst_51 = arith.constant 9.99999997E-7 : f32
    %72 = vector.broadcast %cst_51 : f32 to vector<16x32xf32>
    %73 = arith.addf %71, %72 : vector<16x32xf32>
    %74 = arith.divf %70, %73 : vector<16x32xf32>
    %75 = arith.addf %69, %74 : vector<16x32xf32>
    %76 = vector.extract_strided_slice %68 {offsets = [0, 0], sizes = [16, 32], strides = [1, 1]} : vector<16x64xf32> to vector<16x32xf32>
    %77 = vector.extract_strided_slice %68 {offsets = [0, 32], sizes = [16, 32], strides = [1, 1]} : vector<16x64xf32> to vector<16x32xf32>
    %cst_52 = arith.constant 9.99999997E-7 : f32
    %78 = vector.broadcast %cst_52 : f32 to vector<16x32xf32>
    %79 = arith.addf %77, %78 : vector<16x32xf32>
    %80 = arith.divf %76, %79 : vector<16x32xf32>
    %81 = arith.addf %75, %80 : vector<16x32xf32>
    %c0_53 = arith.constant 0 : index
    %c0_54 = arith.constant 0 : index
    %c0_55 = arith.constant 0 : index
    %82 = vector.load %arg16[%c0_53, %c0_54, %c0_55] : memref<2x1x32xf32, #tpu.memory_space<vmem>>, vector<1x1x32xf32>
    %83 = vector.shape_cast %82 : vector<1x1x32xf32> to vector<1x32xf32>
    %c0_56 = arith.constant 0 : index
    %c0_57 = arith.constant 0 : index
    %c0_58 = arith.constant 0 : index
    %84 = vector.load %arg17[%c0_56, %c0_57, %c0_58] : memref<2x1x32xf32, #tpu.memory_space<vmem>>, vector<1x1x32xf32>
    %85 = vector.shape_cast %84 : vector<1x1x32xf32> to vector<1x32xf32>
    %cst_59 = arith.constant dense<0.000000e+00> : vector<16xf32>
    %86 = vector.multi_reduction <add>, %81, %cst_59 [1] : vector<16x32xf32> to vector<16xf32>
    %87 = vector.shape_cast %86 : vector<16xf32> to vector<16x1xf32>
    %cst_60 = arith.constant 3.200000e+01 : f32
    %88 = vector.broadcast %cst_60 : f32 to vector<16x1xf32>
    %89 = arith.divf %87, %88 : vector<16x1xf32>
    %90 = vector.broadcast %89 : vector<16x1xf32> to vector<16x32xf32>
    %91 = arith.subf %81, %90 : vector<16x32xf32>
    %92 = arith.mulf %91, %91 : vector<16x32xf32>
    %cst_61 = arith.constant dense<0.000000e+00> : vector<16xf32>
    %93 = vector.multi_reduction <add>, %92, %cst_61 [1] : vector<16x32xf32> to vector<16xf32>
    %94 = vector.shape_cast %93 : vector<16xf32> to vector<16x1xf32>
    %cst_62 = arith.constant 3.200000e+01 : f32
    %95 = vector.broadcast %cst_62 : f32 to vector<16x1xf32>
    %96 = arith.divf %94, %95 : vector<16x1xf32>
    %97 = vector.broadcast %89 : vector<16x1xf32> to vector<16x32xf32>
    %98 = arith.subf %81, %97 : vector<16x32xf32>
    %cst_63 = arith.constant 9.99999974E-6 : f32
    %99 = vector.broadcast %cst_63 : f32 to vector<16x1xf32>
    %100 = arith.addf %96, %99 : vector<16x1xf32>
    %101 = math.rsqrt %100 : vector<16x1xf32>
    %102 = vector.broadcast %101 : vector<16x1xf32> to vector<16x32xf32>
    %103 = arith.mulf %98, %102 : vector<16x32xf32>
    %104 = vector.broadcast %83 : vector<1x32xf32> to vector<16x32xf32>
    %105 = arith.mulf %103, %104 : vector<16x32xf32>
    %106 = vector.broadcast %85 : vector<1x32xf32> to vector<16x32xf32>
    %107 = arith.addf %105, %106 : vector<16x32xf32>
    %cst_64 = arith.constant 0.000000e+00 : f32
    %108 = vector.broadcast %cst_64 : f32 to vector<16x32xf32>
    %109 = arith.maximumf %107, %108 : vector<16x32xf32>
    %110 = arith.addf %12, %109 : vector<16x32xf32>
    %c0_65 = arith.constant 0 : index
    %c0_66 = arith.constant 0 : index
    %c0_67 = arith.constant 0 : index
    %111 = vector.load %arg18[%c0_65, %c0_66, %c0_67] : memref<2x1x32xf32, #tpu.memory_space<vmem>>, vector<1x1x32xf32>
    %112 = vector.shape_cast %111 : vector<1x1x32xf32> to vector<1x32xf32>
    %c0_68 = arith.constant 0 : index
    %c0_69 = arith.constant 0 : index
    %c0_70 = arith.constant 0 : index
    %113 = vector.load %arg19[%c0_68, %c0_69, %c0_70] : memref<2x1x32xf32, #tpu.memory_space<vmem>>, vector<1x1x32xf32>
    %114 = vector.shape_cast %113 : vector<1x1x32xf32> to vector<1x32xf32>
    %cst_71 = arith.constant dense<0.000000e+00> : vector<128xf32>
    %115 = vector.multi_reduction <add>, %51, %cst_71 [1] : vector<128x32xf32> to vector<128xf32>
    %116 = vector.shape_cast %115 : vector<128xf32> to vector<128x1xf32>
    %cst_72 = arith.constant 3.200000e+01 : f32
    %117 = vector.broadcast %cst_72 : f32 to vector<128x1xf32>
    %118 = arith.divf %116, %117 : vector<128x1xf32>
    %119 = vector.broadcast %118 : vector<128x1xf32> to vector<128x32xf32>
    %120 = arith.subf %51, %119 : vector<128x32xf32>
    %121 = arith.mulf %120, %120 : vector<128x32xf32>
    %cst_73 = arith.constant dense<0.000000e+00> : vector<128xf32>
    %122 = vector.multi_reduction <add>, %121, %cst_73 [1] : vector<128x32xf32> to vector<128xf32>
    %123 = vector.shape_cast %122 : vector<128xf32> to vector<128x1xf32>
    %cst_74 = arith.constant 3.200000e+01 : f32
    %124 = vector.broadcast %cst_74 : f32 to vector<128x1xf32>
    %125 = arith.divf %123, %124 : vector<128x1xf32>
    %126 = vector.broadcast %118 : vector<128x1xf32> to vector<128x32xf32>
    %127 = arith.subf %51, %126 : vector<128x32xf32>
    %cst_75 = arith.constant 9.99999974E-6 : f32
    %128 = vector.broadcast %cst_75 : f32 to vector<128x1xf32>
    %129 = arith.addf %125, %128 : vector<128x1xf32>
    %130 = math.rsqrt %129 : vector<128x1xf32>
    %131 = vector.broadcast %130 : vector<128x1xf32> to vector<128x32xf32>
    %132 = arith.mulf %127, %131 : vector<128x32xf32>
    %133 = vector.broadcast %112 : vector<1x32xf32> to vector<128x32xf32>
    %134 = arith.mulf %132, %133 : vector<128x32xf32>
    %135 = vector.broadcast %114 : vector<1x32xf32> to vector<128x32xf32>
    %136 = arith.addf %134, %135 : vector<128x32xf32>
    %cst_76 = arith.constant 0.000000e+00 : f32
    %137 = vector.broadcast %cst_76 : f32 to vector<128x32xf32>
    %138 = arith.maximumf %136, %137 : vector<128x32xf32>
    %139 = arith.addf %25, %138 : vector<128x32xf32>
    %c1 = arith.constant 1 : index
    %c0_77 = arith.constant 0 : index
    %c0_78 = arith.constant 0 : index
    %140 = vector.load %arg12[%c1, %c0_77, %c0_78] : memref<2x32x160xf32, #tpu.memory_space<vmem>>, vector<1x32x160xf32>
    %141 = vector.shape_cast %140 : vector<1x32x160xf32> to vector<32x160xf32>
    %cst_79 = arith.constant dense<0.000000e+00> : vector<16x160xf32>
    %142 = tpu.matmul %110, %141, %cst_79 {dimension_numbers = #tpu.dot_dimension_numbers<[1], [0], [0], [1], [0, 0, 1, 1], [], []>} : vector<16x32xf32>, vector<32x160xf32>, vector<16x160xf32> -> vector<16x160xf32>
    %c1_80 = arith.constant 1 : index
    %c0_81 = arith.constant 0 : index
    %c0_82 = arith.constant 0 : index
    %143 = vector.load %arg13[%c1_80, %c0_81, %c0_82] : memref<2x1x160xf32, #tpu.memory_space<vmem>>, vector<1x1x160xf32>
    %144 = vector.shape_cast %143 : vector<1x1x160xf32> to vector<1x160xf32>
    %145 = vector.broadcast %144 : vector<1x160xf32> to vector<16x160xf32>
    %146 = arith.addf %142, %145 : vector<16x160xf32>
    %c1_83 = arith.constant 1 : index
    %c0_84 = arith.constant 0 : index
    %c0_85 = arith.constant 0 : index
    %147 = vector.load %arg14[%c1_83, %c0_84, %c0_85] : memref<2x32x32xf32, #tpu.memory_space<vmem>>, vector<1x32x32xf32>
    %148 = vector.shape_cast %147 : vector<1x32x32xf32> to vector<32x32xf32>
    %cst_86 = arith.constant dense<0.000000e+00> : vector<128x32xf32>
    %149 = tpu.matmul %139, %148, %cst_86 {dimension_numbers = #tpu.dot_dimension_numbers<[1], [0], [0], [1], [0, 0, 1, 1], [], []>} : vector<128x32xf32>, vector<32x32xf32>, vector<128x32xf32> -> vector<128x32xf32>
    %c1_87 = arith.constant 1 : index
    %c0_88 = arith.constant 0 : index
    %c0_89 = arith.constant 0 : index
    %150 = vector.load %arg15[%c1_87, %c0_88, %c0_89] : memref<2x1x32xf32, #tpu.memory_space<vmem>>, vector<1x1x32xf32>
    %151 = vector.shape_cast %150 : vector<1x1x32xf32> to vector<1x32xf32>
    %152 = vector.broadcast %151 : vector<1x32xf32> to vector<128x32xf32>
    %153 = arith.addf %149, %152 : vector<128x32xf32>
    %154 = vector.extract_strided_slice %146 {offsets = [0, 0], sizes = [16, 64], strides = [1, 1]} : vector<16x160xf32> to vector<16x64xf32>
    %c0_90 = arith.constant 0 : index
    %c0_91 = arith.constant 0 : index
    %155 = vector.load %arg0[%c0_90, %c0_91] : memref<128x16xbf16, #tpu.memory_space<vmem>>, vector<128x16xbf16>
    %156 = arith.truncf %154 : vector<16x64xf32> to vector<16x64xbf16>
    %cst_92 = arith.constant dense<0.000000e+00> : vector<128x64xf32>
    %157 = tpu.matmul %155, %156, %cst_92 {dimension_numbers = #tpu.dot_dimension_numbers<[1], [0], [0], [1], [0, 0, 1, 1], [], []>} : vector<128x16xbf16>, vector<16x64xbf16>, vector<128x64xf32> -> vector<128x64xf32>
    %158 = vector.extract_strided_slice %146 {offsets = [0, 64], sizes = [16, 64], strides = [1, 1]} : vector<16x160xf32> to vector<16x64xf32>
    %c0_93 = arith.constant 0 : index
    %c0_94 = arith.constant 0 : index
    %159 = vector.load %arg1[%c0_93, %c0_94] : memref<128x16xbf16, #tpu.memory_space<vmem>>, vector<128x16xbf16>
    %160 = arith.truncf %158 : vector<16x64xf32> to vector<16x64xbf16>
    %cst_95 = arith.constant dense<0.000000e+00> : vector<128x64xf32>
    %161 = tpu.matmul %159, %160, %cst_95 {dimension_numbers = #tpu.dot_dimension_numbers<[1], [0], [0], [1], [0, 0, 1, 1], [], []>} : vector<128x16xbf16>, vector<16x64xbf16>, vector<128x64xf32> -> vector<128x64xf32>
    %162 = vector.extract_strided_slice %157 {offsets = [0, 32], sizes = [128, 32], strides = [1, 1]} : vector<128x64xf32> to vector<128x32xf32>
    %163 = vector.extract_strided_slice %161 {offsets = [0, 32], sizes = [128, 32], strides = [1, 1]} : vector<128x64xf32> to vector<128x32xf32>
    %164 = arith.addf %162, %163 : vector<128x32xf32>
    %165 = arith.addf %164, %153 : vector<128x32xf32>
    %166 = arith.negf %165 : vector<128x32xf32>
    %167 = math.exp %166 : vector<128x32xf32>
    %cst_96 = arith.constant 1.000000e+00 : f32
    %168 = vector.broadcast %cst_96 : f32 to vector<128x32xf32>
    %169 = arith.addf %168, %167 : vector<128x32xf32>
    %170 = arith.divf %168, %169 : vector<128x32xf32>
    %171 = vector.extract_strided_slice %157 {offsets = [0, 0], sizes = [128, 32], strides = [1, 1]} : vector<128x64xf32> to vector<128x32xf32>
    %172 = arith.mulf %170, %171 : vector<128x32xf32>
    %173 = tpu.concatenate %172, %170 in 1 : vector<128x32xf32>, vector<128x32xf32> -> vector<128x64xf32>
    %c0_97 = arith.constant 0 : index
    %c0_98 = arith.constant 0 : index
    %174 = vector.load %arg1[%c0_97, %c0_98] : memref<128x16xbf16, #tpu.memory_space<vmem>>, vector<128x16xbf16>
    %175 = arith.truncf %173 : vector<128x64xf32> to vector<128x64xbf16>
    %cst_99 = arith.constant dense<0.000000e+00> : vector<16x64xf32>
    %176 = tpu.matmul %174, %175, %cst_99 {dimension_numbers = #tpu.dot_dimension_numbers<[0], [0], [1], [1], [0, 1, 1, 1], [], []>} : vector<128x16xbf16>, vector<128x64xbf16>, vector<16x64xf32> -> vector<16x64xf32>
    %177 = vector.extract_strided_slice %161 {offsets = [0, 0], sizes = [128, 32], strides = [1, 1]} : vector<128x64xf32> to vector<128x32xf32>
    %178 = arith.mulf %170, %177 : vector<128x32xf32>
    %179 = tpu.concatenate %178, %170 in 1 : vector<128x32xf32>, vector<128x32xf32> -> vector<128x64xf32>
    %c0_100 = arith.constant 0 : index
    %c0_101 = arith.constant 0 : index
    %180 = vector.load %arg0[%c0_100, %c0_101] : memref<128x16xbf16, #tpu.memory_space<vmem>>, vector<128x16xbf16>
    %181 = arith.truncf %179 : vector<128x64xf32> to vector<128x64xbf16>
    %cst_102 = arith.constant dense<0.000000e+00> : vector<16x64xf32>
    %182 = tpu.matmul %180, %181, %cst_102 {dimension_numbers = #tpu.dot_dimension_numbers<[0], [0], [1], [1], [0, 1, 1, 1], [], []>} : vector<128x16xbf16>, vector<128x64xbf16>, vector<16x64xf32> -> vector<16x64xf32>
    %183 = vector.extract_strided_slice %146 {offsets = [0, 128], sizes = [16, 32], strides = [1, 1]} : vector<16x160xf32> to vector<16x32xf32>
    %184 = vector.extract_strided_slice %176 {offsets = [0, 0], sizes = [16, 32], strides = [1, 1]} : vector<16x64xf32> to vector<16x32xf32>
    %185 = vector.extract_strided_slice %176 {offsets = [0, 32], sizes = [16, 32], strides = [1, 1]} : vector<16x64xf32> to vector<16x32xf32>
    %cst_103 = arith.constant 9.99999997E-7 : f32
    %186 = vector.broadcast %cst_103 : f32 to vector<16x32xf32>
    %187 = arith.addf %185, %186 : vector<16x32xf32>
    %188 = arith.divf %184, %187 : vector<16x32xf32>
    %189 = arith.addf %183, %188 : vector<16x32xf32>
    %190 = vector.extract_strided_slice %182 {offsets = [0, 0], sizes = [16, 32], strides = [1, 1]} : vector<16x64xf32> to vector<16x32xf32>
    %191 = vector.extract_strided_slice %182 {offsets = [0, 32], sizes = [16, 32], strides = [1, 1]} : vector<16x64xf32> to vector<16x32xf32>
    %cst_104 = arith.constant 9.99999997E-7 : f32
    %192 = vector.broadcast %cst_104 : f32 to vector<16x32xf32>
    %193 = arith.addf %191, %192 : vector<16x32xf32>
    %194 = arith.divf %190, %193 : vector<16x32xf32>
    %195 = arith.addf %189, %194 : vector<16x32xf32>
    %c1_105 = arith.constant 1 : index
    %c0_106 = arith.constant 0 : index
    %c0_107 = arith.constant 0 : index
    %196 = vector.load %arg16[%c1_105, %c0_106, %c0_107] : memref<2x1x32xf32, #tpu.memory_space<vmem>>, vector<1x1x32xf32>
    %197 = vector.shape_cast %196 : vector<1x1x32xf32> to vector<1x32xf32>
    %c1_108 = arith.constant 1 : index
    %c0_109 = arith.constant 0 : index
    %c0_110 = arith.constant 0 : index
    %198 = vector.load %arg17[%c1_108, %c0_109, %c0_110] : memref<2x1x32xf32, #tpu.memory_space<vmem>>, vector<1x1x32xf32>
    %199 = vector.shape_cast %198 : vector<1x1x32xf32> to vector<1x32xf32>
    %cst_111 = arith.constant dense<0.000000e+00> : vector<16xf32>
    %200 = vector.multi_reduction <add>, %195, %cst_111 [1] : vector<16x32xf32> to vector<16xf32>
    %201 = vector.shape_cast %200 : vector<16xf32> to vector<16x1xf32>
    %cst_112 = arith.constant 3.200000e+01 : f32
    %202 = vector.broadcast %cst_112 : f32 to vector<16x1xf32>
    %203 = arith.divf %201, %202 : vector<16x1xf32>
    %204 = vector.broadcast %203 : vector<16x1xf32> to vector<16x32xf32>
    %205 = arith.subf %195, %204 : vector<16x32xf32>
    %206 = arith.mulf %205, %205 : vector<16x32xf32>
    %cst_113 = arith.constant dense<0.000000e+00> : vector<16xf32>
    %207 = vector.multi_reduction <add>, %206, %cst_113 [1] : vector<16x32xf32> to vector<16xf32>
    %208 = vector.shape_cast %207 : vector<16xf32> to vector<16x1xf32>
    %cst_114 = arith.constant 3.200000e+01 : f32
    %209 = vector.broadcast %cst_114 : f32 to vector<16x1xf32>
    %210 = arith.divf %208, %209 : vector<16x1xf32>
    %211 = vector.broadcast %203 : vector<16x1xf32> to vector<16x32xf32>
    %212 = arith.subf %195, %211 : vector<16x32xf32>
    %cst_115 = arith.constant 9.99999974E-6 : f32
    %213 = vector.broadcast %cst_115 : f32 to vector<16x1xf32>
    %214 = arith.addf %210, %213 : vector<16x1xf32>
    %215 = math.rsqrt %214 : vector<16x1xf32>
    %216 = vector.broadcast %215 : vector<16x1xf32> to vector<16x32xf32>
    %217 = arith.mulf %212, %216 : vector<16x32xf32>
    %218 = vector.broadcast %197 : vector<1x32xf32> to vector<16x32xf32>
    %219 = arith.mulf %217, %218 : vector<16x32xf32>
    %220 = vector.broadcast %199 : vector<1x32xf32> to vector<16x32xf32>
    %221 = arith.addf %219, %220 : vector<16x32xf32>
    %cst_116 = arith.constant 0.000000e+00 : f32
    %222 = vector.broadcast %cst_116 : f32 to vector<16x32xf32>
    %223 = arith.maximumf %221, %222 : vector<16x32xf32>
    %224 = arith.addf %110, %223 : vector<16x32xf32>
    %c1_117 = arith.constant 1 : index
    %c0_118 = arith.constant 0 : index
    %c0_119 = arith.constant 0 : index
    %225 = vector.load %arg18[%c1_117, %c0_118, %c0_119] : memref<2x1x32xf32, #tpu.memory_space<vmem>>, vector<1x1x32xf32>
    %226 = vector.shape_cast %225 : vector<1x1x32xf32> to vector<1x32xf32>
    %c1_120 = arith.constant 1 : index
    %c0_121 = arith.constant 0 : index
    %c0_122 = arith.constant 0 : index
    %227 = vector.load %arg19[%c1_120, %c0_121, %c0_122] : memref<2x1x32xf32, #tpu.memory_space<vmem>>, vector<1x1x32xf32>
    %228 = vector.shape_cast %227 : vector<1x1x32xf32> to vector<1x32xf32>
    %cst_123 = arith.constant dense<0.000000e+00> : vector<128xf32>
    %229 = vector.multi_reduction <add>, %165, %cst_123 [1] : vector<128x32xf32> to vector<128xf32>
    %230 = vector.shape_cast %229 : vector<128xf32> to vector<128x1xf32>
    %cst_124 = arith.constant 3.200000e+01 : f32
    %231 = vector.broadcast %cst_124 : f32 to vector<128x1xf32>
    %232 = arith.divf %230, %231 : vector<128x1xf32>
    %233 = vector.broadcast %232 : vector<128x1xf32> to vector<128x32xf32>
    %234 = arith.subf %165, %233 : vector<128x32xf32>
    %235 = arith.mulf %234, %234 : vector<128x32xf32>
    %cst_125 = arith.constant dense<0.000000e+00> : vector<128xf32>
    %236 = vector.multi_reduction <add>, %235, %cst_125 [1] : vector<128x32xf32> to vector<128xf32>
    %237 = vector.shape_cast %236 : vector<128xf32> to vector<128x1xf32>
    %cst_126 = arith.constant 3.200000e+01 : f32
    %238 = vector.broadcast %cst_126 : f32 to vector<128x1xf32>
    %239 = arith.divf %237, %238 : vector<128x1xf32>
    %240 = vector.broadcast %232 : vector<128x1xf32> to vector<128x32xf32>
    %241 = arith.subf %165, %240 : vector<128x32xf32>
    %cst_127 = arith.constant 9.99999974E-6 : f32
    %242 = vector.broadcast %cst_127 : f32 to vector<128x1xf32>
    %243 = arith.addf %239, %242 : vector<128x1xf32>
    %244 = math.rsqrt %243 : vector<128x1xf32>
    %245 = vector.broadcast %244 : vector<128x1xf32> to vector<128x32xf32>
    %246 = arith.mulf %241, %245 : vector<128x32xf32>
    %247 = vector.broadcast %226 : vector<1x32xf32> to vector<128x32xf32>
    %248 = arith.mulf %246, %247 : vector<128x32xf32>
    %249 = vector.broadcast %228 : vector<1x32xf32> to vector<128x32xf32>
    %250 = arith.addf %248, %249 : vector<128x32xf32>
    %cst_128 = arith.constant 0.000000e+00 : f32
    %251 = vector.broadcast %cst_128 : f32 to vector<128x32xf32>
    %252 = arith.maximumf %250, %251 : vector<128x32xf32>
    %253 = arith.addf %139, %252 : vector<128x32xf32>
    %c0_129 = arith.constant 0 : index
    %c0_130 = arith.constant 0 : index
    %254 = vector.load %arg20[%c0_129, %c0_130] : memref<32x64xf32, #tpu.memory_space<vmem>>, vector<32x64xf32>
    %cst_131 = arith.constant dense<0.000000e+00> : vector<16x64xf32>
    %255 = tpu.matmul %224, %254, %cst_131 {dimension_numbers = #tpu.dot_dimension_numbers<[1], [0], [0], [1], [0, 0, 1, 1], [], []>} : vector<16x32xf32>, vector<32x64xf32>, vector<16x64xf32> -> vector<16x64xf32>
    %256 = vector.extract_strided_slice %255 {offsets = [0, 0], sizes = [16, 32], strides = [1, 1]} : vector<16x64xf32> to vector<16x32xf32>
    %c0_132 = arith.constant 0 : index
    %c0_133 = arith.constant 0 : index
    %257 = vector.load %arg0[%c0_132, %c0_133] : memref<128x16xbf16, #tpu.memory_space<vmem>>, vector<128x16xbf16>
    %258 = arith.truncf %256 : vector<16x32xf32> to vector<16x32xbf16>
    %cst_134 = arith.constant dense<0.000000e+00> : vector<128x32xf32>
    %259 = tpu.matmul %257, %258, %cst_134 {dimension_numbers = #tpu.dot_dimension_numbers<[1], [0], [0], [1], [0, 0, 1, 1], [], []>} : vector<128x16xbf16>, vector<16x32xbf16>, vector<128x32xf32> -> vector<128x32xf32>
    %260 = vector.extract_strided_slice %255 {offsets = [0, 32], sizes = [16, 32], strides = [1, 1]} : vector<16x64xf32> to vector<16x32xf32>
    %c0_135 = arith.constant 0 : index
    %c0_136 = arith.constant 0 : index
    %261 = vector.load %arg1[%c0_135, %c0_136] : memref<128x16xbf16, #tpu.memory_space<vmem>>, vector<128x16xbf16>
    %262 = arith.truncf %260 : vector<16x32xf32> to vector<16x32xbf16>
    %cst_137 = arith.constant dense<0.000000e+00> : vector<128x32xf32>
    %263 = tpu.matmul %261, %262, %cst_137 {dimension_numbers = #tpu.dot_dimension_numbers<[1], [0], [0], [1], [0, 0, 1, 1], [], []>} : vector<128x16xbf16>, vector<16x32xbf16>, vector<128x32xf32> -> vector<128x32xf32>
    %264 = arith.addf %259, %263 : vector<128x32xf32>
    %c0_138 = arith.constant 0 : index
    %c0_139 = arith.constant 0 : index
    %265 = vector.load %arg21[%c0_138, %c0_139] : memref<32x32xf32, #tpu.memory_space<vmem>>, vector<32x32xf32>
    %cst_140 = arith.constant dense<0.000000e+00> : vector<128x32xf32>
    %266 = tpu.matmul %253, %265, %cst_140 {dimension_numbers = #tpu.dot_dimension_numbers<[1], [0], [0], [1], [0, 0, 1, 1], [], []>} : vector<128x32xf32>, vector<32x32xf32>, vector<128x32xf32> -> vector<128x32xf32>
    %267 = arith.addf %264, %266 : vector<128x32xf32>
    %c0_141 = arith.constant 0 : index
    %c0_142 = arith.constant 0 : index
    %268 = vector.load %arg22[%c0_141, %c0_142] : memref<1x32xf32, #tpu.memory_space<vmem>>, vector<1x32xf32>
    %269 = vector.broadcast %268 : vector<1x32xf32> to vector<128x32xf32>
    %270 = arith.addf %267, %269 : vector<128x32xf32>
    %cst_143 = arith.constant 0.000000e+00 : f32
    %271 = vector.broadcast %cst_143 : f32 to vector<128x32xf32>
    %272 = arith.maximumf %270, %271 : vector<128x32xf32>
    %c0_144 = arith.constant 0 : index
    %c0_145 = arith.constant 0 : index
    %273 = vector.load %arg23[%c0_144, %c0_145] : memref<1x32xf32, #tpu.memory_space<vmem>>, vector<1x32xf32>
    %cst_146 = arith.constant dense<0.000000e+00> : vector<1x128xf32>
    %274 = tpu.matmul %273, %272, %cst_146 {dimension_numbers = #tpu.dot_dimension_numbers<[1], [1], [0], [0], [0, 0, 1, 0], [], []>} : vector<1x32xf32>, vector<128x32xf32>, vector<1x128xf32> -> vector<1x128xf32>
    %c0_147 = arith.constant 0 : index
    %c0_148 = arith.constant 0 : index
    %275 = vector.load %arg24[%c0_147, %c0_148] : memref<1x1xf32, #tpu.memory_space<vmem>>, vector<1x1xf32>
    %276 = vector.broadcast %275 : vector<1x1xf32> to vector<1x128xf32>
    %277 = arith.addf %274, %276 : vector<1x128xf32>
    %c0_149 = arith.constant 0 : index
    %c0_150 = arith.constant 0 : index
    %278 = vector.load %arg25[%c0_149, %c0_150] : memref<1x128xf32, #tpu.memory_space<vmem>>, vector<1x128xf32>
    tpu.vector_store %arg25[%c0_149, %c0_150], %277 {strides = array<i32>} : memref<1x128xf32, #tpu.memory_space<vmem>>, vector<1x128xf32>,
    return
  }
}

</mosaic_0001>

<bundles_post_ra>
// kernel: model_forward.1
= control target key start
LH: loop header
LB: loop body
LE: loop exit
PB: predicated region body
PF: predicated region fallthrough
CT: control target
= control target key end

     0   :  { %s8985_s0 = inlined_call_operand.vmem [shape: bf16[128,16], index: 0, kind: input, shape index: {}]   ;;  %s8986_s1 = inlined_call_operand.vmem [shape: bf16[128,16], index: 1, kind: input, shape index: {}]   ;;  %s8987_s2 = inlined_call_operand.vmem [shape: f32[16,4], index: 2, kind: input, shape index: {}]   ;;  %s8988_s3 = inlined_call_operand.vmem [shape: f32[128,2], index: 3, kind: input, shape index: {}]   ;;  %s8989_s4 = inlined_call_operand.vmem [shape: f32[4,16], index: 4, kind: input, shape index: {}]   ;;  %s8990_s5 = inlined_call_operand.vmem [shape: f32[1,16], index: 5, kind: input, shape index: {}]   ;;  %s8991_s6 = inlined_call_operand.vmem [shape: f32[16,32], index: 6, kind: input, shape index: {}]   ;;  %s8992_s7 = inlined_call_operand.vmem [shape: f32[1,32], index: 7, kind: input, shape index: {}]   ;;  %s8993_s8 = inlined_call_operand.vmem [shape: f32[2,16], index: 8, kind: input, shape index: {}]   ;;  %s8994_s9 = inlined_call_operand.hbm [shape: f32[1,16], index: 9, kind: input, shape index: {}]   ;;  %s8995_s10 = inlined_call_operand.hbm [shape: f32[16,32], index: 10, kind: input, shape index: {}]   ;;  %s8996_s11 = inlined_call_operand.vmem [shape: f32[1,32], index: 11, kind: input, shape index: {}]   ;;  %s8997_s12 = inlined_call_operand.vmem [shape: f32[2,32,160], index: 12, kind: input, shape index: {}]   ;;  %s8998_s13 = inlined_call_operand.hbm [shape: f32[2,1,160], index: 13, kind: input, shape index: {}]   ;;  %s8999_s14 = inlined_call_operand.vmem [shape: f32[2,32,32], index: 14, kind: input, shape index: {}]   ;;  %s9000_s15 = inlined_call_operand.hbm [shape: f32[2,1,32], index: 15, kind: input, shape index: {}]   ;;  %s9001_s16 = inlined_call_operand.hbm [shape: f32[2,1,32], index: 16, kind: input, shape index: {}]   ;;  %s9002_s17 = inlined_call_operand.hbm [shape: f32[2,1,32], index: 17, kind: input, shape index: {}]   ;;  %s9003_s18 = inlined_call_operand.hbm [shape: f32[2,1,32], index: 18, kind: input, shape index: {}]   ;;  %s9004_s19 = inlined_call_operand.hbm [shape: f32[2,1,32], index: 19, kind: input, shape index: {}]   ;;  %s9005_s20 = inlined_call_operand.vmem [shape: f32[32,64], index: 20, kind: input, shape index: {}]   ;;  %s9006_s21 = inlined_call_operand.vmem [shape: f32[32,32], index: 21, kind: input, shape index: {}]   ;;  %s9007_s22 = inlined_call_operand.hbm [shape: f32[1,32], index: 22, kind: input, shape index: {}]   ;;  %s9008_s23 = inlined_call_operand.vmem [shape: f32[1,32], index: 23, kind: input, shape index: {}]   ;;  %s9009_s24 = inlined_call_operand.<no memory space> [shape: f32[1,1], index: 24, kind: input, shape index: {}]   ;;  %s9010_s25 = inlined_call_operand.hbm [shape: f32[1,128], index: 25, kind: output, shape index: {}]  }
   0x1   :  { %9080 = sst [smem:[#allocation54_spill]] %s8985_s0  ;;  %v30_v0 = vstv %s9009_s24 }
   0x2   :  { %9081 = sst [smem:[#allocation55_spill]] %s8986_s1  ;;  %31 = vst [vmem:[#allocation2] sm:$0x1] %v30_v0 }
   0x3   :  { %9082 = sst [smem:[#allocation56_spill]] %s8987_s2 }
   0x4   :  { %9083 = sst [smem:[#allocation57_spill]] %s8988_s3 }
   0x5   :  { %9084 = sst [smem:[#allocation58_spill]] %s8989_s4 }
   0x6   :  { %9085 = sst [smem:[#allocation59_spill]] %s8990_s5 }
   0x7   :  { %9086 = sst [smem:[#allocation60_spill]] %s8991_s6 }
   0x8   :  { %9087 = sst [smem:[#allocation61_spill]] %s8992_s7 }
   0x9   :  { %9088 = sst [smem:[#allocation62_spill]] %s8993_s8 }
   0xa   :  { %9089 = sst [smem:[#allocation63_spill]] %s8994_s9 }
   0xb   :  { %32 = vsyncpa [#allocation4], 0 }
   0xc   :  { %33 = vsyncpa [#allocation7], 0 }
   0xd   :  { %34 = vsyncpa [#allocation10], 0 }
   0xe   :  { %35 = vsyncpa [#allocation13], 0 }
   0xf   :  { %36 = vsyncpa [#allocation16], 0  ;;  %s71_s7 = sshll.u32 %s8995_s10, 4  ;;  %s72_s7 = int_to_ptr.hbm [resolvable:$true] %s71_s7 }
  0x10   :  { %37 = vsyncpa [#allocation5], 0  ;;  %s5879_s3 = smov [#allocation6]   ;;  %s103_s27 = sshll.u32 %s9000_s15, 4  ;;  %s104_s27 = int_to_ptr.hbm [resolvable:$true] %s103_s27 }
  0x11   :  { %s73_s26 = sshll.u32 %s5879_s3, 4  ;;  %s5880_s24 = smov 128   ;;  %s74_s26 = int_to_ptr.vmem [resolvable:$true] %s73_s26 }
  0x12   :  { %s5881_s4 = smov 8   ;;  %s5882_s28 = smov [#allocation9]  }
  0x13   :  { %79 = dma.hbm_to_vmem [thread:$0]  %s72_s7, 256, %s74_s26, [#allocation7], %s5880_s24, %s5880_s24, %s5881_s4  }
  0x14   :  { %s105_s9 = sshll.u32 %s5882_s28, 4  ;;  %s5883_s5 = smov 16   ;;  %s106_s9 = int_to_ptr.vmem [resolvable:$true] %s105_s9 }
  0x15   :  { %s5884_s0 = smov 1   ;;  %s129_s2 = sshll.u32 %s9002_s17, 4  ;;  %s130_s2 = int_to_ptr.hbm [resolvable:$true] %s129_s2 }
  0x16   :  { %111 = dma.hbm_to_vmem [thread:$0]  %s104_s27, 32, %s106_s9, [#allocation10], %s5883_s5, %s5883_s5, %s5884_s0  }
  0x17   :  { %s5885_s6 = smov [#allocation12]   ;;  %s155_s3 = sshll.u32 %s9004_s19, 4  ;;  %s156_s3 = int_to_ptr.hbm [resolvable:$true] %s155_s3 }
  0x18   :  { %s131_s15 = sshll.u32 %s5885_s6, 4  ;;  %s5886_s26 = smov [#allocation15]   ;;  %s132_s15 = int_to_ptr.vmem [resolvable:$true] %s131_s15 }
  0x19   :  { %137 = dma.hbm_to_vmem [thread:$0]  %s130_s2, 32, %s132_s15, [#allocation13], %s5883_s5, %s5883_s5, %s5884_s0  }
  0x1a   :  { %s157_s1 = sshll.u32 %s5886_s26, 4  ;;  %s9090_s24 = sld [smem:[#allocation63_spill]]  ;;  %s158_s1 = int_to_ptr.vmem [resolvable:$true] %s157_s1 }
  0x1b   :  { %163 = dma.hbm_to_vmem [thread:$0]  %s156_s3, 32, %s158_s1, [#allocation16], %s5883_s5, %s5883_s5, %s5884_s0  }
  0x1c   :  { %s88_s19 = sshll.u32 %s8998_s13, 4  ;;  %s5887_s9 = smov [#allocation3]   ;;  %s89_s19 = int_to_ptr.hbm [resolvable:$true] %s88_s19 }
  0x1d   :  { %s63_s10 = sshll.u32 %s5887_s9, 4  ;;  %s5888_s29 = smov [#allocation8]   ;;  %s64_s10 = int_to_ptr.vmem [resolvable:$true] %s63_s10 }
  0x1e   :  { %s90_s2 = sshll.u32 %s5888_s29, 4  ;;  %s5889_s6 = smov 32   ;;  %s91_s2 = int_to_ptr.vmem [resolvable:$true] %s90_s2 }
  0x1f   :  { %s5890_s15 = smov 2   ;;  %s116_s3 = sshll.u32 %s9001_s16, 4  ;;  %s117_s3 = int_to_ptr.hbm [resolvable:$true] %s116_s3 }
  0x20   :  { %s61_s4 = sshll.u32 %s9090_s24, 4  ;;  %s5891_s26 = smov [#allocation11]   ;;  %s62_s4 = int_to_ptr.hbm [resolvable:$true] %s61_s4 }
  0x21   :  { %66 = dma.hbm_to_vmem [thread:$0]  %s62_s4, 16, %s64_s10, [#allocation4]  }
  0x22   :  { %96 = dma.hbm_to_vmem [thread:$0]  %s89_s19, 64, %s91_s2, [#allocation7], %s5889_s6, %s5889_s6, %s5890_s15  }
  0x23   :  { %s118_s13 = sshll.u32 %s5891_s26, 4  ;;  %s142_s27 = sshll.u32 %s9003_s18, 4  ;;  %s119_s13 = int_to_ptr.vmem [resolvable:$true] %s118_s13  ;;  %s143_s27 = int_to_ptr.hbm [resolvable:$true] %s142_s27 }
  0x24   :  { %124 = dma.hbm_to_vmem [thread:$0]  %s117_s3, 32, %s119_s13, [#allocation10], %s5883_s5, %s5883_s5, %s5884_s0  }
  0x25   :  { %s5892_s24 = smov [#allocation14]   ;;  %s173_s19 = sshll.u32 %s9007_s22, 4  ;;  %s174_s19 = int_to_ptr.hbm [resolvable:$true] %s173_s19 }
  0x26   :  { %s144_s4 = sshll.u32 %s5892_s24, 4  ;;  %s5893_s16 = smov [#allocation17]   ;;  %s145_s4 = int_to_ptr.vmem [resolvable:$true] %s144_s4 }
  0x27   :  { %150 = dma.hbm_to_vmem [thread:$0]  %s143_s27, 32, %s145_s4, [#allocation13], %s5883_s5, %s5883_s5, %s5884_s0  }
  0x28   :  { %s175_s9 = sshll.u32 %s5893_s16, 4  ;;  %s176_s9 = int_to_ptr.vmem [resolvable:$true] %s175_s9 }
  0x29   :  { %178 = dma.hbm_to_vmem [thread:$0]  %s174_s19, 16, %s176_s9, [#allocation16]  }
  0x2a   :  { %5867 = dma.done.wait [#allocation4], 16  }
  0x2b   :  { %5868 = vsyncadd [#allocation4], 4294967280 }
  0x2c   :  { %5869 = dma.done.wait [#allocation7], 320  }
  0x2d   :  { %5870 = vsyncadd [#allocation7], 4294966976 }
  0x2e   :  { %5871 = dma.done.wait [#allocation10], 64  }
  0x2f   :  { %5872 = vsyncadd [#allocation10], 4294967232 }
  0x30   :  { %5873 = dma.done.wait [#allocation13], 64  }
  0x31   :  { %5874 = vsyncadd [#allocation13], 4294967232 }
  0x32   :  { %5875 = dma.done.wait [#allocation16], 48  }
  0x33   :  { %5876 = vsyncadd [#allocation16], 4294967248  ;;  %vm369_vm0 = vcmask 1041408   ;;  %vm234_vm1 = vcmask 1043456   ;;  %vm320_vm2 = vcmask 15360   ;;  %vm227_vm3 = vcmask 31744  }
  0x34   :  { %s9091_s5 = sld [smem:[#allocation62_spill]]  ;;  %v455_v20 = vld [vmem:[#allocation6 + $0x8] sm:$0xff]  ;;  %v454_v23 = vld [vmem:[#allocation6] sm:$0xff]  ;;  %vm9046_vm4 = vcmask 130048   ;;  %v6164_v29 = vld [vmem:[#allocation3] ss:$0 sm:$0xff] }
  0x35   :  { %s9092_s29 = sld [smem:[#allocation57_spill]]  ;;  %vm9047_vm5 = vcmask 261120   ;;  %s5894_s27 = smov 64  }
  0x36   :  { %s9093_s30 = sld [smem:[#allocation58_spill]]  ;;  %s5898_s0 = smov [#allocation18]  }
  0x37   :  { %s9094_s26 = sld [smem:[#allocation56_spill]]  ;;  %s4823_s10 = sshll.u32 %s5898_s0, 4  ;;  %s4824_s10 = int_to_ptr.vmem [resolvable:$true] %s4823_s10 }
  0x38   :  { %s9095_s19 = sld [smem:[#allocation60_spill]] }
  0x39   :  { %s9096_s15 = sld [smem:[#allocation59_spill]] }
  0x3a   :  { %v315_v1 = vld [vmem:[%s9091_s5] sm:$0x3]  ;;  %s9097_s5 = sld [smem:[#allocation61_spill]] }
  0x3b   :  { %v299_v2 = vld [vmem:[%s9092_s29] sm:$0xff]  ;;  %4844 = vmatpush.msk.msra.mxu2 %vm369_vm0, %v315_v1  ;;  %5124 = vmatpush.msk.msra.mxu3 %vm369_vm0, %v315_v1  ;;  %v300_v5 = vld [vmem:[%s9092_s29 + $0x8] sm:$0xff]  ;;  %v301_v7 = vld [vmem:[%s9092_s29 + $0x10] sm:$0xff]  ;;  %s9116_s8 = sld [smem:[#allocation54_spill]] }
  0x3c   :  { %v222_v3 = vld [vmem:[%s9093_s30] sm:$0xf]  ;;  %4845 = vmatmul.msk.f32.vlgmr.msra.gmra.mxu2 %vm320_vm2, %v299_v2  ;;  %v302_v8 = vld [vmem:[%s9092_s29 + $0x18] sm:$0xff]  ;;  %v304_v10 = vld [vmem:[%s9092_s29 + $0x28] sm:$0xff]  ;;  %s9117_s7 = sld [smem:[#allocation55_spill]] }
  0x3d   :  { %4839 = vmatpush.msk.msra.mxu0 %vm234_vm1, %v222_v3  ;;  %v220_v4 = vld [vmem:[%s9094_s26] sm:$0xff]  ;;  %v221_v6 = vld [vmem:[%s9094_s26 + $0x8] sm:$0xff]  ;;  %v305_v11 = vld [vmem:[%s9092_s29 + $0x30] sm:$0xff] }
  0x3e   :  { %4840 = vmatmul.msk.f32.vlgmr.msra.gmra.mxu0 %vm227_vm3, %v220_v4  ;;  %v303_v9 = vld [vmem:[%s9092_s29 + $0x20] sm:$0xff]  ;;  %v306_v12 = vld [vmem:[%s9092_s29 + $0x38] sm:$0xff]  ;;  %v308_v14 = vld [vmem:[%s9092_s29 + $0x48] sm:$0xff] }
  0x3f   :  { %v307_v13 = vld [vmem:[%s9092_s29 + $0x40] sm:$0xff]  ;;  %v309_v15 = vld [vmem:[%s9092_s29 + $0x50] sm:$0xff]  ;;  %v314_v16 = vld [vmem:[%s9092_s29 + $0x78] sm:$0xff] }
  0x40   :  { %4860 = vmatmul.msk.f32.vlgmr.msra.gmra.mxu3 %vm320_vm2, %v314_v16  ;;  %v310_v17 = vld [vmem:[%s9092_s29 + $0x58] sm:$0xff]  ;;  %v311_v18 = vld [vmem:[%s9092_s29 + $0x60] sm:$0xff]  ;;  %v264_v19 = vld [vmem:[%s9095_s19 + $0x8] sm:$0xff] }
  0x41   :  { %v312_v21 = vld [vmem:[%s9092_s29 + $0x68] sm:$0xff]  ;;  %290 = vmatpush.msra.mxu1 %v264_v19  ;;  %522 = vmatpush.msra.mxu3 %v455_v20  ;;  %v263_v22 = vld [vmem:[%s9095_s19] sm:$0xff]  ;;  %v313_v24 = vld [vmem:[%s9092_s29 + $0x70] sm:$0xff] }
  0x42   :  { %v5352_v25 = vld [vmem:[%s9096_s15] ss:$0 sm:$0xff]  ;;  %v579_v2 = vld [vmem:[%s8997_s12 + $0x30] sm:$0xff]  ;;  %s4825_s15 = sshll.u32 %s9010_s25, 4  ;;  %s4826_s15 = int_to_ptr.hbm [resolvable:$true] %s4825_s15 }
  0x43   :  { %291 = vmatpush.msra.mxu1 %v263_v22  ;;  %523 = vmatpush.msra.mxu3 %v454_v23 }
  0x44   :  { %4846 = vmatmul.msk.f32.gmra.mxu2 %vm320_vm2, %v300_v5 }
  0x46   :  { %4841 = vmatmul.msk.f32.gmra.mxu0 %vm227_vm3, %v221_v6  ;;  %v577_v6 = vld [vmem:[%s8997_s12 + $0x20] sm:$0xff] }
  0x4c   :  { %4847 = vmatmul.msk.f32.gmra.mxu2 %vm320_vm2, %v301_v7  ;;  %v575_v7 = vld [vmem:[%s8997_s12 + $0x10] sm:$0xff] }
  0x54   :  { %4848 = vmatmul.msk.f32.gmra.mxu2 %vm320_vm2, %v302_v8  ;;  %v643_v8 = vld [vmem:[%s8999_s14 + $0x18] sm:$0xff] }
  0x55   :  { %708 = vmatpush.msra.mxu0 %v643_v8 }
  0x5c   :  { %4849 = vmatmul.msk.f32.gmra.mxu2 %vm320_vm2, %v303_v9  ;;  %v573_v9 = vld [vmem:[%s8997_s12] sm:$0xff] }
  0x64   :  { %4850 = vmatmul.msk.f32.gmra.mxu2 %vm320_vm2, %v304_v10 }
  0x6c   :  { %4851 = vmatmul.msk.f32.gmra.mxu2 %vm320_vm2, %v305_v11 }
  0x74   :  { %4852 = vmatmul.msk.f32.gmra.mxu2 %vm320_vm2, %v306_v12 }
  0x7c   :  { %4853 = vmatmul.msk.f32.gmra.mxu2 %vm320_vm2, %v307_v13  ;;  %v642_v13 = vld [vmem:[%s8999_s14 + $0x10] sm:$0xff] }
  0x7d   :  { %709 = vmatpush.msra.mxu0 %v642_v13 }
  0x84   :  { %4854 = vmatmul.msk.f32.gmra.mxu2 %vm320_vm2, %v308_v14  ;;  %v641_v14 = vld [vmem:[%s8999_s14 + $0x8] sm:$0xff] }
  0x85   :  { %710 = vmatpush.msra.mxu0 %v641_v14  ;;  %v6325_v14 = vld [vmem:[%s9116_s8] sm:$0xff] }
  0x8c   :  { %4855 = vmatmul.msk.f32.gmra.mxu2 %vm320_vm2, %v309_v15 }
  0x94   :  { %4856 = vmatmul.msk.f32.gmra.mxu2 %vm320_vm2, %v310_v17  ;;  %v640_v17 = vld [vmem:[%s8999_s14] sm:$0xff] }
  0x95   :  { %711 = vmatpush.msra.mxu0 %v640_v17 }
  0x9c   :  { %4857 = vmatmul.msk.f32.gmra.mxu2 %vm320_vm2, %v311_v18 }
  0xa4   :  { %4858 = vmatmul.msk.f32.gmra.mxu2 %vm320_vm2, %v312_v21 }
  0xac   :  { %4859 = vmatmul.msk.f32.gmra.mxu2 %vm320_vm2, %v313_v24 }
  0xbb   :  { %v255_v26 = vpop.f32.mrf.mxu0 }
  0xbc   :  { %v256_v27 = vadd.f32 %v5352_v25, %v255_v26  ;;  %v5354_v26 = vld [vmem:[%s9097_s5] ss:$0 sm:$0xff]  ;;  %s5895_s5 = smov 96  }
  0xbe   :  { %v261_v28 = vmax.f32 %v256_v27, 0.0 }
  0xbf   :  { %v390_v30 = vpop.f32.mrf.mxu2 }
  0xc0   :  { %4842 = vmatmul.msk.f32.vlgmr.msra.gmra.mxu1 %vm9046_vm4, %v261_v28  ;;  %v391_v31 = vadd.f32 %v6164_v29, %v390_v30  ;;  %v580_v28 = vld [vmem:[%s8997_s12 + $0x38] sm:$0xff]  ;;  %v578_v30 = vld [vmem:[%s8997_s12 + $0x28] sm:$0xff] }
  0xc2   :  { %v438_v33 = vmax.f32 %v391_v31, 0.0 }
  0xc3   :  { %v258_v32 = vpop.f32.mrf.mxu0  ;;  %v435_v21 = vpop.f32.mrf.mxu3 }
  0xc4   :  { %v259_v34 = vadd.f32 %v5352_v25, %v258_v32  ;;  %4861 = vmatmul.msk.f32.vlgmr.msra.gmra.mxu3 %vm9046_vm4, %v438_v33  ;;  %v436_v23 = vadd.f32 %v6164_v29, %v435_v21  ;;  %v576_v32 = vld [vmem:[%s8997_s12 + $0x18] sm:$0xff] }
  0xc5   :  { %606 = vmatpush.msra.mxu3 %v579_v2 }
  0xc6   :  { %v262_v35 = vmax.f32 %v259_v34, 0.0  ;;  %v453_v24 = vmax.f32 %v436_v23, 0.0 }
  0xc7   :  { %v393_v36 = vpop.f32.mrf.mxu2  ;;  %607 = vmatpush.msra.mxu3 %v577_v6 }
  0xc8   :  { %4843 = vmatmul.msk.f32.gmra.mxu1 %vm9046_vm4, %v262_v35  ;;  %v394_v37 = vadd.f32 %v6164_v29, %v393_v36  ;;  %v574_v36 = vld [vmem:[%s8997_s12 + $0x8] sm:$0xff] }
  0xc9   :  { %608 = vmatpush.msra.mxu3 %v575_v7  ;;  %v6318_v7 = vld [vmem:[#allocation9] ss:$0 sm:$0xff] }
  0xca   :  { %v439_v38 = vmax.f32 %v394_v37, 0.0 }
  0xcb   :  { %609 = vmatpush.msra.mxu3 %v573_v9 }
  0xcc   :  { %4862 = vmatmul.msk.f32.gmra.mxu3 %vm9046_vm4, %v439_v38 }
  0xcf   :  { %v396_v39 = vpop.f32.mrf.mxu2 }
  0xd0   :  { %v397_v40 = vadd.f32 %v6164_v29, %v396_v39 }
  0xd2   :  { %v440_v41 = vmax.f32 %v397_v40, 0.0 }
  0xd4   :  { %4863 = vmatmul.msk.f32.gmra.mxu3 %vm9046_vm4, %v440_v41 }
  0xd7   :  { %v399_v42 = vpop.f32.mrf.mxu2 }
  0xd8   :  { %v400_v43 = vadd.f32 %v6164_v29, %v399_v42 }
  0xda   :  { %v441_v44 = vmax.f32 %v400_v43, 0.0 }
  0xdc   :  { %4864 = vmatmul.msk.f32.gmra.mxu3 %vm9046_vm4, %v441_v44 }
  0xdf   :  { %v402_v45 = vpop.f32.mrf.mxu2 }
  0xe0   :  { %v403_v46 = vadd.f32 %v6164_v29, %v402_v45 }
  0xe2   :  { %v442_v47 = vmax.f32 %v403_v46, 0.0 }
  0xe4   :  { %4865 = vmatmul.msk.f32.gmra.mxu3 %vm9046_vm4, %v442_v47 }
  0xe7   :  { %v405_v48 = vpop.f32.mrf.mxu2 }
  0xe8   :  { %v406_v49 = vadd.f32 %v6164_v29, %v405_v48 }
  0xea   :  { %v443_v50 = vmax.f32 %v406_v49, 0.0 }
  0xec   :  { %4866 = vmatmul.msk.f32.gmra.mxu3 %vm9046_vm4, %v443_v50 }
  0xef   :  { %v408_v51 = vpop.f32.mrf.mxu2 }
  0xf0   :  { %v409_v52 = vadd.f32 %v6164_v29, %v408_v51 }
  0xf2   :  { %v444_v53 = vmax.f32 %v409_v52, 0.0 }
  0xf4   :  { %4867 = vmatmul.msk.f32.gmra.mxu3 %vm9046_vm4, %v444_v53 }
  0xf7   :  { %v411_v54 = vpop.f32.mrf.mxu2 }
  0xf8   :  { %v412_v55 = vadd.f32 %v6164_v29, %v411_v54 }
  0xfa   :  { %v445_v56 = vmax.f32 %v412_v55, 0.0 }
  0xfc   :  { %4868 = vmatmul.msk.f32.gmra.mxu3 %vm9046_vm4, %v445_v56 }
  0xff   :  { %v414_v57 = vpop.f32.mrf.mxu2 }
 0x100   :  { %v415_v58 = vadd.f32 %v6164_v29, %v414_v57 }
 0x102   :  { %v446_v59 = vmax.f32 %v415_v58, 0.0 }
 0x104   :  { %4869 = vmatmul.msk.f32.gmra.mxu3 %vm9046_vm4, %v446_v59 }
 0x107   :  { %v417_v60 = vpop.f32.mrf.mxu2 }
 0x108   :  { %v418_v61 = vadd.f32 %v6164_v29, %v417_v60 }
 0x10a   :  { %v447_v62 = vmax.f32 %v418_v61, 0.0 }
 0x10c   :  { %4870 = vmatmul.msk.f32.gmra.mxu3 %vm9046_vm4, %v447_v62 }
 0x10f   :  { %v420_v63 = vpop.f32.mrf.mxu2 }
 0x110   :  { %v421_v0 = vadd.f32 %v6164_v29, %v420_v63 }
 0x112   :  { %v448_v1 = vmax.f32 %v421_v0, 0.0 }
 0x114   :  { %4871 = vmatmul.msk.f32.gmra.mxu3 %vm9046_vm4, %v448_v1 }
 0x117   :  { %v423_v3 = vpop.f32.mrf.mxu2 }
 0x118   :  { %v424_v4 = vadd.f32 %v6164_v29, %v423_v3 }
 0x11a   :  { %v449_v5 = vmax.f32 %v424_v4, 0.0 }
 0x11c   :  { %4872 = vmatmul.msk.f32.gmra.mxu3 %vm9046_vm4, %v449_v5  ;;  %v581_v5 = vld [vmem:[#allocation8] sm:$0x3] }
 0x11d   :  { %v583_v6 = vperm.slane %v581_v5, 0 }
 0x11f   :  { %v426_v10 = vpop.f32.mrf.mxu2 }
 0x120   :  { %v427_v11 = vadd.f32 %v6164_v29, %v426_v10 }
 0x122   :  { %v450_v12 = vmax.f32 %v427_v11, 0.0 }
 0x124   :  { %4873 = vmatmul.msk.f32.gmra.mxu3 %vm9046_vm4, %v450_v12 }
 0x127   :  { %v429_v15 = vpop.f32.mrf.mxu2 }
 0x128   :  { %v430_v16 = vadd.f32 %v6164_v29, %v429_v15 }
 0x12a   :  { %v451_v18 = vmax.f32 %v430_v16, 0.0 }
 0x12c   :  { %4874 = vmatmul.msk.f32.gmra.mxu3 %vm9046_vm4, %v451_v18 }
 0x12f   :  { %v432_v19 = vpop.f32.mrf.mxu2 }
 0x130   :  { %v433_v20 = vadd.f32 %v6164_v29, %v432_v19  ;;  %v5355_v29 = vld [vmem:[%s8996_s11] ss:$0 sm:$0xff] }
 0x132   :  { %v452_v22 = vmax.f32 %v433_v20, 0.0  ;;  %v5109_v20 = vld [vmem:[%s9116_s8 + $0x8] sm:$0xff] }
 0x134   :  { %4875 = vmatmul.msk.f32.gmra.mxu3 %vm9046_vm4, %v452_v22 }
 0x13c   :  { %4876 = vmatmul.msk.f32.gmra.mxu3 %vm9046_vm4, %v453_v24 }
 0x13d   :  { %v293_v25 = vpop.f32.mrf.mxu1 }
 0x13e   :  { %v6227_v27 = vadd.f32 %v5354_v26, %v293_v25  ;;  %v5110_v25 = vld [vmem:[%s9116_s8 + $0x10] sm:$0xff] }
 0x140   :  { %9098 = vst [vmem:[#allocation25_spill] sm:$0xff] %v6227_v27 }
 0x144   :  { %4877 = vmatmul.msk.f32.vlgmr.msra.gmra.mxu3 %vm9047_vm5, %v6227_v27 }
 0x145   :  { %v296_v31 = vpop.f32.mrf.mxu1  ;;  %629 = vmatpush.msra.mxu3 %v580_v28 }
 0x146   :  { %v6245_v35 = vadd.f32 %v5354_v26, %v296_v31  ;;  %v5111_v31 = vld [vmem:[%s9116_s8 + $0x18] sm:$0xff] }
 0x147   :  { %v525_v33 = vpop.f32.mrf.mxu3  ;;  %630 = vmatpush.msra.mxu3 %v578_v30 }
 0x148   :  { %v6243_v34 = vadd.f32 %v5355_v29, %v525_v33  ;;  %9100 = vst [vmem:[#allocation27_spill] sm:$0xff] %v6245_v35 }
 0x149   :  { %631 = vmatpush.msra.mxu3 %v576_v32 }
 0x14a   :  { %9099 = vst [vmem:[#allocation26_spill] sm:$0xff] %v6243_v34  ;;  %4881 = vmatmul.msk.f32.vlgmr.msra.gmra.mxu0 %vm9047_vm5, %v6243_v34 }
 0x14b   :  { %632 = vmatpush.msra.mxu3 %v574_v36 }
 0x14c   :  { %4878 = vmatmul.msk.f32.gmra.mxu3 %vm9047_vm5, %v6245_v35 }
 0x14f   :  { %v528_v37 = vpop.f32.mrf.mxu3 }
 0x150   :  { %v6254_v38 = vadd.f32 %v5355_v29, %v528_v37 }
 0x152   :  { %9101 = vst [vmem:[#allocation28_spill] sm:$0xff] %v6254_v38  ;;  %4882 = vmatmul.msk.f32.gmra.mxu0 %vm9047_vm5, %v6254_v38 }
 0x154   :  { %4879 = vmatmul.msk.f32.vlgmr.msra.gmra.mxu3 %vm9047_vm5, %v6227_v27 }
 0x157   :  { %v531_v39 = vpop.f32.mrf.mxu3 }
 0x158   :  { %v6260_v40 = vadd.f32 %v5355_v29, %v531_v39  ;;  %v5112_v39 = vld [vmem:[%s9116_s8 + $0x20] sm:$0xff] }
 0x15a   :  { %9102 = vst [vmem:[#allocation29_spill] sm:$0xff] %v6260_v40  ;;  %4883 = vmatmul.msk.f32.gmra.mxu0 %vm9047_vm5, %v6260_v40 }
 0x15c   :  { %4880 = vmatmul.msk.f32.gmra.mxu3 %vm9047_vm5, %v6245_v35 }
 0x15f   :  { %v534_v41 = vpop.f32.mrf.mxu3 }
 0x160   :  { %v6266_v42 = vadd.f32 %v5355_v29, %v534_v41 }
 0x162   :  { %9103 = vst [vmem:[#allocation30_spill] sm:$0xff] %v6266_v42  ;;  %4884 = vmatmul.msk.f32.gmra.mxu0 %vm9047_vm5, %v6266_v42 }
 0x167   :  { %v537_v43 = vpop.f32.mrf.mxu3 }
 0x168   :  { %v6270_v44 = vadd.f32 %v5355_v29, %v537_v43 }
 0x16a   :  { %9104 = vst [vmem:[#allocation31_spill] sm:$0xff] %v6270_v44  ;;  %4885 = vmatmul.msk.f32.gmra.mxu0 %vm9047_vm5, %v6270_v44 }
 0x16f   :  { %v540_v45 = vpop.f32.mrf.mxu3 }
 0x170   :  { %v6274_v46 = vadd.f32 %v5355_v29, %v540_v45 }
 0x172   :  { %9105 = vst [vmem:[#allocation32_spill] sm:$0xff] %v6274_v46  ;;  %4886 = vmatmul.msk.f32.gmra.mxu0 %vm9047_vm5, %v6274_v46 }
 0x177   :  { %v543_v47 = vpop.f32.mrf.mxu3 }
 0x178   :  { %v6278_v48 = vadd.f32 %v5355_v29, %v543_v47 }
 0x17a   :  { %9106 = vst [vmem:[#allocation33_spill] sm:$0xff] %v6278_v48  ;;  %4887 = vmatmul.msk.f32.gmra.mxu0 %vm9047_vm5, %v6278_v48 }
 0x17f   :  { %v546_v49 = vpop.f32.mrf.mxu3 }
 0x180   :  { %v6282_v50 = vadd.f32 %v5355_v29, %v546_v49  ;;  %v5113_v49 = vld [vmem:[%s9116_s8 + $0x28] sm:$0xff] }
 0x182   :  { %9107 = vst [vmem:[#allocation34_spill] sm:$0xff] %v6282_v50  ;;  %4888 = vmatmul.msk.f32.gmra.mxu0 %vm9047_vm5, %v6282_v50 }
 0x187   :  { %v549_v51 = vpop.f32.mrf.mxu3 }
 0x188   :  { %v6286_v52 = vadd.f32 %v5355_v29, %v549_v51 }
 0x18a   :  { %9108 = vst [vmem:[#allocation35_spill] sm:$0xff] %v6286_v52  ;;  %4889 = vmatmul.msk.f32.gmra.mxu0 %vm9047_vm5, %v6286_v52 }
 0x18f   :  { %v552_v53 = vpop.f32.mrf.mxu3 }
 0x190   :  { %v6290_v54 = vadd.f32 %v5355_v29, %v552_v53 }
 0x192   :  { %9109 = vst [vmem:[#allocation36_spill] sm:$0xff] %v6290_v54  ;;  %4890 = vmatmul.msk.f32.gmra.mxu0 %vm9047_vm5, %v6290_v54 }
 0x197   :  { %v555_v55 = vpop.f32.mrf.mxu3 }
 0x198   :  { %v6294_v56 = vadd.f32 %v5355_v29, %v555_v55  ;;  %v5115_v55 = vld [vmem:[%s9116_s8 + $0x38] sm:$0xff] }
 0x199   :  { %5128 = vmatpush.lsf.bf16.msrb.mxu0 %v5115_v55 }
 0x19a   :  { %9110 = vst [vmem:[#allocation37_spill] sm:$0xff] %v6294_v56  ;;  %4891 = vmatmul.msk.f32.gmra.mxu0 %vm9047_vm5, %v6294_v56 }
 0x19f   :  { %v558_v57 = vpop.f32.mrf.mxu3 }
 0x1a0   :  { %v6298_v58 = vadd.f32 %v5355_v29, %v558_v57 }
 0x1a2   :  { %9111 = vst [vmem:[#allocation38_spill] sm:$0xff] %v6298_v58  ;;  %4892 = vmatmul.msk.f32.gmra.mxu0 %vm9047_vm5, %v6298_v58 }
 0x1a7   :  { %v561_v59 = vpop.f32.mrf.mxu3 }
 0x1a8   :  { %v6302_v60 = vadd.f32 %v5355_v29, %v561_v59 }
 0x1aa   :  { %9112 = vst [vmem:[#allocation39_spill] sm:$0xff] %v6302_v60  ;;  %4893 = vmatmul.msk.f32.gmra.mxu0 %vm9047_vm5, %v6302_v60 }
 0x1af   :  { %v564_v61 = vpop.f32.mrf.mxu3 }
 0x1b0   :  { %v6306_v62 = vadd.f32 %v5355_v29, %v564_v61  ;;  %v5114_v61 = vld [vmem:[%s9116_s8 + $0x30] sm:$0xff] }
 0x1b1   :  { %5129 = vmatpush.lsf.bf16.msrb.mxu0 %v5114_v61 }
 0x1b2   :  { %9113 = vst [vmem:[#allocation40_spill] sm:$0xff] %v6306_v62  ;;  %4894 = vmatmul.msk.f32.gmra.mxu0 %vm9047_vm5, %v6306_v62 }
 0x1b5   :  { %5130 = vmatpush.lsf.bf16.msrb.mxu0 %v5113_v49 }
 0x1b7   :  { %v567_v63 = vpop.f32.mrf.mxu3 }
 0x1b8   :  { %v6310_v0 = vadd.f32 %v5355_v29, %v567_v63 }
 0x1b9   :  { %5131 = vmatpush.lsf.bf16.msrb.mxu0 %v5112_v39 }
 0x1ba   :  { %9114 = vst [vmem:[#allocation41_spill] sm:$0xff] %v6310_v0  ;;  %4895 = vmatmul.msk.f32.gmra.mxu0 %vm9047_vm5, %v6310_v0 }
 0x1bd   :  { %5132 = vmatpush.lsf.bf16.msrb.mxu0 %v5111_v31 }
 0x1bf   :  { %v570_v1 = vpop.f32.mrf.mxu3 }
 0x1c0   :  { %v6314_v2 = vadd.f32 %v5355_v29, %v570_v1 }
 0x1c1   :  { %5133 = vmatpush.lsf.bf16.msrb.mxu0 %v5110_v25 }
 0x1c2   :  { %9115 = vst [vmem:[#allocation42_spill] sm:$0xff] %v6314_v2  ;;  %4896 = vmatmul.msk.f32.gmra.mxu0 %vm9047_vm5, %v6314_v2 }
 0x1c5   :  { %5134 = vmatpush.lsf.bf16.msrb.mxu0 %v5109_v20 }
 0x1c7   :  { %v611_v3 = vpop.f32.mrf.mxu3  ;;  %v713_v4 = vpop.f32.mrf.mxu0 }
 0x1c8   :  { %v612_v10 = vadd.f32 %v611_v3, %v583_v6  ;;  %v714_v17 = vadd.f32 %v6318_v7, %v713_v4 }
 0x1c9   :  { %5135 = vmatpush.lsf.bf16.msrb.mxu0 %v6325_v14 }
 0x1cb   :  { %5136 = vllmr.2.mxu0 }
 0x1cf   :  { %v614_v8 = vpop.f32.mrf.mxu3  ;;  %v716_v9 = vpop.f32.mrf.mxu0 }
 0x1d0   :  { %v615_v11 = vadd.f32 %v614_v8, %v583_v6  ;;  %v717_v12 = vadd.f32 %v6318_v7, %v716_v9  ;;  %v5116_v6 = vld [vmem:[%s9117_s7] sm:$0xff] }
 0x1d2   :  { %1058 = vrot.lane.b32.xlu1 %v717_v12, %s5889_s6  ;;  %v777_v13 = vpack.c.bf16 %v615_v11, %v612_v10  ;;  %v5118_v11 = vld [vmem:[%s9117_s7 + $0x10] sm:$0xff] }
 0x1d4   :  { %948 = vrot.lane.b32.xlu0 %v777_v13, %s5894_s27  ;;  %849 = vmatpush.bf16.msrb.mxu1 %v777_v13 }
 0x1d7   :  { %v719_v15 = vpop.f32.mrf.mxu0  ;;  %4929 = vmatmul.msk.bf16.vlgmr.msrb.gmra.mxu1 %vm9046_vm4, %v6325_v14  ;;  %v5119_v14 = vld [vmem:[%s9117_s7 + $0x18] sm:$0xff] }
 0x1d8   :  { %v720_v16 = vadd.f32 %v6318_v7, %v719_v15 }
 0x1da   :  { %1060 = vrot.lane.b32.xlu1 %v720_v16, %s5889_s6 }
 0x1dc   :  { %1056 = vrot.lane.b32.xlu0 %v714_v17, %s5889_s6  ;;  %v5120_v17 = vld [vmem:[%s9117_s7 + $0x20] sm:$0xff] }
 0x1df   :  { %v722_v18 = vpop.f32.mrf.mxu0 }
 0x1e0   :  { %v723_v19 = vadd.f32 %v6318_v7, %v722_v18 }
 0x1e2   :  { %1062 = vrot.lane.b32.xlu2 %v723_v19, %s5889_s6  ;;  %v5123_v19 = vld [vmem:[%s9117_s7 + $0x38] sm:$0xff] }
 0x1e3   :  { %5159 = vmatpush.lsf.bf16.msrb.mxu3 %v5123_v19 }
 0x1e7   :  { %v725_v21 = vpop.f32.mrf.mxu0  ;;  %4930 = vmatmul.msk.bf16.gmra.mxu1 %vm9046_vm4, %v5109_v20 }
 0x1e8   :  { %v726_v22 = vadd.f32 %v6318_v7, %v725_v21  ;;  %v5121_v21 = vld [vmem:[%s9117_s7 + $0x28] sm:$0xff] }
 0x1ea   :  { %1064 = vrot.lane.b32.xlu2 %v726_v22, %s5889_s6  ;;  %v5122_v22 = vld [vmem:[%s9117_s7 + $0x30] sm:$0xff] }
 0x1eb   :  { %5160 = vmatpush.lsf.bf16.msrb.mxu3 %v5122_v22 }
 0x1ef   :  { %v728_v23 = vpop.f32.mrf.mxu0  ;;  %5161 = vmatpush.lsf.bf16.msrb.mxu3 %v5121_v21 }
 0x1f0   :  { %v729_v24 = vadd.f32 %v6318_v7, %v728_v23 }
 0x1f2   :  { %1066 = vrot.lane.b32.xlu0 %v729_v24, %s5889_s6 }
 0x1f3   :  { %5162 = vmatpush.lsf.bf16.msrb.mxu3 %v5120_v17 }
 0x1f7   :  { %v731_v26 = vpop.f32.mrf.mxu0  ;;  %4931 = vmatmul.msk.bf16.gmra.mxu1 %vm9046_vm4, %v5110_v25  ;;  %5163 = vmatpush.lsf.bf16.msrb.mxu3 %v5119_v14 }
 0x1f8   :  { %v732_v28 = vadd.f32 %v6318_v7, %v731_v26 }
 0x1fa   :  { %1068 = vrot.lane.b32.xlu0 %v732_v28, %s5889_s6 }
 0x1fb   :  { %5164 = vmatpush.lsf.bf16.msrb.mxu3 %v5118_v11 }
 0x1ff   :  { %v734_v29 = vpop.f32.mrf.mxu0 }
 0x200   :  { %v735_v30 = vadd.f32 %v6318_v7, %v734_v29 }
 0x202   :  { %1070 = vrot.lane.b32.xlu1 %v735_v30, %s5889_s6 }
 0x207   :  { %v737_v32 = vpop.f32.mrf.mxu0  ;;  %4932 = vmatmul.msk.bf16.gmra.mxu1 %vm9046_vm4, %v5111_v31 }
 0x208   :  { %v738_v33 = vadd.f32 %v6318_v7, %v737_v32 }
 0x20a   :  { %1072 = vrot.lane.b32.xlu1 %v738_v33, %s5889_s6 }
 0x20f   :  { %v740_v36 = vpop.f32.mrf.mxu0 }
 0x210   :  { %v741_v37 = vadd.f32 %v6318_v7, %v740_v36 }
 0x212   :  { %1074 = vrot.lane.b32.xlu2 %v741_v37, %s5889_s6 }
 0x217   :  { %v743_v41 = vpop.f32.mrf.mxu0  ;;  %4933 = vmatmul.msk.bf16.gmra.mxu1 %vm9046_vm4, %v5112_v39 }
 0x218   :  { %v744_v43 = vadd.f32 %v6318_v7, %v743_v41 }
 0x21a   :  { %1076 = vrot.lane.b32.xlu2 %v744_v43, %s5889_s6 }
 0x21f   :  { %v746_v45 = vpop.f32.mrf.mxu0 }
 0x220   :  { %v747_v47 = vadd.f32 %v6318_v7, %v746_v45 }
 0x222   :  { %1078 = vrot.lane.b32.xlu0 %v747_v47, %s5889_s6 }
 0x227   :  { %v749_v51 = vpop.f32.mrf.mxu0  ;;  %4934 = vmatmul.msk.bf16.gmra.mxu1 %vm9046_vm4, %v5113_v49 }
 0x228   :  { %v750_v53 = vadd.f32 %v6318_v7, %v749_v51 }
 0x22a   :  { %1080 = vrot.lane.b32.xlu1 %v750_v53, %s5889_s6 }
 0x22f   :  { %v752_v57 = vpop.f32.mrf.mxu0 }
 0x230   :  { %v753_v59 = vadd.f32 %v6318_v7, %v752_v57 }
 0x232   :  { %1082 = vrot.lane.b32.xlu2 %v753_v59, %s5889_s6 }
 0x237   :  { %v755_v63 = vpop.f32.mrf.mxu0  ;;  %4935 = vmatmul.msk.bf16.gmra.mxu1 %vm9046_vm4, %v5114_v61 }
 0x238   :  { %v756_v1 = vadd.f32 %v6318_v7, %v755_v63 }
 0x23a   :  { %1084 = vrot.lane.b32.xlu0 %v756_v1, %s5889_s6 }
 0x23c   :  { %v1063_v43 = vpop.permute.xlu2 %1062 }
 0x23f   :  { %v758_v3 = vpop.f32.mrf.mxu0 }
 0x240   :  { %v759_v4 = vadd.f32 %v6318_v7, %v758_v3  ;;  %v5117_v7 = vld [vmem:[%s9117_s7 + $0x8] sm:$0xff] }
 0x241   :  { %5165 = vmatpush.lsf.bf16.msrb.mxu3 %v5117_v7 }
 0x242   :  { %1086 = vrot.lane.b32.xlu1 %v759_v4, %s5889_s6 }
 0x244   :  { %v6493_v39 = vpop.permute.xlu1 %1058  ;;  %v1065_v61 = vpop.permute.xlu2 %1064 }
 0x245   :  { %5166 = vmatpush.lsf.bf16.msrb.mxu3 %v5116_v6 }
 0x246   :  { %v949_v5 = vpop.permute.xlu0 %948 }
 0x247   :  { %982 = vmatpush.bf16.msra.mxu2 %v949_v5  ;;  %4936 = vmatmul.msk.bf16.gmra.mxu1 %vm9046_vm4, %v5115_v55 }
 0x248   :  { %5167 = vllmr.2.mxu3 }
 0x24a   :  { %4969 = vmatmul.msk.bf16.vlgmr.msra.gmra.mxu2 %vm9046_vm4, %v5116_v6 }
 0x24b   :  { %5145 = vmatpush.lsf.bf16.msrb.mxu2 %v5123_v19 }
 0x24c   :  { %v1061_v49 = vpop.permute.xlu1 %1060 }
 0x24e   :  { %v6497_v47 = vpop.permute.xlu0 %1056 }
 0x24f   :  { %5146 = vmatpush.lsf.bf16.msrb.mxu2 %v5122_v22 }
 0x253   :  { %5147 = vmatpush.lsf.bf16.msrb.mxu2 %v5121_v21 }
 0x254   :  { %v6393_v8 = vpop.f32.mrf.mxu1 }
 0x255   :  { %1440 = vrot.lane.b32.xlu2 %v6393_v8, %s5889_s6 }
 0x257   :  { %5148 = vmatpush.lsf.bf16.msrb.mxu2 %v5120_v17 }
 0x25a   :  { %4970 = vmatmul.msk.bf16.gmra.mxu2 %vm9046_vm4, %v5117_v7 }
 0x25b   :  { %5149 = vmatpush.lsf.bf16.msrb.mxu2 %v5119_v14 }
 0x25c   :  { %v6401_v9 = vpop.f32.mrf.mxu1 }
 0x25d   :  { %1442 = vrot.lane.b32.xlu0 %v6401_v9, %s5889_s6 }
 0x25f   :  { %5150 = vmatpush.lsf.bf16.msrb.mxu2 %v5118_v11 }
 0x263   :  { %5151 = vmatpush.lsf.bf16.msrb.mxu2 %v5117_v7 }
 0x264   :  { %v6405_v10 = vpop.f32.mrf.mxu1  ;;  %v1067_v57 = vpop.permute.xlu0 %1066 }
 0x265   :  { %1444 = vrot.lane.b32.xlu1 %v6405_v10, %s5889_s6 }
 0x267   :  { %5152 = vmatpush.lsf.bf16.msrb.mxu2 %v5116_v6 }
 0x26a   :  { %4971 = vmatmul.msk.bf16.gmra.mxu2 %vm9046_vm4, %v5118_v11 }
 0x26c   :  { %v6413_v12 = vpop.f32.mrf.mxu1 }
 0x26d   :  { %1446 = vrot.lane.b32.xlu2 %v6413_v12, %s5889_s6 }
 0x274   :  { %v6417_v13 = vpop.f32.mrf.mxu1  ;;  %v1071_v63 = vpop.permute.xlu1 %1070 }
 0x275   :  { %1448 = vrot.lane.b32.xlu0 %v6417_v13, %s5889_s6 }
 0x27a   :  { %4972 = vmatmul.msk.bf16.gmra.mxu2 %vm9046_vm4, %v5119_v14  ;;  %v1075_v14 = vpop.permute.xlu2 %1074 }
 0x27c   :  { %v6425_v15 = vpop.f32.mrf.mxu1 }
 0x27d   :  { %1450 = vrot.lane.b32.xlu1 %v6425_v15, %s5889_s6 }
 0x284   :  { %v6429_v16 = vpop.f32.mrf.mxu1 }
 0x285   :  { %1452 = vrot.lane.b32.xlu2 %v6429_v16, %s5889_s6 }
 0x28a   :  { %4973 = vmatmul.msk.bf16.gmra.mxu2 %vm9046_vm4, %v5120_v17 }
 0x28c   :  { %v6437_v18 = vpop.f32.mrf.mxu1 }
 0x28d   :  { %1454 = vrot.lane.b32.xlu0 %v6437_v18, %s5889_s6 }
 0x294   :  { %v6444_v20 = vpop.f32.mrf.mxu1 }
 0x295   :  { %1456 = vrot.lane.b32.xlu1 %v6444_v20, %s5889_s6 }
 0x29a   :  { %4974 = vmatmul.msk.bf16.gmra.mxu2 %vm9046_vm4, %v5121_v21 }
 0x29c   :  { %v6455_v23 = vpop.f32.mrf.mxu1 }
 0x29d   :  { %1458 = vrot.lane.b32.xlu2 %v6455_v23, %s5889_s6 }
 0x2a4   :  { %v6459_v24 = vpop.f32.mrf.mxu1 }
 0x2a5   :  { %1460 = vrot.lane.b32.xlu0 %v6459_v24, %s5889_s6 }
 0x2aa   :  { %4975 = vmatmul.msk.bf16.gmra.mxu2 %vm9046_vm4, %v5122_v22 }
 0x2ac   :  { %v6464_v25 = vpop.f32.mrf.mxu1 }
 0x2ad   :  { %1462 = vrot.lane.b32.xlu1 %v6464_v25, %s5889_s6 }
 0x2b4   :  { %v6468_v26 = vpop.f32.mrf.mxu1 }
 0x2b5   :  { %1464 = vrot.lane.b32.xlu1 %v6468_v26, %s5889_s6 }
 0x2b9   :  { %5153 = vllmr.2.mxu2 }
 0x2ba   :  { %4976 = vmatmul.msk.bf16.gmra.mxu2 %vm9046_vm4, %v5123_v19 }
 0x2bc   :  { %v6473_v28 = vpop.f32.mrf.mxu1 }
 0x2bd   :  { %1466 = vrot.lane.b32.xlu2 %v6473_v28, %s5889_s6 }
 0x2c4   :  { %v6477_v29 = vpop.f32.mrf.mxu1 }
 0x2c5   :  { %1468 = vrot.lane.b32.xlu2 %v6477_v29, %s5889_s6 }
 0x2cc   :  { %v6483_v31 = vpop.f32.mrf.mxu1 }
 0x2cd   :  { %v6481_v30 = vpop.f32.mrf.mxu2  ;;  %1470 = vrot.lane.b32.xlu0 %v6483_v31, %s5889_s6 }
 0x2d5   :  { %v6487_v32 = vpop.f32.mrf.mxu2 }
 0x2dd   :  { %v989_v33 = vpop.f32.mrf.mxu2 }
 0x2de   :  { %1650 = vrot.lane.b32.xlu0 %v989_v33, %s5889_s6  ;;  %v1026_v45 = vadd.f32 %v989_v33, %v6405_v10 }
 0x2e0   :  { %v6499_v51 = vadd.f32 %v1061_v49, %v1026_v45 }
 0x2e2   :  { %v4979_v55 = vmul.f32 -1.442695, %v6499_v51 }
 0x2e4   :  { %5367 = vpow2.f32 %v4979_v55 }
 0x2e5   :  { %v6490_v36 = vpop.f32.mrf.mxu2 }
 0x2e6   :  { %v1027_v59 = vadd.f32 %v6490_v36, %v6413_v12 }
 0x2e8   :  { %v6506_v4 = vadd.f32 %v1063_v43, %v1027_v59 }
 0x2ea   :  { %v4980_v11 = vmul.f32 -1.442695, %v6506_v4  ;;  %v5368_v12 = vpop.eup %5367 }
 0x2eb   :  { %v6522_v33 = vadd.f32 1.0, %v5368_v12 }
 0x2ec   :  { %5369 = vpow2.f32 %v4980_v11 }
 0x2ed   :  { %v994_v37 = vpop.f32.mrf.mxu2  ;;  %v1225_v60 = vand.u32 2147483648, %v6522_v33  ;;  %vm1219_vm6 = vweird.f32 %v6522_v33 }
 0x2ee   :  { %1654 = vrot.lane.b32.xlu1 %v994_v37, %s5889_s6  ;;  %v1028_v6 = vadd.f32 %v994_v37, %v6417_v13 }
 0x2f0   :  { %v6517_v19 = vadd.f32 %v1065_v61, %v1028_v6 }
 0x2f2   :  { %9120 = vst [vmem:[#allocation45_spill] sm:$0xff] %v6517_v19 }
 0x2f5   :  { %v996_v41 = vpop.f32.mrf.mxu2 }
 0x2f6   :  { %1656 = vrot.lane.b32.xlu2 %v996_v41, %s5889_s6  ;;  %v1029_v1 = vadd.f32 %v996_v41, %v6425_v15  ;;  %v1069_v15 = vpop.permute.xlu0 %1068  ;;  %v4981_v41 = vmul.f32 -1.442695, %v6517_v19 }
 0x2f8   :  { %v6511_v7 = vadd.f32 %v1067_v57, %v1029_v1 }
 0x2fa   :  { %9118 = vst [vmem:[#allocation43_spill] sm:$0xff] %v6511_v7  ;;  %v4982_v21 = vmul.f32 -1.442695, %v6511_v7 }
 0x2fc   :  { %5371 = vpow2.f32 %v4982_v21 }
 0x2fd   :  { %v999_v53 = vpop.f32.mrf.mxu2  ;;  %5373 = vrcp.f32 %v6522_v33 }
 0x2fe   :  { %1658 = vrot.lane.b32.xlu0 %v999_v53, %s5889_s6  ;;  %v1030_v10 = vadd.f32 %v999_v53, %v6429_v16  ;;  %v1073_v16 = vpop.permute.xlu1 %1072  ;;  %v5370_v53 = vpop.eup %5369 }
 0x2ff   :  { %v6535_v61 = vadd.f32 1.0, %v5370_v53 }
 0x300   :  { %v6520_v22 = vadd.f32 %v1069_v15, %v1030_v10 }
 0x301   :  { %vm1234_vm14 = vweird.f32 %v6535_v61 }
 0x302   :  { %9121 = vst [vmem:[#allocation46_spill] sm:$0xff] %v6520_v22  ;;  %v4983_v45 = vmul.f32 -1.442695, %v6520_v22  ;;  %v5372_v59 = vpop.eup %5371 }
 0x303   :  { %v6541_v6 = vadd.f32 1.0, %v5372_v59 }
 0x305   :  { %v1001_v3 = vpop.f32.mrf.mxu2  ;;  %vm1264_vm1 = vweird.f32 %v6541_v6 }
 0x306   :  { %1660 = vrot.lane.b32.xlu1 %v1001_v3, %s5889_s6  ;;  %v1031_v5 = vadd.f32 %v1001_v3, %v6437_v18 }
 0x308   :  { %v6515_v17 = vadd.f32 %v1071_v63, %v1031_v5  ;;  %v6537_v63 = vpop.eup %5373 }
 0x309   :  { %vm1220_vm7 = vweird.f32 %v6537_v63 }
 0x30a   :  { %9119 = vst [vmem:[#allocation44_spill] sm:$0xff] %v6515_v17  ;;  %v4984_v37 = vmul.f32 -1.442695, %v6515_v17  ;;  %vm6632_vm8 = vmor %vm1219_vm6, %vm1220_vm7 }
 0x30c   :  { %5375 = vpow2.f32 %v4984_v37  ;;  %v1215_v37 = vmul.f32 %v6537_v63, %v6522_v33 }
 0x30d   :  { %v1004_v18 = vpop.f32.mrf.mxu2  ;;  %5377 = vpow2.f32 %v4981_v41 }
 0x30e   :  { %v1032_v13 = vadd.f32 %v1004_v18, %v6444_v20  ;;  %1662 = vrot.lane.b32.xlu2 %v1004_v18, %s5889_s6  ;;  %v1077_v20 = vpop.permute.xlu2 %1076  ;;  %5379 = vpow2.f32 %v4983_v45 }
 0x310   :  { %v6528_v43 = vadd.f32 %v1073_v16, %v1032_v13  ;;  %v6555_v16 = vpop.permute.xlu1 %1080 }
 0x312   :  { %9122 = vst [vmem:[#allocation47_spill] sm:$0xff] %v6528_v43  ;;  %v4985_v49 = vmul.f32 -1.442695, %v6528_v43  ;;  %v5376_v3 = vpop.eup %5375 }
 0x313   :  { %v5378_v5 = vpop.eup %5377  ;;  %v6545_v15 = vadd.f32 1.0, %v5376_v3 }
 0x314   :  { %5381 = vpow2.f32 %v4985_v49  ;;  %v5380_v11 = vpop.eup %5379  ;;  %v6549_v18 = vadd.f32 1.0, %v5378_v5 }
 0x315   :  { %v1006_v55 = vpop.f32.mrf.mxu2  ;;  %5383 = vrcp.f32 %v6535_v61  ;;  %v6552_v13 = vadd.f32 1.0, %v5380_v11  ;;  %vm1294_vm13 = vweird.f32 %v6545_v15 }
 0x316   :  { %v1033_v57 = vadd.f32 %v1006_v55, %v6455_v23  ;;  %1664 = vrot.lane.b32.xlu0 %v1006_v55, %s5889_s6  ;;  %v1079_v23 = vpop.permute.xlu0 %1078  ;;  %v6547_v21 = vpop.permute.xlu2 %1082  ;;  %v1216_v55 = vsub.f32 1.0, %v1215_v37 }
 0x317   :  { %vm1279_vm9 = vweird.f32 %v6552_v13 }
 0x318   :  { %v6539_v1 = vadd.f32 %v1075_v14, %v1033_v57  ;;  %v1217_v2 = vmul.f32 %v6537_v63, %v1216_v55  ;;  %v6618_v55 = vor.u32 1.1754944e-38, %v1225_v60 }
 0x31a   :  { %9123 = vst [vmem:[#allocation48_spill] sm:$0xff] %v6539_v1  ;;  %v4986_v10 = vmul.f32 -1.442695, %v6539_v1  ;;  %v5382_v12 = vpop.eup %5381  ;;  %v6611_v52 = vadd.f32 %v6537_v63, %v1217_v2 }
 0x31b   :  { %v6559_v41 = vadd.f32 1.0, %v5382_v12  ;;  %v6562_v45 = vpop.eup %5383 }
 0x31c   :  { %5385 = vpow2.f32 %v4986_v10  ;;  %v1230_v10 = vmul.f32 %v6562_v45, %v6535_v61  ;;  %vm1235_vm10 = vweird.f32 %v6562_v45 }
 0x31d   :  { %v1009_v14 = vpop.f32.mrf.mxu2  ;;  %5387 = vrcp.f32 %v6541_v6  ;;  %vm1309_vm5 = vweird.f32 %v6559_v41 }
 0x31e   :  { %1666 = vrot.lane.b32.xlu1 %v1009_v14, %s5889_s6  ;;  %5389 = vrcp.f32 %v6545_v15  ;;  %v1034_v53 = vadd.f32 %v1009_v14, %v6459_v24  ;;  %v6572_v3 = vpop.permute.xlu0 %1084  ;;  %v6574_v5 = vpop.permute.xlu2 %1440 }
 0x31f   :  { %5391 = vrcp.f32 %v6549_v18  ;;  %9124 = vst [vmem:[#allocation49_spill] sm:$0xff] %v6574_v5 }
 0x320   :  { %5393 = vrcp.f32 %v6552_v13  ;;  %v6581_v24 = vadd.f32 %v1077_v20, %v1034_v53  ;;  %v1240_v53 = vand.u32 2147483648, %v6535_v61 }
 0x321   :  { %5395 = vrcp.f32 %v6559_v41 }
 0x322   :  { %v5386_v49 = vpop.eup %5385  ;;  %9125 = vst [vmem:[#allocation50_spill] sm:$0xff] %v6581_v24  ;;  %v4987_v54 = vmul.f32 -1.442695, %v6581_v24 }
 0x323   :  { %v6568_v57 = vadd.f32 1.0, %v5386_v49  ;;  %v6570_v59 = vpop.eup %5387  ;;  %v6587_v49 = vpop.permute.xlu1 %1086 }
 0x324   :  { %v6579_v12 = vpop.eup %5389  ;;  %v1260_v0 = vmul.f32 %v6570_v59, %v6541_v6  ;;  %vm1265_vm11 = vweird.f32 %v6570_v59 }
 0x325   :  { %5397 = vrcp.f32 %v6568_v57  ;;  %v1011_v11 = vpop.f32.mrf.mxu2  ;;  %v6585_v37 = vpop.eup %5391  ;;  %vm1295_vm15 = vweird.f32 %v6579_v12  ;;  %v1330_v17 = vand.u32 2147483648, %v6568_v57  ;;  %vm1324_vm7 = vweird.f32 %v6568_v57 }
 0x326   :  { %v1035_v14 = vadd.f32 %v1011_v11, %v6464_v25  ;;  %1668 = vrot.lane.b32.xlu2 %v1011_v11, %s5889_s6  ;;  %v6592_v62 = vpop.eup %5393  ;;  %v1231_v25 = vsub.f32 1.0, %v1230_v10  ;;  %v1290_v11 = vmul.f32 %v6579_v12, %v6545_v15  ;;  %v1245_v56 = vmul.f32 %v6585_v37, %v6549_v18  ;;  %v6616_v48 = vpop.permute.xlu0 %1442  ;;  %vm6705_vm6 = vmor %vm1294_vm13, %vm1295_vm15 }
 0x327   :  { %v6597_v20 = vpop.eup %5395  ;;  %v1261_v10 = vsub.f32 1.0, %v1260_v0  ;;  %v1275_v50 = vmul.f32 %v6592_v62, %v6552_v13  ;;  %9127 = vst [vmem:[#allocation52_spill] sm:$0xff] %v6616_v48  ;;  %v6625_v2 = vpop.permute.xlu2 %1446  ;;  %v6628_v0 = vor.u32 1.1754944e-38, %v1240_v53  ;;  %vm1280_vm12 = vweird.f32 %v6592_v62 }
 0x328   :  { %v6595_v58 = vadd.f32 %v1079_v23, %v1035_v14  ;;  %v1305_v44 = vmul.f32 %v6597_v20, %v6559_v41  ;;  %v1232_v40 = vmul.f32 %v6562_v45, %v1231_v25  ;;  %v1291_v38 = vsub.f32 1.0, %v1290_v11  ;;  %vm6738_vm0 = vmor %vm1279_vm9, %vm1280_vm12 }
 0x329   :  { %v1246_v46 = vsub.f32 1.0, %v1245_v56  ;;  %v1276_v27 = vsub.f32 1.0, %v1275_v50  ;;  %v1300_v56 = vand.u32 2147483648, %v6545_v15  ;;  %vm1310_vm3 = vweird.f32 %v6597_v20 }
 0x32a   :  { %9126 = vst [vmem:[#allocation51_spill] sm:$0xff] %v6595_v58  ;;  %v4988_v23 = vmul.f32 -1.442695, %v6595_v58  ;;  %vm6755_vm9 = vmor %vm1309_vm5, %vm1310_vm3  ;;  %v1331_v48 = vor.u32 1.1754944e-38, %v1330_v17 }
 0x32b   :  { %v6608_v14 = vpop.eup %5397  ;;  %v6640_v53 = vpop.permute.xlu1 %1444  ;;  %v6660_v50 = vmul.f32 %v6585_v37, %v1246_v46  ;;  %v1301_v22 = vor.u32 1.1754944e-38, %v1300_v56 }
 0x32c   :  { %v1320_v42 = vmul.f32 %v6608_v14, %v6568_v57  ;;  %5399 = vpow2.f32 %v4988_v23  ;;  %v1262_v23 = vmul.f32 %v6570_v59, %v1261_v10  ;;  %v1292_v10 = vmul.f32 %v6579_v12, %v1291_v38 }
 0x32d   :  { %v1014_v34 = vpop.f32.mrf.mxu2  ;;  %5401 = vpow2.f32 %v4987_v54  ;;  %v1285_v54 = vand.u32 2147483648, %v6552_v13  ;;  %vm1325_vm2 = vweird.f32 %v6608_v14 }
 0x32e   :  { %v1036_v35 = vadd.f32 %v1014_v34, %v6468_v26  ;;  %1646 = vrot.lane.b32.xlu2 %v6481_v30, %s5889_s6  ;;  %1670 = vrot.lane.b32.xlu0 %v1014_v34, %s5889_s6  ;;  %v1321_v25 = vsub.f32 1.0, %v1320_v42  ;;  %v1306_v34 = vsub.f32 1.0, %v1305_v44  ;;  %v6654_v42 = vadd.f32 %v6562_v45, %v1232_v40  ;;  %v6673_v1 = vpop.permute.xlu0 %1448  ;;  %vm6724_vm13 = vmor %vm1324_vm7, %vm1325_vm2 }
 0x32f   :  { %v6667_v40 = vadd.f32 %v6570_v59, %v1262_v23  ;;  %v1277_v44 = vmul.f32 %v6592_v62, %v1276_v27  ;;  %v6671_v38 = vor.u32 1.1754944e-38, %v1285_v54  ;;  %v6680_v23 = vpop.permute.xlu2 %1452  ;;  %v1293_v27 = vadd.f32 %v6579_v12, %v1292_v10 }
 0x330   :  { %v6651_v58 = vadd.f32 %v6555_v16, %v1036_v35  ;;  %v1322_v35 = vmul.f32 %v6608_v14, %v1321_v25  ;;  %v1307_v25 = vmul.f32 %v6597_v20, %v1306_v34  ;;  %v1298_v54 = vand.u32 2147483647, %v6545_v15 }
 0x331   :  { %v1278_v43 = vadd.f32 %v6592_v62, %v1277_v44  ;;  %v1313_v15 = vand.u32 2147483647, %v6559_v41 }
 0x332   :  { %9130 = vst [vmem:[#allocation53_spill] sm:$0xff] %v6651_v58  ;;  %v4989_v26 = vmul.f32 -1.442695, %v6651_v58  ;;  %v5400_v16 = vpop.eup %5399  ;;  %v1323_v58 = vadd.f32 %v6608_v14, %v1322_v35  ;;  %vm6715_vm4 = vcmp.eq.f32.partialorder %v1298_v54, 8.507059e+37 }
 0x333   :  { %v5402_v46 = vpop.eup %5401  ;;  %v6694_v10 = vpop.permute.xlu1 %1450  ;;  %vm1314_vm2 = vcmp.eq.f32.partialorder %v1313_v15, 8.507059e+37  ;;  %v9160_v15 = vand.u32 2147483648, %v6541_v6 }
 0x334   :  { %5403 = vpow2.f32 %v4989_v26  ;;  %v6688_v26 = vadd.f32 1.0, %v5400_v16  ;;  %v6696_v24 = vadd.f32 1.0, %v5402_v46  ;;  %v1328_v16 = vand.u32 2147483647, %v6568_v57 }
 0x335   :  { %v1016_v11 = vpop.f32.mrf.mxu2  ;;  %v1315_v46 = vand.u32 2147483648, %v6559_v41  ;;  %v1297_v41 = vsel %vm6705_vm6, %v6579_v12, %v1293_v27  ;;  %v9144_v12 = vand.u32 2147483647, %v6522_v33  ;;  %v9161_v57 = vsel %vm6632_vm8, %v6537_v63, %v6611_v52 }
 0x336   :  { %v1037_v34 = vadd.f32 %v1016_v11, %v6473_v28  ;;  %1672 = vrot.lane.b32.xlu1 %v1016_v11, %s5889_s6  ;;  %v1308_v11 = vadd.f32 %v6597_v20, %v1307_v25  ;;  %5405 = vrcp.f32 %v6688_v26  ;;  %vm1329_vm5 = vcmp.eq.f32.partialorder %v1328_v16, 8.507059e+37 }
 0x337   :  { %5407 = vrcp.f32 %v6696_v24  ;;  %vm6761_vm12 = vcmp.eq.f32.partialorder %v9144_v12, 8.507059e+37  ;;  %v6773_v17 = vsel %vm6715_vm4, %v1301_v22, %v1297_v41  ;;  %v1316_v33 = vor.u32 1.1754944e-38, %v1315_v46  ;;  %v1459_v28 = vpop.permute.xlu2 %1458 }
 0x338   :  { %v6711_v35 = vadd.f32 %v6547_v21, %v1037_v34  ;;  %v9137_v34 = vand.u32 2147483647, %v6535_v61  ;;  %v1312_v56 = vsel %vm6755_vm9, %v6597_v20, %v1308_v11  ;;  %v9149_v22 = vand.u32 2147483647, %v6552_v13 }
 0x339   :  { %v6810_v13 = vsel %vm1314_vm2, %v1316_v33, %v1312_v56  ;;  %v9155_v16 = vand.u32 2147483647, %v6549_v18  ;;  %v1271_v46 = vor.u32 1.1754944e-38, %v9160_v15  ;;  %vm1339_vm8 = vweird.f32 %v6696_v24 }
 0x33a   :  { %v5404_v21 = vpop.eup %5403  ;;  %vm6730_vm15 = vcmp.eq.f32.partialorder %v9137_v34, 8.507059e+37  ;;  %v4990_v19 = vmul.f32 -1.442695, %v6711_v35  ;;  %v1327_v34 = vsel %vm6724_vm13, %v6608_v14, %v1323_v58  ;;  %v1282_v58 = vsel %vm6738_vm0, %v6592_v62, %v1278_v43  ;;  %v1455_v14 = vpop.permute.xlu0 %1454  ;;  %vm6782_vm0 = vmor %vm1234_vm14, %vm1235_vm10 }
 0x33b   :  { %v6751_v7 = vadd.f32 1.0, %v5404_v21  ;;  %v6776_v25 = vsel %vm1329_vm5, %v1331_v48, %v1327_v34  ;;  %vm1284_vm4 = vcmp.eq.f32.partialorder %v9149_v22, 8.507059e+37  ;;  %v1237_v48 = vsel %vm6782_vm0, %v6562_v45, %v6654_v42  ;;  %vm6803_vm14 = vmor %vm1264_vm1, %vm1265_vm11 }
 0x33c   :  { %5409 = vpow2.f32 %v4990_v19  ;;  %v1248_v19 = vadd.f32 %v6585_v37, %v6660_v50  ;;  %vm1249_vm10 = vweird.f32 %v6549_v18  ;;  %v6812_v5 = vpop.eup %5405  ;;  %v1267_v45 = vsel %vm6803_vm14, %v6570_v59, %v6667_v40 }
 0x33d   :  { %5411 = vrcp.f32 %v6751_v7  ;;  %v1019_v21 = vpop.f32.mrf.mxu2  ;;  %v1495_v20 = vmul.f32 %v1455_v14, %v6773_v17  ;;  %v1497_v42 = vmul.f32 %v1459_v28, %v6776_v25  ;;  %v6823_v11 = vpop.eup %5407  ;;  %vm9152_vm11 = vweird.f32 %v6585_v37 }
 0x33e   :  { %v1038_v43 = vadd.f32 %v1019_v21, %v6477_v29  ;;  %1652 = vrot.lane.b32.xlu1 %v6490_v36, %s5889_s6  ;;  %1674 = vrot.lane.b32.xlu2 %v1019_v21, %s5889_s6  ;;  %v6808_v29 = vsel %vm1284_vm4, %v6671_v38, %v1282_v58  ;;  %v1457_v36 = vpop.permute.xlu1 %1456  ;;  %vm6827_vm1 = vmor %vm1249_vm10, %vm9152_vm11  ;;  %vm6833_vm3 = vcmp.eq.f32.partialorder %v9155_v16, 8.507059e+37  ;;  %v9158_v59 = vand.u32 2147483648, %v6549_v18 }
 0x33f   :  { %v1252_v41 = vsel %vm6827_vm1, %v6585_v37, %v1248_v19  ;;  %v1494_v34 = vmul.f32 %v6680_v23, %v6808_v29  ;;  %v1496_v12 = vmul.f32 %v1457_v36, %v6810_v13  ;;  %v6855_v14 = vsel %vm6730_vm15, %v6628_v0, %v1237_v48 }
 0x340   :  { %v6821_v50 = vadd.f32 %v6572_v3, %v1038_v43  ;;  %v1256_v40 = vor.u32 1.1754944e-38, %v9158_v59  ;;  %v9159_v3 = vand.u32 2147483647, %v6541_v6  ;;  %v1350_v37 = vmul.f32 %v6812_v5, %v6688_v26 }
 0x341   :  { %v5195_v33 = vpack.i.bf16 %v1495_v20, %v1494_v34  ;;  %v5190_v23 = vpack.i.bf16 %v1497_v42, %v1496_v12  ;;  %v6873_v0 = vsel %vm6761_vm12, %v6618_v55, %v9161_v57  ;;  %v1335_v62 = vmul.f32 %v6823_v11, %v6696_v24 }
 0x342   :  { %vm1269_vm6 = vcmp.eq.f32.partialorder %v9159_v3, 8.507059e+37  ;;  %v5410_v54 = vpop.eup %5409  ;;  %v4991_v58 = vmul.f32 -1.442695, %v6821_v50  ;;  %v6877_v21 = vsel %vm6833_vm3, %v1256_v40, %v1252_v41  ;;  %v1491_v60 = vmul.f32 %v6625_v2, %v6855_v14 }
 0x343   :  { %v6850_v18 = vpop.eup %5411  ;;  %v6857_v6 = vsel %vm1269_vm6, %v1271_v46, %v1267_v45  ;;  %v6859_v56 = vadd.f32 1.0, %v5410_v54  ;;  %v1351_v27 = vsub.f32 1.0, %v1350_v37  ;;  %v1490_v22 = vmul.f32 %v6640_v53, %v6873_v0 }
 0x344   :  { %5413 = vpow2.f32 %v4991_v58  ;;  %v1365_v28 = vmul.f32 %v6850_v18, %v6751_v7  ;;  %v6886_v52 = vmul.f32 %v6694_v10, %v6857_v6  ;;  %v6896_v2 = vmul.f32 %v6673_v1, %v6877_v21 }
 0x345   :  { %5415 = vrcp.f32 %v6859_v56  ;;  %v1021_v19 = vpop.f32.mrf.mxu2  ;;  %v1336_v43 = vsub.f32 1.0, %v1335_v62  ;;  %v5205_v36 = vpack.i.bf16 %v1491_v60, %v1490_v22  ;;  %v1343_v1 = vand.u32 2147483647, %v6696_v24 }
 0x346   :  { %v1039_v63 = vadd.f32 %v1021_v19, %v6483_v31  ;;  %5196 = vrot.lane.b32.xlu1 %v5195_v33, %s5895_s5  ;;  %5191 = vrot.lane.b32.xlu2 %v5190_v23, %s5895_s5  ;;  %v1366_v55 = vsub.f32 1.0, %v1365_v28  ;;  %v6902_v48 = vpop.permute.xlu1 %1462  ;;  %v5200_v45 = vpack.i.bf16 %v6886_v52, %v6896_v2  ;;  %vm1370_vm7 = vweird.f32 %v6850_v18 }
 0x347   :  { %1676 = vrot.lane.b32.xlu0 %v1021_v19, %s5889_s6  ;;  %v1337_v44 = vmul.f32 %v6823_v11, %v1336_v43  ;;  %v1345_v59 = vand.u32 2147483648, %v6696_v24  ;;  %v1375_v40 = vand.u32 2147483648, %v6751_v7  ;;  %vm1340_vm13 = vweird.f32 %v6823_v11 }
 0x348   :  { %v6899_v10 = vadd.f32 %v6587_v49, %v1039_v63  ;;  %v1367_v31 = vmul.f32 %v6850_v18, %v1366_v55  ;;  %v1352_v49 = vmul.f32 %v6812_v5, %v1351_v27  ;;  %vm1369_vm15 = vweird.f32 %v6751_v7  ;;  %vm6956_vm11 = vmor %vm1339_vm8, %vm1340_vm13 }
 0x349   :  { %v1373_v15 = vand.u32 2147483647, %v6751_v7  ;;  %v1390_v46 = vand.u32 2147483648, %v6859_v56  ;;  %vm1355_vm9 = vweird.f32 %v6812_v5  ;;  %v1360_v41 = vand.u32 2147483648, %v6688_v26  ;;  %vm6927_vm12 = vmor %vm1369_vm15, %vm1370_vm7 }
 0x34a   :  { %v5414_v61 = vpop.eup %5413  ;;  %v4992_v20 = vmul.f32 -1.442695, %v6899_v10  ;;  %v1368_v16 = vadd.f32 %v6850_v18, %v1367_v31  ;;  %v1353_v54 = vadd.f32 %v6812_v5, %v1352_v49  ;;  %v1388_v7 = vand.u32 2147483647, %v6859_v56  ;;  %v1467_v31 = vpop.permute.xlu2 %1466 }
 0x34b   :  { %v5416_v53 = vpop.eup %5415  ;;  %v6907_v42 = vadd.f32 1.0, %v5414_v61  ;;  %v1338_v37 = vadd.f32 %v6823_v11, %v1337_v44  ;;  %vm1354_vm0 = vweird.f32 %v6688_v26  ;;  %v1358_v33 = vand.u32 2147483647, %v6688_v26 }
 0x34c   :  { %v1380_v38 = vmul.f32 %v5416_v53, %v6859_v56  ;;  %5417 = vpow2.f32 %v4992_v20  ;;  %vm1385_vm5 = vweird.f32 %v5416_v53  ;;  %v1372_v58 = vsel %vm6927_vm12, %v6850_v18, %v1368_v16  ;;  %vm6943_vm2 = vmor %vm1354_vm0, %vm1355_vm9 }
 0x34d   :  { %5419 = vrcp.f32 %v6907_v42  ;;  %v1376_v23 = vor.u32 1.1754944e-38, %v1375_v40  ;;  %v1346_v57 = vor.u32 1.1754944e-38, %v1345_v59  ;;  %vm1384_vm4 = vweird.f32 %v6859_v56 }
 0x34e   :  { %v1381_v3 = vsub.f32 1.0, %v1380_v38  ;;  %5206 = vrot.lane.b32.xlu2 %v5205_v36, %s5895_s5  ;;  %vm1374_vm10 = vcmp.eq.f32.partialorder %v1373_v15, 8.507059e+37  ;;  %vm1386_vm14 = vmor %vm1384_vm4, %vm1385_vm5  ;;  %v1391_v60 = vor.u32 1.1754944e-38, %v1390_v46  ;;  %v1357_v26 = vsel %vm6943_vm2, %v6812_v5, %v1353_v54  ;;  %v1465_v63 = vpop.permute.xlu1 %1464 }
 0x34f   :  { %1648 = vrot.lane.b32.xlu0 %v6487_v32, %s5889_s6  ;;  %v6950_v55 = vsel %vm1374_vm10, %v1376_v23, %v1372_v58  ;;  %vm1389_vm1 = vcmp.eq.f32.partialorder %v1388_v7, 8.507059e+37  ;;  %v1361_v22 = vor.u32 1.1754944e-38, %v1360_v41  ;;  %v1342_v5 = vsel %vm6956_vm11, %v6823_v11, %v1338_v37 }
 0x350   :  { %v1382_v12 = vmul.f32 %v5416_v53, %v1381_v3  ;;  %vm1359_vm3 = vcmp.eq.f32.partialorder %v1358_v33, 8.507059e+37  ;;  %v1500_v20 = vmul.f32 %v1465_v63, %v6950_v55  ;;  %vm1344_vm6 = vcmp.eq.f32.partialorder %v1343_v1, 8.507059e+37 }
 0x351   :  { %v6967_v61 = vsel %vm1359_vm3, %v1361_v22, %v1357_v26  ;;  %v6971_v49 = vsel %vm1344_vm6, %v1346_v57, %v1342_v5  ;;  %v1405_v1 = vand.u32 2147483648, %v6907_v42  ;;  %vm1399_vm7 = vweird.f32 %v6907_v42 }
 0x352   :  { %v5418_v28 = vpop.eup %5417  ;;  %v1383_v62 = vadd.f32 %v5416_v53, %v1382_v12  ;;  %v1499_v16 = vmul.f32 %v6902_v48, %v6967_v61  ;;  %v1025_v5 = vadd.f32 %v6487_v32, %v6401_v9 }
 0x353   :  { %v5420_v18 = vpop.eup %5419  ;;  %v1183_v52 = vadd.f32 1.0, %v5418_v28  ;;  %v1406_v12 = vor.u32 1.1754944e-38, %v1405_v1 }
 0x354   :  { %v1387_v27 = vsel %vm1386_vm14, %v5416_v53, %v1383_v62  ;;  %v1395_v2 = vmul.f32 %v5420_v18, %v6907_v42  ;;  %v1461_v53 = vpop.permute.xlu0 %1460  ;;  %vm1400_vm8 = vweird.f32 %v5420_v18 }
 0x355   :  { %v6964_v43 = vsel %vm1389_vm1, %v1391_v60, %v1387_v27  ;;  %5421 = vrcp.f32 %v1183_v52  ;;  %v1498_v59 = vmul.f32 %v1461_v53, %v6971_v49  ;;  %vm1401_vm13 = vmor %vm1399_vm7, %vm1400_vm8  ;;  %v1420_v54 = vand.u32 2147483648, %v1183_v52 }
 0x356   :  { %v1501_v24 = vmul.f32 %v1467_v31, %v6964_v43  ;;  %v1396_v36 = vsub.f32 1.0, %v1395_v2  ;;  %v1418_v34 = vand.u32 2147483647, %v1183_v52  ;;  %vm1414_vm12 = vweird.f32 %v1183_v52 }
 0x357   :  { %5201 = vrot.lane.b32.xlu0 %v5200_v45, %s5895_s5  ;;  %v5210_v15 = vpack.i.bf16 %v1499_v16, %v1498_v59  ;;  %v1403_v45 = vand.u32 2147483647, %v6907_v42  ;;  %v1421_v37 = vor.u32 1.1754944e-38, %v1420_v54  ;;  %v1469_v42 = vpop.permute.xlu2 %1468  ;;  %vm9174_vm8 = vcmask 261120  }
 0x358   :  { %v1397_v38 = vmul.f32 %v5420_v18, %v1396_v36  ;;  %v5215_v11 = vpack.i.bf16 %v1501_v24, %v1500_v20  ;;  %vm1419_vm0 = vcmp.eq.f32.partialorder %v1418_v34, 8.507059e+37  ;;  %v1024_v20 = vadd.f32 %v6481_v30, %v6393_v8  ;;  %vm9175_vm7 = vmmov %vm9174_vm8 }
 0x359   :  { %vm1404_vm9 = vcmp.eq.f32.partialorder %v1403_v45, 8.507059e+37 }
 0x35a   :  { %5216 = vrot.lane.b32.xlu2 %v5215_v11, %s5895_s5  ;;  %v1398_v40 = vadd.f32 %v5420_v18, %v1397_v38  ;;  %v6998_v38 = vadd.f32 %v6493_v39, %v1025_v5  ;;  %v7002_v11 = vadd.f32 %v6497_v47, %v1024_v20 }
 0x35b   :  { %v5422_v44 = vpop.eup %5421 }
 0x35c   :  { %v1410_v3 = vmul.f32 %v5422_v44, %v1183_v52  ;;  %v1402_v48 = vsel %vm1401_vm13, %v5420_v18, %v1398_v40  ;;  %vm1415_vm15 = vweird.f32 %v5422_v44  ;;  %v1471_v33 = vpop.permute.xlu0 %1470  ;;  %v4978_v9 = vmul.f32 -1.442695, %v6998_v38  ;;  %vm9176_vm13 = vmmov %vm9175_vm7 }
 0x35d   :  { %v6981_v58 = vsel %vm1404_vm9, %v1406_v12, %v1402_v48  ;;  %vm1416_vm5 = vmor %vm1414_vm12, %vm1415_vm15  ;;  %v4977_v40 = vmul.f32 -1.442695, %v7002_v11 }
 0x35e   :  { %v1411_v46 = vsub.f32 1.0, %v1410_v3  ;;  %v1502_v57 = vmul.f32 %v1469_v42, %v6981_v58  ;;  %5423 = vpow2.f32 %v4978_v9  ;;  %vm9177_vm15 = vmmov %vm9175_vm7 }
 0x35f   :  { %5211 = vrot.lane.b32.xlu0 %v5210_v15, %s5895_s5  ;;  %v1657_v22 = vpop.permute.xlu2 %1656  ;;  %5425 = vpow2.f32 %v4977_v40  ;;  %vm9178_vm9 = vmmov %vm9175_vm7 }
 0x360   :  { %v1412_v41 = vmul.f32 %v5422_v44, %v1411_v46  ;;  %v1655_v60 = vpop.permute.xlu1 %1654  ;;  %v1699_v39 = vmul.f32 %v1657_v22, %v6857_v6  ;;  %vm9179_vm12 = vmmov %vm9175_vm7 }
 0x361   :  { %v1698_v30 = vmul.f32 %v1655_v60, %v6877_v21 }
 0x362   :  { %v1413_v7 = vadd.f32 %v5422_v44, %v1412_v41 }
 0x363   :  { %v5255_v3 = vpack.i.bf16 %v1699_v39, %v1698_v30  ;;  %v9169_v39 = vld [vmem:[#allocation49_spill] sm:$0xff] }
 0x364   :  { %v1417_v23 = vsel %vm1416_vm5, %v5422_v44, %v1413_v7  ;;  %v1651_v18 = vpop.permute.xlu0 %1650  ;;  %v5424_v47 = vpop.eup %5423  ;;  %vm9180_vm5 = vmmov %vm9175_vm7 }
 0x365   :  { %v6983_v28 = vsel %vm1419_vm0, %v1421_v37, %v1417_v23  ;;  %v5426_v15 = vpop.eup %5425  ;;  %v1169_v1 = vadd.f32 1.0, %v5424_v47  ;;  %vm9181_vm0 = vmmov %vm9180_vm5 }
 0x366   :  { %v1503_v62 = vmul.f32 %v1471_v33, %v6983_v28  ;;  %v1168_v45 = vadd.f32 1.0, %v5426_v15 }
 0x367   :  { %5427 = vrcp.f32 %v1169_v1  ;;  %vm1204_vm10 = vweird.f32 %v1169_v1  ;;  %v1208_v5 = vand.u32 2147483647, %v1169_v1 }
 0x368   :  { %v5220_v19 = vpack.i.bf16 %v1503_v62, %v1502_v57  ;;  %v1663_v2 = vpop.permute.xlu2 %1662  ;;  %5429 = vrcp.f32 %v1168_v45  ;;  %vm1189_vm14 = vweird.f32 %v1168_v45 }
 0x369   :  { %v1702_v24 = vmul.f32 %v1663_v2, %v6810_v13  ;;  %vm1209_vm3 = vcmp.eq.f32.partialorder %v1208_v5, 8.507059e+37 }
 0x36a   :  { %5221 = vrot.lane.b32.xlu1 %v5220_v19, %s5895_s5  ;;  %v1696_v19 = vmul.f32 %v1651_v18, %v6873_v0  ;;  %v1195_v18 = vand.u32 2147483648, %v1168_v45 }
 0x36d   :  { %v5428_v54 = vpop.eup %5427 }
 0x36e   :  { %v5430_v41 = vpop.eup %5429  ;;  %v1200_v7 = vmul.f32 %v5428_v54, %v1169_v1  ;;  %vm1205_vm4 = vweird.f32 %v5428_v54 }
 0x36f   :  { %v1185_v33 = vmul.f32 %v5430_v41, %v1168_v45  ;;  %vm1190_vm2 = vweird.f32 %v5430_v41  ;;  %vm1206_vm11 = vmor %vm1204_vm10, %vm1205_vm4 }
 0x370   :  { %v1659_v52 = vpop.permute.xlu0 %1658  ;;  %v1201_v23 = vsub.f32 1.0, %v1200_v7  ;;  %vm1191_vm1 = vmor %vm1189_vm14, %vm1190_vm2 }
 0x371   :  { %v1700_v63 = vmul.f32 %v1659_v52, %v6808_v29  ;;  %v1186_v57 = vsub.f32 1.0, %v1185_v33  ;;  %vm9182_vm4 = vmmov %vm9181_vm0 }
 0x372   :  { %v1202_v52 = vmul.f32 %v5428_v54, %v1201_v23  ;;  %vm9183_vm2 = vmmov %vm9181_vm0 }
 0x373   :  { %vm9184_vm10 = vmmov %vm9181_vm0 }
 0x374   :  { %vm9185_vm14 = vmmov %vm9181_vm0 }
 0x378   :  { %v1661_v26 = vpop.permute.xlu1 %1660 }
 0x379   :  { %v1701_v56 = vmul.f32 %v1661_v26, %v6773_v17 }
 0x37b   :  { %v5225_v27 = vpack.i.bf16 %v1701_v56, %v1700_v63  ;;  %v1187_v63 = vmul.f32 %v5430_v41, %v1186_v57  ;;  %v1203_v56 = vadd.f32 %v5428_v54, %v1202_v52 }
 0x37d   :  { %5226 = vrot.lane.b32.xlu0 %v5225_v27, %s5895_s5  ;;  %v1210_v27 = vand.u32 2147483648, %v1169_v1  ;;  %v1188_v2 = vadd.f32 %v5430_v41, %v1187_v63  ;;  %v9170_v1 = vld [vmem:[#allocation43_spill] sm:$0xff] }
 0x37f   :  { %v1192_v9 = vsel %vm1191_vm1, %v5430_v41, %v1188_v2  ;;  %v9171_v41 = vld [vmem:[#allocation46_spill] sm:$0xff]  ;;  %vm9187_vm1 = vmmov %vm9181_vm0 }
 0x380   :  { %v1669_v16 = vpop.permute.xlu2 %1668 }
 0x381   :  { %v1705_v44 = vmul.f32 %v1669_v16, %v6967_v61  ;;  %v1211_v16 = vor.u32 1.1754944e-38, %v1210_v27 }
 0x388   :  { %v1665_v31 = vpop.permute.xlu0 %1664  ;;  %v1647_v42 = vpop.permute.xlu2 %1646 }
 0x389   :  { %v1703_v36 = vmul.f32 %v1665_v31, %v6776_v25 }
 0x38b   :  { %v5230_v53 = vpack.i.bf16 %v1703_v36, %v1702_v24  ;;  %v1193_v24 = vand.u32 2147483647, %v1168_v45  ;;  %v1207_v36 = vsel %vm1206_vm11, %v5428_v54, %v1203_v56  ;;  %vm9186_vm11 = vmmov %vm9181_vm0 }
 0x38d   :  { %5231 = vrot.lane.b32.xlu1 %v5230_v53, %s5895_s5  ;;  %vm1194_vm6 = vcmp.eq.f32.partialorder %v1193_v24, 8.507059e+37 }
 0x390   :  { %v1667_v32 = vpop.permute.xlu1 %1666 }
 0x391   :  { %v1704_v59 = vmul.f32 %v1667_v32, %v6971_v49 }
 0x393   :  { %v5235_v8 = vpack.i.bf16 %v1705_v44, %v1704_v59  ;;  %v1196_v44 = vor.u32 1.1754944e-38, %v1195_v18  ;;  %v7026_v59 = vsel %vm1209_vm3, %v1211_v16, %v1207_v36  ;;  %vm9188_vm3 = vmmov %vm9181_vm0 }
 0x395   :  { %5236 = vrot.lane.b32.xlu2 %v5235_v8, %s5895_s5  ;;  %v7031_v40 = vsel %vm1194_vm6, %v1196_v44, %v1192_v9  ;;  %v9168_v8 = vld [vmem:[#allocation52_spill] sm:$0xff]  ;;  %vm9189_vm6 = vmmov %vm9181_vm0 }
 0x396   :  { %v1489_v30 = vmul.f32 %v9168_v8, %v7026_v59  ;;  %v1488_v47 = vmul.f32 %v9169_v39, %v7031_v40  ;;  %v1694_v54 = vmul.f32 %v1647_v42, %v7031_v40  ;;  %v9173_v42 = vld [vmem:[#allocation44_spill] sm:$0xff] }
 0x398   :  { %v1675_v22 = vpop.permute.xlu2 %1674 }
 0x399   :  { %v1708_v20 = vmul.f32 %v1675_v22, %v6981_v58 }
 0x39d   :  { %5256 = vrot.lane.b32.xlu2 %v5255_v3, %s5895_s5  ;;  %v5250_v3 = vpack.i.bf16 %v1489_v30, %v1488_v47 }
 0x3a0   :  { %v1671_v46 = vpop.permute.xlu0 %1670  ;;  %v5192_v45 = vpop.permute.xlu2 %5191 }
 0x3a1   :  { %v1706_v34 = vmul.f32 %v1671_v46, %v6950_v55  ;;  %v5193_v24 = vunpack.i.l.bf16 %v5192_v45 }
 0x3a5   :  { %2005 = vrot.lane.b32.xlu2 %v7002_v11, %s5895_s5 }
 0x3a8   :  { %v1673_v48 = vpop.permute.xlu1 %1672 }
 0x3a9   :  { %v1707_v12 = vmul.f32 %v1673_v48, %v6964_v43 }
 0x3ab   :  { %v5240_v37 = vpack.i.bf16 %v1707_v12, %v1706_v34  ;;  %v5207_v34 = vpop.permute.xlu2 %5206 }
 0x3ad   :  { %2007 = vrot.lane.b32.xlu2 %v6998_v38, %s5895_s5  ;;  %5241 = vrot.lane.b32.xlu0 %v5240_v37, %s5895_s5  ;;  %v9172_v37 = vld [vmem:[#allocation45_spill] sm:$0xff] }
 0x3b0   :  { %v1653_v62 = vpop.permute.xlu1 %1652 }
 0x3b1   :  { %v1697_v60 = vmul.f32 %v1653_v62, %v6855_v14 }
 0x3b3   :  { %v5260_v26 = vpack.i.bf16 %v1697_v60, %v1696_v19 }
 0x3b4   :  { %v5217_v33 = vpop.permute.xlu2 %5216 }
 0x3b5   :  { %2009 = vrot.lane.b32.xlu2 %v6499_v51, %s5895_s5  ;;  %5261 = vrot.lane.b32.xlu0 %v5260_v26, %s5895_s5  ;;  %v5219_v57 = vunpack.i.h.bf16 %v5217_v33  ;;  %v5218_v62 = vunpack.i.l.bf16 %v5217_v33 }
 0x3b7   :  { %v1580_v2 = vsel %vm9176_vm13, %v5218_v62, %v6950_v55  ;;  %v1581_v5 = vsel %vm9177_vm15, %v5219_v57, %v6964_v43  ;;  %vm9196_vm13 = vmmov %vm9181_vm0 }
 0x3b8   :  { %v5197_v12 = vpop.permute.xlu1 %5196  ;;  %v1590_v18 = vpack.c.bf16 %v1581_v5, %v1580_v2  ;;  %v9192_v2 = vld [vmem:[#allocation50_spill] sm:$0xff]  ;;  %vm9197_vm15 = vmmov %vm9181_vm0 }
 0x3b9   :  { %v1677_v31 = vpop.permute.xlu0 %1676  ;;  %v5199_v16 = vunpack.i.h.bf16 %v5197_v12  ;;  %v5198_v9 = vunpack.i.l.bf16 %v5197_v12 }
 0x3ba   :  { %v1709_v53 = vmul.f32 %v1677_v31, %v6983_v28  ;;  %v5194_v31 = vunpack.i.h.bf16 %v5192_v45 }
 0x3bb   :  { %v1574_v47 = vsel %vm9182_vm4, %v5198_v9, %v6808_v29  ;;  %vm9201_vm4 = vmmov %vm9181_vm0 }
 0x3bc   :  { %v5245_v32 = vpack.i.bf16 %v1709_v53, %v1708_v20  ;;  %v1577_v44 = vsel %vm9181_vm0, %v5194_v31, %v6776_v25  ;;  %v9193_v31 = vld [vmem:[#allocation48_spill] sm:$0xff] }
 0x3bd   :  { %2011 = vrot.lane.b32.xlu0 %v6506_v4, %s5895_s5 }
 0x3be   :  { %5246 = vrot.lane.b32.xlu1 %v5245_v32, %s5895_s5  ;;  %v1576_v32 = vsel %vm9180_vm5, %v5193_v24, %v6810_v13  ;;  %v9194_v24 = vld [vmem:[#allocation51_spill] sm:$0xff]  ;;  %vm9200_vm5 = vmmov %vm9181_vm0 }
 0x3bf   :  { %v1588_v8 = vpack.c.bf16 %v1577_v44, %v1576_v32 }
 0x3c1   :  { %v1649_v15 = vpop.permute.xlu0 %1648 }
 0x3c2   :  { %v1695_v46 = vmul.f32 %v1649_v15, %v7026_v59 }
 0x3c4   :  { %v5265_v48 = vpack.i.bf16 %v1695_v46, %v1694_v54  ;;  %v5209_v46 = vunpack.i.h.bf16 %v5207_v34  ;;  %v5208_v54 = vunpack.i.l.bf16 %v5207_v34 }
 0x3c5   :  { %2015 = vrot.lane.b32.xlu0 %v9170_v1, %s5895_s5 }
 0x3c6   :  { %5251 = vrot.lane.b32.xlu1 %v5250_v3, %s5895_s5  ;;  %v1575_v3 = vsel %vm9183_vm2, %v5199_v16, %v6773_v17  ;;  %vm9202_vm2 = vmmov %vm9181_vm0 }
 0x3c7   :  { %v1587_v45 = vpack.c.bf16 %v1575_v3, %v1574_v47 }
 0x3c9   :  { %v5202_v7 = vpop.permute.xlu0 %5201 }
 0x3ca   :  { %v5204_v30 = vunpack.i.h.bf16 %v5202_v7  ;;  %v5203_v39 = vunpack.i.l.bf16 %v5202_v7  ;;  %v1570_v7 = vsel %vm9186_vm11, %v5208_v54, %v6873_v0  ;;  %vm9205_vm11 = vmmov %vm9181_vm0 }
 0x3cc   :  { %v1573_v12 = vsel %vm9185_vm14, %v5204_v30, %v6857_v6  ;;  %vm9204_vm14 = vmmov %vm9181_vm0 }
 0x3cd   :  { %2017 = vrot.lane.b32.xlu0 %v9171_v41, %s5895_s5 }
 0x3ce   :  { %5266 = vrot.lane.b32.xlu1 %v5265_v48, %s5895_s5  ;;  %v1572_v48 = vsel %vm9184_vm10, %v5203_v39, %v6877_v21  ;;  %vm9203_vm10 = vmmov %vm9181_vm0 }
 0x3cf   :  { %v1586_v33 = vpack.c.bf16 %v1573_v12, %v1572_v48 }
 0x3d1   :  { %v5212_v52 = vpop.permute.xlu0 %5211 }
 0x3d2   :  { %v5214_v27 = vunpack.i.h.bf16 %v5212_v52  ;;  %v5213_v22 = vunpack.i.l.bf16 %v5212_v52 }
 0x3d4   :  { %v1578_v36 = vsel %vm9178_vm9, %v5213_v22, %v6971_v49  ;;  %v1579_v20 = vsel %vm9179_vm12, %v5214_v27, %v6967_v61  ;;  %v9191_v22 = vld [vmem:[#allocation47_spill] sm:$0xff]  ;;  %vm9198_vm9 = vmmov %vm9181_vm0 }
 0x3d5   :  { %v1589_v53 = vpack.c.bf16 %v1579_v20, %v1578_v36  ;;  %vm9199_vm12 = vmmov %vm9181_vm0 }
 0x3d6   :  { %2013 = vrot.lane.b32.xlu1 %v9172_v37, %s5895_s5 }
 0x3dc   :  { %v5222_v23 = vpop.permute.xlu1 %5221 }
 0x3dd   :  { %v5224_v19 = vunpack.i.h.bf16 %v5222_v23  ;;  %v5223_v60 = vunpack.i.l.bf16 %v5222_v23  ;;  %v1571_v23 = vsel %vm9187_vm1, %v5209_v46, %v6855_v14  ;;  %vm9206_vm1 = vmmov %vm9181_vm0 }
 0x3de   :  { %2019 = vrot.lane.b32.xlu1 %v9173_v42, %s5895_s5  ;;  %v1585_v62 = vpack.c.bf16 %v1571_v23, %v1570_v7 }
 0x3df   :  { %v1582_v26 = vsel %vm9174_vm8, %v5223_v60, %v6981_v58  ;;  %v1583_v63 = vsel %vm9175_vm7, %v5224_v19, %v6983_v28  ;;  %vm9190_vm8 = vmmov %vm9181_vm0 }
 0x3e0   :  { %v1591_v56 = vpack.c.bf16 %v1583_v63, %v1582_v26  ;;  %vm9195_vm7 = vmmov %vm9181_vm0 }
 0x3e2   :  { %1616 = vmatpush.bf16.msra.mxu3 %v1591_v56 }
 0x3e6   :  { %1617 = vmatpush.bf16.msra.mxu3 %v1590_v18 }
 0x3ea   :  { %1618 = vmatpush.bf16.msra.mxu3 %v1589_v53 }
 0x3ee   :  { %1619 = vmatpush.bf16.msra.mxu3 %v1588_v8 }
 0x3ef   :  { %v5237_v15 = vpop.permute.xlu2 %5236  ;;  %v5227_v56 = vpop.permute.xlu0 %5226 }
 0x3f0   :  { %v5239_v39 = vunpack.i.h.bf16 %v5237_v15  ;;  %v5238_v47 = vunpack.i.l.bf16 %v5237_v15 }
 0x3f2   :  { %1620 = vmatpush.bf16.msra.mxu3 %v1587_v45 }
 0x3f6   :  { %1621 = vmatpush.bf16.msra.mxu3 %v1586_v33 }
 0x3f7   :  { %v7077_v57 = vpop.permute.xlu2 %5256 }
 0x3fa   :  { %1622 = vmatpush.bf16.msra.mxu3 %v1585_v62 }
 0x3ff   :  { %v2006_v34 = vpop.permute.xlu2 %2005  ;;  %v5232_v18 = vpop.permute.xlu1 %5231 }
 0x400   :  { %v2053_v19 = vsel %vm9188_vm3, %v2006_v34, 0.0  ;;  %v5234_v15 = vunpack.i.h.bf16 %v5232_v18  ;;  %v5233_v7 = vunpack.i.l.bf16 %v5232_v18  ;;  %vm9207_vm3 = vmmov %vm9181_vm0 }
 0x401   :  { %2054 = vadd.xlane.f32.xlu2 %v2053_v19 }
 0x407   :  { %v2008_v60 = vpop.permute.xlu2 %2007 }
 0x408   :  { %v2056_v52 = vsel %vm9189_vm6, %v2008_v60, 0.0  ;;  %v5229_v60 = vunpack.i.h.bf16 %v5227_v56  ;;  %vm9208_vm6 = vmmov %vm9181_vm0 }
 0x409   :  { %2057 = vadd.xlane.f32.xlu2 %v2056_v52  ;;  %v5228_v52 = vunpack.i.l.bf16 %v5227_v56 }
 0x40a   :  { %v1781_v56 = vsel %vm9207_vm3, %v5229_v60, %v6773_v17  ;;  %v7164_v60 = vpop.f32.mrf.mxu3 }
 0x40b   :  { %v1780_v18 = vsel %vm9206_vm1, %v5228_v52, %v6808_v29 }
 0x40f   :  { %v2010_v26 = vpop.permute.xlu2 %2009 }
 0x410   :  { %v2059_v63 = vsel %vm9190_vm8, %v2010_v26, 0.0  ;;  %vm9209_vm8 = vmmov %vm9181_vm0 }
 0x411   :  { %2060 = vadd.xlane.f32.xlu0 %v2059_v63  ;;  %v5259_v63 = vunpack.i.h.bf16 %v7077_v57 }
 0x41f   :  { %v5242_v27 = vpop.permute.xlu0 %5241 }
 0x420   :  { %v5244_v16 = vunpack.i.h.bf16 %v5242_v27  ;;  %v5243_v9 = vunpack.i.l.bf16 %v5242_v27  ;;  %v5258_v27 = vunpack.i.l.bf16 %v7077_v57  ;;  %v1779_v57 = vsel %vm9209_vm8, %v5259_v63, %v6857_v6 }
 0x421   :  { %2021 = vrot.lane.b32.xlu2 %v9191_v22, %s5895_s5 }
 0x422   :  { %v1786_v45 = vsel %vm9198_vm9, %v5243_v9, %v6950_v55  ;;  %v1787_v46 = vsel %vm9199_vm12, %v5244_v16, %v6964_v43  ;;  %vm9213_vm9 = vmmov %vm9181_vm0 }
 0x423   :  { %v1796_v33 = vpack.c.bf16 %v1787_v46, %v1786_v45  ;;  %vm9215_vm12 = vmmov %vm9181_vm0 }
 0x425   :  { %2025 = vrot.lane.b32.xlu0 %v9192_v2, %s5895_s5 }
 0x427   :  { %v7086_v5 = vpop.permute.xlu0 %5261 }
 0x429   :  { %2023 = vrot.lane.b32.xlu2 %v9193_v31, %s5895_s5 }
 0x42d   :  { %2027 = vrot.lane.b32.xlu0 %v9194_v24, %s5895_s5 }
 0x42f   :  { %v2012_v36 = vpop.permute.xlu0 %2011 }
 0x430   :  { %v5247_v20 = vpop.permute.xlu1 %5246  ;;  %v2062_v53 = vsel %vm9195_vm7, %v2012_v36, 0.0  ;;  %v1793_v36 = vpack.c.bf16 %v1781_v56, %v1780_v18  ;;  %vm9210_vm7 = vmmov %vm9181_vm0 }
 0x431   :  { %v5249_v32 = vunpack.i.h.bf16 %v5247_v20  ;;  %v5248_v44 = vunpack.i.l.bf16 %v5247_v20  ;;  %2063 = vadd.xlane.f32.xlu1 %v2062_v53  ;;  %v1778_v53 = vsel %vm9208_vm6, %v5258_v27, %v6877_v21 }
 0x432   :  { %v1792_v16 = vpack.c.bf16 %v1779_v57, %v1778_v53 }
 0x433   :  { %v1788_v8 = vsel %vm9196_vm13, %v5248_v44, %v6981_v58  ;;  %v1789_v30 = vsel %vm9197_vm15, %v5249_v32, %v6983_v28  ;;  %v1784_v58 = vsel %vm9181_vm0, %v5238_v47, %v6971_v49  ;;  %v1785_v28 = vsel %vm9201_vm4, %v5239_v39, %v6967_v61  ;;  %vm9211_vm13 = vmmov %vm9181_vm0 }
 0x434   :  { %v1797_v3 = vpack.c.bf16 %v1789_v30, %v1788_v8  ;;  %v1795_v19 = vpack.c.bf16 %v1785_v28, %v1784_v58  ;;  %v1782_v49 = vsel %vm9204_vm14, %v5233_v7, %v6810_v13  ;;  %v1783_v61 = vsel %vm9205_vm11, %v5234_v15, %v6776_v25  ;;  %vm9212_vm15 = vmmov %vm9181_vm0  ;;  %v9214_v30 = vld [vmem:[#allocation53_spill] sm:$0xff] }
 0x435   :  { %v1794_v26 = vpack.c.bf16 %v1783_v61, %v1782_v49  ;;  %v5264_v13 = vunpack.i.h.bf16 %v7086_v5  ;;  %v5263_v25 = vunpack.i.l.bf16 %v7086_v5  ;;  %vm9217_vm4 = vmmov %vm9206_vm1 }
 0x436   :  { %1822 = vmatpush.bf16.msra.mxu0 %v1797_v3  ;;  %vm9220_vm14 = vmmov %vm9206_vm1 }
 0x437   :  { %v2016_v54 = vpop.permute.xlu0 %2015  ;;  %v1776_v17 = vsel %vm9210_vm7, %v5263_v25, %v6873_v0  ;;  %v1777_v32 = vsel %vm9211_vm13, %v5264_v13, %v6855_v14  ;;  %vm9221_vm11 = vmmov %vm9206_vm1 }
 0x438   :  { %v5252_v48 = vpop.permute.xlu1 %5251  ;;  %v2068_v12 = vsel %vm9200_vm5, %v2016_v54, 0.0  ;;  %v1791_v5 = vpack.c.bf16 %v1777_v32, %v1776_v17  ;;  %vm9216_vm5 = vmmov %vm9181_vm0 }
 0x439   :  { %v5254_v23 = vunpack.i.h.bf16 %v5252_v48  ;;  %v5253_v62 = vunpack.i.l.bf16 %v5252_v48  ;;  %2069 = vadd.xlane.f32.xlu1 %v2068_v12 }
 0x43a   :  { %1823 = vmatpush.bf16.msra.mxu0 %v1796_v33 }
 0x43b   :  { %v1568_v55 = vsel %vm9202_vm2, %v5253_v62, %v7031_v40  ;;  %v1569_v43 = vsel %vm9203_vm10, %v5254_v23, %v7026_v59  ;;  %vm9218_vm2 = vmmov %vm9206_vm1 }
 0x43c   :  { %v1584_v34 = vpack.c.bf16 %v1569_v43, %v1568_v55  ;;  %vm9219_vm10 = vmmov %vm9206_vm1 }
 0x43e   :  { %1623 = vmatpush.bf16.msra.mxu3 %v1584_v34  ;;  %1824 = vmatpush.bf16.msra.mxu0 %v1795_v19 }
 0x43f   :  { %v2018_v39 = vpop.permute.xlu0 %2017 }
 0x440   :  { %v5267_v20 = vpop.permute.xlu1 %5266  ;;  %v2071_v14 = vsel %vm9216_vm5, %v2018_v39, 0.0  ;;  %vm9223_vm5 = vmmov %vm9218_vm2 }
 0x441   :  { %5168 = vmatmul.lmr.bf16.vlgmr.msra.gmra.2.mxu3  ;;  %v5269_v9 = vunpack.i.h.bf16 %v5267_v20  ;;  %v5268_v29 = vunpack.i.l.bf16 %v5267_v20 }
 0x442   :  { %1825 = vmatpush.bf16.msra.mxu0 %v1794_v26 }
 0x443   :  { %v1774_v44 = vsel %vm9212_vm15, %v5268_v29, %v7031_v40  ;;  %v1775_v21 = vsel %vm9213_vm9, %v5269_v9, %v7026_v59  ;;  %v5896_v40 = vmov 32.0  }
 0x444   :  { %v1790_v8 = vpack.c.bf16 %v1775_v21, %v1774_v44  ;;  %5431 = vrcp.f32 %v5896_v40 }
 0x446   :  { %1826 = vmatpush.bf16.msra.mxu0 %v1793_v36 }
 0x448   :  { %v2014_v6 = vpop.permute.xlu1 %2013 }
 0x449   :  { %5169 = vmatmul.lmr.bf16.gmra.2.mxu3  ;;  %v2065_v0 = vsel %vm9215_vm12, %v2014_v6, 0.0  ;;  %vm9222_vm12 = vmmov %vm9218_vm2 }
 0x44a   :  { %1827 = vmatpush.bf16.msra.mxu0 %v1792_v16  ;;  %v5432_v47 = vpop.eup %5431 }
 0x44b   :  { %v1929_v59 = vmul.f32 32.0, %v5432_v47  ;;  %vm1933_vm0 = vweird.f32 %v5432_v47 }
 0x44d   :  { %v1930_v3 = vsub.f32 1.0, %v1929_v59 }
 0x44e   :  { %1828 = vmatpush.bf16.msra.mxu0 %v1791_v5 }
 0x44f   :  { %v1931_v45 = vmul.f32 %v5432_v47, %v1930_v3 }
 0x450   :  { %v2020_v54 = vpop.permute.xlu1 %2019 }
 0x451   :  { %v1932_v48 = vadd.f32 %v5432_v47, %v1931_v45  ;;  %v2074_v12 = vsel %vm9217_vm4, %v2020_v54, 0.0 }
 0x452   :  { %1829 = vmatpush.bf16.msra.mxu0 %v1790_v8  ;;  %2029 = vrot.lane.b32.xlu1 %v9214_v30, %s5895_s5 }
 0x453   :  { %2066 = vadd.xlane.f32.xlu2 %v2065_v0  ;;  %v7141_v33 = vsel %vm1933_vm0, %v5432_v47, %v1932_v48 }
 0x455   :  { %5137 = vmatmul.lmr.bf16.vlgmr.msra.gmra.2.mxu0 }
 0x457   :  { %2072 = vadd.xlane.f32.xlu0 %v2071_v14 }
 0x45d   :  { %5138 = vmatmul.lmr.bf16.gmra.2.mxu0 }
 0x46b   :  { %2031 = vrot.lane.b32.xlu2 %v6711_v35, %s5895_s5 }
 0x474   :  { %v2055_v46 = vpop.xlane.xlu2 %2054 }
 0x475   :  { %v2101_v34 = vmul.f32 %v2055_v46, %v7141_v33 }
 0x47c   :  { %v2058_v58 = vpop.xlane.xlu2 %2057  ;;  %2075 = vadd.xlane.f32.xlu1 %v2074_v12 }
 0x47d   :  { %v2102_v28 = vmul.f32 %v2058_v58, %v7141_v33 }
 0x47f   :  { %v7145_v15 = vsub.f32 %v6998_v38, %v2102_v28  ;;  %v7159_v38 = vsub.f32 %v7002_v11, %v2101_v34 }
 0x481   :  { %v2134_v7 = vmul.f32 %v7145_v15, %v7145_v15  ;;  %v2133_v19 = vmul.f32 %v7159_v38, %v7159_v38 }
 0x483   :  { %2167 = vrot.lane.b32.xlu2 %v2134_v7, %s5895_s5 }
 0x484   :  { %v2061_v23 = vpop.xlane.xlu0 %2060  ;;  %v2022_v52 = vpop.permute.xlu2 %2021 }
 0x485   :  { %v2103_v62 = vmul.f32 %v2061_v23, %v7141_v33  ;;  %v2077_v9 = vsel %vm9219_vm10, %v2022_v52, 0.0  ;;  %vm9224_vm10 = vmmov %vm9223_vm5 }
 0x487   :  { %v7152_v55 = vsub.f32 %v6499_v51, %v2103_v62  ;;  %v7166_v51 = vpop.f32.mrf.mxu3 }
 0x489   :  { %v2135_v43 = vmul.f32 %v7152_v55, %v7152_v55 }
 0x48b   :  { %2169 = vrot.lane.b32.xlu2 %v2135_v43, %s5895_s5 }
 0x48c   :  { %v2024_v49 = vpop.permute.xlu2 %2023 }
 0x48d   :  { %v2080_v16 = vsel %vm9218_vm2, %v2024_v49, 0.0 }
 0x495   :  { %2165 = vrot.lane.b32.xlu1 %v2133_v19, %s5895_s5 }
 0x497   :  { %v2026_v5 = vpop.permute.xlu0 %2025 }
 0x498   :  { %v2083_v59 = vsel %vm9221_vm11, %v2026_v5, 0.0 }
 0x49f   :  { %v2028_v6 = vpop.permute.xlu0 %2027 }
 0x4a0   :  { %v2086_v8 = vsel %vm9220_vm14, %v2028_v6, 0.0 }
 0x4a4   :  { %v2064_v61 = vpop.xlane.xlu1 %2063 }
 0x4a5   :  { %v2104_v63 = vmul.f32 %v2064_v61, %v7141_v33 }
 0x4a7   :  { %v7174_v11 = vsub.f32 %v6506_v4, %v2104_v63  ;;  %v7221_v63 = vld [vmem:[#allocation8] sm:$0x3] }
 0x4a9   :  { %v2136_v25 = vmul.f32 %v7174_v11, %v7174_v11 }
 0x4ac   :  { %v7209_v39 = vpop.xlane.xlu1 %2069 }
 0x4c4   :  { %v7168_v26 = vpop.f32.mrf.mxu3  ;;  %v7212_v3 = vpop.permute.xlu1 %2029 }
 0x4c5   :  { %v1836_v27 = vadd.f32 1e-06, %v7168_v26 }
 0x4c6   :  { %v2067_v18 = vpop.xlane.xlu2 %2066 }
 0x4c7   :  { %1840 = vrot.lane.b32.xlu2 %v1836_v27, %s5895_s5  ;;  %v2105_v36 = vmul.f32 %v2067_v18, %v7141_v33  ;;  %v584_v27 = vperm.slane %v7221_v63, 1 }
 0x4c9   :  { %v7185_v20 = vsub.f32 %v9172_v37, %v2105_v36 }
 0x4ca   :  { %v2073_v14 = vpop.xlane.xlu0 %2072 }
 0x4cb   :  { %v2137_v57 = vmul.f32 %v7185_v20, %v7185_v20  ;;  %v2107_v45 = vmul.f32 %v2073_v14, %v7141_v33 }
 0x4cc   :  { %v7176_v56 = vpop.f32.mrf.mxu3 }
 0x4cd   :  { %v1837_v13 = vadd.f32 1e-06, %v7176_v56  ;;  %v7216_v48 = vsub.f32 %v9171_v41, %v2107_v45 }
 0x4ce   :  { %v7202_v17 = vpop.permute.xlu2 %2031 }
 0x4cf   :  { %2171 = vrot.lane.b32.xlu2 %v2136_v25, %s5895_s5  ;;  %1842 = vrot.lane.b32.xlu1 %v1837_v13, %s5895_s5  ;;  %v2139_v43 = vmul.f32 %v7216_v48, %v7216_v48 }
 0x4d2   :  { %v7187_v53 = vpop.f32.mrf.mxu0 }
 0x4d3   :  { %v1878_v4 = vadd.f32 1e-06, %v7187_v53 }
 0x4d5   :  { %1882 = vrot.lane.b32.xlu0 %v1878_v4, %s5895_s5  ;;  %v635_v4 = vadd.f32 %v7164_v60, %v584_v27 }
 0x4d7   :  { %2173 = vrot.lane.b32.xlu1 %v2137_v57, %s5895_s5 }
 0x4da   :  { %v7196_v29 = vpop.f32.mrf.mxu0 }
 0x4db   :  { %v1879_v37 = vadd.f32 1e-06, %v7196_v29 }
 0x4dd   :  { %v2168_v32 = vpop.permute.xlu2 %2167 }
 0x4e5   :  { %v7206_v44 = vpop.permute.xlu2 %2169 }
 0x4ef   :  { %v2076_v23 = vpop.xlane.xlu1 %2075 }
 0x4f8   :  { %2081 = vadd.xlane.f32.xlu2 %v2080_v16 }
 0x4ff   :  { %2078 = vadd.xlane.f32.xlu0 %v2077_v9 }
 0x507   :  { %v7226_v57 = vpop.permute.xlu1 %2165 }
 0x510   :  { %1884 = vrot.lane.b32.xlu2 %v1879_v37, %s5895_s5 }
 0x513   :  { %2033 = vrot.lane.b32.xlu0 %v6821_v50, %s5895_s5 }
 0x51b   :  { %2035 = vrot.lane.b32.xlu0 %v6899_v10, %s5895_s5 }
 0x521   :  { %v1841_v21 = vpop.permute.xlu2 %1840 }
 0x522   :  { %5433 = vrcp.f32 %v1841_v21  ;;  %v1857_v58 = vand.u32 2147483648, %v1841_v21  ;;  %v1855_v28 = vand.u32 2147483647, %v1841_v21  ;;  %vm1851_vm3 = vweird.f32 %v1841_v21 }
 0x524   :  { %vm1856_vm8 = vcmp.eq.f32.partialorder %v1855_v28, 8.507059e+37  ;;  %v1858_v19 = vor.u32 1.1754944e-38, %v1857_v58 }
 0x528   :  { %v5434_v0 = vpop.eup %5433 }
 0x529   :  { %v1847_v40 = vmul.f32 %v5434_v0, %v1841_v21  ;;  %vm1852_vm1 = vweird.f32 %v5434_v0 }
 0x52a   :  { %vm1853_vm6 = vmor %vm1851_vm3, %vm1852_vm1 }
 0x52b   :  { %v1848_v47 = vsub.f32 1.0, %v1847_v40 }
 0x52d   :  { %v1849_v46 = vmul.f32 %v5434_v0, %v1848_v47 }
 0x52f   :  { %v1850_v12 = vadd.f32 %v5434_v0, %v1849_v46 }
 0x531   :  { %v1854_v34 = vsel %vm1853_vm6, %v5434_v0, %v1850_v12  ;;  %v2216_v0 = vsel %vm9223_vm5, %v2168_v32, 0.0 }
 0x532   :  { %v1859_v61 = vsel %vm1856_vm8, %v1858_v19, %v1854_v34  ;;  %vm9225_vm8 = vmmov %vm9223_vm5 }
 0x533   :  { %v1860_v13 = vmul.f32 %v1859_v61, %v7168_v26  ;;  %v7233_v26 = vpop.permute.xlu2 %2171 }
 0x535   :  { %v1876_v37 = vadd.f32 %v1860_v13, %v635_v4 }
 0x539   :  { %2087 = vadd.xlane.f32.xlu2 %v2086_v8 }
 0x541   :  { %v1843_v8 = vpop.permute.xlu1 %1842 }
 0x542   :  { %vm1866_vm0 = vweird.f32 %v1843_v8  ;;  %v1872_v12 = vand.u32 2147483648, %v1843_v8  ;;  %v1870_v32 = vand.u32 2147483647, %v1843_v8 }
 0x544   :  { %vm1871_vm14 = vcmp.eq.f32.partialorder %v1870_v32, 8.507059e+37 }
 0x545   :  { %2084 = vadd.xlane.f32.xlu0 %v2083_v59 }
 0x547   :  { %v1883_v54 = vpop.permute.xlu0 %1882 }
 0x548   :  { %5435 = vrcp.f32 %v1883_v54  ;;  %v1899_v52 = vand.u32 2147483648, %v1883_v54  ;;  %vm1893_vm7 = vweird.f32 %v1883_v54  ;;  %v1897_v41 = vand.u32 2147483647, %v1883_v54 }
 0x549   :  { %5437 = vrcp.f32 %v1843_v8 }
 0x54a   :  { %v1900_v36 = vor.u32 1.1754944e-38, %v1899_v52  ;;  %vm1898_vm9 = vcmp.eq.f32.partialorder %v1897_v41, 8.507059e+37 }
 0x54e   :  { %v5436_v7 = vpop.eup %5435 }
 0x54f   :  { %v1889_v62 = vmul.f32 %v5436_v7, %v1883_v54  ;;  %vm1894_vm13 = vweird.f32 %v5436_v7  ;;  %v5438_v60 = vpop.eup %5437 }
 0x550   :  { %vm1895_vm15 = vmor %vm1893_vm7, %vm1894_vm13  ;;  %v1862_v14 = vmul.f32 %v5438_v60, %v1843_v8  ;;  %vm1867_vm4 = vweird.f32 %v5438_v60  ;;  %v2106_v8 = vmul.f32 %v7209_v39, %v7141_v33 }
 0x551   :  { %v1890_v49 = vsub.f32 1.0, %v1889_v62  ;;  %2177 = vrot.lane.b32.xlu2 %v2139_v43, %s5895_s5  ;;  %vm1868_vm2 = vmor %vm1866_vm0, %vm1867_vm4 }
 0x552   :  { %v1863_v47 = vsub.f32 1.0, %v1862_v14  ;;  %vm9226_vm7 = vmmov %vm9223_vm5 }
 0x553   :  { %v1891_v18 = vmul.f32 %v5436_v7, %v1890_v49  ;;  %vm9227_vm13 = vmmov %vm9223_vm5 }
 0x554   :  { %v1864_v59 = vmul.f32 %v5438_v60, %v1863_v47  ;;  %v2213_v47 = vsel %vm9227_vm13, %v7226_v57, 0.0  ;;  %vm9231_vm0 = vmmov %vm9223_vm5 }
 0x555   :  { %v1892_v25 = vadd.f32 %v5436_v7, %v1891_v18  ;;  %vm9232_vm4 = vmmov %vm9231_vm0 }
 0x556   :  { %v1865_v58 = vadd.f32 %v5438_v60, %v1864_v59 }
 0x557   :  { %v1896_v16 = vsel %vm1895_vm15, %v5436_v7, %v1892_v25  ;;  %vm9228_vm15 = vmmov %vm9223_vm5 }
 0x558   :  { %v1901_v9 = vsel %vm1898_vm9, %v1900_v36, %v1896_v16  ;;  %v1869_v34 = vsel %vm1868_vm2, %v5438_v60, %v1865_v58  ;;  %v2219_v59 = vsel %vm9228_vm15, %v7206_v44, 0.0  ;;  %vm9229_vm9 = vmmov %vm9223_vm5  ;;  %v2174_v58 = vpop.permute.xlu1 %2173 }
 0x559   :  { %v1902_v5 = vmul.f32 %v1901_v9, %v7187_v53  ;;  %v2108_v53 = vmul.f32 %v2076_v23, %v7141_v33  ;;  %v2089_v23 = vsel %vm9224_vm10, %v7212_v3, 0.0  ;;  %v2225_v32 = vsel %vm9223_vm5, %v2174_v58, 0.0  ;;  %vm9233_vm2 = vmmov %vm9231_vm0  ;;  %v4998_v58 = vld [vmem:[%s8997_s12 + $0x68] sm:$0xff] }
 0x55a   :  { %vm9234_vm10 = vmmov %vm9231_vm0 }
 0x55b   :  { %v7229_v21 = vadd.f32 %v1902_v5, %v1876_v37  ;;  %v7240_v46 = vsub.f32 %v9173_v42, %v2108_v53  ;;  %v1873_v42 = vor.u32 1.1754944e-38, %v1872_v12  ;;  %v5357_v37 = vld [vmem:[#allocation14] ss:$0 sm:$0xff] }
 0x55d   :  { %v1922_v6 = vsel %vm9222_vm12, %v7229_v21, 0.0  ;;  %v2140_v7 = vmul.f32 %v7240_v46, %v7240_v46  ;;  %v1874_v49 = vsel %vm1871_vm14, %v1873_v42, %v1869_v34  ;;  %vm9230_vm12 = vmmov %vm9223_vm5 }
 0x55e   :  { %1923 = vadd.xlane.f32.xlu0 %v1922_v6  ;;  %v1875_v18 = vmul.f32 %v1874_v49, %v7176_v56  ;;  %v5358_v56 = vld [vmem:[#allocation15] ss:$0 sm:$0xff]  ;;  %v2092_v57 = vsel %vm9230_vm12, %v7202_v17, 0.0 }
 0x566   :  { %2217 = vadd.xlane.f32.xlu0 %v2216_v0 }
 0x56b   :  { %v7236_v40 = vpop.xlane.xlu2 %2081 }
 0x572   :  { %v2079_v54 = vpop.xlane.xlu0 %2078 }
 0x573   :  { %v1885_v45 = vpop.permute.xlu2 %1884  ;;  %v2109_v28 = vmul.f32 %v2079_v54, %v7141_v33 }
 0x574   :  { %5439 = vrcp.f32 %v1885_v45  ;;  %v1914_v41 = vand.u32 2147483648, %v1885_v45  ;;  %v1912_v63 = vand.u32 2147483647, %v1885_v45  ;;  %vm1908_vm1 = vweird.f32 %v1885_v45 }
 0x575   :  { %v7249_v19 = vsub.f32 %v9191_v22, %v2109_v28  ;;  %v638_v22 = vadd.f32 %v7166_v51, %v584_v27  ;;  %v7263_v51 = vsub.f32 %v9170_v1, %v2106_v8 }
 0x576   :  { %v1915_v13 = vor.u32 1.1754944e-38, %v1914_v41  ;;  %vm1913_vm6 = vcmp.eq.f32.partialorder %v1912_v63, 8.507059e+37 }
 0x577   :  { %v2141_v3 = vmul.f32 %v7249_v19, %v7249_v19  ;;  %v1877_v16 = vadd.f32 %v1875_v18, %v638_v22  ;;  %v2138_v27 = vmul.f32 %v7263_v51, %v7263_v51 }
 0x57a   :  { %v5440_v62 = vpop.eup %5439  ;;  %2090 = vadd.xlane.f32.xlu2 %v2089_v23  ;;  %2179 = vrot.lane.b32.xlu0 %v2140_v7, %s5895_s5 }
 0x57b   :  { %v1904_v43 = vmul.f32 %v5440_v62, %v1885_v45  ;;  %vm1909_vm11 = vweird.f32 %v5440_v62 }
 0x57c   :  { %vm1910_vm3 = vmor %vm1908_vm1, %vm1909_vm11 }
 0x57d   :  { %v1905_v52 = vsub.f32 1.0, %v1904_v43 }
 0x57f   :  { %v1906_v61 = vmul.f32 %v5440_v62, %v1905_v52 }
 0x581   :  { %v1907_v36 = vadd.f32 %v5440_v62, %v1906_v61 }
 0x582   :  { %2181 = vrot.lane.b32.xlu0 %v2141_v3, %s5895_s5 }
 0x583   :  { %v1911_v25 = vsel %vm1910_vm3, %v5440_v62, %v1907_v36  ;;  %vm9235_vm3 = vmmov %vm9231_vm0 }
 0x584   :  { %v1916_v4 = vsel %vm1913_vm6, %v1915_v13, %v1911_v25  ;;  %vm9236_vm6 = vmmov %vm9231_vm0 }
 0x585   :  { %v1917_v9 = vmul.f32 %v1916_v4, %v7196_v29  ;;  %v2034_v29 = vpop.permute.xlu0 %2033 }
 0x586   :  { %v2095_v36 = vsel %vm9233_vm2, %v2034_v29, 0.0 }
 0x587   :  { %v1919_v5 = vadd.f32 %v1917_v9, %v1877_v16  ;;  %v2110_v9 = vmul.f32 %v7236_v40, %v7141_v33 }
 0x589   :  { %v1925_v6 = vsel %vm9225_vm8, %v1919_v5, 0.0  ;;  %vm9237_vm8 = vmmov %vm9231_vm0 }
 0x58a   :  { %2471 = vrot.lane.b32.xlu0 %v5357_v37, %s5889_s6  ;;  %1926 = vadd.xlane.f32.xlu1 %v1925_v6 }
 0x58d   :  { %v2036_v0 = vpop.permute.xlu0 %2035 }
 0x58e   :  { %v2098_v60 = vsel %vm9226_vm7, %v2036_v0, 0.0 }
 0x592   :  { %2492 = vrot.lane.b32.xlu0 %v5358_v56, %s5889_s6  ;;  %v7320_v56 = vsub.f32 %v9193_v31, %v2110_v9 }
 0x5a3   :  { %2175 = vrot.lane.b32.xlu1 %v2138_v27, %s5895_s5  ;;  %v2142_v27 = vmul.f32 %v7320_v56, %v7320_v56 }
 0x5ac   :  { %v2088_v12 = vpop.xlane.xlu2 %2087 }
 0x5b4   :  { %v2178_v44 = vpop.permute.xlu2 %2177 }
 0x5b8   :  { %v2085_v14 = vpop.xlane.xlu0 %2084 }
 0x5b9   :  { %v2111_v23 = vmul.f32 %v2085_v14, %v7141_v33 }
 0x5bb   :  { %v7293_v42 = vsub.f32 %v9192_v2, %v2111_v23 }
 0x5bc   :  { %2099 = vadd.xlane.f32.xlu0 %v2098_v60  ;;  %v2231_v60 = vsel %vm9235_vm3, %v2178_v44, 0.0  ;;  %v4995_v44 = vld [vmem:[%s8997_s12 + $0x50] sm:$0xff] }
 0x5bd   :  { %v2143_v43 = vmul.f32 %v7293_v42, %v7293_v42 }
 0x5cd   :  { %2214 = vadd.xlane.f32.xlu1 %v2213_v47 }
 0x5d1   :  { %v1924_v53 = vpop.xlane.xlu0 %1923 }
 0x5d2   :  { %v1935_v39 = vmul.f32 %v7141_v33, %v1924_v53 }
 0x5d4   :  { %v7273_v1 = vsub.f32 %v7229_v21, %v1935_v39  ;;  %v2222_v21 = vsel %vm9231_vm0, %v7233_v26, 0.0  ;;  %v2112_v26 = vmul.f32 %v2088_v12, %v7141_v33  ;;  %v5000_v12 = vld [vmem:[%s8997_s12 + $0x78] sm:$0xff] }
 0x5d5   :  { %2220 = vadd.xlane.f32.xlu1 %v2219_v59  ;;  %2664 = vmatpush.msra.mxu1 %v5000_v12 }
 0x5d6   :  { %v1939_v45 = vmul.f32 %v7273_v1, %v7273_v1  ;;  %v7301_v34 = vsub.f32 %v9194_v24, %v2112_v26  ;;  %v4994_v26 = vld [vmem:[%s8997_s12 + $0x48] sm:$0xff] }
 0x5d7   :  { %2665 = vmatpush.msra.mxu1 %v4998_v58 }
 0x5d8   :  { %v1941_v54 = vsel %vm9229_vm9, %v1939_v45, 0.0  ;;  %v2144_v2 = vmul.f32 %v7301_v34, %v7301_v34 }
 0x5d9   :  { %1942 = vadd.xlane.f32.xlu2 %v1941_v54  ;;  %v4999_v54 = vld [vmem:[%s8997_s12 + $0x70] sm:$0xff] }
 0x5da   :  { %2641 = vmatpush.msra.mxu3 %v4999_v54  ;;  %v5359_v54 = vld [vmem:[#allocation11] ss:$0 sm:$0xff] }
 0x5dd   :  { %2093 = vadd.xlane.f32.xlu1 %v2092_v57  ;;  %v4997_v57 = vld [vmem:[%s8997_s12 + $0x60] sm:$0xff] }
 0x5de   :  { %2642 = vmatpush.msra.mxu3 %v4997_v57 }
 0x5e0   :  { %2643 = vmatpush.msra.mxu3 %v4995_v44  ;;  %v5360_v44 = vld [vmem:[#allocation12] ss:$0 sm:$0xff] }
 0x5e1   :  { %2226 = vadd.xlane.f32.xlu2 %v2225_v32 }
 0x5e5   :  { %2223 = vadd.xlane.f32.xlu1 %v2222_v21 }
 0x5ed   :  { %v2091_v28 = vpop.xlane.xlu2 %2090 }
 0x5ee   :  { %v2113_v7 = vmul.f32 %v2091_v28, %v7141_v33  ;;  %v4996_v28 = vld [vmem:[%s8997_s12 + $0x58] sm:$0xff] }
 0x5ef   :  { %2666 = vmatpush.msra.mxu1 %v4996_v28 }
 0x5f0   :  { %v7288_v62 = vsub.f32 %v9214_v30, %v2113_v7  ;;  %v2218_v30 = vpop.xlane.xlu0 %2217 }
 0x5f1   :  { %v2262_v41 = vmul.f32 %v2218_v30, %v7141_v33  ;;  %2667 = vmatpush.msra.mxu1 %v4994_v26 }
 0x5f2   :  { %v2145_v17 = vmul.f32 %v7288_v62, %v7288_v62 }
 0x5f3   :  { %v2278_v3 = vadd.f32 1e-05, %v2262_v41 }
 0x5f4   :  { %2189 = vrot.lane.b32.xlu0 %v2145_v17, %s5895_s5  ;;  %v4993_v17 = vld [vmem:[%s8997_s12 + $0x40] sm:$0xff] }
 0x5f5   :  { %5441 = vrsqrt.f32 %v2278_v3  ;;  %vm2309_vm11 = vweird.f32 %v2278_v3  ;;  %2644 = vmatpush.msra.mxu3 %v4993_v17 }
 0x5f8   :  { %v2180_v18 = vpop.permute.xlu0 %2179 }
 0x5f9   :  { %2185 = vrot.lane.b32.xlu2 %v2143_v43, %s5895_s5 }
 0x5fb   :  { %v5442_v13 = vpop.eup %5441 }
 0x5fc   :  { %v2304_v22 = vmul.f32 %v5442_v13, %v2278_v3  ;;  %vm2310_vm14 = vweird.f32 %v5442_v13 }
 0x5fd   :  { %v1927_v52 = vpop.xlane.xlu1 %1926  ;;  %vm2311_vm1 = vmor %vm2309_vm11, %vm2310_vm14 }
 0x5fe   :  { %v1936_v49 = vmul.f32 %v7141_v33, %v1927_v52  ;;  %v2305_v25 = vmul.f32 %v5442_v13, %v2304_v22  ;;  %vm9241_vm14 = vmmov %vm9235_vm3 }
 0x600   :  { %v7307_v61 = vsub.f32 %v1919_v5, %v1936_v49  ;;  %v2182_v4 = vpop.permute.xlu0 %2181  ;;  %v2306_v16 = vmul.f32 0.5, %v2305_v25  ;;  %v2234_v5 = vsel %vm9234_vm10, %v2180_v18, 0.0  ;;  %vm9240_vm10 = vmmov %vm9235_vm3 }
 0x601   :  { %2187 = vrot.lane.b32.xlu2 %v2144_v2, %s5895_s5  ;;  %v2237_v53 = vsel %vm9236_vm6, %v2182_v4, 0.0 }
 0x602   :  { %v1940_v63 = vmul.f32 %v7307_v61, %v7307_v61  ;;  %v2307_v37 = vsub.f32 1.5, %v2306_v16 }
 0x604   :  { %v1944_v24 = vsel %vm9232_vm4, %v1940_v63, 0.0  ;;  %v2308_v8 = vmul.f32 %v5442_v13, %v2307_v37 }
 0x605   :  { %1945 = vadd.xlane.f32.xlu1 %v1944_v24 }
 0x606   :  { %v2312_v29 = vsel %vm2311_vm1, %v5442_v13, %v2308_v8 }
 0x607   :  { %v2454_v40 = vmul.f32 %v2312_v29, %v7145_v15 }
 0x608   :  { %v7317_v6 = vpop.permute.xlu0 %2471 }
 0x609   :  { %v2475_v31 = vmul.f32 %v7317_v6, %v2454_v40 }
 0x60d   :  { %2096 = vadd.xlane.f32.xlu1 %v2095_v36 }
 0x610   :  { %v7326_v0 = vpop.permute.xlu0 %2492 }
 0x611   :  { %v2496_v14 = vadd.f32 %v7326_v0, %v2475_v31 }
 0x613   :  { %v2512_v47 = vmax.f32 %v2496_v14, 0.0 }
 0x615   :  { %v2176_v39 = vpop.permute.xlu1 %2175 }
 0x616   :  { %v2228_v41 = vsel %vm9237_vm8, %v2176_v39, 0.0  ;;  %vm9242_vm8 = vmmov %vm9236_vm6 }
 0x61e   :  { %2235 = vadd.xlane.f32.xlu0 %v2234_v5 }
 0x626   :  { %2183 = vrot.lane.b32.xlu1 %v2142_v27, %s5895_s5 }
 0x62a   :  { %2232 = vadd.xlane.f32.xlu2 %v2231_v60 }
 0x62f   :  { %v2100_v5 = vpop.xlane.xlu0 %2099 }
 0x630   :  { %v2116_v14 = vmul.f32 %v2100_v5, %v7141_v33 }
 0x632   :  { %2545 = vrot.lane.b32.xlu0 %v2512_v47, %s5895_s5  ;;  %2238 = vadd.xlane.f32.xlu2 %v2237_v53 }
 0x640   :  { %v2215_v59 = vpop.xlane.xlu1 %2214 }
 0x641   :  { %v2261_v45 = vmul.f32 %v2215_v59, %v7141_v33 }
 0x643   :  { %v2277_v15 = vadd.f32 1e-05, %v2261_v45 }
 0x645   :  { %5443 = vrsqrt.f32 %v2277_v15  ;;  %vm2299_vm13 = vweird.f32 %v2277_v15 }
 0x648   :  { %v2221_v32 = vpop.xlane.xlu1 %2220 }
 0x649   :  { %v2263_v21 = vmul.f32 %v2221_v32, %v7141_v33 }
 0x64b   :  { %v5444_v7 = vpop.eup %5443  ;;  %v2279_v23 = vadd.f32 1e-05, %v2263_v21 }
 0x64c   :  { %v2294_v43 = vmul.f32 %v5444_v7, %v2277_v15  ;;  %v1943_v30 = vpop.xlane.xlu2 %1942  ;;  %vm2300_vm7 = vweird.f32 %v5444_v7  ;;  %v7369_v15 = vsub.f32 %v6899_v10, %v2116_v14 }
 0x64d   :  { %5445 = vrsqrt.f32 %v2279_v23  ;;  %v1947_v52 = vmul.f32 %v1943_v30, %v7141_v33  ;;  %vm2301_vm15 = vmor %vm2299_vm13, %vm2300_vm7  ;;  %vm2319_vm12 = vweird.f32 %v2279_v23 }
 0x64e   :  { %v2295_v49 = vmul.f32 %v5444_v7, %v2294_v43  ;;  %vm9243_vm7 = vmmov %vm9236_vm6 }
 0x64f   :  { %v1949_v2 = vadd.f32 1e-05, %v1947_v52  ;;  %vm9246_vm13 = vmmov %vm9236_vm6 }
 0x650   :  { %v2296_v63 = vmul.f32 0.5, %v2295_v49  ;;  %2229 = vadd.xlane.f32.xlu1 %v2228_v41  ;;  %v2094_v31 = vpop.xlane.xlu1 %2093 }
 0x651   :  { %5447 = vrsqrt.f32 %v1949_v2  ;;  %v2114_v39 = vmul.f32 %v2094_v31, %v7141_v33  ;;  %vm1957_vm4 = vweird.f32 %v1949_v2 }
 0x652   :  { %v2297_v3 = vsub.f32 1.5, %v2296_v63 }
 0x653   :  { %v5446_v24 = vpop.eup %5445  ;;  %v7374_v32 = vsub.f32 %v6711_v35, %v2114_v39  ;;  %v5006_v39 = vld [vmem:[%s8999_s14 + $0x28] sm:$0xff] }
 0x654   :  { %v2298_v18 = vmul.f32 %v5444_v7, %v2297_v3  ;;  %v2314_v36 = vmul.f32 %v5446_v24, %v2279_v23  ;;  %vm2320_vm9 = vweird.f32 %v5446_v24  ;;  %v2227_v30 = vpop.xlane.xlu2 %2226 }
 0x655   :  { %vm2321_vm5 = vmor %vm2319_vm12, %vm2320_vm9  ;;  %v2146_v10 = vmul.f32 %v7374_v32, %v7374_v32 }
 0x656   :  { %v2315_v13 = vmul.f32 %v5446_v24, %v2314_v36  ;;  %v2302_v22 = vsel %vm2301_vm15, %v5444_v7, %v2298_v18  ;;  %vm9247_vm15 = vmmov %vm9236_vm6 }
 0x657   :  { %v5448_v25 = vpop.eup %5447  ;;  %v2453_v4 = vmul.f32 %v2302_v22, %v7159_v38  ;;  %vm9248_vm9 = vmmov %vm9236_vm6 }
 0x658   :  { %v2316_v16 = vmul.f32 0.5, %v2315_v13  ;;  %v1952_v9 = vmul.f32 %v5448_v25, %v1949_v2  ;;  %vm1958_vm0 = vweird.f32 %v5448_v25  ;;  %v2224_v26 = vpop.xlane.xlu1 %2223 }
 0x659   :  { %v2474_v37 = vmul.f32 %v7317_v6, %v2453_v4  ;;  %vm1959_vm2 = vmor %vm1957_vm4, %vm1958_vm0 }
 0x65a   :  { %v2317_v8 = vsub.f32 1.5, %v2316_v16  ;;  %v1953_v27 = vmul.f32 %v5448_v25, %v1952_v9  ;;  %vm9251_vm4 = vmmov %vm9236_vm6 }
 0x65b   :  { %v2495_v29 = vadd.f32 %v7326_v0, %v2474_v37 }
 0x65c   :  { %v2318_v40 = vmul.f32 %v5446_v24, %v2317_v8  ;;  %v1954_v60 = vmul.f32 0.5, %v1953_v27  ;;  %v2186_v3 = vpop.permute.xlu2 %2185 }
 0x65d   :  { %v2511_v47 = vmax.f32 %v2495_v29, 0.0  ;;  %v2264_v29 = vmul.f32 %v2224_v26, %v7141_v33 }
 0x65e   :  { %v1955_v53 = vsub.f32 1.5, %v1954_v60  ;;  %v2322_v38 = vsel %vm2321_vm5, %v5446_v24, %v2318_v40  ;;  %v5008_v60 = vld [vmem:[%s8999_s14 + $0x38] sm:$0xff] }
 0x65f   :  { %2543 = vrot.lane.b32.xlu2 %v2511_v47, %s5895_s5  ;;  %v2455_v59 = vmul.f32 %v2322_v38, %v7152_v55  ;;  %v2148_v55 = vmul.f32 %v7369_v15, %v7369_v15  ;;  %v9244_v47 = vld [vmem:[#allocation27_spill] sm:$0xff]  ;;  %v2280_v38 = vadd.f32 1e-05, %v2264_v29 }
 0x660   :  { %v1956_v45 = vmul.f32 %v5448_v25, %v1955_v53 }
 0x661   :  { %v2476_v12 = vmul.f32 %v7317_v6, %v2455_v59  ;;  %v5005_v59 = vld [vmem:[%s8999_s14 + $0x20] sm:$0xff]  ;;  %vm2329_vm5 = vweird.f32 %v2280_v38 }
 0x662   :  { %v1960_v57 = vsel %vm1959_vm2, %v5448_v25, %v1956_v45  ;;  %v2265_v45 = vmul.f32 %v2227_v30, %v7141_v33 }
 0x663   :  { %v1971_v58 = vmul.f32 %v1960_v57, %v7273_v1  ;;  %v2497_v21 = vadd.f32 %v7326_v0, %v2476_v12  ;;  %v9238_v1 = vld [vmem:[#allocation25_spill] sm:$0xff] }
 0x664   :  { %v2188_v16 = vpop.permute.xlu2 %2187 }
 0x665   :  { %v1976_v28 = vmul.f32 %v5359_v54, %v1971_v58  ;;  %v2513_v7 = vmax.f32 %v2497_v21, 0.0  ;;  %v2246_v5 = vsel %vm9242_vm8, %v2188_v16, 0.0 }
 0x666   :  { %v2190_v40 = vpop.permute.xlu0 %2189 }
 0x667   :  { %2195 = vrot.lane.b32.xlu2 %v2148_v55, %s5895_s5  ;;  %2547 = vrot.lane.b32.xlu0 %v2513_v7, %s5895_s5  ;;  %v1981_v23 = vadd.f32 %v5360_v44, %v1976_v28  ;;  %v2249_v14 = vsel %vm9243_vm7, %v2190_v40, 0.0 }
 0x669   :  { %2191 = vrot.lane.b32.xlu1 %v2146_v10, %s5895_s5  ;;  %v1983_v35 = vmax.f32 %v1981_v23, 0.0 }
 0x66b   :  { %v7385_v17 = vadd.f32 %v1983_v35, %v9238_v1 }
 0x66d   :  { %9239 = vst [vmem:[#allocation52_spill] sm:$0xff] %v7385_v17  ;;  %5001 = vmatmul.msk.f32.vlgmr.msra.gmra.mxu3 %vm9240_vm10, %v7385_v17  ;;  %5003 = vmatmul.msk.f32.vlgmr.msra.gmra.mxu1 %vm9241_vm14, %v7385_v17 }
 0x66e   :  { %2745 = vmatpush.msra.mxu3 %v5008_v60 }
 0x678   :  { %v1946_v43 = vpop.xlane.xlu1 %1945 }
 0x679   :  { %v1948_v52 = vmul.f32 %v1946_v43, %v7141_v33 }
 0x67b   :  { %v1950_v49 = vadd.f32 1e-05, %v1948_v52 }
 0x67d   :  { %5449 = vrsqrt.f32 %v1950_v49  ;;  %vm1967_vm1 = vweird.f32 %v1950_v49 }
 0x67e   :  { %5451 = vrsqrt.f32 %v2280_v38 }
 0x680   :  { %v2097_v2 = vpop.xlane.xlu1 %2096 }
 0x681   :  { %v2115_v41 = vmul.f32 %v2097_v2, %v7141_v33 }
 0x683   :  { %v5450_v63 = vpop.eup %5449  ;;  %v7394_v24 = vsub.f32 %v6821_v50, %v2115_v41  ;;  %v2243_v50 = vsel %vm9236_vm6, %v2186_v3, 0.0  ;;  %v9249_v3 = vld [vmem:[#allocation26_spill] sm:$0xff] }
 0x684   :  { %v1962_v18 = vmul.f32 %v5450_v63, %v1950_v49  ;;  %vm1968_vm11 = vweird.f32 %v5450_v63  ;;  %v5452_v12 = vpop.eup %5451 }
 0x685   :  { %v2147_v36 = vmul.f32 %v7394_v24, %v7394_v24  ;;  %vm1969_vm3 = vmor %vm1967_vm1, %vm1968_vm11  ;;  %v2324_v57 = vmul.f32 %v5452_v12, %v2280_v38  ;;  %vm2330_vm12 = vweird.f32 %v5452_v12 }
 0x686   :  { %v1963_v13 = vmul.f32 %v5450_v63, %v1962_v18  ;;  %vm2331_vm0 = vmor %vm2329_vm5, %vm2330_vm12 }
 0x687   :  { %2193 = vrot.lane.b32.xlu1 %v2147_v36, %s5895_s5  ;;  %v2325_v21 = vmul.f32 %v5452_v12, %v2324_v57  ;;  %vm9254_vm11 = vmmov %vm9251_vm4 }
 0x688   :  { %v1964_v22 = vmul.f32 0.5, %v1963_v13 }
 0x689   :  { %v2326_v55 = vmul.f32 0.5, %v2325_v21 }
 0x68a   :  { %v1965_v25 = vsub.f32 1.5, %v1964_v22 }
 0x68b   :  { %v2327_v35 = vsub.f32 1.5, %v2326_v55 }
 0x68c   :  { %v1966_v4 = vmul.f32 %v5450_v63, %v1965_v25 }
 0x68d   :  { %v2328_v30 = vmul.f32 %v5452_v12, %v2327_v35 }
 0x68e   :  { %v1970_v9 = vsel %vm1969_vm3, %v5450_v63, %v1966_v4 }
 0x68f   :  { %v1972_v37 = vmul.f32 %v1970_v9, %v7307_v61  ;;  %v5007_v61 = vld [vmem:[%s8999_s14 + $0x30] sm:$0xff]  ;;  %v2332_v63 = vsel %vm2331_vm0, %v5452_v12, %v2328_v30 }
 0x690   :  { %2244 = vadd.xlane.f32.xlu2 %v2243_v50  ;;  %2746 = vmatpush.msra.mxu3 %v5007_v61  ;;  %v2456_v13 = vmul.f32 %v2332_v63, %v7174_v11  ;;  %v9252_v50 = vld [vmem:[#allocation28_spill] sm:$0xff] }
 0x691   :  { %2247 = vadd.xlane.f32.xlu0 %v2246_v5  ;;  %v1977_v8 = vmul.f32 %v5359_v54, %v1972_v37  ;;  %v2281_v54 = vadd.f32 1e-05, %v2265_v45  ;;  %v2236_v52 = vpop.xlane.xlu0 %2235 }
 0x692   :  { %2747 = vmatpush.msra.mxu3 %v5006_v39  ;;  %v2268_v36 = vmul.f32 %v2236_v52, %v7141_v33  ;;  %v2477_v16 = vmul.f32 %v7317_v6, %v2456_v13 }
 0x693   :  { %v1982_v27 = vadd.f32 %v5360_v44, %v1977_v8  ;;  %5453 = vrsqrt.f32 %v2281_v54  ;;  %vm2339_vm10 = vweird.f32 %v2281_v54 }
 0x694   :  { %2748 = vmatpush.msra.mxu3 %v5005_v59  ;;  %v2284_v4 = vadd.f32 1e-05, %v2268_v36  ;;  %v2498_v11 = vadd.f32 %v7326_v0, %v2477_v16 }
 0x695   :  { %v1984_v31 = vmax.f32 %v1982_v27, 0.0 }
 0x696   :  { %vm2369_vm5 = vweird.f32 %v2284_v4 }
 0x697   :  { %v7411_v53 = vadd.f32 %v1984_v31, %v9244_v47  ;;  %v2514_v31 = vmax.f32 %v2498_v11, 0.0 }
 0x698   :  { %2250 = vadd.xlane.f32.xlu2 %v2249_v14  ;;  %v2184_v7 = vpop.permute.xlu1 %2183 }
 0x699   :  { %9245 = vst [vmem:[#allocation49_spill] sm:$0xff] %v7411_v53  ;;  %5002 = vmatmul.msk.f32.gmra.mxu3 %vm9246_vm13, %v7411_v53  ;;  %5004 = vmatmul.msk.f32.gmra.mxu1 %vm9247_vm15, %v7411_v53  ;;  %v5454_v44 = vpop.eup %5453  ;;  %v2240_v10 = vsel %vm9248_vm9, %v2184_v7, 0.0  ;;  %vm9257_vm15 = vmmov %vm9251_vm4 }
 0x69a   :  { %v2334_v28 = vmul.f32 %v5454_v44, %v2281_v54  ;;  %vm2340_vm2 = vweird.f32 %v5454_v44  ;;  %vm9258_vm9 = vmmov %vm9251_vm4 }
 0x69b   :  { %vm2341_vm14 = vmor %vm2339_vm10, %vm2340_vm2 }
 0x69c   :  { %v2335_v23 = vmul.f32 %v5454_v44, %v2334_v28  ;;  %vm9259_vm10 = vmmov %vm9251_vm4 }
 0x69d   :  { %v2233_v58 = vpop.xlane.xlu2 %2232 }
 0x69e   :  { %v2267_v26 = vmul.f32 %v2233_v58, %v7141_v33  ;;  %v2336_v43 = vmul.f32 0.5, %v2335_v23 }
 0x6a0   :  { %v2283_v49 = vadd.f32 1e-05, %v2267_v26  ;;  %v2337_v2 = vsub.f32 1.5, %v2336_v43  ;;  %v9255_v43 = vld [vmem:[#allocation29_spill] sm:$0xff] }
 0x6a2   :  { %5455 = vrsqrt.f32 %v2283_v49  ;;  %v2338_v22 = vmul.f32 %v5454_v44, %v2337_v2  ;;  %vm2359_vm6 = vweird.f32 %v2283_v49 }
 0x6a3   :  { %5457 = vrsqrt.f32 %v2284_v4 }
 0x6a4   :  { %v2546_v25 = vpop.permute.xlu0 %2545  ;;  %v2342_v9 = vsel %vm2341_vm14, %v5454_v44, %v2338_v22 }
 0x6a5   :  { %v7425_v1 = vpop.xlane.xlu2 %2238  ;;  %v7437_v5 = vadd.f32 %v2546_v25, %v9252_v50  ;;  %v2457_v29 = vmul.f32 %v2342_v9, %v7185_v20 }
 0x6a6   :  { %v2269_v22 = vmul.f32 %v7425_v1, %v7141_v33 }
 0x6a7   :  { %9253 = vst [vmem:[#allocation46_spill] sm:$0xff] %v7437_v5  ;;  %v2478_v61 = vmul.f32 %v7317_v6, %v2457_v29 }
 0x6a8   :  { %v5456_v37 = vpop.eup %5455  ;;  %v2285_v9 = vadd.f32 1e-05, %v2269_v22 }
 0x6a9   :  { %v2354_v40 = vmul.f32 %v5456_v37, %v2283_v49  ;;  %v5458_v47 = vpop.eup %5457  ;;  %v2499_v38 = vadd.f32 %v7326_v0, %v2478_v61  ;;  %vm2360_vm1 = vweird.f32 %v5456_v37 }
 0x6aa   :  { %v2364_v39 = vmul.f32 %v5458_v47, %v2284_v4  ;;  %vm2361_vm8 = vmor %vm2359_vm6, %vm2360_vm1  ;;  %vm2370_vm12 = vweird.f32 %v5458_v47  ;;  %vm2379_vm14 = vweird.f32 %v2285_v9 }
 0x6ab   :  { %v2355_v14 = vmul.f32 %v5456_v37, %v2354_v40  ;;  %v2515_v12 = vmax.f32 %v2499_v38, 0.0  ;;  %vm2371_vm0 = vmor %vm2369_vm5, %vm2370_vm12 }
 0x6ac   :  { %v2365_v57 = vmul.f32 %v5458_v47, %v2364_v39 }
 0x6ad   :  { %v2356_v59 = vmul.f32 0.5, %v2355_v14 }
 0x6ae   :  { %v2366_v44 = vmul.f32 0.5, %v2365_v57 }
 0x6af   :  { %v2357_v58 = vsub.f32 1.5, %v2356_v59 }
 0x6b1   :  { %2241 = vadd.xlane.f32.xlu1 %v2240_v10  ;;  %v2358_v28 = vmul.f32 %v5456_v37, %v2357_v58  ;;  %v2367_v10 = vsub.f32 1.5, %v2366_v44 }
 0x6b3   :  { %v2362_v26 = vsel %vm2361_vm8, %v5456_v37, %v2358_v28 }
 0x6b4   :  { %v2459_v63 = vmul.f32 %v2362_v26, %v7216_v48 }
 0x6b9   :  { %v2544_v41 = vpop.permute.xlu2 %2543 }
 0x6ba   :  { %v7429_v18 = vadd.f32 %v2544_v41, %v9249_v3  ;;  %v2368_v3 = vmul.f32 %v5458_v47, %v2367_v10 }
 0x6bc   :  { %9250 = vst [vmem:[#allocation43_spill] sm:$0xff] %v7429_v18  ;;  %5009 = vmatmul.msk.f32.vlgmr.msra.gmra.mxu3 %vm9251_vm4, %v7429_v18  ;;  %v2372_v25 = vsel %vm2371_vm0, %v5458_v47, %v2368_v3 }
 0x6bd   :  { %v2460_v48 = vmul.f32 %v2372_v25, %v7240_v46 }
 0x6bf   :  { %v2481_v50 = vmul.f32 %v7317_v6, %v2460_v48 }
 0x6c1   :  { %v2502_v4 = vadd.f32 %v7326_v0, %v2481_v50  ;;  %v2196_v46 = vpop.permute.xlu2 %2195 }
 0x6c2   :  { %v2258_v14 = vsel %vm9259_vm10, %v2196_v46, 0.0 }
 0x6c3   :  { %v2230_v8 = vpop.xlane.xlu1 %2229 }
 0x6c4   :  { %v2266_v27 = vmul.f32 %v2230_v8, %v7141_v33  ;;  %5010 = vmatmul.msk.f32.gmra.mxu3 %vm9254_vm11, %v7437_v5 }
 0x6c6   :  { %v2282_v60 = vadd.f32 1e-05, %v2266_v27  ;;  %v2518_v27 = vmax.f32 %v2502_v4, 0.0 }
 0x6c8   :  { %5459 = vrsqrt.f32 %v2282_v60  ;;  %vm2349_vm7 = vweird.f32 %v2282_v60 }
 0x6c9   :  { %5461 = vrsqrt.f32 %v2285_v9 }
 0x6ca   :  { %2549 = vrot.lane.b32.xlu1 %v2514_v31, %s5895_s5 }
 0x6ce   :  { %v5460_v45 = vpop.eup %5459 }
 0x6cf   :  { %v2344_v54 = vmul.f32 %v5460_v45, %v2282_v60  ;;  %vm2350_vm3 = vweird.f32 %v5460_v45  ;;  %v5462_v8 = vpop.eup %5461 }
 0x6d0   :  { %vm2351_vm13 = vmor %vm2349_vm7, %vm2350_vm3  ;;  %v2374_v11 = vmul.f32 %v5462_v8, %v2285_v9  ;;  %vm2380_vm2 = vweird.f32 %v5462_v8 }
 0x6d1   :  { %v2345_v20 = vmul.f32 %v5460_v45, %v2344_v54  ;;  %vm2381_vm11 = vmor %vm2379_vm14, %vm2380_vm2  ;;  %vm9264_vm14 = vcmask 261120  }
 0x6d2   :  { %2551 = vrot.lane.b32.xlu1 %v2515_v12, %s5895_s5  ;;  %v2375_v1 = vmul.f32 %v5462_v8, %v2374_v11  ;;  %v5586_v11 = vld [vmem:[%s9116_s8] sm:$0xff] }
 0x6d3   :  { %v2346_v21 = vmul.f32 0.5, %v2345_v20 }
 0x6d4   :  { %v2376_v40 = vmul.f32 0.5, %v2375_v1 }
 0x6d5   :  { %v2347_v55 = vsub.f32 1.5, %v2346_v21 }
 0x6d6   :  { %v2377_v31 = vsub.f32 1.5, %v2376_v40 }
 0x6d7   :  { %v2348_v7 = vmul.f32 %v5460_v45, %v2347_v55 }
 0x6d8   :  { %v2378_v61 = vmul.f32 %v5462_v8, %v2377_v31 }
 0x6d9   :  { %v2548_v23 = vpop.permute.xlu0 %2547  ;;  %v2352_v35 = vsel %vm2351_vm13, %v5460_v45, %v2348_v7 }
 0x6da   :  { %v7449_v30 = vadd.f32 %v2548_v23, %v9255_v43  ;;  %v2458_v52 = vmul.f32 %v2352_v35, %v7263_v51  ;;  %v2480_v51 = vmul.f32 %v7317_v6, %v2459_v63  ;;  %v2382_v59 = vsel %vm2381_vm11, %v5462_v8, %v2378_v61  ;;  %v2617_v43 = vld [vmem:[#allocation8 + $0x2] sm:$0x3] }
 0x6db   :  { %v2192_v2 = vpop.permute.xlu1 %2191  ;;  %v2461_v45 = vmul.f32 %v2382_v59, %v7249_v19 }
 0x6dc   :  { %9256 = vst [vmem:[#allocation45_spill] sm:$0xff] %v7449_v30  ;;  %5011 = vmatmul.msk.f32.gmra.mxu3 %vm9257_vm15, %v7449_v30  ;;  %v2252_v41 = vsel %vm9258_vm9, %v2192_v2, 0.0  ;;  %v2479_v49 = vmul.f32 %v7317_v6, %v2458_v52  ;;  %v2501_v16 = vadd.f32 %v7326_v0, %v2480_v51  ;;  %vm9260_vm15 = vcmask 130048  }
 0x6dd   :  { %2253 = vadd.xlane.f32.xlu2 %v2252_v41  ;;  %v2482_v57 = vmul.f32 %v7317_v6, %v2461_v45  ;;  %v2619_v41 = vperm.slane %v2617_v43, 0  ;;  %vm9261_vm9 = vmmov %vm9260_vm15 }
 0x6de   :  { %v2500_v36 = vadd.f32 %v7326_v0, %v2479_v49  ;;  %v2517_v37 = vmax.f32 %v2501_v16, 0.0  ;;  %vm9265_vm11 = vmmov %vm9261_vm9 }
 0x6df   :  { %v2503_v28 = vadd.f32 %v7326_v0, %v2482_v57 }
 0x6e0   :  { %v2516_v13 = vmax.f32 %v2500_v36, 0.0 }
 0x6e1   :  { %v2519_v19 = vmax.f32 %v2503_v28, 0.0 }
 0x6e2   :  { %2553 = vrot.lane.b32.xlu1 %v2516_v13, %s5895_s5 }
 0x6ea   :  { %2555 = vrot.lane.b32.xlu1 %v2517_v37, %s5895_s5 }
 0x6f0   :  { %v2646_v10 = vpop.f32.mrf.mxu3 }
 0x6f1   :  { %v2647_v51 = vadd.f32 %v2646_v10, %v2619_v41 }
 0x6f2   :  { %2557 = vrot.lane.b32.xlu1 %v2518_v27, %s5895_s5 }
 0x6f9   :  { %v2194_v29 = vpop.permute.xlu1 %2193 }
 0x6fa   :  { %v2255_v60 = vsel %vm9251_vm4, %v2194_v29, 0.0 }
 0x6fb   :  { %2256 = vadd.xlane.f32.xlu0 %v2255_v60 }
 0x703   :  { %v2245_v47 = vpop.xlane.xlu2 %2244  ;;  %2259 = vadd.xlane.f32.xlu0 %v2258_v14 }
 0x704   :  { %v2271_v38 = vmul.f32 %v2245_v47, %v7141_v33  ;;  %v2248_v55 = vpop.xlane.xlu0 %2247 }
 0x705   :  { %v2272_v35 = vmul.f32 %v2248_v55, %v7141_v33 }
 0x706   :  { %v2287_v39 = vadd.f32 1e-05, %v2271_v38 }
 0x707   :  { %v2288_v63 = vadd.f32 1e-05, %v2272_v35 }
 0x708   :  { %5463 = vrsqrt.f32 %v2287_v39  ;;  %vm2399_vm3 = vweird.f32 %v2287_v39 }
 0x709   :  { %vm2409_vm0 = vweird.f32 %v2288_v63 }
 0x70b   :  { %v2251_v54 = vpop.xlane.xlu2 %2250 }
 0x70c   :  { %v2273_v12 = vmul.f32 %v2251_v54, %v7141_v33  ;;  %v5587_v54 = vld [vmem:[%s9116_s8 + $0x8] sm:$0xff] }
 0x70e   :  { %v5464_v58 = vpop.eup %5463  ;;  %v2289_v20 = vadd.f32 1e-05, %v2273_v12 }
 0x70f   :  { %v2394_v21 = vmul.f32 %v5464_v58, %v2287_v39  ;;  %vm2400_vm1 = vweird.f32 %v5464_v58 }
 0x710   :  { %5465 = vrsqrt.f32 %v2289_v20  ;;  %vm2401_vm6 = vmor %vm2399_vm3, %vm2400_vm1  ;;  %vm2419_vm7 = vweird.f32 %v2289_v20 }
 0x711   :  { %v2395_v44 = vmul.f32 %v5464_v58, %v2394_v21  ;;  %5467 = vrsqrt.f32 %v2288_v63  ;;  %vm9268_vm1 = vmmov %vm9264_vm14 }
 0x712   :  { %vm9269_vm3 = vmmov %vm9261_vm9 }
 0x713   :  { %v2396_v7 = vmul.f32 0.5, %v2395_v44 }
 0x715   :  { %v2397_v23 = vsub.f32 1.5, %v2396_v7  ;;  %v9262_v7 = vld [vmem:[#allocation30_spill] sm:$0xff] }
 0x716   :  { %v5466_v26 = vpop.eup %5465 }
 0x717   :  { %v2398_v52 = vmul.f32 %v5464_v58, %v2397_v23  ;;  %v2414_v2 = vmul.f32 %v5466_v26, %v2289_v20  ;;  %2559 = vrot.lane.b32.xlu0 %v2519_v19, %s5895_s5  ;;  %vm2420_vm8 = vweird.f32 %v5466_v26  ;;  %v5468_v4 = vpop.eup %5467 }
 0x718   :  { %vm2421_vm13 = vmor %vm2419_vm7, %vm2420_vm8  ;;  %v2404_v29 = vmul.f32 %v5468_v4, %v2288_v63  ;;  %vm2410_vm12 = vweird.f32 %v5468_v4 }
 0x719   :  { %v2402_v49 = vsel %vm2401_vm6, %v5464_v58, %v2398_v52  ;;  %v2415_v3 = vmul.f32 %v5466_v26, %v2414_v2  ;;  %vm2411_vm4 = vmor %vm2409_vm0, %vm2410_vm12 }
 0x71a   :  { %v2463_v36 = vmul.f32 %v2402_v49, %v7293_v42  ;;  %vm9272_vm6 = vmmov %vm9268_vm1 }
 0x71b   :  { %v2416_v13 = vmul.f32 0.5, %v2415_v3  ;;  %vm9275_vm8 = vmmov %vm9268_vm1 }
 0x71c   :  { %v2649_v22 = vpop.f32.mrf.mxu3  ;;  %v2484_v37 = vmul.f32 %v7317_v6, %v2463_v36  ;;  %vm9279_vm12 = vmmov %vm9268_vm1 }
 0x71d   :  { %v2417_v25 = vsub.f32 1.5, %v2416_v13  ;;  %v2650_v16 = vadd.f32 %v2649_v22, %v2619_v41  ;;  %v5589_v13 = vld [vmem:[%s9116_s8 + $0x18] sm:$0xff]  ;;  %vm9281_vm0 = vmmov %vm9269_vm3 }
 0x71e   :  { %v2505_v8 = vadd.f32 %v7326_v0, %v2484_v37 }
 0x71f   :  { %v2418_v48 = vmul.f32 %v5466_v26, %v2417_v25  ;;  %v2798_v9 = vpack.c.bf16 %v2650_v16, %v2647_v51  ;;  %v9270_v51 = vld [vmem:[#allocation32_spill] sm:$0xff] }
 0x720   :  { %v2521_v60 = vmax.f32 %v2505_v8, 0.0 }
 0x721   :  { %v2422_v50 = vsel %vm2421_vm13, %v5466_v26, %v2418_v48  ;;  %2806 = vmatpush.bf16.msra.mxu0 %v2798_v9  ;;  %2849 = vrot.lane.b32.xlu2 %v2798_v9, %s5894_s27  ;;  %v9273_v9 = vld [vmem:[#allocation33_spill] sm:$0xff] }
 0x722   :  { %v2465_v42 = vmul.f32 %v2422_v50, %v7288_v62  ;;  %v2405_v62 = vmul.f32 %v5468_v4, %v2404_v29 }
 0x724   :  { %v2242_v27 = vpop.xlane.xlu1 %2241  ;;  %5025 = vmatmul.msk.bf16.vlgmr.msra.gmra.mxu0 %vm9260_vm15, %v5586_v11  ;;  %v2486_v46 = vmul.f32 %v7317_v6, %v2465_v42  ;;  %v2406_v61 = vmul.f32 0.5, %v2405_v62  ;;  %v5590_v11 = vld [vmem:[%s9116_s8 + $0x20] sm:$0xff]  ;;  %vm9276_vm15 = vmmov %vm9269_vm3 }
 0x725   :  { %v2270_v1 = vmul.f32 %v2242_v27, %v7141_v33 }
 0x726   :  { %v2507_v31 = vadd.f32 %v7326_v0, %v2486_v46  ;;  %v2407_v39 = vsub.f32 1.5, %v2406_v61 }
 0x727   :  { %v2286_v40 = vadd.f32 1e-05, %v2270_v1  ;;  %v9277_v1 = vld [vmem:[#allocation34_spill] sm:$0xff] }
 0x728   :  { %v2523_v47 = vmax.f32 %v2507_v31, 0.0  ;;  %v2408_v12 = vmul.f32 %v5468_v4, %v2407_v39 }
 0x729   :  { %5469 = vrsqrt.f32 %v2286_v40  ;;  %2563 = vrot.lane.b32.xlu2 %v2521_v60, %s5895_s5  ;;  %vm2389_vm2 = vweird.f32 %v2286_v40 }
 0x72a   :  { %v2412_v20 = vsel %vm2411_vm4, %v5468_v4, %v2408_v12 }
 0x72b   :  { %v2464_v55 = vmul.f32 %v2412_v20, %v7301_v34  ;;  %v5588_v34 = vld [vmem:[%s9116_s8 + $0x10] sm:$0xff] }
 0x72d   :  { %v2485_v26 = vmul.f32 %v7317_v6, %v2464_v55 }
 0x72f   :  { %v5470_v14 = vpop.eup %5469  ;;  %v2506_v2 = vadd.f32 %v7326_v0, %v2485_v26 }
 0x730   :  { %v2384_v38 = vmul.f32 %v5470_v14, %v2286_v40  ;;  %vm2390_vm5 = vweird.f32 %v5470_v14 }
 0x731   :  { %2567 = vrot.lane.b32.xlu2 %v2523_v47, %s5895_s5  ;;  %vm2391_vm10 = vmor %vm2389_vm2, %vm2390_vm5  ;;  %v2522_v41 = vmax.f32 %v2506_v2, 0.0  ;;  %v5593_v2 = vld [vmem:[%s9116_s8 + $0x30] sm:$0xff] }
 0x732   :  { %v2385_v59 = vmul.f32 %v5470_v14, %v2384_v38  ;;  %vm9280_vm5 = vmmov %vm9269_vm3 }
 0x734   :  { %v2386_v45 = vmul.f32 0.5, %v2385_v59  ;;  %5026 = vmatmul.msk.bf16.gmra.mxu0 %vm9261_vm9, %v5587_v54  ;;  %v7548_v59 = vld [vmem:[#allocation9 + $0x1] ss:$0 sm:$0xff] }
 0x736   :  { %v2387_v57 = vsub.f32 1.5, %v2386_v45 }
 0x738   :  { %v2388_v58 = vmul.f32 %v5470_v14, %v2387_v57 }
 0x73a   :  { %v2392_v21 = vsel %vm2391_vm10, %v5470_v14, %v2388_v58 }
 0x73b   :  { %v2462_v44 = vmul.f32 %v2392_v21, %v7320_v56  ;;  %v9266_v56 = vld [vmem:[#allocation31_spill] sm:$0xff] }
 0x73c   :  { %v2550_v28 = vpop.permute.xlu1 %2549 }
 0x73d   :  { %v7498_v10 = vadd.f32 %v2550_v28, %v9262_v7  ;;  %v2483_v23 = vmul.f32 %v7317_v6, %v2462_v44 }
 0x73f   :  { %9263 = vst [vmem:[#allocation44_spill] sm:$0xff] %v7498_v10  ;;  %5012 = vmatmul.msk.f32.gmra.mxu3 %vm9264_vm14, %v7498_v10  ;;  %v2504_v35 = vadd.f32 %v7326_v0, %v2483_v23  ;;  %v7542_v46 = vpop.f32.mrf.mxu3  ;;  %v5592_v23 = vld [vmem:[%s9117_s7] sm:$0xff]  ;;  %vm9282_vm14 = vmmov %vm9281_vm0 }
 0x741   :  { %v2520_v19 = vmax.f32 %v2504_v35, 0.0 }
 0x743   :  { %2561 = vrot.lane.b32.xlu1 %v2520_v19, %s5895_s5 }
 0x744   :  { %v2552_v43 = vpop.permute.xlu1 %2551  ;;  %5027 = vmatmul.msk.bf16.gmra.mxu0 %vm9265_vm11, %v5588_v34 }
 0x745   :  { %v7511_v52 = vadd.f32 %v2552_v43, %v9266_v56 }
 0x747   :  { %9267 = vst [vmem:[#allocation47_spill] sm:$0xff] %v7511_v52  ;;  %5013 = vmatmul.msk.f32.gmra.mxu3 %vm9268_vm1, %v7511_v52  ;;  %v2753_v39 = vpop.f32.mrf.mxu3 }
 0x748   :  { %v2754_v45 = vadd.f32 %v7548_v59, %v2753_v39 }
 0x74b   :  { %2565 = vrot.lane.b32.xlu1 %v2522_v41, %s5895_s5 }
 0x750   :  { %v2254_v49 = vpop.xlane.xlu2 %2253 }
 0x751   :  { %v2274_v63 = vmul.f32 %v2254_v49, %v7141_v33 }
 0x753   :  { %v2290_v3 = vadd.f32 1e-05, %v2274_v63 }
 0x754   :  { %v2554_v36 = vpop.permute.xlu1 %2553  ;;  %5028 = vmatmul.msk.bf16.gmra.mxu0 %vm9269_vm3, %v5589_v13 }
 0x755   :  { %5471 = vrsqrt.f32 %v2290_v3  ;;  %v7523_v22 = vadd.f32 %v2554_v36, %v9270_v51  ;;  %vm2429_vm13 = vweird.f32 %v2290_v3 }
 0x757   :  { %9271 = vst [vmem:[#allocation50_spill] sm:$0xff] %v7523_v22  ;;  %5014 = vmatmul.msk.f32.gmra.mxu3 %vm9272_vm6, %v7523_v22 }
 0x75b   :  { %v5472_v25 = vpop.eup %5471 }
 0x75c   :  { %v2424_v16 = vmul.f32 %v5472_v25, %v2290_v3  ;;  %v2556_v48 = vpop.permute.xlu1 %2555  ;;  %vm2430_vm7 = vweird.f32 %v5472_v25 }
 0x75d   :  { %v7528_v37 = vadd.f32 %v2556_v48, %v9273_v9  ;;  %vm2431_vm9 = vmor %vm2429_vm13, %vm2430_vm7 }
 0x75e   :  { %v2425_v50 = vmul.f32 %v5472_v25, %v2424_v16  ;;  %vm9286_vm7 = vmmov %vm9281_vm0 }
 0x75f   :  { %9274 = vst [vmem:[#allocation48_spill] sm:$0xff] %v7528_v37  ;;  %5015 = vmatmul.msk.f32.gmra.mxu3 %vm9275_vm8, %v7528_v37  ;;  %v2756_v20 = vpop.f32.mrf.mxu3  ;;  %vm9285_vm8 = vmmov %vm9281_vm0 }
 0x760   :  { %v2426_v4 = vmul.f32 0.5, %v2425_v50  ;;  %v2757_v55 = vadd.f32 %v7548_v59, %v2756_v20  ;;  %v5594_v50 = vld [vmem:[%s9117_s7 + $0x8] sm:$0xff]  ;;  %vm9287_vm13 = vmmov %vm9281_vm0 }
 0x762   :  { %v2427_v42 = vsub.f32 1.5, %v2426_v4 }
 0x764   :  { %v2428_v8 = vmul.f32 %v5472_v25, %v2427_v42  ;;  %v2558_v27 = vpop.permute.xlu1 %2557  ;;  %5029 = vmatmul.msk.bf16.gmra.mxu0 %vm9276_vm15, %v5590_v11  ;;  %vm9288_vm15 = vmmov %vm9281_vm0 }
 0x765   :  { %v7537_v29 = vadd.f32 %v2558_v27, %v9277_v1  ;;  %v5595_v27 = vld [vmem:[%s9116_s8 + $0x38] sm:$0xff] }
 0x766   :  { %v2432_v40 = vsel %vm2431_vm9, %v5472_v25, %v2428_v8  ;;  %v9283_v25 = vld [vmem:[#allocation35_spill] sm:$0xff]  ;;  %v9289_v1 = vld [vmem:[#allocation36_spill] sm:$0xff]  ;;  %vm9291_vm9 = vmmov %vm9272_vm6 }
 0x767   :  { %9278 = vst [vmem:[#allocation51_spill] sm:$0xff] %v7537_v29  ;;  %v2466_v60 = vmul.f32 %v2432_v40, %v7374_v32  ;;  %5016 = vmatmul.msk.f32.gmra.mxu3 %vm9279_vm12, %v7537_v29  ;;  %v5591_v32 = vld [vmem:[%s9116_s8 + $0x28] sm:$0xff]  ;;  %vm9294_vm12 = vmmov %vm9281_vm0 }
 0x769   :  { %v2487_v62 = vmul.f32 %v7317_v6, %v2466_v60 }
 0x76b   :  { %v2508_v31 = vadd.f32 %v7326_v0, %v2487_v62 }
 0x76d   :  { %v2524_v61 = vmax.f32 %v2508_v31, 0.0  ;;  %v5598_v31 = vld [vmem:[%s9117_s7 + $0x20] sm:$0xff] }
 0x76e   :  { %v2257_v14 = vpop.xlane.xlu0 %2256 }
 0x76f   :  { %v2275_v47 = vmul.f32 %v2257_v14, %v7141_v33  ;;  %2569 = vrot.lane.b32.xlu0 %v2524_v61, %s5895_s5 }
 0x771   :  { %v2291_v38 = vadd.f32 1e-05, %v2275_v47 }
 0x773   :  { %5473 = vrsqrt.f32 %v2291_v38  ;;  %vm2439_vm2 = vweird.f32 %v2291_v38 }
 0x774   :  { %5030 = vmatmul.msk.bf16.gmra.mxu0 %vm9280_vm5, %v5591_v32  ;;  %vm9295_vm5 = vmmov %vm9272_vm6 }
 0x776   :  { %v2260_v54 = vpop.xlane.xlu0 %2259 }
 0x777   :  { %v2276_v12 = vmul.f32 %v2260_v54, %v7141_v33  ;;  %2935 = vrot.lane.b32.xlu0 %v2754_v45, %s5889_s6 }
 0x779   :  { %v5474_v57 = vpop.eup %5473  ;;  %v2292_v58 = vadd.f32 1e-05, %v2276_v12  ;;  %v9299_v12 = vld [vmem:[#allocation39_spill] sm:$0xff] }
 0x77a   :  { %v2434_v21 = vmul.f32 %v5474_v57, %v2291_v38  ;;  %vm2440_vm4 = vweird.f32 %v5474_v57  ;;  %v9296_v38 = vld [vmem:[#allocation38_spill] sm:$0xff] }
 0x77b   :  { %5475 = vrsqrt.f32 %v2292_v58  ;;  %v2850_v44 = vpop.permute.xlu2 %2849  ;;  %vm2441_vm10 = vmor %vm2439_vm2, %vm2440_vm4  ;;  %vm2449_vm1 = vweird.f32 %v2292_v58 }
 0x77c   :  { %v2435_v28 = vmul.f32 %v5474_v57, %v2434_v21  ;;  %2859 = vmatpush.bf16.msrb.mxu1 %v2850_v44  ;;  %vm9301_vm4 = vmmov %vm9286_vm7  ;;  %v5600_v44 = vld [vmem:[%s9117_s7 + $0x30] sm:$0xff] }
 0x77e   :  { %v2436_v7 = vmul.f32 0.5, %v2435_v28 }
 0x77f   :  { %5033 = vmatmul.msk.bf16.vlgmr.msrb.gmra.mxu1 %vm9281_vm0, %v5592_v23  ;;  %2937 = vrot.lane.b32.xlu0 %v2757_v55, %s5889_s6  ;;  %vm9298_vm0 = vmmov %vm9295_vm5  ;;  %v9304_v55 = vld [vmem:[#allocation40_spill] sm:$0xff] }
 0x780   :  { %v2437_v35 = vsub.f32 1.5, %v2436_v7  ;;  %vm9302_vm2 = vmmov %vm9298_vm0 }
 0x781   :  { %v5476_v19 = vpop.eup %5475 }
 0x782   :  { %v2438_v26 = vmul.f32 %v5474_v57, %v2437_v35  ;;  %v2444_v43 = vmul.f32 %v5476_v19, %v2292_v58  ;;  %vm2450_vm11 = vweird.f32 %v5476_v19  ;;  %v5599_v58 = vld [vmem:[%s9117_s7 + $0x28] sm:$0xff] }
 0x783   :  { %vm2451_vm3 = vmor %vm2449_vm1, %vm2450_vm11  ;;  %v2564_v60 = vpop.permute.xlu2 %2563 }
 0x784   :  { %v2442_v34 = vsel %vm2441_vm10, %v5474_v57, %v2438_v26  ;;  %v2445_v56 = vmul.f32 %v5476_v19, %v2444_v43  ;;  %5031 = vmatmul.msk.bf16.gmra.mxu0 %vm9282_vm14, %v5593_v2  ;;  %vm9303_vm10 = vmmov %vm9301_vm4  ;;  %v5601_v43 = vld [vmem:[%s9117_s7 + $0x38] sm:$0xff] }
 0x785   :  { %v2467_v41 = vmul.f32 %v2442_v34, %v7394_v24  ;;  %vm9306_vm14 = vmmov %vm9298_vm0 }
 0x786   :  { %v2446_v49 = vmul.f32 0.5, %v2445_v56  ;;  %vm9307_vm11 = vmmov %vm9301_vm4  ;;  %v7652_v56 = vpop.f32.mrf.mxu1 }
 0x787   :  { %v2488_v63 = vmul.f32 %v7317_v6, %v2467_v41  ;;  %9308 = vst [vmem:[#allocation30_spill] sm:$0xff] %v7652_v56  ;;  %vm9311_vm1 = vmmov %vm9298_vm0 }
 0x788   :  { %v2447_v3 = vsub.f32 1.5, %v2446_v49  ;;  %v9309_v49 = vld [vmem:[#allocation41_spill] sm:$0xff] }
 0x789   :  { %v2560_v36 = vpop.permute.xlu0 %2559  ;;  %v2509_v13 = vadd.f32 %v7326_v0, %v2488_v63 }
 0x78a   :  { %v2448_v51 = vmul.f32 %v5476_v19, %v2447_v3  ;;  %v7571_v16 = vadd.f32 %v2560_v36, %v9283_v25 }
 0x78b   :  { %v2525_v48 = vmax.f32 %v2509_v13, 0.0  ;;  %v2568_v45 = vpop.permute.xlu2 %2567  ;;  %v9313_v13 = vld [vmem:[#allocation42_spill] sm:$0xff] }
 0x78c   :  { %9284 = vst [vmem:[#allocation53_spill] sm:$0xff] %v7571_v16  ;;  %v2452_v9 = vsel %vm2451_vm3, %v5476_v19, %v2448_v51  ;;  %5017 = vmatmul.msk.f32.gmra.mxu3 %vm9272_vm6, %v7571_v16  ;;  %v7623_v57 = vadd.f32 %v2568_v45, %v9299_v12  ;;  %vm9315_vm3 = vmmov %vm9298_vm0 }
 0x78d   :  { %v2468_v24 = vmul.f32 %v2452_v9, %v7369_v15  ;;  %2571 = vrot.lane.b32.xlu1 %v2525_v48, %s5895_s5  ;;  %v2751_v15 = vadd.f32 %v7548_v59, %v7542_v46  ;;  %v9292_v46 = vld [vmem:[#allocation37_spill] sm:$0xff] }
 0x78e   :  { %v7605_v62 = vadd.f32 %v2564_v60, %v9292_v46  ;;  %9300 = vst [vmem:[#allocation28_spill] sm:$0xff] %v7623_v57  ;;  %v7661_v3 = vpop.f32.mrf.mxu1 }
 0x78f   :  { %5034 = vmatmul.msk.bf16.gmra.mxu1 %vm9285_vm8, %v5594_v50  ;;  %v2489_v4 = vmul.f32 %v7317_v6, %v2468_v24  ;;  %v5596_v6 = vld [vmem:[%s9117_s7 + $0x10] sm:$0xff]  ;;  %9312 = vst [vmem:[#allocation32_spill] sm:$0xff] %v7661_v3 }
 0x790   :  { %9293 = vst [vmem:[#allocation27_spill] sm:$0xff] %v7605_v62 }
 0x791   :  { %v2510_v42 = vadd.f32 %v7326_v0, %v2489_v4  ;;  %v5597_v0 = vld [vmem:[%s9117_s7 + $0x18] sm:$0xff] }
 0x793   :  { %v2526_v8 = vmax.f32 %v2510_v42, 0.0 }
 0x794   :  { %5032 = vmatmul.msk.bf16.gmra.mxu0 %vm9286_vm7, %v5595_v27 }
 0x795   :  { %2573 = vrot.lane.b32.xlu2 %v2526_v8, %s5895_s5 }
 0x79d   :  { %2933 = vrot.lane.b32.xlu2 %v2751_v15, %s5889_s6 }
 0x79f   :  { %5035 = vmatmul.msk.bf16.gmra.mxu1 %vm9287_vm13, %v5596_v6 }
 0x7a1   :  { %v7650_v34 = vpop.f32.mrf.mxu0 }
 0x7a9   :  { %v7654_v2 = vpop.f32.mrf.mxu0 }
 0x7af   :  { %5036 = vmatmul.msk.bf16.gmra.mxu1 %vm9288_vm15, %v5597_v0 }
 0x7b1   :  { %v7666_v25 = vpop.f32.mrf.mxu0 }
 0x7b5   :  { %v2562_v11 = vpop.permute.xlu1 %2561 }
 0x7b6   :  { %v7600_v40 = vadd.f32 %v2562_v11, %v9289_v1 }
 0x7b8   :  { %9290 = vst [vmem:[#allocation25_spill] sm:$0xff] %v7600_v40  ;;  %5018 = vmatmul.msk.f32.gmra.mxu3 %vm9291_vm9, %v7600_v40 }
 0x7b9   :  { %v7673_v50 = vpop.f32.mrf.mxu0 }
 0x7bd   :  { %v2566_v14 = vpop.permute.xlu1 %2565 }
 0x7be   :  { %v7616_v39 = vadd.f32 %v2566_v14, %v9296_v38 }
 0x7bf   :  { %5037 = vmatmul.msk.bf16.gmra.mxu1 %vm9294_vm12, %v5598_v31 }
 0x7c0   :  { %5019 = vmatmul.msk.f32.gmra.mxu3 %vm9295_vm5, %v7605_v62  ;;  %9297 = vst [vmem:[#allocation26_spill] sm:$0xff] %v7616_v39 }
 0x7c1   :  { %v7678_v42 = vpop.f32.mrf.mxu0 }
 0x7c2   :  { %v2759_v61 = vpop.f32.mrf.mxu3 }
 0x7c3   :  { %v2760_v47 = vadd.f32 %v7548_v59, %v2759_v61 }
 0x7c5   :  { %2939 = vrot.lane.b32.xlu1 %v2760_v47, %s5889_s6 }
 0x7c8   :  { %5020 = vmatmul.msk.f32.gmra.mxu3 %vm9298_vm0, %v7616_v39 }
 0x7c9   :  { %v7682_v27 = vpop.f32.mrf.mxu0 }
 0x7ca   :  { %v2762_v32 = vpop.f32.mrf.mxu3 }
 0x7cb   :  { %v2763_v54 = vadd.f32 %v7548_v59, %v2762_v32 }
 0x7cd   :  { %2941 = vrot.lane.b32.xlu1 %v2763_v54, %s5889_s6 }
 0x7cf   :  { %5038 = vmatmul.msk.bf16.gmra.mxu1 %vm9301_vm4, %v5599_v58 }
 0x7d0   :  { %5021 = vmatmul.msk.f32.gmra.mxu3 %vm9302_vm2, %v7623_v57 }
 0x7d1   :  { %v7686_v6 = vpop.f32.mrf.mxu0 }
 0x7d9   :  { %v7690_v11 = vpop.f32.mrf.mxu0 }
 0x7da   :  { %v2765_v20 = vpop.f32.mrf.mxu3 }
 0x7db   :  { %v2766_v21 = vadd.f32 %v7548_v59, %v2765_v20 }
 0x7dd   :  { %2943 = vrot.lane.b32.xlu2 %v2766_v21, %s5889_s6 }
 0x7df   :  { %5039 = vmatmul.msk.bf16.gmra.mxu1 %vm9303_vm10, %v5600_v44 }
 0x7e1   :  { %v2570_v28 = vpop.permute.xlu0 %2569  ;;  %v7696_v31 = vpop.f32.mrf.mxu0 }
 0x7e2   :  { %v7638_v7 = vadd.f32 %v2570_v28, %v9304_v55  ;;  %v2768_v23 = vpop.f32.mrf.mxu3 }
 0x7e3   :  { %v2769_v35 = vadd.f32 %v7548_v59, %v2768_v23 }
 0x7e4   :  { %9305 = vst [vmem:[#allocation29_spill] sm:$0xff] %v7638_v7  ;;  %5022 = vmatmul.msk.f32.gmra.mxu3 %vm9306_vm14, %v7638_v7 }
 0x7e5   :  { %2945 = vrot.lane.b32.xlu2 %v2769_v35, %s5889_s6 }
 0x7e9   :  { %v7702_v38 = vpop.f32.mrf.mxu0 }
 0x7ea   :  { %v2771_v19 = vpop.f32.mrf.mxu3 }
 0x7eb   :  { %v2772_v26 = vadd.f32 %v7548_v59, %v2771_v19 }
 0x7ed   :  { %2947 = vrot.lane.b32.xlu0 %v2772_v26, %s5889_s6 }
 0x7ef   :  { %5040 = vmatmul.msk.bf16.gmra.mxu1 %vm9307_vm11, %v5601_v43  ;;  %v2574_v36 = vpop.permute.xlu2 %2573 }
 0x7f0   :  { %v7664_v51 = vadd.f32 %v2574_v36, %v9313_v13 }
 0x7f1   :  { %v7708_v12 = vpop.f32.mrf.mxu0 }
 0x7f2   :  { %9314 = vst [vmem:[#allocation33_spill] sm:$0xff] %v7664_v51 }
 0x7f9   :  { %v7714_v44 = vpop.f32.mrf.mxu0 }
 0x7fc   :  { %v7670_v48 = vpop.f32.mrf.mxu1 }
 0x7ff   :  { %v2572_v41 = vpop.permute.xlu1 %2571 }
 0x800   :  { %v7657_v63 = vadd.f32 %v2572_v41, %v9309_v49 }
 0x801   :  { %v7720_v55 = vpop.f32.mrf.mxu0 }
 0x802   :  { %9310 = vst [vmem:[#allocation31_spill] sm:$0xff] %v7657_v63  ;;  %5023 = vmatmul.msk.f32.gmra.mxu3 %vm9311_vm1, %v7657_v63 }
 0x804   :  { %v7676_v4 = vpop.f32.mrf.mxu1 }
 0x809   :  { %v7726_v19 = vpop.f32.mrf.mxu0 }
 0x80a   :  { %5024 = vmatmul.msk.f32.gmra.mxu3 %vm9315_vm3, %v7664_v51 }
 0x80c   :  { %v7680_v8 = vpop.f32.mrf.mxu1 }
 0x80f   :  { %v2774_v9 = vpop.f32.mrf.mxu3 }
 0x810   :  { %v2775_v24 = vadd.f32 %v7548_v59, %v2774_v9 }
 0x811   :  { %v7732_v43 = vpop.f32.mrf.mxu0 }
 0x812   :  { %2949 = vrot.lane.b32.xlu0 %v2775_v24, %s5889_s6 }
 0x814   :  { %v7684_v15 = vpop.f32.mrf.mxu1 }
 0x819   :  { %v7740_v36 = vpop.f32.mrf.mxu0 }
 0x81c   :  { %v7688_v0 = vpop.f32.mrf.mxu1 }
 0x824   :  { %v7692_v60 = vpop.f32.mrf.mxu1 }
 0x82c   :  { %v7699_v47 = vpop.f32.mrf.mxu1 }
 0x834   :  { %v7706_v54 = vpop.f32.mrf.mxu1 }
 0x83b   :  { %v2777_v1 = vpop.f32.mrf.mxu3 }
 0x83c   :  { %v2778_v46 = vadd.f32 %v7548_v59, %v2777_v1  ;;  %v7712_v21 = vpop.f32.mrf.mxu1 }
 0x83d   :  { %v2909_v10 = vadd.f32 %v7712_v21, %v7696_v31 }
 0x83e   :  { %2951 = vrot.lane.b32.xlu1 %v2778_v46, %s5889_s6 }
 0x843   :  { %v2780_v61 = vpop.f32.mrf.mxu3 }
 0x844   :  { %v2781_v14 = vadd.f32 %v7548_v59, %v2780_v61  ;;  %v7718_v28 = vpop.f32.mrf.mxu1 }
 0x846   :  { %2953 = vrot.lane.b32.xlu1 %v2781_v14, %s5889_s6  ;;  %v2934_v14 = vpop.permute.xlu2 %2933 }
 0x84b   :  { %v2783_v32 = vpop.f32.mrf.mxu3 }
 0x84c   :  { %v2784_v45 = vadd.f32 %v7548_v59, %v2783_v32  ;;  %v7728_v26 = vpop.f32.mrf.mxu1  ;;  %v2901_v32 = vadd.f32 %v7670_v48, %v7650_v34 }
 0x84e   :  { %2955 = vrot.lane.b32.xlu2 %v2784_v45, %s5889_s6  ;;  %v2936_v45 = vpop.permute.xlu0 %2935 }
 0x853   :  { %v2786_v58 = vpop.f32.mrf.mxu3 }
 0x854   :  { %v2787_v20 = vadd.f32 %v7548_v59, %v2786_v58  ;;  %v7734_v41 = vpop.f32.mrf.mxu1  ;;  %v7788_v58 = vadd.f32 %v2934_v14, %v2901_v32 }
 0x856   :  { %2957 = vrot.lane.b32.xlu2 %v2787_v20, %s5889_s6  ;;  %v2902_v20 = vadd.f32 %v7676_v4, %v7654_v2 }
 0x85c   :  { %v7738_v49 = vpop.f32.mrf.mxu1 }
 0x85d   :  { %v2913_v40 = vadd.f32 %v7738_v49, %v7720_v55 }
 0x85e   :  { %3323 = vrot.lane.b32.xlu2 %v7673_v50, %s5889_s6 }
 0x864   :  { %v7744_v13 = vpop.f32.mrf.mxu1 }
 0x866   :  { %3325 = vrot.lane.b32.xlu2 %v7678_v42, %s5889_s6 }
 0x867   :  { %v2789_v23 = vpop.f32.mrf.mxu3 }
 0x868   :  { %v2790_v35 = vadd.f32 %v7548_v59, %v2789_v23 }
 0x86a   :  { %2959 = vrot.lane.b32.xlu0 %v2790_v35, %s5889_s6  ;;  %v5041_v35 = vmul.f32 -1.442695, %v7788_v58 }
 0x86c   :  { %v7758_v61 = vpop.f32.mrf.mxu1  ;;  %5477 = vpow2.f32 %v5041_v35 }
 0x86e   :  { %3335 = vrot.lane.b32.xlu2 %v7702_v38, %s5889_s6 }
 0x876   :  { %3337 = vrot.lane.b32.xlu2 %v7708_v12, %s5889_s6 }
 0x87e   :  { %3347 = vrot.lane.b32.xlu2 %v7740_v36, %s5889_s6 }
 0x885   :  { %v2792_v9 = vpop.f32.mrf.mxu3 }
 0x886   :  { %v2793_v24 = vadd.f32 %v7548_v59, %v2792_v9  ;;  %3525 = vrot.lane.b32.xlu2 %v7744_v13, %s5889_s6  ;;  %v7799_v9 = vpop.permute.xlu2 %2943 }
 0x888   :  { %2961 = vrot.lane.b32.xlu0 %v2793_v24, %s5889_s6  ;;  %v7801_v24 = vadd.f32 %v2936_v45, %v2902_v20  ;;  %v2904_v45 = vadd.f32 %v7684_v15, %v7673_v50  ;;  %v5478_v20 = vpop.eup %5477 }
 0x88d   :  { %v2795_v1 = vpop.f32.mrf.mxu3 }
 0x88e   :  { %v2796_v46 = vadd.f32 %v7548_v59, %v2795_v1  ;;  %3527 = vrot.lane.b32.xlu2 %v7758_v61, %s5889_s6  ;;  %v2940_v59 = vpop.permute.xlu1 %2939  ;;  %v7805_v1 = vpop.f32.mrf.mxu1 }
 0x88f   :  { %v7819_v35 = vpop.permute.xlu2 %2945  ;;  %v7821_v51 = vadd.f32 %v2940_v59, %v2904_v45  ;;  %v2911_v59 = vadd.f32 %v7728_v26, %v7708_v12 }
 0x890   :  { %2963 = vrot.lane.b32.xlu1 %v2796_v46, %s5889_s6  ;;  %3317 = vrot.lane.b32.xlu0 %v7650_v34, %s5889_s6  ;;  %v2903_v34 = vadd.f32 %v7680_v8, %v7666_v25  ;;  %v2938_v46 = vpop.permute.xlu0 %2937 }
 0x892   :  { %v7812_v14 = vadd.f32 %v2938_v46, %v2903_v34  ;;  %v7827_v34 = vadd.f32 1.0, %v5478_v20 }
 0x894   :  { %v3070_v37 = vand.u32 2147483647, %v7827_v34  ;;  %vm3066_vm8 = vweird.f32 %v7827_v34 }
 0x896   :  { %v7796_v23 = vpop.permute.xlu1 %2941  ;;  %vm7905_vm13 = vcmp.eq.f32.partialorder %v3070_v37, 8.507059e+37  ;;  %v2915_v37 = vadd.f32 %v7758_v61, %v7732_v43  ;;  %v2910_v61 = vadd.f32 %v7718_v28, %v7702_v38 }
 0x898   :  { %3319 = vrot.lane.b32.xlu1 %v7654_v2, %s5889_s6  ;;  %3327 = vrot.lane.b32.xlu0 %v7682_v27, %s5889_s6  ;;  %v5042_v2 = vmul.f32 -1.442695, %v7801_v24  ;;  %v7829_v46 = vpop.permute.xlu0 %2947 }
 0x89a   :  { %5479 = vpow2.f32 %v5042_v2  ;;  %v5044_v2 = vmul.f32 -1.442695, %v7821_v51 }
 0x8a0   :  { %3321 = vrot.lane.b32.xlu1 %v7666_v25, %s5889_s6  ;;  %3329 = vrot.lane.b32.xlu0 %v7686_v6, %s5889_s6  ;;  %v5043_v25 = vmul.f32 -1.442695, %v7812_v14  ;;  %v5480_v50 = vpop.eup %5479 }
 0x8a1   :  { %v7835_v45 = vadd.f32 1.0, %v5480_v50 }
 0x8a2   :  { %5481 = vpow2.f32 %v5043_v25 }
 0x8a3   :  { %5483 = vrcp.f32 %v7827_v34  ;;  %vm3081_vm9 = vweird.f32 %v7835_v45 }
 0x8a4   :  { %5485 = vpow2.f32 %v5044_v2 }
 0x8a5   :  { %5487 = vrcp.f32 %v7835_v45 }
 0x8a8   :  { %3331 = vrot.lane.b32.xlu1 %v7690_v11, %s5889_s6  ;;  %3339 = vrot.lane.b32.xlu0 %v7714_v44, %s5889_s6  ;;  %v2956_v7 = vpop.permute.xlu2 %2955  ;;  %v5482_v57 = vpop.eup %5481 }
 0x8a9   :  { %v7848_v12 = vadd.f32 1.0, %v5482_v57  ;;  %v7852_v50 = vpop.eup %5483 }
 0x8aa   :  { %vm3067_vm6 = vweird.f32 %v7852_v50 }
 0x8ab   :  { %5489 = vrcp.f32 %v7848_v12  ;;  %vm7901_vm7 = vmor %vm3066_vm8, %vm3067_vm6  ;;  %vm3096_vm4 = vweird.f32 %v7848_v12 }
 0x8b0   :  { %3333 = vrot.lane.b32.xlu1 %v7696_v31, %s5889_s6  ;;  %3341 = vrot.lane.b32.xlu0 %v7720_v55, %s5889_s6  ;;  %v7814_v32 = vpop.permute.xlu1 %2951  ;;  %v2958_v2 = vpop.permute.xlu2 %2957 }
 0x8b1   :  { %v7875_v29 = vadd.f32 %v2958_v2, %v2913_v40  ;;  %v3072_v40 = vand.u32 2147483648, %v7827_v34 }
 0x8b3   :  { %v3073_v52 = vor.u32 1.1754944e-38, %v3072_v40 }
 0x8b8   :  { %3343 = vrot.lane.b32.xlu1 %v7726_v19, %s5889_s6  ;;  %3507 = vrot.lane.b32.xlu0 %v7688_v0, %s5889_s6  ;;  %v2954_v63 = vpop.permute.xlu1 %2953  ;;  %v7896_v2 = vpop.permute.xlu2 %3323 }
 0x8b9   :  { %v7839_v20 = vadd.f32 %v2954_v63, %v2911_v59 }
 0x8bb   :  { %v5051_v63 = vmul.f32 -1.442695, %v7839_v20 }
 0x8bd   :  { %5491 = vpow2.f32 %v5051_v63 }
 0x8c0   :  { %3345 = vrot.lane.b32.xlu1 %v7732_v43, %s5889_s6  ;;  %3511 = vrot.lane.b32.xlu0 %v7699_v47, %s5889_s6 }
 0x8c8   :  { %3509 = vrot.lane.b32.xlu1 %v7692_v60, %s5889_s6  ;;  %3515 = vrot.lane.b32.xlu0 %v7712_v21, %s5889_s6 }
 0x8d0   :  { %3513 = vrot.lane.b32.xlu1 %v7706_v54, %s5889_s6  ;;  %3519 = vrot.lane.b32.xlu0 %v7728_v26, %s5889_s6  ;;  %v7850_v26 = vpop.permute.xlu0 %2949 }
 0x8d8   :  { %3517 = vrot.lane.b32.xlu1 %v7718_v28, %s5889_s6  ;;  %3529 = vrot.lane.b32.xlu0 %v7805_v1, %s5889_s6  ;;  %v2906_v28 = vadd.f32 %v7692_v60, %v7682_v27  ;;  %v7973_v60 = vpop.permute.xlu2 %3325 }
 0x8dc   :  { %v2960_v59 = vpop.permute.xlu0 %2959 }
 0x8e0   :  { %3521 = vrot.lane.b32.xlu1 %v7734_v41, %s5889_s6  ;;  %3503 = vrot.lane.b32.xlu0 %v7680_v8, %s5889_s6  ;;  %v2912_v8 = vadd.f32 %v7734_v41, %v7714_v44  ;;  %v5486_v41 = vpop.eup %5485 }
 0x8e1   :  { %v7863_v57 = vadd.f32 1.0, %v5486_v41 }
 0x8e2   :  { %v7845_v25 = vadd.f32 %v2956_v7, %v2912_v8  ;;  %v7859_v7 = vpop.eup %5487 }
 0x8e3   :  { %v3077_v39 = vmul.f32 %v7859_v7, %v7835_v45  ;;  %v7867_v62 = vpop.eup %5489  ;;  %vm3082_vm15 = vweird.f32 %v7859_v7  ;;  %vm3111_vm14 = vweird.f32 %v7863_v57 }
 0x8e4   :  { %v5052_v44 = vmul.f32 -1.442695, %v7845_v25  ;;  %v5492_v63 = vpop.eup %5491  ;;  %v3092_v55 = vmul.f32 %v7867_v62, %v7848_v12  ;;  %vm7942_vm5 = vmor %vm3081_vm9, %vm3082_vm15  ;;  %vm3097_vm0 = vweird.f32 %v7867_v62 }
 0x8e5   :  { %v3078_v41 = vsub.f32 1.0, %v3077_v39  ;;  %vm7984_vm2 = vmor %vm3096_vm4, %vm3097_vm0 }
 0x8e6   :  { %5493 = vpow2.f32 %v5052_v44  ;;  %v2914_v44 = vadd.f32 %v7744_v13, %v7726_v19  ;;  %v5053_v13 = vmul.f32 -1.442695, %v7875_v29 }
 0x8e7   :  { %5495 = vrcp.f32 %v7863_v57 }
 0x8e8   :  { %3523 = vrot.lane.b32.xlu1 %v7738_v49, %s5889_s6  ;;  %3499 = vrot.lane.b32.xlu0 %v7670_v48, %s5889_s6  ;;  %v3062_v48 = vmul.f32 %v7852_v50, %v7827_v34  ;;  %v7883_v49 = vadd.f32 %v2960_v59, %v2914_v44  ;;  %v3085_v59 = vand.u32 2147483647, %v7835_v45  ;;  %v3087_v34 = vand.u32 2147483648, %v7835_v45 }
 0x8ea   :  { %v3063_v8 = vsub.f32 1.0, %v3062_v48  ;;  %v7877_v48 = vadd.f32 1.0, %v5492_v63  ;;  %9316 = vst [vmem:[#allocation34_spill] sm:$0xff] %v7883_v49  ;;  %v3093_v63 = vsub.f32 1.0, %v3092_v55  ;;  %vm7923_vm12 = vcmp.eq.f32.partialorder %v3085_v59, 8.507059e+37 }
 0x8eb   :  { %v3088_v21 = vor.u32 1.1754944e-38, %v3087_v34 }
 0x8ec   :  { %v3064_v16 = vmul.f32 %v7852_v50, %v3063_v8  ;;  %5497 = vrcp.f32 %v7877_v48 }
 0x8ee   :  { %v3065_v19 = vadd.f32 %v7852_v50, %v3064_v16  ;;  %v5054_v16 = vmul.f32 -1.442695, %v7883_v49 }
 0x8f0   :  { %3505 = vrot.lane.b32.xlu1 %v7684_v15, %s5889_s6  ;;  %v5494_v15 = vpop.eup %5493  ;;  %v3069_v55 = vsel %vm7901_vm7, %v7852_v50, %v3065_v19  ;;  %v3094_v50 = vmul.f32 %v7867_v62, %v3093_v63  ;;  %v2916_v19 = vadd.f32 %v7805_v1, %v7740_v36  ;;  %v7948_v1 = vadd.f32 %v7850_v26, %v2909_v10 }
 0x8f1   :  { %v7886_v8 = vadd.f32 1.0, %v5494_v15  ;;  %v7891_v39 = vpop.eup %5495  ;;  %v7938_v45 = vsel %vm7905_vm13, %v3073_v52, %v3069_v55  ;;  %v2907_v63 = vadd.f32 %v7699_v47, %v7686_v6  ;;  %v2908_v26 = vadd.f32 %v7706_v54, %v7690_v11 }
 0x8f2   :  { %v7932_v43 = vpop.eup %5497  ;;  %9326 = vst [vmem:[#allocation36_spill] sm:$0xff] %v7948_v1  ;;  %v3095_v10 = vadd.f32 %v7867_v62, %v3094_v50  ;;  %v3100_v6 = vand.u32 2147483647, %v7848_v12  ;;  %v5049_v11 = vmul.f32 -1.442695, %v7948_v1  ;;  %vm3112_vm10 = vweird.f32 %v7891_v39 }
 0x8f3   :  { %5499 = vrcp.f32 %v7886_v8  ;;  %v7994_v55 = vadd.f32 %v7819_v35, %v2907_v63  ;;  %v8001_v50 = vadd.f32 %v7829_v46, %v2908_v26  ;;  %vm8021_vm11 = vmor %vm3111_vm14, %vm3112_vm10  ;;  %vm3217_vm6 = vweird.f32 %v7932_v43 }
 0x8f4   :  { %5501 = vpow2.f32 %v5053_v13  ;;  %v3099_v5 = vsel %vm7984_vm2, %v7867_v62, %v3095_v10  ;;  %vm3101_vm1 = vcmp.eq.f32.partialorder %v3100_v6, 8.507059e+37  ;;  %vm3216_vm7 = vweird.f32 %v7877_v48 }
 0x8f5   :  { %5503 = vpow2.f32 %v5054_v16  ;;  %v7963_v16 = vadd.f32 %v7814_v32, %v2910_v61  ;;  %v5048_v63 = vmul.f32 -1.442695, %v8001_v50  ;;  %vm8068_vm13 = vmor %vm3216_vm7, %vm3217_vm6  ;;  %vm3231_vm15 = vweird.f32 %v7886_v8 }
 0x8f8   :  { %3501 = vrot.lane.b32.xlu1 %v7676_v4, %s5889_s6  ;;  %v3079_v4 = vmul.f32 %v7859_v7, %v3078_v41  ;;  %v3107_v41 = vmul.f32 %v7891_v39, %v7863_v57 }
 0x8f9   :  { %v7956_v38 = vpop.eup %5499 }
 0x8fa   :  { %v2962_v22 = vpop.permute.xlu0 %2961  ;;  %v3080_v30 = vadd.f32 %v7859_v7, %v3079_v4  ;;  %v3108_v40 = vsub.f32 1.0, %v3107_v41  ;;  %v5502_v44 = vpop.eup %5501  ;;  %v3227_v41 = vmul.f32 %v7956_v38, %v7886_v8  ;;  %vm3232_vm8 = vweird.f32 %v7956_v38 }
 0x8fb   :  { %v7930_v31 = vadd.f32 %v2962_v22, %v2915_v37  ;;  %v3102_v22 = vand.u32 2147483648, %v7848_v12  ;;  %v5504_v32 = vpop.eup %5503  ;;  %v7991_v12 = vadd.f32 %v7799_v9, %v2906_v28  ;;  %v5050_v37 = vmul.f32 -1.442695, %v7963_v16  ;;  %vm8082_vm9 = vmor %vm3231_vm15, %vm3232_vm8 }
 0x8fc   :  { %v3084_v52 = vsel %vm7942_vm5, %v7859_v7, %v3080_v30  ;;  %v3212_v30 = vmul.f32 %v7932_v43, %v7877_v48  ;;  %v3109_v27 = vmul.f32 %v7891_v39, %v3108_v40  ;;  %v3117_v9 = vand.u32 2147483648, %v7863_v57 }
 0x8fd   :  { %9323 = vst [vmem:[#allocation35_spill] sm:$0xff] %v7930_v31  ;;  %v5055_v7 = vmul.f32 -1.442695, %v7930_v31  ;;  %v3103_v47 = vor.u32 1.1754944e-38, %v3102_v22  ;;  %v7980_v54 = vsel %vm7923_vm12, %v3088_v21, %v3084_v52  ;;  %v8008_v35 = vadd.f32 1.0, %v5504_v32 }
 0x8fe   :  { %v3213_v21 = vsub.f32 1.0, %v3212_v30  ;;  %v3110_v61 = vadd.f32 %v7891_v39, %v3109_v27  ;;  %v3228_v36 = vsub.f32 1.0, %v3227_v41  ;;  %v5047_v22 = vmul.f32 -1.442695, %v7994_v55 }
 0x8ff   :  { %v3115_v52 = vand.u32 2147483647, %v7863_v57  ;;  %v8035_v27 = vsel %vm3101_vm1, %v3103_v47, %v3099_v5  ;;  %v3222_v47 = vand.u32 2147483648, %v7877_v48  ;;  %vm3261_vm10 = vweird.f32 %v8008_v35 }
 0x900   :  { %v3114_v30 = vsel %vm8021_vm11, %v7891_v39, %v3110_v61  ;;  %v3229_v32 = vmul.f32 %v7956_v38, %v3228_v36 }
 0x901   :  { %vm3116_vm3 = vcmp.eq.f32.partialorder %v3115_v52, 8.507059e+37  ;;  %v3223_v10 = vor.u32 1.1754944e-38, %v3222_v47 }
 0x902   :  { %v3318_v4 = vpop.permute.xlu0 %3317  ;;  %v2964_v13 = vpop.permute.xlu1 %2963 }
 0x903   :  { %v7950_v59 = vadd.f32 %v2964_v13, %v2916_v19  ;;  %v8003_v19 = vadd.f32 1.0, %v5502_v44  ;;  %v3365_v62 = vmul.f32 %v3318_v4, %v7938_v45  ;;  %v3214_v4 = vmul.f32 %v7932_v43, %v3213_v21 }
 0x904   :  { %v3118_v44 = vor.u32 1.1754944e-38, %v3117_v9  ;;  %v3220_v9 = vand.u32 2147483647, %v7877_v48  ;;  %v3237_v48 = vand.u32 2147483648, %v7886_v8 }
 0x905   :  { %9327 = vst [vmem:[#allocation37_spill] sm:$0xff] %v7950_v59  ;;  %v5056_v15 = vmul.f32 -1.442695, %v7950_v59  ;;  %v3215_v41 = vadd.f32 %v7932_v43, %v3214_v4  ;;  %vm3246_vm2 = vweird.f32 %v8003_v19 }
 0x906   :  { %v8041_v6 = vsel %vm3116_vm3, %v3118_v44, %v3114_v30  ;;  %vm3221_vm12 = vcmp.eq.f32.partialorder %v3220_v9, 8.507059e+37 }
 0x907   :  { %5505 = vpow2.f32 %v5056_v15  ;;  %v2905_v15 = vadd.f32 %v7688_v0, %v7678_v42  ;;  %v3368_v0 = vmul.f32 %v7896_v2, %v8041_v6  ;;  %v3219_v52 = vsel %vm8068_vm13, %v7932_v43, %v3215_v41 }
 0x908   :  { %5507 = vpow2.f32 %v5055_v7  ;;  %v8029_v7 = vpop.permute.xlu2 %3335 }
 0x909   :  { %5509 = vpow2.f32 %v5049_v11  ;;  %v5046_v11 = vmul.f32 -1.442695, %v7991_v12 }
 0x90a   :  { %v8010_v40 = vpop.permute.xlu0 %3327  ;;  %v3320_v13 = vpop.permute.xlu1 %3319  ;;  %5511 = vpow2.f32 %v5050_v37 }
 0x90b   :  { %v3366_v46 = vmul.f32 %v3320_v13, %v7980_v54  ;;  %5513 = vrcp.f32 %v8003_v19 }
 0x90c   :  { %5515 = vrcp.f32 %v8008_v35 }
 0x90d   :  { %v5506_v28 = vpop.eup %5505  ;;  %v5305_v26 = vpack.i.bf16 %v3366_v46, %v3365_v62  ;;  %5517 = vpow2.f32 %v5047_v22  ;;  %v3230_v62 = vadd.f32 %v7956_v38, %v3229_v32  ;;  %v8062_v46 = vadd.f32 %v7796_v23, %v2905_v15 }
 0x90e   :  { %v5508_v57 = vpop.eup %5507  ;;  %v8039_v39 = vadd.f32 1.0, %v5506_v28  ;;  %5519 = vpow2.f32 %v5048_v63  ;;  %v3235_v23 = vand.u32 2147483647, %v7886_v8  ;;  %v8097_v32 = vsel %vm3221_vm12, %v3223_v10, %v3219_v52 }
 0x90f   :  { %5306 = vrot.lane.b32.xlu1 %v5305_v26, %s5895_s5  ;;  %v5510_v34 = vpop.eup %5509  ;;  %v8048_v37 = vadd.f32 1.0, %v5508_v57  ;;  %v3234_v57 = vsel %vm8082_vm9, %v7956_v38, %v3230_v62  ;;  %v5045_v15 = vmul.f32 -1.442695, %v8062_v46 }
 0x910   :  { %v5512_v42 = vpop.eup %5511  ;;  %v8064_v36 = vadd.f32 1.0, %v5510_v34  ;;  %5521 = vrcp.f32 %v8039_v39  ;;  %v3338_v44 = vpop.permute.xlu2 %3337  ;;  %v3238_v34 = vor.u32 1.1754944e-38, %v3237_v48  ;;  %vm3236_vm5 = vcmp.eq.f32.partialorder %v3235_v23, 8.507059e+37 }
 0x911   :  { %v8053_v61 = vpop.eup %5513  ;;  %5523 = vrcp.f32 %v8048_v37  ;;  %v8088_v43 = vadd.f32 1.0, %v5512_v42  ;;  %v3375_v9 = vmul.f32 %v3338_v44, %v8097_v32  ;;  %vm3291_vm7 = vweird.f32 %v8039_v39 }
 0x912   :  { %v8050_v5 = vpop.permute.xlu0 %3329  ;;  %v3322_v21 = vpop.permute.xlu1 %3321  ;;  %v3242_v26 = vmul.f32 %v8053_v61, %v8003_v19  ;;  %5525 = vpow2.f32 %v5046_v11  ;;  %v8106_v47 = vsel %vm3236_vm5, %v3238_v34, %v3234_v57  ;;  %vm3247_vm0 = vweird.f32 %v8053_v61 }
 0x913   :  { %v3367_v13 = vmul.f32 %v3322_v21, %v8035_v27  ;;  %v8059_v2 = vpop.eup %5515  ;;  %5527 = vrcp.f32 %v8064_v36  ;;  %vm8152_vm14 = vmor %vm3246_vm2, %vm3247_vm0  ;;  %vm3276_vm15 = vweird.f32 %v8048_v37  ;;  %vm3186_vm5 = vweird.f32 %v8064_v36 }
 0x914   :  { %v5518_v63 = vpop.eup %5517  ;;  %v3257_v8 = vmul.f32 %v8059_v2, %v8008_v35  ;;  %v3243_v11 = vsub.f32 1.0, %v3242_v26  ;;  %5529 = vrcp.f32 %v8088_v43  ;;  %vm3262_vm4 = vweird.f32 %v8059_v2 }
 0x915   :  { %v5300_v28 = vpack.i.bf16 %v3368_v0, %v3367_v13  ;;  %v5520_v30 = vpop.eup %5519  ;;  %v8099_v41 = vadd.f32 1.0, %v5518_v63  ;;  %5531 = vpow2.f32 %v5045_v15  ;;  %vm8160_vm11 = vmor %vm3261_vm10, %vm3262_vm4  ;;  %vm3201_vm10 = vweird.f32 %v8088_v43 }
 0x916   :  { %v8102_v42 = vpop.eup %5521  ;;  %v8104_v0 = vadd.f32 1.0, %v5520_v30  ;;  %v3258_v13 = vsub.f32 1.0, %v3257_v8  ;;  %v3244_v23 = vmul.f32 %v8053_v61, %v3243_v11 }
 0x917   :  { %5301 = vrot.lane.b32.xlu0 %v5300_v28, %s5895_s5  ;;  %v8113_v22 = vpop.eup %5523  ;;  %5533 = vrcp.f32 %v8099_v41  ;;  %v3287_v52 = vmul.f32 %v8102_v42, %v8039_v39  ;;  %vm3292_vm6 = vweird.f32 %v8102_v42 }
 0x918   :  { %v5526_v28 = vpop.eup %5525  ;;  %5535 = vrcp.f32 %v8104_v0  ;;  %v3259_v10 = vmul.f32 %v8059_v2, %v3258_v13  ;;  %v3272_v4 = vmul.f32 %v8113_v22, %v8048_v37  ;;  %v3245_v15 = vadd.f32 %v8053_v61, %v3244_v23  ;;  %vm8200_vm13 = vmor %vm3291_vm7, %vm3292_vm6 }
 0x919   :  { %v8120_v63 = vpop.eup %5527  ;;  %v3288_v30 = vsub.f32 1.0, %v3287_v52  ;;  %v8128_v57 = vadd.f32 1.0, %v5526_v28  ;;  %v3267_v28 = vand.u32 2147483648, %v8008_v35  ;;  %v3250_v23 = vand.u32 2147483647, %v8003_v19 }
 0x91a   :  { %v3340_v21 = vpop.permute.xlu0 %3339  ;;  %v8108_v38 = vpop.permute.xlu1 %3331  ;;  %v3182_v34 = vmul.f32 %v8120_v63, %v8064_v36  ;;  %v3273_v13 = vsub.f32 1.0, %v3272_v4  ;;  %vm3277_vm8 = vweird.f32 %v8113_v22  ;;  %vm3187_vm0 = vweird.f32 %v8120_v63 }
 0x91b   :  { %v3376_v62 = vmul.f32 %v3340_v21, %v8106_v47  ;;  %v8126_v26 = vpop.eup %5529  ;;  %v3289_v18 = vmul.f32 %v8102_v42, %v3288_v30  ;;  %5537 = vrcp.f32 %v8128_v57  ;;  %v3268_v31 = vor.u32 1.1754944e-38, %v3267_v28  ;;  %vm8211_vm9 = vmor %vm3276_vm15, %vm3277_vm8 }
 0x91c   :  { %v5532_v8 = vpop.eup %5531  ;;  %v3197_v52 = vmul.f32 %v8126_v26, %v8088_v43  ;;  %v3274_v3 = vmul.f32 %v8113_v22, %v3273_v13  ;;  %vm3251_vm1 = vcmp.eq.f32.partialorder %v3250_v23, 8.507059e+37  ;;  %v3183_v49 = vsub.f32 1.0, %v3182_v34 }
 0x91d   :  { %v5270_v48 = vpack.i.bf16 %v3376_v62, %v3375_v9  ;;  %v8136_v11 = vpop.eup %5533  ;;  %v3260_v9 = vadd.f32 %v8059_v2, %v3259_v10  ;;  %v3252_v62 = vand.u32 2147483648, %v8003_v19  ;;  %v3265_v10 = vand.u32 2147483647, %v8008_v35 }
 0x91e   :  { %v8158_v53 = vadd.f32 1.0, %v5532_v8  ;;  %v8166_v19 = vmul.f32 %v8136_v11, %v8099_v41  ;;  %v3249_v35 = vsel %vm8152_vm14, %v8053_v61, %v3245_v15  ;;  %v3198_v59 = vsub.f32 1.0, %v3197_v52  ;;  %vm8242_vm14 = vmor %vm3186_vm5, %vm3187_vm0 }
 0x91f   :  { %5271 = vrot.lane.b32.xlu2 %v5270_v48, %s5895_s5  ;;  %v8141_v48 = vpop.eup %5535  ;;  %v3264_v30 = vsel %vm8160_vm11, %v8059_v2, %v3260_v9  ;;  %v3253_v56 = vor.u32 1.1754944e-38, %v3252_v62  ;;  %vm3266_vm3 = vcmp.eq.f32.partialorder %v3265_v10, 8.507059e+37  ;;  %v3290_v4 = vadd.f32 %v8102_v42, %v3289_v18 }
 0x920   :  { %v3167_v8 = vmul.f32 %v8141_v48, %v8104_v0  ;;  %v8181_v61 = vsel %vm3266_vm3, %v3268_v31, %v3264_v30  ;;  %v3297_v15 = vand.u32 2147483648, %v8039_v39  ;;  %v3275_v34 = vadd.f32 %v8113_v22, %v3274_v3 }
 0x921   :  { %v8177_v1 = vsel %vm3251_vm1, %v3253_v56, %v3249_v35  ;;  %v3295_v18 = vand.u32 2147483647, %v8039_v39  ;;  %v8192_v13 = vpop.eup %5537  ;;  %5539 = vrcp.f32 %v8158_v53  ;;  %v3199_v31 = vmul.f32 %v8126_v26, %v3198_v59 }
 0x922   :  { %v3342_v44 = vpop.permute.xlu0 %3341  ;;  %v8134_v21 = vpop.permute.xlu1 %3333  ;;  %v3282_v62 = vand.u32 2147483648, %v8048_v37  ;;  %v3184_v52 = vmul.f32 %v8120_v63, %v3183_v49  ;;  %v3280_v39 = vand.u32 2147483647, %v8048_v37  ;;  %v3294_v28 = vsel %vm8200_vm13, %v8102_v42, %v3290_v4 }
 0x923   :  { %v3377_v56 = vmul.f32 %v3342_v44, %v8177_v1  ;;  %v3298_v49 = vor.u32 1.1754944e-38, %v3297_v15  ;;  %v3153_v23 = vsub.f32 1.0, %v8166_v19  ;;  %v3279_v10 = vsel %vm8211_vm9, %v8113_v22, %v3275_v34  ;;  %v3348_v19 = vpop.permute.xlu2 %3347 }
 0x924   :  { %v3168_v35 = vsub.f32 1.0, %v3167_v8  ;;  %vm3296_vm12 = vcmp.eq.f32.partialorder %v3295_v18, 8.507059e+37  ;;  %v3283_v37 = vor.u32 1.1754944e-38, %v3282_v62  ;;  %v3200_v30 = vadd.f32 %v8126_v26, %v3199_v31 }
 0x925   :  { %v8222_v42 = vsel %vm3296_vm12, %v3298_v49, %v3294_v28  ;;  %vm3202_vm4 = vweird.f32 %v8126_v26  ;;  %vm3281_vm2 = vcmp.eq.f32.partialorder %v3280_v39, 8.507059e+37  ;;  %v3185_v4 = vadd.f32 %v8120_v63, %v3184_v52 }
 0x926   :  { %v3207_v8 = vand.u32 2147483648, %v8088_v43  ;;  %v3190_v15 = vand.u32 2147483647, %v8064_v36  ;;  %v3192_v34 = vand.u32 2147483648, %v8064_v36  ;;  %v3205_v18 = vand.u32 2147483647, %v8088_v43  ;;  %vm3203_vm11 = vmor %vm3201_vm10, %vm3202_vm4 }
 0x927   :  { %v8227_v22 = vpop.eup %5539  ;;  %v3380_v62 = vmul.f32 %v3348_v19, %v8222_v42  ;;  %v3137_v3 = vmul.f32 %v8192_v13, %v8128_v57  ;;  %v3204_v43 = vsel %vm3203_vm11, %v8126_v26, %v3200_v30  ;;  %v3169_v39 = vmul.f32 %v8141_v48, %v3168_v35 }
 0x928   :  { %v3189_v36 = vsel %vm8242_vm14, %v8120_v63, %v3185_v4  ;;  %v3122_v28 = vmul.f32 %v8227_v22, %v8158_v53  ;;  %v3208_v59 = vor.u32 1.1754944e-38, %v3207_v8  ;;  %v3193_v49 = vor.u32 1.1754944e-38, %v3192_v34 }
 0x929   :  { %vm3206_vm1 = vcmp.eq.f32.partialorder %v3205_v18, 8.507059e+37  ;;  %vm3191_vm3 = vcmp.eq.f32.partialorder %v3190_v15, 8.507059e+37  ;;  %v3138_v35 = vsub.f32 1.0, %v3137_v3  ;;  %v3170_v30 = vadd.f32 %v8141_v48, %v3169_v39 }
 0x92a   :  { %v8184_v17 = vpop.permute.xlu0 %3507  ;;  %v3344_v2 = vpop.permute.xlu1 %3343  ;;  %v8263_v26 = vsel %vm3191_vm3, %v3193_v49, %v3189_v36  ;;  %vm3172_vm6 = vweird.f32 %v8141_v48  ;;  %v3123_v19 = vsub.f32 1.0, %v3122_v28  ;;  %vm3157_vm8 = vweird.f32 %v8136_v11 }
 0x92b   :  { %v3378_v9 = vmul.f32 %v3344_v2, %v8181_v61  ;;  %v8230_v2 = vsel %vm3281_vm2, %v3283_v37, %v3279_v10  ;;  %v3154_v10 = vmul.f32 %v8136_v11, %v3153_v23  ;;  %v8261_v37 = vsel %vm3206_vm1, %v3208_v59, %v3204_v43 }
 0x92c   :  { %v3373_v63 = vmul.f32 %v8134_v21, %v8263_v26  ;;  %v3177_v23 = vand.u32 2147483648, %v8104_v0  ;;  %v3374_v15 = vmul.f32 %v8029_v7, %v8261_v37  ;;  %vm3171_vm7 = vweird.f32 %v8104_v0 }
 0x92d   :  { %v5275_v44 = vpack.i.bf16 %v3378_v9, %v3377_v56  ;;  %v3155_v34 = vadd.f32 %v8136_v11, %v3154_v10  ;;  %vm3156_vm13 = vweird.f32 %v8099_v41  ;;  %v3162_v21 = vand.u32 2147483648, %v8099_v41  ;;  %vm3173_vm15 = vmor %vm3171_vm7, %vm3172_vm6 }
 0x92e   :  { %v3139_v18 = vmul.f32 %v8192_v13, %v3138_v35  ;;  %v3160_v31 = vand.u32 2147483647, %v8099_v41  ;;  %vm3158_vm9 = vmor %vm3156_vm13, %vm3157_vm8  ;;  %v3178_v7 = vor.u32 1.1754944e-38, %v3177_v23  ;;  %v3124_v3 = vmul.f32 %v8227_v22, %v3123_v19 }
 0x92f   :  { %5276 = vrot.lane.b32.xlu2 %v5275_v44, %s5895_s5  ;;  %v3163_v43 = vor.u32 1.1754944e-38, %v3162_v21  ;;  %vm3142_vm5 = vweird.f32 %v8192_v13  ;;  %vm3141_vm4 = vweird.f32 %v8128_v57  ;;  %vm3127_vm2 = vweird.f32 %v8227_v22 }
 0x930   :  { %v3140_v36 = vadd.f32 %v8192_v13, %v3139_v18  ;;  %vm3161_vm0 = vcmp.eq.f32.partialorder %v3160_v31, 8.507059e+37  ;;  %v3125_v28 = vadd.f32 %v8227_v22, %v3124_v3  ;;  %v3145_v59 = vand.u32 2147483647, %v8128_v57  ;;  %vm3143_vm10 = vmor %vm3141_vm4, %vm3142_vm5 }
 0x931   :  { %v3132_v10 = vand.u32 2147483648, %v8158_v53  ;;  %vm3126_vm14 = vweird.f32 %v8158_v53  ;;  %v3130_v35 = vand.u32 2147483647, %v8158_v53  ;;  %vm9346_vm6 = vcmask 261120  }
 0x932   :  { %v8234_v56 = vpop.permute.xlu0 %3511  ;;  %v3346_v9 = vpop.permute.xlu1 %3345  ;;  %vm3128_vm11 = vmor %vm3126_vm14, %vm3127_vm2  ;;  %vm3146_vm1 = vcmp.eq.f32.partialorder %v3145_v59, 8.507059e+37 }
 0x933   :  { %v3379_v52 = vmul.f32 %v3346_v9, %v8230_v2  ;;  %v3175_v9 = vand.u32 2147483647, %v8104_v0  ;;  %v3159_v0 = vsel %vm3158_vm9, %v8136_v11, %v3155_v34  ;;  %v3129_v23 = vsel %vm3128_vm11, %v8227_v22, %v3125_v28  ;;  %vm9347_vm8 = vmmov %vm9346_vm6 }
 0x934   :  { %vm3131_vm3 = vcmp.eq.f32.partialorder %v3130_v35, 8.507059e+37  ;;  %vm9348_vm7 = vmmov %vm9346_vm6 }
 0x935   :  { %v5280_v44 = vpack.i.bf16 %v3380_v62, %v3379_v52  ;;  %v3174_v62 = vsel %vm3173_vm15, %v8141_v48, %v3170_v30  ;;  %v5285_v52 = vpack.i.bf16 %v3374_v15, %v3373_v63  ;;  %vm3176_vm12 = vcmp.eq.f32.partialorder %v3175_v9, 8.507059e+37  ;;  %vm9349_vm13 = vmmov %vm9346_vm6 }
 0x936   :  { %v8290_v39 = vsel %vm3176_vm12, %v3178_v7, %v3174_v62  ;;  %v3147_v48 = vand.u32 2147483648, %v8128_v57  ;;  %v3144_v30 = vsel %vm3143_vm10, %v8192_v13, %v3140_v36  ;;  %v3133_v57 = vor.u32 1.1754944e-38, %v3132_v10  ;;  %vm9350_vm15 = vmmov %vm9346_vm6 }
 0x937   :  { %5281 = vrot.lane.b32.xlu2 %v5280_v44, %s5895_s5  ;;  %v3372_v41 = vmul.f32 %v8108_v38, %v8290_v39  ;;  %v8298_v44 = vsel %vm3161_vm0, %v3163_v43, %v3159_v0  ;;  %vm9351_vm9 = vmmov %vm9346_vm6 }
 0x938   :  { %v3371_v49 = vmul.f32 %v8050_v5, %v8298_v44  ;;  %v3148_v19 = vor.u32 1.1754944e-38, %v3147_v48  ;;  %v3526_v5 = vpop.permute.xlu2 %3525  ;;  %v8315_v9 = vsel %vm3131_vm3, %v3133_v57, %v3129_v23  ;;  %vm9352_vm12 = vmmov %vm9346_vm6 }
 0x939   :  { %v3369_v13 = vmul.f32 %v7973_v60, %v8315_v9  ;;  %v3551_v48 = vmul.f32 %v8184_v17, %v8315_v9  ;;  %vm9353_vm5 = vmmov %vm9346_vm6 }
 0x93a   :  { %v8271_v4 = vpop.permute.xlu0 %3515  ;;  %v8273_v8 = vpop.permute.xlu1 %3509  ;;  %v5290_v63 = vpack.i.bf16 %v3372_v41, %v3371_v49  ;;  %v8311_v15 = vsel %vm3146_vm1, %v3148_v19, %v3144_v30  ;;  %v3560_v41 = vmul.f32 %v3526_v5, %v8181_v61  ;;  %vm9354_vm0 = vmmov %vm9353_vm5 }
 0x93b   :  { %v3370_v34 = vmul.f32 %v8010_v40, %v8311_v15  ;;  %v3552_v60 = vmul.f32 %v8273_v8, %v8311_v15  ;;  %v3555_v28 = vmul.f32 %v8271_v4, %v8263_v26  ;;  %v3553_v4 = vmul.f32 %v8234_v56, %v8298_v44  ;;  %vm9355_vm4 = vmmov %vm9354_vm0 }
 0x93c   :  { %vm9356_vm2 = vmmov %vm9354_vm0 }
 0x93d   :  { %v5295_v21 = vpack.i.bf16 %v3370_v34, %v3369_v13  ;;  %v5335_v49 = vpack.i.bf16 %v3552_v60, %v3551_v48  ;;  %vm9357_vm10 = vmmov %vm9354_vm0 }
 0x93e   :  { %vm9358_vm14 = vmmov %vm9354_vm0 }
 0x93f   :  { %5286 = vrot.lane.b32.xlu2 %v5285_v52, %s5895_s5  ;;  %vm9359_vm11 = vmmov %vm9354_vm0 }
 0x940   :  { %v3528_v22 = vpop.permute.xlu2 %3527  ;;  %vm9360_vm1 = vmmov %vm9354_vm0 }
 0x941   :  { %v3561_v52 = vmul.f32 %v3528_v22, %v8230_v2  ;;  %vm9361_vm3 = vmmov %vm9354_vm0 }
 0x942   :  { %v3514_v11 = vpop.permute.xlu1 %3513  ;;  %v3520_v38 = vpop.permute.xlu0 %3519 }
 0x943   :  { %v3557_v7 = vmul.f32 %v3520_v38, %v8097_v32  ;;  %v3554_v8 = vmul.f32 %v3514_v11, %v8290_v39 }
 0x945   :  { %v5330_v23 = vpack.i.bf16 %v3554_v8, %v3553_v4 }
 0x947   :  { %5291 = vrot.lane.b32.xlu2 %v5290_v63, %s5895_s5 }
 0x94a   :  { %v3518_v53 = vpop.permute.xlu1 %3517  ;;  %v3530_v18 = vpop.permute.xlu0 %3529 }
 0x94b   :  { %v3562_v31 = vmul.f32 %v3530_v18, %v8222_v42  ;;  %v3556_v43 = vmul.f32 %v3518_v53, %v8261_v37 }
 0x94d   :  { %v5320_v3 = vpack.i.bf16 %v3562_v31, %v3561_v52  ;;  %v5325_v10 = vpack.i.bf16 %v3556_v43, %v3555_v28  ;;  %v5602_v52 = vld [vmem:[%s9116_s8] sm:$0xff] }
 0x94f   :  { %5296 = vrot.lane.b32.xlu2 %v5295_v21, %s5895_s5 }
 0x952   :  { %v3522_v62 = vpop.permute.xlu1 %3521  ;;  %v3504_v35 = vpop.permute.xlu0 %3503 }
 0x953   :  { %v3558_v40 = vmul.f32 %v3522_v62, %v8106_v47  ;;  %v3549_v17 = vmul.f32 %v3504_v35, %v8035_v27 }
 0x955   :  { %v5310_v0 = vpack.i.bf16 %v3558_v40, %v3557_v7 }
 0x957   :  { %5321 = vrot.lane.b32.xlu2 %v5320_v3, %s5895_s5  ;;  %5311 = vrot.lane.b32.xlu1 %v5310_v0, %s5895_s5 }
 0x95a   :  { %v3524_v36 = vpop.permute.xlu1 %3523  ;;  %v3500_v57 = vpop.permute.xlu0 %3499 }
 0x95b   :  { %v3559_v59 = vmul.f32 %v3524_v36, %v8177_v1  ;;  %v3547_v34 = vmul.f32 %v3500_v57, %v7938_v45 }
 0x95d   :  { %v5315_v38 = vpack.i.bf16 %v3560_v41, %v3559_v59 }
 0x95f   :  { %5326 = vrot.lane.b32.xlu2 %v5325_v10, %s5895_s5  ;;  %5336 = vrot.lane.b32.xlu1 %v5335_v49, %s5895_s5 }
 0x960   :  { %5316 = vrot.lane.b32.xlu0 %v5315_v38, %s5895_s5 }
 0x962   :  { %v3506_v30 = vpop.permute.xlu1 %3505 }
 0x963   :  { %v3550_v63 = vmul.f32 %v3506_v30, %v8041_v6 }
 0x965   :  { %v5340_v19 = vpack.i.bf16 %v3550_v63, %v3549_v17 }
 0x967   :  { %5341 = vrot.lane.b32.xlu2 %v5340_v19, %s5895_s5  ;;  %v5603_v19 = vld [vmem:[%s9116_s8 + $0x8] sm:$0xff] }
 0x968   :  { %5331 = vrot.lane.b32.xlu0 %v5330_v23, %s5895_s5 }
 0x96a   :  { %v3502_v5 = vpop.permute.xlu1 %3501 }
 0x96b   :  { %v3548_v11 = vmul.f32 %v3502_v5, %v7980_v54 }
 0x96d   :  { %v5345_v53 = vpack.i.bf16 %v3548_v11, %v3547_v34 }
 0x96f   :  { %3831 = vrot.lane.b32.xlu2 %v7788_v58, %s5895_s5 }
 0x970   :  { %5346 = vrot.lane.b32.xlu0 %v5345_v53, %s5895_s5 }
 0x977   :  { %3835 = vrot.lane.b32.xlu2 %v7812_v14, %s5895_s5 }
 0x978   :  { %3833 = vrot.lane.b32.xlu0 %v7801_v24, %s5895_s5 }
 0x979   :  { %v5272_v56 = vpop.permute.xlu2 %5271 }
 0x97a   :  { %v5274_v0 = vunpack.i.h.bf16 %v5272_v56  ;;  %v5273_v60 = vunpack.i.l.bf16 %v5272_v56 }
 0x97c   :  { %v3455_v49 = vsel %vm9350_vm15, %v5273_v60, %v8097_v32  ;;  %v3456_v10 = vsel %vm9351_vm9, %v5274_v0, %v8106_v47  ;;  %vm9366_vm15 = vmmov %vm9354_vm0 }
 0x97d   :  { %v3466_v38 = vpack.c.bf16 %v3456_v10, %v3455_v49  ;;  %vm9367_vm9 = vmmov %vm9354_vm0 }
 0x97f   :  { %3839 = vrot.lane.b32.xlu2 %v8062_v46, %s5895_s5 }
 0x980   :  { %3837 = vrot.lane.b32.xlu0 %v7821_v51, %s5895_s5 }
 0x988   :  { %3841 = vrot.lane.b32.xlu0 %v7991_v12, %s5895_s5 }
 0x989   :  { %v5277_v13 = vpop.permute.xlu2 %5276  ;;  %v5302_v34 = vpop.permute.xlu0 %5301 }
 0x98a   :  { %v5279_v18 = vunpack.i.h.bf16 %v5277_v13  ;;  %v5278_v22 = vunpack.i.l.bf16 %v5277_v13  ;;  %v5304_v53 = vunpack.i.h.bf16 %v5302_v34  ;;  %v5303_v56 = vunpack.i.l.bf16 %v5302_v34 }
 0x98c   :  { %v3457_v43 = vsel %vm9348_vm7, %v5278_v22, %v8177_v1  ;;  %v3458_v36 = vsel %vm9349_vm13, %v5279_v18, %v8181_v61  ;;  %v5307_v18 = vpop.permute.xlu1 %5306  ;;  %vm9364_vm7 = vmmov %vm9354_vm0 }
 0x98d   :  { %v3467_v48 = vpack.c.bf16 %v3458_v36, %v3457_v43  ;;  %vm9365_vm13 = vmmov %vm9354_vm0 }
 0x990   :  { %3843 = vrot.lane.b32.xlu0 %v7994_v55, %s5895_s5 }
 0x991   :  { %v5282_v21 = vpop.permute.xlu2 %5281 }
 0x992   :  { %v5284_v31 = vunpack.i.h.bf16 %v5282_v21  ;;  %v5283_v62 = vunpack.i.l.bf16 %v5282_v21 }
 0x994   :  { %1806 = vxpose.xlu1.c.b16.start [1/8] (narrow) %v5602_v52, 16  ;;  %v3459_v7 = vsel %vm9346_vm6, %v5283_v62, %v8230_v2  ;;  %v3460_v40 = vsel %vm9347_vm8, %v5284_v31, %v8222_v42  ;;  %v5309_v52 = vunpack.i.h.bf16 %v5307_v18  ;;  %vm9362_vm6 = vmmov %vm9354_vm0 }
 0x995   :  { %v3468_v3 = vpack.c.bf16 %v3460_v40, %v3459_v7  ;;  %v5308_v7 = vunpack.i.l.bf16 %v5307_v18  ;;  %v3447_v40 = vsel %vm9358_vm14, %v5303_v56, %v8035_v27  ;;  %vm9363_vm8 = vmmov %vm9354_vm0 }
 0x996   :  { %vm9373_vm14 = vmmov %vm9354_vm0 }
 0x997   :  { %3469 = vmatpush.bf16.msra.mxu2 %v3468_v3  ;;  %v3448_v3 = vsel %vm9359_vm11, %v5304_v53, %v8041_v6  ;;  %vm9374_vm11 = vmmov %vm9354_vm0 }
 0x998   :  { %v3462_v60 = vpack.c.bf16 %v3448_v3, %v3447_v40 }
 0x999   :  { %v5287_v41 = vpop.permute.xlu2 %5286 }
 0x99a   :  { %v5289_v28 = vunpack.i.h.bf16 %v5287_v41  ;;  %v5288_v59 = vunpack.i.l.bf16 %v5287_v41  ;;  %v3445_v41 = vsel %vm9360_vm1, %v5308_v7, %v7938_v45  ;;  %vm9375_vm1 = vmmov %vm9354_vm0 }
 0x99b   :  { %3470 = vmatpush.bf16.msra.mxu2 %v3467_v48  ;;  %v3446_v48 = vsel %vm9361_vm3, %v5309_v52, %v7980_v54  ;;  %vm9376_vm3 = vmmov %vm9354_vm0 }
 0x99c   :  { %v3453_v35 = vsel %vm9352_vm12, %v5288_v59, %v8263_v26  ;;  %v3454_v8 = vsel %vm9353_vm5, %v5289_v28, %v8261_v37  ;;  %v5604_v28 = vld [vmem:[%s9116_s8 + $0x10] sm:$0xff]  ;;  %v3461_v59 = vpack.c.bf16 %v3446_v48, %v3445_v41  ;;  %vm9368_vm12 = vmmov %vm9354_vm0 }
 0x99d   :  { %v3465_v17 = vpack.c.bf16 %v3454_v8, %v3453_v35  ;;  %vm9369_vm5 = vmmov %vm9354_vm0 }
 0x99f   :  { %3471 = vmatpush.bf16.msra.mxu2 %v3466_v38 }
 0x9a1   :  { %v5292_v30 = vpop.permute.xlu2 %5291 }
 0x9a2   :  { %v5294_v63 = vunpack.i.h.bf16 %v5292_v30  ;;  %v5293_v4 = vunpack.i.l.bf16 %v5292_v30  ;;  %v5605_v30 = vld [vmem:[%s9116_s8 + $0x18] sm:$0xff] }
 0x9a3   :  { %3472 = vmatpush.bf16.msra.mxu2 %v3465_v17 }
 0x9a4   :  { %1807 = vxpose.xlu1.c.b16.cont [2/8] (narrow) %v5603_v19, 16  ;;  %v3451_v23 = vsel %vm9354_vm0, %v5293_v4, %v8298_v44  ;;  %v3452_v57 = vsel %vm9355_vm4, %v5294_v63, %v8290_v39  ;;  %vm9370_vm4 = vmmov %vm9354_vm0 }
 0x9a5   :  { %v3464_v5 = vpack.c.bf16 %v3452_v57, %v3451_v23 }
 0x9a7   :  { %3473 = vmatpush.bf16.msra.mxu2 %v3464_v5  ;;  %v5606_v5 = vld [vmem:[%s9116_s8 + $0x20] sm:$0xff] }
 0x9a9   :  { %v5297_v11 = vpop.permute.xlu2 %5296 }
 0x9aa   :  { %v5299_v13 = vunpack.i.h.bf16 %v5297_v11  ;;  %v5298_v21 = vunpack.i.l.bf16 %v5297_v11 }
 0x9ac   :  { %v3449_v22 = vsel %vm9356_vm2, %v5298_v21, %v8315_v9  ;;  %v3450_v31 = vsel %vm9357_vm10, %v5299_v13, %v8311_v15  ;;  %vm9371_vm2 = vmmov %vm9354_vm0 }
 0x9ad   :  { %v3463_v62 = vpack.c.bf16 %v3450_v31, %v3449_v22  ;;  %vm9372_vm10 = vmmov %vm9354_vm0 }
 0x9af   :  { %3474 = vmatpush.bf16.msra.mxu2 %v3463_v62 }
 0x9b1   :  { %v5322_v0 = vpop.permute.xlu2 %5321 }
 0x9b2   :  { %v5324_v43 = vunpack.i.h.bf16 %v5322_v0  ;;  %v5323_v36 = vunpack.i.l.bf16 %v5322_v0 }
 0x9b3   :  { %3475 = vmatpush.bf16.msra.mxu2 %v3462_v60 }
 0x9b4   :  { %1808 = vxpose.xlu1.c.b16.cont [3/8] (narrow) %v5604_v28, 16  ;;  %v3641_v49 = vsel %vm9362_vm6, %v5323_v36, %v8230_v2  ;;  %v3642_v10 = vsel %vm9363_vm8, %v5324_v43, %v8222_v42  ;;  %vm9377_vm6 = vmmov %vm9354_vm0 }
 0x9b5   :  { %v3650_v35 = vpack.c.bf16 %v3642_v10, %v3641_v49  ;;  %vm9378_vm8 = vmmov %vm9354_vm0 }
 0x9b7   :  { %3476 = vmatpush.bf16.msra.mxu2 %v3461_v59 }
 0x9b9   :  { %v5327_v38 = vpop.permute.xlu2 %5326 }
 0x9ba   :  { %5154 = vmatmul.lmr.bf16.vlgmr.msra.gmra.2.mxu2  ;;  %v5329_v56 = vunpack.i.h.bf16 %v5327_v38  ;;  %v5328_v13 = vunpack.i.l.bf16 %v5327_v38 }
 0x9bb   :  { %3651 = vmatpush.bf16.msra.mxu2 %v3650_v35 }
 0x9c1   :  { %v5342_v8 = vpop.permute.xlu2 %5341 }
 0x9c2   :  { %5155 = vmatmul.lmr.bf16.gmra.2.mxu2  ;;  %v5344_v36 = vunpack.i.h.bf16 %v5342_v8  ;;  %v5343_v41 = vunpack.i.l.bf16 %v5342_v8 }
 0x9c4   :  { %1809 = vxpose.xlu1.c.b16.cont [4/8] (narrow) %v5605_v30, 16  ;;  %v3629_v59 = vsel %vm9374_vm11, %v5343_v41, %v8035_v27  ;;  %v3630_v49 = vsel %vm9375_vm1, %v5344_v36, %v8041_v6  ;;  %v5608_v30 = vld [vmem:[%s9116_s8 + $0x30] sm:$0xff] }
 0x9c5   :  { %v3644_v10 = vpack.c.bf16 %v3630_v49, %v3629_v59 }
 0x9c9   :  { %v3832_v17 = vpop.permute.xlu2 %3831  ;;  %v5312_v2 = vpop.permute.xlu1 %5311 }
 0x9ca   :  { %v3879_v63 = vsel %vm9364_vm7, %v3832_v17, 0.0  ;;  %v5314_v19 = vunpack.i.h.bf16 %v5312_v2  ;;  %v5313_v42 = vunpack.i.l.bf16 %v5312_v2  ;;  %vm9379_vm7 = vmmov %vm9354_vm0  ;;  %v5609_v2 = vld [vmem:[%s9116_s8 + $0x38] sm:$0xff] }
 0x9cb   :  { %3880 = vadd.xlane.f32.xlu2 %v3879_v63 }
 0x9cc   :  { %v3637_v21 = vsel %vm9367_vm9, %v5313_v42, %v8097_v32  ;;  %v3638_v18 = vsel %vm9368_vm12, %v5314_v19, %v8106_v47  ;;  %vm9382_vm9 = vmmov %vm9354_vm0 }
 0x9cd   :  { %v3648_v31 = vpack.c.bf16 %v3638_v18, %v3637_v21  ;;  %vm9383_vm12 = vmmov %vm9354_vm0  ;;  %v9385_v21 = vld [vmem:[#allocation36_spill] sm:$0xff] }
 0x9d1   :  { %v5337_v7 = vpop.permute.xlu1 %5336  ;;  %v3836_v8 = vpop.permute.xlu2 %3835 }
 0x9d2   :  { %v5317_v4 = vpop.permute.xlu0 %5316  ;;  %v5339_v3 = vunpack.i.h.bf16 %v5337_v7  ;;  %v5338_v0 = vunpack.i.l.bf16 %v5337_v7  ;;  %v3885_v6 = vsel %vm9379_vm7, %v3836_v8, 0.0 }
 0x9d3   :  { %v5319_v23 = vunpack.i.h.bf16 %v5317_v4  ;;  %v5318_v57 = vunpack.i.l.bf16 %v5317_v4 }
 0x9d4   :  { %1810 = vxpose.xlu1.c.b16.cont [5/8] (narrow) %v5606_v5, 16 }
 0x9d5   :  { %v3639_v34 = vsel %vm9365_vm13, %v5318_v57, %v8177_v1  ;;  %v3640_v11 = vsel %vm9366_vm15, %v5319_v23, %v8181_v61  ;;  %v3635_v1 = vsel %vm9369_vm5, %v5328_v13, %v8263_v26  ;;  %v3636_v61 = vsel %vm9354_vm0, %v5329_v56, %v8261_v37  ;;  %vm9380_vm13 = vmmov %vm9354_vm0 }
 0x9d6   :  { %v3649_v53 = vpack.c.bf16 %v3640_v11, %v3639_v34  ;;  %v3647_v40 = vpack.c.bf16 %v3636_v61, %v3635_v1  ;;  %v3631_v37 = vsel %vm9372_vm10, %v5338_v0, %v8315_v9  ;;  %v3632_v26 = vsel %vm9373_vm14, %v5339_v3, %v8311_v15  ;;  %vm9381_vm15 = vmmov %vm9354_vm0 }
 0x9d7   :  { %vm9384_vm5 = vmmov %vm9354_vm0 }
 0x9d8   :  { %3652 = vmatpush.bf16.msra.mxu2 %v3649_v53  ;;  %vm9391_vm10 = vmmov %vm9354_vm0 }
 0x9d9   :  { %vm9392_vm14 = vmmov %vm9354_vm0 }
 0x9da   :  { %v5332_v22 = vpop.permute.xlu0 %5331 }
 0x9db   :  { %v5334_v62 = vunpack.i.h.bf16 %v5332_v22  ;;  %v5333_v52 = vunpack.i.l.bf16 %v5332_v22 }
 0x9dc   :  { %3653 = vmatpush.bf16.msra.mxu2 %v3648_v31 }
 0x9dd   :  { %v3633_v32 = vsel %vm9370_vm4, %v5333_v52, %v8298_v44  ;;  %v3634_v47 = vsel %vm9371_vm2, %v5334_v62, %v8290_v39  ;;  %v5607_v44 = vld [vmem:[%s9116_s8 + $0x28] sm:$0xff]  ;;  %v3645_v39 = vpack.c.bf16 %v3632_v26, %v3631_v37  ;;  %vm9388_vm4 = vmmov %vm9354_vm0 }
 0x9de   :  { %v3646_v43 = vpack.c.bf16 %v3634_v47, %v3633_v32  ;;  %v9386_v62 = vld [vmem:[#allocation34_spill] sm:$0xff]  ;;  %vm9389_vm2 = vmmov %vm9354_vm0 }
 0x9e0   :  { %3654 = vmatpush.bf16.msra.mxu2 %v3647_v40 }
 0x9e2   :  { %v5347_v60 = vpop.permute.xlu0 %5346 }
 0x9e3   :  { %3845 = vrot.lane.b32.xlu2 %v8001_v50, %s5895_s5  ;;  %v5349_v48 = vunpack.i.h.bf16 %v5347_v60  ;;  %v5348_v28 = vunpack.i.l.bf16 %v5347_v60 }
 0x9e4   :  { %3655 = vmatpush.bf16.msra.mxu2 %v3646_v43  ;;  %1811 = vxpose.xlu1.c.b16.cont [6/8] (narrow) %v5607_v44, 16 }
 0x9e5   :  { %v3627_v38 = vsel %vm9377_vm6, %v5348_v28, %v7938_v45  ;;  %v3628_v35 = vsel %vm9378_vm8, %v5349_v48, %v7980_v54  ;;  %v3840_v54 = vpop.permute.xlu2 %3839  ;;  %v9387_v28 = vld [vmem:[#allocation35_spill] sm:$0xff] }
 0x9e6   :  { %v3643_v27 = vpack.c.bf16 %v3628_v35, %v3627_v38  ;;  %v3891_v63 = vsel %vm9381_vm15, %v3840_v54, 0.0 }
 0x9e8   :  { %3656 = vmatpush.bf16.msra.mxu2 %v3645_v39 }
 0x9ea   :  { %v3834_v9 = vpop.permute.xlu0 %3833 }
 0x9eb   :  { %v3882_v15 = vsel %vm9376_vm3, %v3834_v9, 0.0  ;;  %3849 = vrot.lane.b32.xlu2 %v7963_v16, %s5895_s5 }
 0x9ec   :  { %3883 = vadd.xlane.f32.xlu0 %v3882_v15  ;;  %3657 = vmatpush.bf16.msra.mxu2 %v3644_v10 }
 0x9f0   :  { %3658 = vmatpush.bf16.msra.mxu2 %v3643_v27  ;;  %v9390_v27 = vld [vmem:[#allocation37_spill] sm:$0xff] }
 0x9f2   :  { %v3838_v45 = vpop.permute.xlu0 %3837 }
 0x9f3   :  { %3851 = vrot.lane.b32.xlu2 %v7839_v20, %s5895_s5  ;;  %v3888_v17 = vsel %vm9380_vm13, %v3838_v45, 0.0 }
 0x9f4   :  { %3886 = vadd.xlane.f32.xlu0 %v3885_v6  ;;  %1812 = vxpose.xlu1.c.b16.cont [7/8] (narrow) %v5608_v30, 16 }
 0x9fa   :  { %v3842_v4 = vpop.permute.xlu0 %3841 }
 0x9fb   :  { %v3894_v19 = vsel %vm9382_vm9, %v3842_v4, 0.0 }
 0x9fc   :  { %3889 = vadd.xlane.f32.xlu0 %v3888_v17 }
 0xa02   :  { %v3844_v42 = vpop.permute.xlu0 %3843 }
 0xa03   :  { %v3897_v23 = vsel %vm9383_vm12, %v3844_v42, 0.0 }
 0xa04   :  { %3892 = vadd.xlane.f32.xlu0 %v3891_v63  ;;  %1813 = vxpose.xlu1.c.b16.end [8/8] (narrow) %v5609_v2, 16 }
 0xa0c   :  { %3895 = vadd.xlane.f32.xlu0 %v3894_v19 }
 0xa1c   :  { %3898 = vadd.xlane.f32.xlu2 %v3897_v23 }
 0xa20   :  { %3853 = vrot.lane.b32.xlu0 %v7845_v25, %s5895_s5 }
 0xa28   :  { %3855 = vrot.lane.b32.xlu0 %v7875_v29, %s5895_s5 }
 0xa3d   :  { %v8492_v40 = vpop.f32.mrf.mxu2 }
 0xa3e   :  { %v3881_v57 = vpop.xlane.xlu2 %3880 }
 0xa3f   :  { %v3927_v5 = vmul.f32 %v3881_v57, %v7141_v33 }
 0xa40   :  { %v1814_v34 = vpop.trf.xlu1 }
 0xa41   :  { %v8469_v11 = vsub.f32 %v7788_v58, %v3927_v5  ;;  %3659 = vmatmul.bf16.vlgmr.msra.gmra.mxu2 %v1814_v34 }
 0xa43   :  { %v3959_v53 = vmul.f32 %v8469_v11, %v8469_v11 }
 0xa45   :  { %3991 = vrot.lane.b32.xlu2 %v3959_v53, %s5895_s5  ;;  %v8497_v3 = vpop.f32.mrf.mxu2 }
 0xa46   :  { %v3846_v56 = vpop.permute.xlu2 %3845  ;;  %v3666_v0 = vadd.f32 1e-06, %v8497_v3 }
 0xa47   :  { %v3900_v13 = vsel %vm9384_vm5, %v3846_v56, 0.0 }
 0xa4e   :  { %v8509_v36 = vpop.permute.xlu2 %3849 }
 0xa52   :  { %3901 = vadd.xlane.f32.xlu0 %v3900_v13 }
 0xa56   :  { %v3852_v48 = vpop.permute.xlu2 %3851 }
 0xa57   :  { %v3909_v49 = vsel %vm9388_vm4, %v3852_v48, 0.0 }
 0xa5e   :  { %3847 = vrot.lane.b32.xlu1 %v9385_v21, %s5895_s5 }
 0xa5f   :  { %v3884_v18 = vpop.xlane.xlu0 %3883 }
 0xa60   :  { %v3928_v22 = vmul.f32 %v3884_v18, %v7141_v33 }
 0xa62   :  { %v8479_v31 = vsub.f32 %v7801_v24, %v3928_v22  ;;  %v3665_v24 = vadd.f32 1e-06, %v8492_v40 }
 0xa64   :  { %v3960_v58 = vmul.f32 %v8479_v31, %v8479_v31 }
 0xa66   :  { %3993 = vrot.lane.b32.xlu0 %v3960_v58, %s5895_s5  ;;  %3857 = vrot.lane.b32.xlu1 %v9386_v62, %s5895_s5 }
 0xa67   :  { %v3887_v52 = vpop.xlane.xlu0 %3886 }
 0xa68   :  { %v3929_v1 = vmul.f32 %v3887_v52, %v7141_v33 }
 0xa6a   :  { %v8488_v61 = vsub.f32 %v7812_v14, %v3929_v1 }
 0xa6c   :  { %v3961_v7 = vmul.f32 %v8488_v61, %v8488_v61 }
 0xa6e   :  { %3995 = vrot.lane.b32.xlu2 %v3961_v7, %s5895_s5 }
 0xa6f   :  { %v8501_v32 = vpop.xlane.xlu0 %3889 }
 0xa76   :  { %3669 = vrot.lane.b32.xlu2 %v3665_v24, %s5895_s5 }
 0xa77   :  { %v3893_v60 = vpop.xlane.xlu0 %3892 }
 0xa78   :  { %v3931_v44 = vmul.f32 %v3893_v60, %v7141_v33 }
 0xa7a   :  { %v8518_v59 = vsub.f32 %v8062_v46, %v3931_v44 }
 0xa7c   :  { %v3963_v9 = vmul.f32 %v8518_v59, %v8518_v59 }
 0xa7e   :  { %3671 = vrot.lane.b32.xlu2 %v3666_v0, %s5895_s5 }
 0xa7f   :  { %v3896_v39 = vpop.xlane.xlu0 %3895 }
 0xa80   :  { %v3932_v38 = vmul.f32 %v3896_v39, %v7141_v33 }
 0xa82   :  { %v8529_v46 = vsub.f32 %v7991_v12, %v3932_v38 }
 0xa84   :  { %v3964_v30 = vmul.f32 %v8529_v46, %v8529_v46 }
 0xa8f   :  { %v3899_v8 = vpop.xlane.xlu2 %3898 }
 0xa90   :  { %v3933_v45 = vmul.f32 %v3899_v8, %v7141_v33 }
 0xa92   :  { %v3854_v10 = vpop.permute.xlu0 %3853  ;;  %v8537_v54 = vsub.f32 %v7994_v55, %v3933_v45 }
 0xa93   :  { %v3912_v15 = vsel %vm9389_vm2, %v3854_v10, 0.0 }
 0xa94   :  { %v3965_v12 = vmul.f32 %v8537_v54, %v8537_v54 }
 0xa9a   :  { %v3856_v35 = vpop.permute.xlu0 %3855 }
 0xa9b   :  { %v3915_v6 = vsel %vm9391_vm10, %v3856_v35, 0.0 }
 0xa9f   :  { %v8543_v2 = vpop.permute.xlu2 %3991 }
 0xac4   :  { %v8503_v14 = vpop.f32.mrf.mxu2 }
 0xac5   :  { %v3707_v47 = vadd.f32 1e-06, %v8503_v14  ;;  %v8547_v42 = vpop.xlane.xlu0 %3901 }
 0xac7   :  { %3711 = vrot.lane.b32.xlu0 %v3707_v47, %s5895_s5 }
 0xac8   :  { %v8545_v4 = vpop.permute.xlu2 %3995 }
 0xacc   :  { %v8507_v43 = vpop.f32.mrf.mxu2 }
 0xacd   :  { %v3708_v41 = vadd.f32 1e-06, %v8507_v43 }
 0xacf   :  { %3713 = vrot.lane.b32.xlu0 %v3708_v41, %s5895_s5 }
 0xad0   :  { %v3848_v37 = vpop.permute.xlu1 %3847  ;;  %v3670_v19 = vpop.permute.xlu2 %3669 }
 0xad1   :  { %v3903_v26 = vsel %vm9354_vm0, %v3848_v37, 0.0  ;;  %5541 = vrcp.f32 %v3670_v19  ;;  %vm3680_vm11 = vweird.f32 %v3670_v19  ;;  %v3686_v22 = vand.u32 2147483648, %v3670_v19 }
 0xad2   :  { %3904 = vadd.xlane.f32.xlu1 %v3903_v26  ;;  %v3684_v52 = vand.u32 2147483647, %v3670_v19  ;;  %v5610_v26 = vld [vmem:[#allocation8 + $0x2] sm:$0x3] }
 0xad3   :  { %v3687_v0 = vor.u32 1.1754944e-38, %v3686_v22  ;;  %v2620_v44 = vperm.slane %v5610_v26, 1 }
 0xad4   :  { %vm3685_vm6 = vcmp.eq.f32.partialorder %v3684_v52, 8.507059e+37 }
 0xad7   :  { %3859 = vrot.lane.b32.xlu0 %v9387_v28, %s5895_s5  ;;  %v5542_v57 = vpop.eup %5541 }
 0xad8   :  { %v3858_v17 = vpop.permute.xlu1 %3857  ;;  %v3672_v23 = vpop.permute.xlu2 %3671  ;;  %v3676_v55 = vmul.f32 %v5542_v57, %v3670_v19  ;;  %vm3681_vm1 = vweird.f32 %v5542_v57 }
 0xad9   :  { %v3918_v63 = vsel %vm9392_vm14, %v3858_v17, 0.0  ;;  %5543 = vrcp.f32 %v3672_v23  ;;  %v8549_v5 = vpop.permute.xlu0 %3993  ;;  %vm8551_vm3 = vmor %vm3680_vm11, %vm3681_vm1  ;;  %vm3695_vm8 = vweird.f32 %v3672_v23  ;;  %v3699_v48 = vand.u32 2147483647, %v3672_v23  ;;  %v9397_v17 = vld [vmem:[#allocation30_spill] sm:$0xff] }
 0xada   :  { %3910 = vadd.xlane.f32.xlu1 %v3909_v49  ;;  %v3677_v34 = vsub.f32 1.0, %v3676_v55  ;;  %v3701_v49 = vand.u32 2147483648, %v3672_v23  ;;  %vm9399_vm1 = vmmov %vm9391_vm10 }
 0xadb   :  { %vm3700_vm12 = vcmp.eq.f32.partialorder %v3699_v48, 8.507059e+37 }
 0xadc   :  { %v3678_v56 = vmul.f32 %v5542_v57, %v3677_v34 }
 0xade   :  { %v3679_v58 = vadd.f32 %v5542_v57, %v3678_v56 }
 0xadf   :  { %3999 = vrot.lane.b32.xlu0 %v3963_v9, %s5895_s5  ;;  %v5544_v53 = vpop.eup %5543 }
 0xae0   :  { %v3691_v13 = vmul.f32 %v5544_v53, %v3672_v23  ;;  %v3683_v37 = vsel %vm8551_vm3, %v5542_v57, %v3679_v58  ;;  %vm3696_vm7 = vweird.f32 %v5544_v53  ;;  %vm9400_vm3 = vmmov %vm9399_vm1 }
 0xae1   :  { %v3688_v10 = vsel %vm3685_vm6, %v3687_v0, %v3683_v37  ;;  %vm8557_vm15 = vmor %vm3695_vm8, %vm3696_vm7 }
 0xae2   :  { %3913 = vadd.xlane.f32.xlu1 %v3912_v15  ;;  %v3692_v1 = vsub.f32 1.0, %v3691_v13  ;;  %vm9401_vm6 = vmmov %vm9399_vm1 }
 0xae3   :  { %vm9402_vm8 = vmmov %vm9399_vm1 }
 0xae4   :  { %v3693_v47 = vmul.f32 %v5544_v53, %v3692_v1  ;;  %vm9403_vm7 = vmmov %vm9399_vm1 }
 0xae6   :  { %v3694_v15 = vadd.f32 %v5544_v53, %v3693_v47 }
 0xae7   :  { %3861 = vrot.lane.b32.xlu0 %v9390_v27, %s5895_s5 }
 0xae8   :  { %v3698_v55 = vsel %vm8557_vm15, %v5544_v53, %v3694_v15  ;;  %v9398_v53 = vld [vmem:[#allocation32_spill] sm:$0xff]  ;;  %vm9405_vm15 = vmmov %vm9399_vm1 }
 0xaea   :  { %3916 = vadd.xlane.f32.xlu1 %v3915_v6 }
 0xaef   :  { %4001 = vrot.lane.b32.xlu0 %v3964_v30, %s5895_s5  ;;  %v3689_v30 = vmul.f32 %v3688_v10, %v8492_v40 }
 0xaf2   :  { %3919 = vadd.xlane.f32.xlu1 %v3918_v63  ;;  %v2670_v63 = vadd.f32 %v9397_v17, %v2620_v44 }
 0xaf4   :  { %v3705_v13 = vadd.f32 %v3689_v30, %v2670_v63 }
 0xaf7   :  { %4003 = vrot.lane.b32.xlu0 %v3965_v12, %s5895_s5  ;;  %v3702_v12 = vor.u32 1.1754944e-38, %v3701_v49 }
 0xaf9   :  { %v3703_v40 = vsel %vm3700_vm12, %v3702_v12, %v3698_v55  ;;  %vm9407_vm12 = vmmov %vm9399_vm1 }
 0xb39   :  { %v3712_v18 = vpop.permute.xlu0 %3711 }
 0xb3a   :  { %5545 = vrcp.f32 %v3712_v18  ;;  %v3728_v9 = vand.u32 2147483648, %v3712_v18  ;;  %v3726_v35 = vand.u32 2147483647, %v3712_v18  ;;  %vm3722_vm9 = vweird.f32 %v3712_v18 }
 0xb3c   :  { %v3729_v19 = vor.u32 1.1754944e-38, %v3728_v9  ;;  %vm3727_vm0 = vcmp.eq.f32.partialorder %v3726_v35, 8.507059e+37  ;;  %v3934_v9 = vmul.f32 %v8547_v42, %v7141_v33  ;;  %v4039_v35 = vsel %vm9401_vm6, %v8543_v2, 0.0 }
 0xb3e   :  { %v8581_v10 = vsub.f32 %v8001_v50, %v3934_v9  ;;  %v5362_v50 = vld [vmem:[#allocation14 + $0x1] ss:$0 sm:$0xff] }
 0xb3f   :  { %4297 = vrot.lane.b32.xlu1 %v5362_v50, %s5889_s6  ;;  %v4435_v50 = vld [vmem:[%s9005_s20 + $0x10] sm:$0xff] }
 0xb40   :  { %v5546_v24 = vpop.eup %5545  ;;  %v3966_v15 = vmul.f32 %v8581_v10, %v8581_v10 }
 0xb41   :  { %v3718_v60 = vmul.f32 %v5546_v24, %v3712_v18  ;;  %v3714_v41 = vpop.permute.xlu0 %3713  ;;  %vm3723_vm13 = vweird.f32 %v5546_v24 }
 0xb42   :  { %5547 = vrcp.f32 %v3714_v41  ;;  %vm3724_vm5 = vmor %vm3722_vm9, %vm3723_vm13  ;;  %v3743_v22 = vand.u32 2147483648, %v3714_v41  ;;  %v3741_v52 = vand.u32 2147483647, %v3714_v41  ;;  %vm3737_vm2 = vweird.f32 %v3714_v41 }
 0xb43   :  { %v3719_v39 = vsub.f32 1.0, %v3718_v60  ;;  %v2673_v60 = vadd.f32 %v9398_v53, %v2620_v44  ;;  %vm9404_vm13 = vmmov %vm9399_vm1 }
 0xb44   :  { %v3744_v47 = vor.u32 1.1754944e-38, %v3743_v22  ;;  %vm3742_vm11 = vcmp.eq.f32.partialorder %v3741_v52, 8.507059e+37  ;;  %vm9406_vm9 = vmmov %vm9399_vm1 }
 0xb45   :  { %v3720_v38 = vmul.f32 %v5546_v24, %v3719_v39 }
 0xb47   :  { %v3721_v6 = vadd.f32 %v5546_v24, %v3720_v38  ;;  %v3906_v38 = vsel %vm9400_vm3, %v8509_v36, 0.0 }
 0xb48   :  { %v5548_v45 = vpop.eup %5547 }
 0xb49   :  { %v3733_v23 = vmul.f32 %v5548_v45, %v3714_v41  ;;  %v3725_v57 = vsel %vm3724_vm5, %v5546_v24, %v3721_v6  ;;  %vm3738_vm4 = vweird.f32 %v5548_v45  ;;  %v3704_v24 = vmul.f32 %v3703_v40, %v8497_v3  ;;  %v3860_v8 = vpop.permute.xlu0 %3859  ;;  %vm9408_vm5 = vmmov %vm9399_vm1 }
 0xb4a   :  { %v3730_v34 = vsel %vm3727_vm0, %v3729_v19, %v3725_v57  ;;  %vm3739_vm14 = vmor %vm3737_vm2, %vm3738_vm4  ;;  %v3930_v41 = vmul.f32 %v8501_v32, %v7141_v33 }
 0xb4b   :  { %v3734_v56 = vsub.f32 1.0, %v3733_v23  ;;  %v3731_v18 = vmul.f32 %v3730_v34, %v8503_v14  ;;  %v3706_v26 = vadd.f32 %v3704_v24, %v2673_v60  ;;  %v4042_v34 = vsel %vm9403_vm7, %v8549_v5, 0.0  ;;  %vm9409_vm0 = vmmov %vm9399_vm1 }
 0xb4c   :  { %v8574_v3 = vsub.f32 %v7821_v51, %v3930_v41  ;;  %vm9410_vm4 = vmmov %vm9409_vm0 }
 0xb4d   :  { %v3735_v58 = vmul.f32 %v5548_v45, %v3734_v56  ;;  %v3747_v1 = vadd.f32 %v3731_v18, %v3705_v13  ;;  %v4045_v13 = vsel %vm9405_vm15, %v8545_v4, 0.0  ;;  %v3921_v18 = vsel %vm9406_vm9, %v3860_v8, 0.0  ;;  %v5363_v4 = vld [vmem:[#allocation15 + $0x1] ss:$0 sm:$0xff]  ;;  %vm9411_vm2 = vmmov %vm9409_vm0 }
 0xb4e   :  { %v3962_v44 = vmul.f32 %v8574_v3, %v8574_v3  ;;  %vm9413_vm15 = vmmov %vm9409_vm0 }
 0xb4f   :  { %v3736_v7 = vadd.f32 %v5548_v45, %v3735_v58  ;;  %v3753_v0 = vsel %vm9391_vm10, %v3747_v1, 0.0  ;;  %vm9414_vm9 = vmmov %vm9409_vm0 }
 0xb50   :  { %3754 = vadd.xlane.f32.xlu2 %v3753_v0 }
 0xb51   :  { %v3740_v37 = vsel %vm3739_vm14, %v5548_v45, %v3736_v7  ;;  %v4000_v6 = vpop.permute.xlu0 %3999 }
 0xb52   :  { %v3745_v14 = vsel %vm3742_vm11, %v3744_v47, %v3740_v37 }
 0xb53   :  { %v3746_v39 = vmul.f32 %v3745_v14, %v8507_v43  ;;  %v3905_v43 = vpop.xlane.xlu1 %3904  ;;  %v4051_v14 = vsel %vm9409_vm0, %v4000_v6, 0.0 }
 0xb54   :  { %v3935_v32 = vmul.f32 %v3905_v43, %v7141_v33 }
 0xb55   :  { %v3748_v48 = vadd.f32 %v3746_v39, %v3706_v26 }
 0xb56   :  { %v8589_v51 = vsub.f32 %v9385_v21, %v3935_v32  ;;  %v4436_v32 = vld [vmem:[%s9005_s20 + $0x18] sm:$0xff] }
 0xb57   :  { %v3756_v49 = vsel %vm9399_vm1, %v3748_v48, 0.0  ;;  %4455 = vmatpush.msra.mxu3 %v4436_v32 }
 0xb58   :  { %3757 = vadd.xlane.f32.xlu0 %v3756_v49  ;;  %v3967_v42 = vmul.f32 %v8589_v51, %v8589_v51 }
 0xb59   :  { %v3862_v21 = vpop.permute.xlu0 %3861  ;;  %4456 = vmatpush.msra.mxu3 %v4435_v50 }
 0xb5a   :  { %v3924_v9 = vsel %vm9410_vm4, %v3862_v21, 0.0  ;;  %v4433_v21 = vld [vmem:[%s9005_s20] sm:$0xff] }
 0xb5b   :  { %v3911_v40 = vpop.xlane.xlu1 %3910 }
 0xb5c   :  { %v3937_v52 = vmul.f32 %v3911_v40, %v7141_v33 }
 0xb5e   :  { %v8619_v5 = vsub.f32 %v7839_v20, %v3937_v52 }
 0xb61   :  { %v4002_v30 = vpop.permute.xlu0 %4001 }
 0xb62   :  { %v4054_v60 = vsel %vm9408_vm5, %v4002_v30, 0.0  ;;  %vm9417_vm5 = vmmov %vm9409_vm0 }
 0xb63   :  { %v3914_v20 = vpop.xlane.xlu1 %3913 }
 0xb64   :  { %v3938_v41 = vmul.f32 %v3914_v20, %v7141_v33 }
 0xb68   :  { %3997 = vrot.lane.b32.xlu2 %v3962_v44, %s5895_s5 }
 0xb69   :  { %v4004_v45 = vpop.permute.xlu0 %4003 }
 0xb6b   :  { %v3917_v53 = vpop.xlane.xlu1 %3916 }
 0xb6c   :  { %4005 = vrot.lane.b32.xlu0 %v3966_v15, %s5895_s5  ;;  %v8647_v15 = vsub.f32 %v7845_v25, %v3938_v41 }
 0xb73   :  { %v3920_v37 = vpop.xlane.xlu1 %3919 }
 0xb74   :  { %4007 = vrot.lane.b32.xlu0 %v3967_v42, %s5895_s5  ;;  %v3940_v26 = vmul.f32 %v3920_v37, %v7141_v33  ;;  %v4057_v42 = vsel %vm9411_vm2, %v4004_v45, 0.0 }
 0xb76   :  { %v8636_v39 = vsub.f32 %v9386_v62, %v3940_v26  ;;  %v3970_v62 = vmul.f32 %v8647_v15, %v8647_v15 }
 0xb91   :  { %3907 = vadd.xlane.f32.xlu2 %v3906_v38 }
 0xb99   :  { %4040 = vadd.xlane.f32.xlu2 %v4039_v35  ;;  %v4434_v35 = vld [vmem:[%s9005_s20 + $0x8] sm:$0xff] }
 0xb9a   :  { %4457 = vmatpush.msra.mxu3 %v4434_v35 }
 0xb9c   :  { %4458 = vmatpush.msra.mxu3 %v4433_v21 }
 0xbc3   :  { %v3755_v17 = vpop.xlane.xlu2 %3754 }
 0xbc4   :  { %v3759_v63 = vmul.f32 %v3755_v17, %v7141_v33 }
 0xbc6   :  { %v8600_v12 = vsub.f32 %v3747_v1, %v3759_v63  ;;  %v3969_v1 = vmul.f32 %v8619_v5, %v8619_v5 }
 0xbc8   :  { %v3763_v19 = vmul.f32 %v8600_v12, %v8600_v12 }
 0xbca   :  { %v3765_v36 = vsel %vm9402_vm8, %v3763_v19, 0.0 }
 0xbcb   :  { %3766 = vadd.xlane.f32.xlu2 %v3765_v36  ;;  %v3758_v23 = vpop.xlane.xlu0 %3757  ;;  %v3998_v22 = vpop.permute.xlu2 %3997 }
 0xbcc   :  { %v3760_v2 = vmul.f32 %v3758_v23, %v7141_v33  ;;  %v4048_v58 = vsel %vm9407_vm12, %v3998_v22, 0.0  ;;  %vm9416_vm12 = vmmov %vm9409_vm0 }
 0xbce   :  { %v8606_v57 = vsub.f32 %v3748_v48, %v3760_v2 }
 0xbd0   :  { %v3764_v55 = vmul.f32 %v8606_v57, %v8606_v57 }
 0xbd2   :  { %v3768_v56 = vsel %vm9404_vm13, %v3764_v55, 0.0 }
 0xbd3   :  { %4043 = vadd.xlane.f32.xlu2 %v4042_v34  ;;  %3769 = vadd.xlane.f32.xlu0 %v3768_v56  ;;  %v3939_v56 = vmul.f32 %v3917_v53, %v7141_v33 }
 0xbdb   :  { %4046 = vadd.xlane.f32.xlu2 %v4045_v13  ;;  %3922 = vadd.xlane.f32.xlu0 %v3921_v18 }
 0xbde   :  { %v8644_v44 = vpop.permute.xlu0 %4005 }
 0xbe3   :  { %4049 = vadd.xlane.f32.xlu2 %v4048_v58  ;;  %v8671_v58 = vsub.f32 %v7875_v29, %v3939_v56 }
 0xbe5   :  { %v3971_v20 = vmul.f32 %v8671_v58, %v8671_v58 }
 0xbe6   :  { %v8659_v25 = vpop.permute.xlu0 %4007 }
 0xbef   :  { %4011 = vrot.lane.b32.xlu0 %v3969_v1, %s5895_s5 }
 0xbfb   :  { %4318 = vrot.lane.b32.xlu2 %v5363_v4, %s5889_s6 }
 0xc04   :  { %v3908_v7 = vpop.xlane.xlu2 %3907 }
 0xc05   :  { %v3936_v0 = vmul.f32 %v3908_v7, %v7141_v33 }
 0xc07   :  { %v8627_v24 = vsub.f32 %v7963_v16, %v3936_v0  ;;  %v3972_v16 = vmul.f32 %v8636_v39, %v8636_v39  ;;  %v5364_v0 = vld [vmem:[#allocation11 + $0x1] ss:$0 sm:$0xff] }
 0xc09   :  { %v3968_v47 = vmul.f32 %v8627_v24, %v8627_v24 }
 0xc0b   :  { %4009 = vrot.lane.b32.xlu1 %v3968_v47, %s5895_s5 }
 0xc0c   :  { %v4041_v48 = vpop.xlane.xlu2 %4040 }
 0xc0d   :  { %v4087_v49 = vmul.f32 %v4041_v48, %v7141_v33 }
 0xc0f   :  { %v4103_v43 = vadd.f32 1e-05, %v4087_v49 }
 0xc11   :  { %5549 = vrsqrt.f32 %v4103_v43  ;;  %vm4125_vm3 = vweird.f32 %v4103_v43 }
 0xc17   :  { %v5550_v8 = vpop.eup %5549 }
 0xc18   :  { %v4120_v45 = vmul.f32 %v5550_v8, %v4103_v43  ;;  %vm4126_vm14 = vweird.f32 %v5550_v8 }
 0xc19   :  { %4055 = vadd.xlane.f32.xlu0 %v4054_v60  ;;  %vm4127_vm6 = vmor %vm4125_vm3, %vm4126_vm14  ;;  %v5365_v60 = vld [vmem:[#allocation12 + $0x1] ss:$0 sm:$0xff] }
 0xc1a   :  { %v4121_v17 = vmul.f32 %v5550_v8, %v4120_v45  ;;  %vm9418_vm14 = vmmov %vm9417_vm5 }
 0xc1c   :  { %v4122_v55 = vmul.f32 0.5, %v4121_v17  ;;  %v4060_v17 = vsel %vm9414_vm9, %v8644_v44, 0.0 }
 0xc1e   :  { %v4123_v18 = vsub.f32 1.5, %v4122_v55 }
 0xc20   :  { %v4124_v4 = vmul.f32 %v5550_v8, %v4123_v18 }
 0xc24   :  { %4052 = vadd.xlane.f32.xlu2 %v4051_v14  ;;  %v4128_v14 = vsel %vm4127_vm6, %v5550_v8, %v4124_v4 }
 0xc25   :  { %v4279_v49 = vmul.f32 %v4128_v14, %v8469_v11 }
 0xc2d   :  { %4017 = vrot.lane.b32.xlu0 %v3972_v16, %s5895_s5 }
 0xc35   :  { %3925 = vadd.xlane.f32.xlu1 %v3924_v9 }
 0xc3c   :  { %4013 = vrot.lane.b32.xlu2 %v3970_v62, %s5895_s5  ;;  %v8678_v62 = vpop.permute.xlu1 %4297 }
 0xc3d   :  { %4058 = vadd.xlane.f32.xlu1 %v4057_v42  ;;  %v9412_v42 = vld [vmem:[#allocation52_spill] sm:$0xff] }
 0xc3e   :  { %v3767_v38 = vpop.xlane.xlu2 %3766 }
 0xc3f   :  { %v3771_v6 = vmul.f32 %v3767_v38, %v7141_v33  ;;  %v4300_v38 = vmul.f32 %v8678_v62, %v4279_v49 }
 0xc41   :  { %v3773_v30 = vadd.f32 1e-05, %v3771_v6 }
 0xc43   :  { %5551 = vrsqrt.f32 %v3773_v30  ;;  %vm3781_vm11 = vweird.f32 %v3773_v30 }
 0xc46   :  { %v4044_v63 = vpop.xlane.xlu2 %4043  ;;  %v3770_v19 = vpop.xlane.xlu0 %3769 }
 0xc47   :  { %v3772_v36 = vmul.f32 %v3770_v19, %v7141_v33 }
 0xc49   :  { %v5552_v23 = vpop.eup %5551  ;;  %v3774_v2 = vadd.f32 1e-05, %v3772_v36 }
 0xc4a   :  { %v3776_v34 = vmul.f32 %v5552_v23, %v3773_v30  ;;  %vm3782_vm10 = vweird.f32 %v5552_v23  ;;  %v4088_v30 = vmul.f32 %v4044_v63, %v7141_v33 }
 0xc4b   :  { %5553 = vrsqrt.f32 %v3774_v2  ;;  %vm3783_vm1 = vmor %vm3781_vm11, %vm3782_vm10  ;;  %vm3791_vm7 = vweird.f32 %v3774_v2 }
 0xc4c   :  { %v3777_v13 = vmul.f32 %v5552_v23, %v3776_v34  ;;  %v4104_v36 = vadd.f32 1e-05, %v4088_v30 }
 0xc4e   :  { %v3778_v22 = vmul.f32 0.5, %v3777_v13  ;;  %v4047_v40 = vpop.xlane.xlu2 %4046  ;;  %5555 = vrsqrt.f32 %v4104_v36  ;;  %v3923_v34 = vpop.xlane.xlu0 %3922  ;;  %vm4135_vm4 = vweird.f32 %v4104_v36 }
 0xc4f   :  { %v3941_v63 = vmul.f32 %v3923_v34, %v7141_v33 }
 0xc50   :  { %v3779_v52 = vsub.f32 1.5, %v3778_v22 }
 0xc51   :  { %v5554_v1 = vpop.eup %5553  ;;  %v8697_v44 = vsub.f32 %v9387_v28, %v3941_v63 }
 0xc52   :  { %v3780_v7 = vmul.f32 %v5552_v23, %v3779_v52  ;;  %v3786_v47 = vmul.f32 %v5554_v1, %v3774_v2  ;;  %vm3792_vm8 = vweird.f32 %v5554_v1  ;;  %v4089_v2 = vmul.f32 %v4047_v40, %v7141_v33 }
 0xc53   :  { %vm3793_vm13 = vmor %vm3791_vm7, %vm3792_vm8  ;;  %v3973_v4 = vmul.f32 %v8697_v44, %v8697_v44 }
 0xc54   :  { %v3784_v53 = vsel %vm3783_vm1, %v5552_v23, %v3780_v7  ;;  %v3787_v37 = vmul.f32 %v5554_v1, %v3786_v47  ;;  %v4105_v55 = vadd.f32 1e-05, %v4089_v2  ;;  %v5556_v56 = vpop.eup %5555  ;;  %vm9419_vm7 = vmmov %vm9417_vm5 }
 0xc55   :  { %v3795_v29 = vmul.f32 %v3784_v53, %v8600_v12  ;;  %v4130_v18 = vmul.f32 %v5556_v56, %v4104_v36  ;;  %vm4136_vm0 = vweird.f32 %v5556_v56 }
 0xc56   :  { %v4050_v26 = vpop.xlane.xlu2 %4049  ;;  %4015 = vrot.lane.b32.xlu1 %v3971_v20, %s5895_s5  ;;  %v3788_v48 = vmul.f32 0.5, %v3787_v37  ;;  %5557 = vrsqrt.f32 %v4105_v55  ;;  %vm4137_vm2 = vmor %vm4135_vm4, %vm4136_vm0  ;;  %vm4145_vm11 = vweird.f32 %v4105_v55 }
 0xc57   :  { %v3800_v16 = vmul.f32 %v5364_v0, %v3795_v29  ;;  %v4090_v13 = vmul.f32 %v4050_v26, %v7141_v33  ;;  %v4131_v52 = vmul.f32 %v5556_v56, %v4130_v18 }
 0xc58   :  { %v3789_v9 = vsub.f32 1.5, %v3788_v48 }
 0xc59   :  { %v3805_v41 = vadd.f32 %v5365_v60, %v3800_v16  ;;  %v4106_v22 = vadd.f32 1e-05, %v4090_v13  ;;  %v4132_v40 = vmul.f32 0.5, %v4131_v52 }
 0xc5a   :  { %v3790_v32 = vmul.f32 %v5554_v1, %v3789_v9 }
 0xc5b   :  { %v3807_v43 = vmax.f32 %v3805_v41, 0.0  ;;  %5559 = vrsqrt.f32 %v4106_v22  ;;  %v4133_v47 = vsub.f32 1.5, %v4132_v40  ;;  %vm4155_vm6 = vweird.f32 %v4106_v22 }
 0xc5c   :  { %v3794_v50 = vsel %vm3793_vm13, %v5554_v1, %v3790_v32  ;;  %v5558_v1 = vpop.eup %5557 }
 0xc5d   :  { %v3809_v12 = vadd.f32 %v3807_v43, %v9412_v42  ;;  %v3796_v35 = vmul.f32 %v3794_v50, %v8606_v57  ;;  %v9415_v57 = vld [vmem:[#allocation49_spill] sm:$0xff]  ;;  %v4140_v7 = vmul.f32 %v5558_v1, %v4105_v55  ;;  %v4134_v28 = vmul.f32 %v5556_v56, %v4133_v47 }
 0xc5e   :  { %v8683_v8 = vpop.permute.xlu2 %4318  ;;  %vm4146_vm10 = vweird.f32 %v5558_v1 }
 0xc5f   :  { %5057 = vmatmul.msk.f32.vlgmr.msra.gmra.mxu3 %vm9413_vm15, %v3809_v12  ;;  %v4321_v11 = vadd.f32 %v8683_v8, %v4300_v38  ;;  %v3801_v6 = vmul.f32 %v5364_v0, %v3796_v35  ;;  %v4063_v0 = vsel %vm9417_vm5, %v8659_v25, 0.0  ;;  %v4141_v20 = vmul.f32 %v5558_v1, %v4140_v7  ;;  %vm4147_vm1 = vmor %vm4145_vm11, %vm4146_vm10 }
 0xc60   :  { %v4138_v14 = vsel %vm4137_vm2, %v5556_v56, %v4134_v28  ;;  %vm9421_vm11 = vmmov %vm9419_vm7 }
 0xc61   :  { %v4337_v21 = vmax.f32 %v4321_v11, 0.0  ;;  %v3806_v45 = vadd.f32 %v5365_v60, %v3801_v6  ;;  %v5560_v53 = vpop.eup %5559  ;;  %v4142_v60 = vmul.f32 0.5, %v4141_v20  ;;  %v8704_v37 = vpop.permute.xlu0 %4011  ;;  %v4280_v49 = vmul.f32 %v4138_v14, %v8479_v31 }
 0xc62   :  { %v4150_v29 = vmul.f32 %v5560_v53, %v4106_v22  ;;  %vm4156_vm3 = vweird.f32 %v5560_v53 }
 0xc63   :  { %4369 = vrot.lane.b32.xlu0 %v4337_v21, %s5895_s5  ;;  %v3808_v19 = vmax.f32 %v3806_v45, 0.0  ;;  %v4143_v26 = vsub.f32 1.5, %v4142_v60  ;;  %v4301_v12 = vmul.f32 %v8678_v62, %v4280_v49  ;;  %vm4157_vm8 = vmor %vm4155_vm6, %vm4156_vm3  ;;  %vm9425_vm6 = vcmask 130048  }
 0xc64   :  { %v4151_v16 = vmul.f32 %v5560_v53, %v4150_v29 }
 0xc65   :  { %4061 = vadd.xlane.f32.xlu2 %v4060_v17  ;;  %v3810_v23 = vadd.f32 %v3808_v19, %v9415_v57  ;;  %v4144_v41 = vmul.f32 %v5558_v1, %v4143_v26  ;;  %v4322_v31 = vadd.f32 %v8683_v8, %v4301_v12 }
 0xc66   :  { %v4152_v25 = vmul.f32 0.5, %v4151_v16  ;;  %v4572_v16 = vld [vmem:[%s9006_s21 + $0x18] sm:$0xff] }
 0xc67   :  { %5058 = vmatmul.msk.f32.gmra.mxu3 %vm9416_vm12, %v3810_v23  ;;  %v4148_v50 = vsel %vm4147_vm1, %v5558_v1, %v4144_v41  ;;  %v4338_v30 = vmax.f32 %v4322_v31, 0.0  ;;  %4633 = vmatpush.msra.mxu1 %v4572_v16  ;;  %vm9423_vm1 = vmmov %vm9419_vm7 }
 0xc68   :  { %v4153_v38 = vsub.f32 1.5, %v4152_v25  ;;  %v4281_v35 = vmul.f32 %v4148_v50, %v8488_v61  ;;  %vm9424_vm3 = vmmov %vm9423_vm1 }
 0xc6a   :  { %v4154_v11 = vmul.f32 %v5560_v53, %v4153_v38  ;;  %v4302_v45 = vmul.f32 %v8678_v62, %v4281_v35 }
 0xc6c   :  { %v4158_v17 = vsel %vm4157_vm8, %v5560_v53, %v4154_v11  ;;  %v4323_v23 = vadd.f32 %v8683_v8, %v4302_v45  ;;  %vm9426_vm8 = vmmov %vm9425_vm6 }
 0xc6d   :  { %v4282_v61 = vmul.f32 %v4158_v17, %v8574_v3 }
 0xc6e   :  { %v4339_v34 = vmax.f32 %v4323_v23, 0.0 }
 0xc6f   :  { %v4303_v56 = vmul.f32 %v8678_v62, %v4282_v61 }
 0xc71   :  { %v4324_v52 = vadd.f32 %v8683_v8, %v4303_v56 }
 0xc73   :  { %v4340_v40 = vmax.f32 %v4324_v52, 0.0 }
 0xc7d   :  { %4019 = vrot.lane.b32.xlu2 %v3973_v4, %s5895_s5  ;;  %v4010_v48 = vpop.permute.xlu1 %4009 }
 0xc7e   :  { %v4066_v9 = vsel %vm9418_vm14, %v4010_v48, 0.0  ;;  %vm9420_vm14 = vmmov %vm9419_vm7 }
 0xc80   :  { %4064 = vadd.xlane.f32.xlu1 %v4063_v0 }
 0xc8c   :  { %v4056_v43 = vpop.xlane.xlu0 %4055 }
 0xc8d   :  { %v4092_v32 = vmul.f32 %v4056_v43, %v7141_v33  ;;  %4067 = vadd.xlane.f32.xlu0 %v4066_v9  ;;  %v4570_v9 = vld [vmem:[%s9006_s21 + $0x8] sm:$0xff] }
 0xc8f   :  { %v4108_v42 = vadd.f32 1e-05, %v4092_v32 }
 0xc91   :  { %5561 = vrsqrt.f32 %v4108_v42  ;;  %vm4175_vm9 = vweird.f32 %v4108_v42 }
 0xc97   :  { %v5562_v6 = vpop.eup %5561  ;;  %v4053_v21 = vpop.xlane.xlu2 %4052 }
 0xc98   :  { %v4091_v19 = vmul.f32 %v4053_v21, %v7141_v33  ;;  %v4170_v36 = vmul.f32 %v5562_v6, %v4108_v42  ;;  %vm4176_vm13 = vweird.f32 %v5562_v6  ;;  %v4569_v42 = vld [vmem:[%s9006_s21] sm:$0xff] }
 0xc99   :  { %4371 = vrot.lane.b32.xlu1 %v4338_v30, %s5895_s5  ;;  %vm4177_vm12 = vmor %vm4175_vm9, %vm4176_vm13 }
 0xc9a   :  { %v4107_v57 = vadd.f32 1e-05, %v4091_v19  ;;  %v4171_v2 = vmul.f32 %v5562_v6, %v4170_v36  ;;  %vm9427_vm9 = vmmov %vm9423_vm1 }
 0xc9c   :  { %5563 = vrsqrt.f32 %v4107_v57  ;;  %v4172_v13 = vmul.f32 0.5, %v4171_v2  ;;  %vm4165_vm5 = vweird.f32 %v4107_v57 }
 0xc9e   :  { %v4173_v1 = vsub.f32 1.5, %v4172_v13 }
 0xc9f   :  { %v4014_v55 = vpop.permute.xlu2 %4013  ;;  %v4018_v61 = vpop.permute.xlu0 %4017 }
 0xca0   :  { %v4072_v63 = vsel %vm9419_vm7, %v4014_v55, 0.0  ;;  %v4174_v0 = vmul.f32 %v5562_v6, %v4173_v1  ;;  %v4078_v2 = vsel %vm9421_vm11, %v4018_v61, 0.0  ;;  %vm9433_vm11 = vmmov %vm9423_vm1 }
 0xca1   :  { %4073 = vadd.xlane.f32.xlu0 %v4072_v63  ;;  %4373 = vrot.lane.b32.xlu1 %v4339_v34, %s5895_s5  ;;  %v9422_v34 = vld [vmem:[#allocation43_spill] sm:$0xff] }
 0xca2   :  { %v5564_v18 = vpop.eup %5563  ;;  %v4178_v60 = vsel %vm4177_vm12, %v5562_v6, %v4174_v0  ;;  %vm9429_vm12 = vmmov %vm9423_vm1 }
 0xca3   :  { %v4160_v22 = vmul.f32 %v5564_v18, %v4107_v57  ;;  %vm4166_vm15 = vweird.f32 %v5564_v18  ;;  %v4284_v48 = vmul.f32 %v4178_v60, %v8529_v46 }
 0xca4   :  { %vm4167_vm0 = vmor %vm4165_vm5, %vm4166_vm15 }
 0xca5   :  { %v4161_v3 = vmul.f32 %v5564_v18, %v4160_v22  ;;  %v4305_v46 = vmul.f32 %v8678_v62, %v4284_v48  ;;  %v5611_v22 = vld [vmem:[%s9116_s8] sm:$0xff] }
 0xca7   :  { %v4162_v4 = vmul.f32 0.5, %v4161_v3  ;;  %v4326_v12 = vadd.f32 %v8683_v8, %v4305_v46 }
 0xca8   :  { %v3926_v7 = vpop.xlane.xlu1 %3925 }
 0xca9   :  { %v4163_v47 = vsub.f32 1.5, %v4162_v4  ;;  %v3942_v20 = vmul.f32 %v3926_v7, %v7141_v33  ;;  %4375 = vrot.lane.b32.xlu1 %v4340_v40, %s5895_s5  ;;  %v4342_v35 = vmax.f32 %v4326_v12, 0.0  ;;  %v9428_v12 = vld [vmem:[#allocation46_spill] sm:$0xff] }
 0xcab   :  { %v4164_v53 = vmul.f32 %v5564_v18, %v4163_v47  ;;  %v8724_v28 = vsub.f32 %v9390_v27, %v3942_v20 }
 0xcad   :  { %v4168_v29 = vsel %vm4167_vm0, %v5564_v18, %v4164_v53  ;;  %v3974_v14 = vmul.f32 %v8724_v28, %v8724_v28  ;;  %vm9430_vm0 = vmmov %vm9425_vm6 }
 0xcae   :  { %v4283_v26 = vmul.f32 %v4168_v29, %v8518_v59  ;;  %v4571_v59 = vld [vmem:[%s9006_s21 + $0x10] sm:$0xff]  ;;  %v5612_v29 = vld [vmem:[%s9116_s8 + $0x8] sm:$0xff] }
 0xcaf   :  { %4021 = vrot.lane.b32.xlu2 %v3974_v14, %s5895_s5  ;;  %4634 = vmatpush.msra.mxu1 %v4571_v59 }
 0xcb0   :  { %v4059_v49 = vpop.xlane.xlu1 %4058  ;;  %v4304_v27 = vmul.f32 %v8678_v62, %v4283_v26 }
 0xcb1   :  { %v4093_v41 = vmul.f32 %v4059_v49, %v7141_v33  ;;  %4635 = vmatpush.msra.mxu1 %v4570_v9 }
 0xcb2   :  { %v4325_v25 = vadd.f32 %v8683_v8, %v4304_v27 }
 0xcb3   :  { %v4109_v43 = vadd.f32 1e-05, %v4093_v41  ;;  %4636 = vmatpush.msra.mxu1 %v4569_v42 }
 0xcb4   :  { %v4341_v32 = vmax.f32 %v4325_v25, 0.0 }
 0xcb5   :  { %5565 = vrsqrt.f32 %v4109_v43  ;;  %vm4185_vm2 = vweird.f32 %v4109_v43 }
 0xcb6   :  { %4377 = vrot.lane.b32.xlu1 %v4341_v32, %s5895_s5 }
 0xcbb   :  { %v5566_v50 = vpop.eup %5565 }
 0xcbc   :  { %v4180_v38 = vmul.f32 %v5566_v50, %v4109_v43  ;;  %vm4186_vm4 = vweird.f32 %v5566_v50 }
 0xcbd   :  { %vm4187_vm10 = vmor %vm4185_vm2, %vm4186_vm4 }
 0xcbe   :  { %v4181_v31 = vmul.f32 %v5566_v50, %v4180_v38  ;;  %4379 = vrot.lane.b32.xlu1 %v4342_v35, %s5895_s5 }
 0xcc0   :  { %v4182_v11 = vmul.f32 0.5, %v4181_v31 }
 0xcc2   :  { %v4183_v6 = vsub.f32 1.5, %v4182_v11 }
 0xcc4   :  { %v4184_v21 = vmul.f32 %v5566_v50, %v4183_v6 }
 0xcc6   :  { %v4188_v30 = vsel %vm4187_vm10, %v5566_v50, %v4184_v21  ;;  %vm9432_vm10 = vmmov %vm9423_vm1 }
 0xcc7   :  { %v4285_v45 = vmul.f32 %v4188_v30, %v8537_v54  ;;  %v4069_v54 = vsel %vm9423_vm1, %v8704_v37, 0.0  ;;  %v5613_v30 = vld [vmem:[%s9116_s8 + $0x10] sm:$0xff] }
 0xcc8   :  { %v4016_v17 = vpop.permute.xlu1 %4015 }
 0xcc9   :  { %v4075_v19 = vsel %vm9420_vm14, %v4016_v17, 0.0  ;;  %v4306_v36 = vmul.f32 %v8678_v62, %v4285_v45 }
 0xcca   :  { %4076 = vadd.xlane.f32.xlu0 %v4075_v19 }
 0xccb   :  { %v4327_v57 = vadd.f32 %v8683_v8, %v4306_v36  ;;  %v9431_v36 = vld [vmem:[#allocation45_spill] sm:$0xff] }
 0xccd   :  { %v4343_v23 = vmax.f32 %v4327_v57, 0.0 }
 0xccf   :  { %4381 = vrot.lane.b32.xlu1 %v4343_v23, %s5895_s5 }
 0xcd2   :  { %4079 = vadd.xlane.f32.xlu0 %v4078_v2 }
 0xcd5   :  { %v4370_v55 = vpop.permute.xlu0 %4369 }
 0xcd6   :  { %v4417_v56 = vadd.f32 %v4370_v55, %v9422_v34 }
 0xcd8   :  { %4070 = vadd.xlane.f32.xlu2 %v4069_v54  ;;  %5075 = vmatmul.msk.f32.vlgmr.msra.gmra.mxu1 %vm9424_vm3, %v4417_v56  ;;  %v4062_v1 = vpop.xlane.xlu2 %4061 }
 0xcd9   :  { %v4094_v4 = vmul.f32 %v4062_v1, %v7141_v33 }
 0xcdb   :  { %v4110_v40 = vadd.f32 1e-05, %v4094_v4  ;;  %v9437_v4 = vld [vmem:[#allocation47_spill] sm:$0xff] }
 0xcdd   :  { %vm4195_vm1 = vweird.f32 %v4110_v40 }
 0xce0   :  { %v4020_v20 = vpop.permute.xlu2 %4019 }
 0xce1   :  { %v4081_v55 = vsel %vm9433_vm11, %v4020_v20, 0.0  ;;  %v5615_v20 = vld [vmem:[%s9116_s8 + $0x20] sm:$0xff] }
 0xce2   :  { %v4460_v63 = vpop.f32.mrf.mxu3 }
 0xcea   :  { %v4463_v13 = vpop.f32.mrf.mxu3 }
 0xceb   :  { %v4466_v18 = vpack.c.bf16 %v4463_v13, %v4460_v63  ;;  %v9434_v63 = vld [vmem:[#allocation44_spill] sm:$0xff] }
 0xced   :  { %4527 = vmatpush.bf16.msra.mxu2 %v4466_v18  ;;  %4468 = vrot.lane.b32.xlu0 %v4466_v18, %s5895_s5 }
 0xcf0   :  { %5067 = vmatmul.msk.bf16.vlgmr.msra.gmra.mxu2 %vm9425_vm6, %v5611_v22  ;;  %vm9435_vm6 = vmmov %vm9427_vm9 }
 0xcf3   :  { %v4065_v52 = vpop.xlane.xlu1 %4064 }
 0xcf4   :  { %v4095_v3 = vmul.f32 %v4065_v52, %v7141_v33  ;;  %v5614_v52 = vld [vmem:[%s9116_s8 + $0x18] sm:$0xff] }
 0xcf6   :  { %v4111_v37 = vadd.f32 1e-05, %v4095_v3 }
 0xcf8   :  { %5567 = vrsqrt.f32 %v4111_v37  ;;  %vm4205_vm13 = vweird.f32 %v4111_v37 }
 0xcf9   :  { %5569 = vrsqrt.f32 %v4110_v40 }
 0xcfe   :  { %v5568_v7 = vpop.eup %5567 }
 0xcff   :  { %v4200_v0 = vmul.f32 %v5568_v7, %v4111_v37  ;;  %v5570_v16 = vpop.eup %5569  ;;  %vm4206_vm7 = vweird.f32 %v5568_v7 }
 0xd00   :  { %v4068_v47 = vpop.xlane.xlu0 %4067  ;;  %5068 = vmatmul.msk.bf16.gmra.mxu2 %vm9426_vm8, %v5612_v29  ;;  %v4190_v27 = vmul.f32 %v5570_v16, %v4110_v40  ;;  %vm4207_vm15 = vmor %vm4205_vm13, %vm4206_vm7  ;;  %vm4196_vm14 = vweird.f32 %v5570_v16 }
 0xd01   :  { %v4201_v53 = vmul.f32 %v5568_v7, %v4200_v0  ;;  %v4096_v60 = vmul.f32 %v4068_v47, %v7141_v33  ;;  %vm4197_vm3 = vmor %vm4195_vm1, %vm4196_vm14  ;;  %v9439_v0 = vld [vmem:[#allocation50_spill] sm:$0xff] }
 0xd02   :  { %v4191_v46 = vmul.f32 %v5570_v16, %v4190_v27  ;;  %vm9436_vm8 = vmmov %vm9430_vm0 }
 0xd03   :  { %v4202_v14 = vmul.f32 0.5, %v4201_v53  ;;  %v4112_v26 = vadd.f32 1e-05, %v4096_v60  ;;  %vm9438_vm7 = vmmov %vm9435_vm6 }
 0xd04   :  { %v4192_v11 = vmul.f32 0.5, %v4191_v46  ;;  %vm9440_vm13 = vmmov %vm9430_vm0 }
 0xd05   :  { %v4203_v48 = vsub.f32 1.5, %v4202_v14  ;;  %5571 = vrsqrt.f32 %v4112_v26  ;;  %vm4215_vm4 = vweird.f32 %v4112_v26 }
 0xd06   :  { %v4193_v17 = vsub.f32 1.5, %v4192_v11 }
 0xd07   :  { %v4204_v49 = vmul.f32 %v5568_v7, %v4203_v48 }
 0xd08   :  { %v4194_v2 = vmul.f32 %v5570_v16, %v4193_v17 }
 0xd09   :  { %v4208_v41 = vsel %vm4207_vm15, %v5568_v7, %v4204_v49  ;;  %v4022_v25 = vpop.permute.xlu2 %4021  ;;  %vm9441_vm15 = vmmov %vm9435_vm6  ;;  %v9442_v49 = vld [vmem:[#allocation48_spill] sm:$0xff] }
 0xd0a   :  { %v4287_v59 = vmul.f32 %v4208_v41, %v8589_v51  ;;  %v4084_v9 = vsel %vm9427_vm9, %v4022_v25, 0.0  ;;  %v4198_v54 = vsel %vm4197_vm3, %v5570_v16, %v4194_v2  ;;  %v5616_v41 = vld [vmem:[%s9116_s8 + $0x28] sm:$0xff]  ;;  %vm9443_vm9 = vmmov %vm9430_vm0 }
 0xd0b   :  { %v5572_v43 = vpop.eup %5571  ;;  %v4372_v32 = vpop.permute.xlu1 %4371  ;;  %4085 = vadd.xlane.f32.xlu2 %v4084_v9  ;;  %v4286_v22 = vmul.f32 %v4198_v54, %v8581_v10 }
 0xd0c   :  { %v4210_v42 = vmul.f32 %v5572_v43, %v4112_v26  ;;  %v4418_v50 = vadd.f32 %v4372_v32, %v9428_v12  ;;  %v4308_v38 = vmul.f32 %v8678_v62, %v4287_v59  ;;  %vm4216_vm5 = vweird.f32 %v5572_v43 }
 0xd0d   :  { %vm4217_vm2 = vmor %vm4215_vm4, %vm4216_vm5  ;;  %v4307_v1 = vmul.f32 %v8678_v62, %v4286_v22 }
 0xd0e   :  { %v4211_v35 = vmul.f32 %v5572_v43, %v4210_v42  ;;  %5076 = vmatmul.msk.f32.gmra.mxu1 %vm9429_vm12, %v4418_v50  ;;  %v4329_v31 = vadd.f32 %v8683_v8, %v4308_v38  ;;  %vm9444_vm12 = vmmov %vm9435_vm6 }
 0xd0f   :  { %v4328_v3 = vadd.f32 %v8683_v8, %v4307_v1 }
 0xd10   :  { %v4212_v6 = vmul.f32 0.5, %v4211_v35  ;;  %v4345_v21 = vmax.f32 %v4329_v31, 0.0  ;;  %5069 = vmatmul.msk.bf16.gmra.mxu2 %vm9430_vm0, %v5613_v30  ;;  %v5617_v30 = vld [vmem:[%s9116_s8 + $0x30] sm:$0xff] }
 0xd11   :  { %v4344_v7 = vmax.f32 %v4328_v3, 0.0 }
 0xd12   :  { %v4213_v51 = vsub.f32 1.5, %v4212_v6  ;;  %4385 = vrot.lane.b32.xlu1 %v4345_v21, %s5895_s5 }
 0xd13   :  { %v4374_v45 = vpop.permute.xlu1 %4373 }
 0xd14   :  { %v4214_v19 = vmul.f32 %v5572_v43, %v4213_v51  ;;  %v4419_v57 = vadd.f32 %v4374_v45, %v9431_v36  ;;  %v4074_v53 = vpop.xlane.xlu0 %4073 }
 0xd15   :  { %v4098_v60 = vmul.f32 %v4074_v53, %v7141_v33 }
 0xd16   :  { %v4218_v61 = vsel %vm4217_vm2, %v5572_v43, %v4214_v19  ;;  %5077 = vmatmul.msk.f32.gmra.mxu1 %vm9432_vm10, %v4419_v57  ;;  %vm9445_vm2 = vmmov %vm9436_vm8 }
 0xd17   :  { %v4288_v23 = vmul.f32 %v4218_v61, %v8627_v24  ;;  %4082 = vadd.xlane.f32.xlu0 %v4081_v55  ;;  %v4114_v26 = vadd.f32 1e-05, %v4098_v60 }
 0xd19   :  { %v4309_v34 = vmul.f32 %v8678_v62, %v4288_v23  ;;  %vm4235_vm11 = vweird.f32 %v4114_v26 }
 0xd1b   :  { %v4376_v56 = vpop.permute.xlu1 %4375  ;;  %v4330_v18 = vadd.f32 %v8683_v8, %v4309_v34 }
 0xd1c   :  { %v4420_v13 = vadd.f32 %v4376_v56, %v9434_v63 }
 0xd1d   :  { %v4346_v24 = vmax.f32 %v4330_v18, 0.0 }
 0xd1e   :  { %5078 = vmatmul.msk.f32.gmra.mxu1 %vm9435_vm6, %v4420_v13 }
 0xd20   :  { %5070 = vmatmul.msk.bf16.gmra.mxu2 %vm9436_vm8, %v5614_v52  ;;  %vm9446_vm8 = vmmov %vm9445_vm2 }
 0xd23   :  { %4387 = vrot.lane.b32.xlu2 %v4346_v24, %s5895_s5 }
 0xd28   :  { %v4378_v37 = vpop.permute.xlu1 %4377 }
 0xd29   :  { %v4421_v40 = vadd.f32 %v4378_v37, %v9437_v4  ;;  %v5618_v4 = vld [vmem:[%s9116_s8 + $0x38] sm:$0xff] }
 0xd2b   :  { %5079 = vmatmul.msk.f32.gmra.mxu1 %vm9438_vm7, %v4421_v40  ;;  %4383 = vrot.lane.b32.xlu0 %v4344_v7, %s5895_s5 }
 0xd30   :  { %v4380_v10 = vpop.permute.xlu1 %4379  ;;  %5071 = vmatmul.msk.bf16.gmra.mxu2 %vm9440_vm13, %v5615_v20  ;;  %vm9447_vm13 = vmmov %vm9445_vm2 }
 0xd31   :  { %v4422_v47 = vadd.f32 %v4380_v10, %v9439_v0  ;;  %v5619_v0 = vld [vmem:[%s9117_s7] sm:$0xff] }
 0xd33   :  { %5080 = vmatmul.msk.f32.gmra.mxu1 %vm9441_vm15, %v4422_v47 }
 0xd3d   :  { %v4077_v29 = vpop.xlane.xlu0 %4076 }
 0xd3e   :  { %v4099_v14 = vmul.f32 %v4077_v29, %v7141_v33 }
 0xd40   :  { %v4115_v16 = vadd.f32 1e-05, %v4099_v14  ;;  %5072 = vmatmul.msk.bf16.gmra.mxu2 %vm9443_vm9, %v5616_v41  ;;  %v5621_v41 = vld [vmem:[%s9117_s7 + $0x10] sm:$0xff] }
 0xd41   :  { %v4382_v48 = vpop.permute.xlu1 %4381 }
 0xd42   :  { %5573 = vrsqrt.f32 %v4115_v16  ;;  %v4423_v27 = vadd.f32 %v4382_v48, %v9442_v49  ;;  %vm4245_vm0 = vweird.f32 %v4115_v16 }
 0xd43   :  { %5575 = vrsqrt.f32 %v4114_v26 }
 0xd44   :  { %5081 = vmatmul.msk.f32.gmra.mxu1 %vm9444_vm12, %v4423_v27  ;;  %vm9448_vm12 = vmmov %vm9445_vm2 }
 0xd45   :  { %v4080_v25 = vpop.xlane.xlu0 %4079 }
 0xd46   :  { %v4100_v59 = vmul.f32 %v4080_v25, %v7141_v33 }
 0xd48   :  { %v5574_v9 = vpop.eup %5573  ;;  %v4116_v43 = vadd.f32 1e-05, %v4100_v59 }
 0xd49   :  { %v4240_v32 = vmul.f32 %v5574_v9, %v4115_v16  ;;  %v5576_v46 = vpop.eup %5575  ;;  %vm4246_vm5 = vweird.f32 %v5574_v9  ;;  %v5620_v16 = vld [vmem:[%s9117_s7 + $0x8] sm:$0xff] }
 0xd4a   :  { %5577 = vrsqrt.f32 %v4116_v43  ;;  %v4230_v38 = vmul.f32 %v5576_v46, %v4114_v26  ;;  %vm4247_vm4 = vmor %vm4245_vm0, %vm4246_vm5  ;;  %vm4236_vm10 = vweird.f32 %v5576_v46  ;;  %vm4255_vm15 = vweird.f32 %v4116_v43 }
 0xd4b   :  { %v4241_v42 = vmul.f32 %v5574_v9, %v4240_v32  ;;  %v4071_v12 = vpop.xlane.xlu2 %4070  ;;  %vm4237_vm1 = vmor %vm4235_vm11, %vm4236_vm10 }
 0xd4c   :  { %v4097_v50 = vmul.f32 %v4071_v12, %v7141_v33  ;;  %v4231_v6 = vmul.f32 %v5576_v46, %v4230_v38  ;;  %vm9449_vm5 = vmmov %vm9445_vm2 }
 0xd4d   :  { %v4242_v35 = vmul.f32 0.5, %v4241_v42  ;;  %vm9450_vm10 = vmmov %vm9449_vm5 }
 0xd4e   :  { %v4113_v31 = vadd.f32 1e-05, %v4097_v50  ;;  %v4232_v19 = vmul.f32 0.5, %v4231_v6 }
 0xd4f   :  { %v4243_v11 = vsub.f32 1.5, %v4242_v35 }
 0xd50   :  { %5579 = vrsqrt.f32 %v4113_v31  ;;  %v5578_v51 = vpop.eup %5577  ;;  %5073 = vmatmul.msk.bf16.gmra.mxu2 %vm9445_vm2, %v5617_v30  ;;  %v4233_v55 = vsub.f32 1.5, %v4232_v19  ;;  %vm4225_vm3 = vweird.f32 %v4113_v31 }
 0xd51   :  { %v4244_v21 = vmul.f32 %v5574_v9, %v4243_v11  ;;  %v4250_v36 = vmul.f32 %v5578_v51, %v4116_v43  ;;  %vm4256_vm7 = vweird.f32 %v5578_v51 }
 0xd52   :  { %v4234_v13 = vmul.f32 %v5576_v46, %v4233_v55  ;;  %vm4257_vm9 = vmor %vm4255_vm15, %vm4256_vm7  ;;  %v5623_v55 = vld [vmem:[%s9117_s7 + $0x20] sm:$0xff] }
 0xd53   :  { %v4248_v45 = vsel %vm4247_vm4, %v5574_v9, %v4244_v21  ;;  %v4251_v34 = vmul.f32 %v5578_v51, %v4250_v36  ;;  %v9451_v36 = vld [vmem:[#allocation51_spill] sm:$0xff]  ;;  %vm9459_vm15 = vmmov %vm9449_vm5 }
 0xd54   :  { %v4291_v17 = vmul.f32 %v4248_v45, %v8671_v58  ;;  %v4238_v24 = vsel %vm4237_vm1, %v5576_v46, %v4234_v13 }
 0xd55   :  { %v4252_v18 = vmul.f32 0.5, %v4251_v34  ;;  %v4290_v40 = vmul.f32 %v4238_v24, %v8647_v15  ;;  %v5626_v24 = vld [vmem:[%s9117_s7 + $0x38] sm:$0xff] }
 0xd56   :  { %v5580_v57 = vpop.eup %5579  ;;  %v4312_v61 = vmul.f32 %v8678_v62, %v4291_v17 }
 0xd57   :  { %v4220_v23 = vmul.f32 %v5580_v57, %v4113_v31  ;;  %vm4226_vm14 = vweird.f32 %v5580_v57  ;;  %v4253_v52 = vsub.f32 1.5, %v4252_v18  ;;  %v4311_v20 = vmul.f32 %v8678_v62, %v4290_v40  ;;  %v5622_v31 = vld [vmem:[%s9117_s7 + $0x18] sm:$0xff] }
 0xd58   :  { %v4333_v2 = vadd.f32 %v8683_v8, %v4312_v61  ;;  %vm4227_vm6 = vmor %vm4225_vm3, %vm4226_vm14  ;;  %vm9452_vm3 = vcmask 261120  }
 0xd59   :  { %v4221_v56 = vmul.f32 %v5580_v57, %v4220_v23  ;;  %v4254_v10 = vmul.f32 %v5578_v51, %v4253_v52  ;;  %v4332_v60 = vadd.f32 %v8683_v8, %v4311_v20  ;;  %vm9457_vm7 = vmmov %vm9452_vm3 }
 0xd5a   :  { %v4349_v54 = vmax.f32 %v4333_v2, 0.0 }
 0xd5b   :  { %v4222_v63 = vmul.f32 0.5, %v4221_v56  ;;  %v4258_v53 = vsel %vm4257_vm9, %v5578_v51, %v4254_v10  ;;  %v4348_v29 = vmax.f32 %v4332_v60, 0.0  ;;  %vm9460_vm9 = vmmov %vm9449_vm5 }
 0xd5c   :  { %4393 = vrot.lane.b32.xlu0 %v4349_v54, %s5895_s5  ;;  %v4292_v15 = vmul.f32 %v4258_v53, %v8636_v39  ;;  %v9454_v54 = vld [vmem:[#allocation53_spill] sm:$0xff] }
 0xd5d   :  { %v4223_v22 = vsub.f32 1.5, %v4222_v63 }
 0xd5e   :  { %v4313_v14 = vmul.f32 %v8678_v62, %v4292_v15 }
 0xd5f   :  { %v4224_v58 = vmul.f32 %v5580_v57, %v4223_v22  ;;  %v4469_v3 = vpop.permute.xlu0 %4468 }
 0xd60   :  { %4478 = vmatpush.bf16.msra.mxu0 %v4469_v3  ;;  %5074 = vmatmul.msk.bf16.gmra.mxu2 %vm9446_vm8, %v5618_v4  ;;  %v4334_v26 = vadd.f32 %v8683_v8, %v4313_v14  ;;  %vm9455_vm8 = vmmov %vm9452_vm3  ;;  %v8890_v3 = vpop.f32.mrf.mxu1 }
 0xd61   :  { %v4228_v1 = vsel %vm4227_vm6, %v5580_v57, %v4224_v58  ;;  %vm9453_vm6 = vmmov %vm9449_vm5  ;;  %v5624_v58 = vld [vmem:[%s9117_s7 + $0x28] sm:$0xff] }
 0xd62   :  { %v4289_v37 = vmul.f32 %v4228_v1, %v8619_v5  ;;  %v4350_v48 = vmax.f32 %v4334_v26, 0.0 }
 0xd63   :  { %5059 = vmatmul.msk.bf16.vlgmr.msra.gmra.mxu0 %vm9447_vm13, %v5619_v0  ;;  %vm9458_vm13 = vmmov %vm9449_vm5 }
 0xd64   :  { %v4310_v7 = vmul.f32 %v8678_v62, %v4289_v37  ;;  %v9461_v37 = vld [vmem:[#allocation27_spill] sm:$0xff] }
 0xd66   :  { %v4331_v5 = vadd.f32 %v8683_v8, %v4310_v7 }
 0xd68   :  { %v4347_v47 = vmax.f32 %v4331_v5, 0.0 }
 0xd6a   :  { %4389 = vrot.lane.b32.xlu1 %v4347_v47, %s5895_s5  ;;  %v9463_v47 = vld [vmem:[#allocation26_spill] sm:$0xff] }
 0xd72   :  { %4391 = vrot.lane.b32.xlu1 %v4348_v29, %s5895_s5  ;;  %v9465_v29 = vld [vmem:[#allocation28_spill] sm:$0xff] }
 0xd73   :  { %5060 = vmatmul.msk.bf16.gmra.mxu0 %vm9448_vm12, %v5620_v16  ;;  %vm9462_vm12 = vmmov %vm9452_vm3 }
 0xd7a   :  { %4395 = vrot.lane.b32.xlu1 %v4350_v48, %s5895_s5 }
 0xd7e   :  { %v4086_v49 = vpop.xlane.xlu2 %4085 }
 0xd7f   :  { %v4102_v39 = vmul.f32 %v4086_v49, %v7141_v33 }
 0xd81   :  { %v4118_v27 = vadd.f32 1e-05, %v4102_v39 }
 0xd83   :  { %5581 = vrsqrt.f32 %v4118_v27  ;;  %5061 = vmatmul.msk.bf16.gmra.mxu0 %vm9449_vm5, %v5621_v41  ;;  %vm4275_vm4 = vweird.f32 %v4118_v27  ;;  %vm9464_vm5 = vmmov %vm9452_vm3 }
 0xd84   :  { %v4386_v2 = vpop.permute.xlu1 %4385 }
 0xd85   :  { %v4425_v63 = vadd.f32 %v4386_v2, %v9454_v54 }
 0xd86   :  { %v4388_v18 = vpop.permute.xlu2 %4387 }
 0xd89   :  { %v5582_v25 = vpop.eup %5581 }
 0xd8a   :  { %v4270_v59 = vmul.f32 %v5582_v25, %v4118_v27  ;;  %v4083_v43 = vpop.xlane.xlu0 %4082  ;;  %vm4276_vm0 = vweird.f32 %v5582_v25  ;;  %v9467_v27 = vld [vmem:[#allocation29_spill] sm:$0xff] }
 0xd8b   :  { %v4101_v32 = vmul.f32 %v4083_v43, %v7141_v33  ;;  %vm4277_vm2 = vmor %vm4275_vm4, %vm4276_vm0  ;;  %v8896_v5 = vpop.f32.mrf.mxu1 }
 0xd8c   :  { %v4271_v9 = vmul.f32 %v5582_v25, %v4270_v59  ;;  %vm9466_vm0 = vmmov %vm9452_vm3 }
 0xd8d   :  { %v4117_v42 = vadd.f32 1e-05, %v4101_v32  ;;  %vm9468_vm4 = vmmov %vm9466_vm0 }
 0xd8e   :  { %v4272_v46 = vmul.f32 0.5, %v4271_v9 }
 0xd8f   :  { %5583 = vrsqrt.f32 %v4117_v42  ;;  %vm4265_vm11 = vweird.f32 %v4117_v42 }
 0xd90   :  { %v4273_v12 = vsub.f32 1.5, %v4272_v46 }
 0xd92   :  { %v4274_v50 = vmul.f32 %v5582_v25, %v4273_v12 }
 0xd93   :  { %5062 = vmatmul.msk.bf16.gmra.mxu0 %vm9450_vm10, %v5622_v31  ;;  %v8903_v16 = vpop.f32.mrf.mxu1  ;;  %vm9472_vm10 = vmmov %vm9466_vm0 }
 0xd94   :  { %v4278_v38 = vsel %vm4277_vm2, %v5582_v25, %v4274_v50  ;;  %vm9470_vm2 = vmmov %vm9466_vm0 }
 0xd95   :  { %v4294_v35 = vmul.f32 %v4278_v38, %v8724_v28  ;;  %v5584_v11 = vpop.eup %5583  ;;  %v9469_v38 = vld [vmem:[#allocation31_spill] sm:$0xff] }
 0xd96   :  { %v4260_v6 = vmul.f32 %v5584_v11, %v4117_v42  ;;  %vm4266_vm14 = vweird.f32 %v5584_v11 }
 0xd97   :  { %v4315_v33 = vmul.f32 %v8678_v62, %v4294_v35  ;;  %vm4267_vm1 = vmor %vm4265_vm11, %vm4266_vm14 }
 0xd98   :  { %v4261_v51 = vmul.f32 %v5584_v11, %v4260_v6  ;;  %vm9473_vm14 = vmmov %vm9466_vm0 }
 0xd99   :  { %v4336_v21 = vadd.f32 %v8683_v8, %v4315_v33  ;;  %vm9474_vm11 = vmmov %vm9466_vm0 }
 0xd9a   :  { %v4262_v45 = vmul.f32 0.5, %v4261_v51  ;;  %v9471_v51 = vld [vmem:[#allocation33_spill] sm:$0xff] }
 0xd9b   :  { %v4352_v30 = vmax.f32 %v4336_v21, 0.0  ;;  %v8910_v59 = vpop.f32.mrf.mxu1 }
 0xd9c   :  { %v4263_v17 = vsub.f32 1.5, %v4262_v45 }
 0xd9d   :  { %4399 = vrot.lane.b32.xlu0 %v4352_v30, %s5895_s5  ;;  %v4384_v28 = vpop.permute.xlu0 %4383 }
 0xd9e   :  { %v4264_v19 = vmul.f32 %v5584_v11, %v4263_v17  ;;  %v4424_v57 = vadd.f32 %v4384_v28, %v9451_v36 }
 0xda0   :  { %v4268_v61 = vsel %vm4267_vm1, %v5584_v11, %v4264_v19  ;;  %5082 = vmatmul.msk.f32.gmra.mxu1 %vm9452_vm3, %v4424_v57  ;;  %vm9475_vm1 = vmmov %vm9466_vm0 }
 0xda1   :  { %v4293_v23 = vmul.f32 %v4268_v61, %v8697_v44  ;;  %v9456_v44 = vld [vmem:[#allocation25_spill] sm:$0xff]  ;;  %vm9476_vm3 = vmmov %vm9466_vm0 }
 0xda2   :  { %v4426_v22 = vadd.f32 %v4388_v18, %v9456_v44 }
 0xda3   :  { %5063 = vmatmul.msk.bf16.gmra.mxu0 %vm9453_vm6, %v5623_v55  ;;  %v4314_v34 = vmul.f32 %v8678_v62, %v4293_v23  ;;  %v5625_v62 = vld [vmem:[%s9117_s7 + $0x30] sm:$0xff]  ;;  %vm9477_vm6 = vmmov %vm9466_vm0 }
 0xda5   :  { %v4335_v56 = vadd.f32 %v8683_v8, %v4314_v34  ;;  %v4529_v8 = vpop.f32.mrf.mxu2 }
 0xda7   :  { %v4351_v13 = vmax.f32 %v4335_v56, 0.0 }
 0xda8   :  { %5083 = vmatmul.msk.f32.gmra.mxu1 %vm9455_vm8, %v4425_v63  ;;  %v8914_v32 = vpop.f32.mrf.mxu1  ;;  %vm9478_vm8 = vmmov %vm9466_vm0 }
 0xda9   :  { %4397 = vrot.lane.b32.xlu2 %v4351_v13, %s5895_s5 }
 0xdad   :  { %v4531_v52 = vpop.f32.mrf.mxu2 }
 0xdb0   :  { %5084 = vmatmul.msk.f32.gmra.mxu1 %vm9457_vm7, %v4426_v22  ;;  %v8922_v33 = vpop.f32.mrf.mxu1  ;;  %vm9479_vm7 = vmmov %vm9466_vm0 }
 0xdb3   :  { %5064 = vmatmul.msk.bf16.gmra.mxu0 %vm9458_vm13, %v5624_v58  ;;  %vm9480_vm13 = vmmov %vm9466_vm0 }
 0xdb5   :  { %v4534_v0 = vpop.f32.mrf.mxu2 }
 0xdbd   :  { %v4536_v26 = vpop.f32.mrf.mxu2 }
 0xdc1   :  { %v4656_v28 = vpop.f32.mrf.mxu1 }
 0xdc3   :  { %5065 = vmatmul.msk.bf16.gmra.mxu0 %vm9459_vm15, %v5625_v62  ;;  %vm9481_vm15 = vmmov %vm9466_vm0 }
 0xdc5   :  { %v4539_v25 = vpop.f32.mrf.mxu2 }
 0xdcd   :  { %v4541_v42 = vpop.f32.mrf.mxu2 }
 0xdce   :  { %v4394_v53 = vpop.permute.xlu0 %4393 }
 0xdcf   :  { %v4429_v14 = vadd.f32 %v4394_v53, %v9465_v29 }
 0xdd3   :  { %5066 = vmatmul.msk.bf16.gmra.mxu0 %vm9460_vm9, %v5626_v24  ;;  %vm9482_vm9 = vmmov %vm9466_vm0 }
 0xdd5   :  { %v4544_v6 = vpop.f32.mrf.mxu2 }
 0xddc   :  { %v4390_v1 = vpop.permute.xlu1 %4389 }
 0xddd   :  { %v4427_v4 = vadd.f32 %v4390_v1, %v9461_v37  ;;  %v4546_v19 = vpop.f32.mrf.mxu2 }
 0xddf   :  { %5085 = vmatmul.msk.f32.gmra.mxu1 %vm9462_vm12, %v4427_v4  ;;  %vm9483_vm12 = vmmov %vm9466_vm0 }
 0xde0   :  { %v4480_v40 = vpop.f32.mrf.mxu0 }
 0xde1   :  { %v8894_v7 = vadd.f32 %v4529_v8, %v4480_v40 }
 0xde4   :  { %v4392_v10 = vpop.permute.xlu1 %4391 }
 0xde5   :  { %v4428_v20 = vadd.f32 %v4392_v10, %v9463_v47  ;;  %v4549_v23 = vpop.f32.mrf.mxu2 }
 0xde7   :  { %5086 = vmatmul.msk.f32.gmra.mxu1 %vm9464_vm5, %v4428_v20  ;;  %vm9484_vm5 = vmmov %vm9466_vm0 }
 0xde8   :  { %v4482_v15 = vpop.f32.mrf.mxu0 }
 0xde9   :  { %v8900_v60 = vadd.f32 %v4531_v52, %v4482_v15 }
 0xdec   :  { %v4396_v48 = vpop.permute.xlu1 %4395 }
 0xded   :  { %v4430_v41 = vadd.f32 %v4396_v48, %v9467_v27  ;;  %v4551_v13 = vpop.f32.mrf.mxu2 }
 0xdef   :  { %5087 = vmatmul.msk.f32.gmra.mxu1 %vm9466_vm0, %v4429_v14 }
 0xdf0   :  { %v4485_v49 = vpop.f32.mrf.mxu0 }
 0xdf1   :  { %v8906_v39 = vadd.f32 %v4534_v0, %v4485_v49 }
 0xdf5   :  { %v4554_v8 = vpop.f32.mrf.mxu2 }
 0xdf7   :  { %5088 = vmatmul.msk.f32.gmra.mxu1 %vm9468_vm4, %v4430_v41  ;;  %v8930_v41 = vld [vmem:[#allocation17] ss:$0 sm:$0xff]  ;;  %vm9485_vm4 = vmmov %vm9466_vm0 }
 0xdf8   :  { %v4487_v9 = vpop.f32.mrf.mxu0 }
 0xdf9   :  { %v8912_v43 = vadd.f32 %v4536_v26, %v4487_v9 }
 0xdfd   :  { %v4556_v1 = vpop.f32.mrf.mxu2 }
 0xe00   :  { %v4490_v46 = vpop.f32.mrf.mxu0 }
 0xe01   :  { %v8916_v12 = vadd.f32 %v4539_v25, %v4490_v46 }
 0xe03   :  { %v4398_v50 = vpop.permute.xlu2 %4397 }
 0xe04   :  { %v4431_v35 = vadd.f32 %v4398_v50, %v9469_v38 }
 0xe05   :  { %v4559_v40 = vpop.f32.mrf.mxu2 }
 0xe06   :  { %5089 = vmatmul.msk.f32.gmra.mxu1 %vm9470_vm2, %v4431_v35  ;;  %vm9486_vm2 = vmmov %vm9466_vm0 }
 0xe08   :  { %v4492_v31 = vpop.f32.mrf.mxu0 }
 0xe09   :  { %v8920_v11 = vadd.f32 %v4541_v42, %v4492_v31 }
 0xe0d   :  { %v4561_v47 = vpop.f32.mrf.mxu2 }
 0xe0f   :  { %v4400_v21 = vpop.permute.xlu0 %4399 }
 0xe10   :  { %v4432_v30 = vadd.f32 %v4400_v21, %v9471_v51  ;;  %v4495_v45 = vpop.f32.mrf.mxu0 }
 0xe11   :  { %v4545_v17 = vadd.f32 %v4544_v6, %v4495_v45 }
 0xe12   :  { %5090 = vmatmul.msk.f32.gmra.mxu1 %vm9472_vm10, %v4432_v30  ;;  %vm9487_vm10 = vmmov %vm9466_vm0 }
 0xe13   :  { %v8926_v36 = vadd.f32 %v4656_v28, %v4545_v17 }
 0xe15   :  { %v4564_v15 = vpop.f32.mrf.mxu2 }
 0xe18   :  { %v4497_v57 = vpop.f32.mrf.mxu0 }
 0xe19   :  { %v4547_v61 = vadd.f32 %v4546_v19, %v4497_v57 }
 0xe1d   :  { %v4659_v2 = vpop.f32.mrf.mxu1  ;;  %v4566_v26 = vpop.f32.mrf.mxu2 }
 0xe1e   :  { %v8928_v55 = vadd.f32 %v4659_v2, %v4547_v61 }
 0xe20   :  { %v4500_v34 = vpop.f32.mrf.mxu0 }
 0xe21   :  { %v4550_v56 = vadd.f32 %v4549_v23, %v4500_v34 }
 0xe25   :  { %v4662_v54 = vpop.f32.mrf.mxu1 }
 0xe26   :  { %v4694_v63 = vadd.f32 %v4662_v54, %v4550_v56 }
 0xe28   :  { %v4502_v18 = vpop.f32.mrf.mxu0 }
 0xe29   :  { %v4552_v44 = vadd.f32 %v4551_v13, %v4502_v18  ;;  %v4714_v13 = vadd.f32 %v8930_v41, %v4694_v63  ;;  %v5897_v63 = vmov 0  }
 0xe2a   :  { %5350 = vset.pattern.permute.xlu1 %v5897_v63  ;;  %5351 = vset.pattern.permute.xlu0 %v5897_v63 }
 0xe2d   :  { %v4665_v22 = vpop.f32.mrf.mxu1 }
 0xe2e   :  { %v4695_v58 = vadd.f32 %v4665_v22, %v4552_v44  ;;  %v4713_v44 = vadd.f32 %v8930_v41, %v8928_v55  ;;  %v4730_v22 = vmax.f32 %v4714_v13, 0.0  ;;  %v4690_v55 = vadd.f32 %v8914_v32, %v8916_v12 }
 0xe2f   :  { %v4687_v32 = vadd.f32 %v8896_v5, %v8900_v60  ;;  %v4738_v5 = vld [vmem:[%s9008_s23] sm:$0x1] }
 0xe30   :  { %v4505_v62 = vpop.f32.mrf.mxu0  ;;  %v4715_v56 = vadd.f32 %v8930_v41, %v4695_v58  ;;  %v4712_v58 = vadd.f32 %v8930_v41, %v8926_v36 }
 0xe31   :  { %v4555_v45 = vadd.f32 %v4554_v8, %v4505_v62  ;;  %v4691_v62 = vadd.f32 %v8922_v33, %v8920_v11  ;;  %v4729_v8 = vmax.f32 %v4713_v44, 0.0  ;;  %v4689_v11 = vadd.f32 %v8910_v59, %v8912_v43 }
 0xe32   :  { %v4731_v18 = vmax.f32 %v4715_v56, 0.0  ;;  %v4710_v33 = vadd.f32 %v8930_v41, %v4690_v55  ;;  %v4686_v59 = vadd.f32 %v8890_v3, %v8894_v7  ;;  %v4707_v43 = vadd.f32 %v8930_v41, %v4687_v32 }
 0xe38   :  { %v4507_v52 = vpop.f32.mrf.mxu0 }
 0xe39   :  { %v4557_v6 = vadd.f32 %v4556_v1, %v4507_v52  ;;  %v4711_v52 = vadd.f32 %v8930_v41, %v4691_v62  ;;  %v4728_v1 = vmax.f32 %v4712_v58, 0.0 }
 0xe3b   :  { %v4727_v36 = vmax.f32 %v4711_v52, 0.0 }
 0xe40   :  { %v4510_v4 = vpop.f32.mrf.mxu0 }
 0xe41   :  { %v4560_v50 = vadd.f32 %v4559_v40, %v4510_v4  ;;  %v4709_v4 = vadd.f32 %v8930_v41, %v4689_v11  ;;  %v4726_v40 = vmax.f32 %v4710_v33, 0.0 }
 0xe48   :  { %v4512_v0 = vpop.f32.mrf.mxu0 }
 0xe49   :  { %v4562_v25 = vadd.f32 %v4561_v47, %v4512_v0 }
 0xe50   :  { %v4515_v53 = vpop.f32.mrf.mxu0 }
 0xe51   :  { %v4565_v48 = vadd.f32 %v4564_v15, %v4515_v53 }
 0xe58   :  { %v4517_v14 = vpop.f32.mrf.mxu0 }
 0xe59   :  { %v4567_v49 = vadd.f32 %v4566_v26, %v4517_v14 }
 0xe5c   :  { %v4668_v24 = vpop.f32.mrf.mxu1 }
 0xe5d   :  { %v4696_v57 = vadd.f32 %v4668_v24, %v4555_v45  ;;  %v4739_v24 = vld [vmem:[#allocation2] sm:$0x1] }
 0xe5e   :  { %4742 = vperm.xlu1 %5350, %v4739_v24  }
 0xe5f   :  { %v4716_v2 = vadd.f32 %v8930_v41, %v4696_v57 }
 0xe61   :  { %v4732_v54 = vmax.f32 %v4716_v2, 0.0 }
 0xe64   :  { %v4671_v37 = vpop.f32.mrf.mxu1 }
 0xe65   :  { %v4697_v17 = vadd.f32 %v4671_v37, %v4557_v6  ;;  %v4688_v37 = vadd.f32 %v8903_v16, %v8906_v39  ;;  %v4706_v16 = vadd.f32 %v8930_v41, %v4686_v59  ;;  %v4723_v39 = vmax.f32 %v4707_v43, 0.0 }
 0xe67   :  { %v4717_v61 = vadd.f32 %v8930_v41, %v4697_v17  ;;  %v4708_v12 = vadd.f32 %v8930_v41, %v4688_v37  ;;  %v4722_v47 = vmax.f32 %v4706_v16, 0.0 }
 0xe69   :  { %v4733_v34 = vmax.f32 %v4717_v61, 0.0  ;;  %v4724_v0 = vmax.f32 %v4708_v12, 0.0 }
 0xe6c   :  { %v4674_v10 = vpop.f32.mrf.mxu1 }
 0xe6d   :  { %v4698_v21 = vadd.f32 %v4674_v10, %v4560_v50  ;;  %v4725_v10 = vmax.f32 %v4709_v4, 0.0 }
 0xe6f   :  { %v4718_v28 = vadd.f32 %v8930_v41, %v4698_v21 }
 0xe71   :  { %v4734_v23 = vmax.f32 %v4718_v28, 0.0 }
 0xe74   :  { %v4677_v20 = vpop.f32.mrf.mxu1 }
 0xe75   :  { %v4699_v38 = vadd.f32 %v4677_v20, %v4562_v25 }
 0xe77   :  { %v4719_v51 = vadd.f32 %v8930_v41, %v4699_v38 }
 0xe79   :  { %v4735_v19 = vmax.f32 %v4719_v51, 0.0 }
 0xe83   :  { %v4680_v29 = vpop.f32.mrf.mxu1 }
 0xe84   :  { %v4700_v9 = vadd.f32 %v4680_v29, %v4565_v48 }
 0xe86   :  { %v4720_v35 = vadd.f32 %v8930_v41, %v4700_v9 }
 0xe88   :  { %v4736_v30 = vmax.f32 %v4720_v35, 0.0 }
 0xe8f   :  { %v4683_v27 = vpop.f32.mrf.mxu1 }
 0xe90   :  { %v4701_v46 = vadd.f32 %v4683_v27, %v4567_v49 }
 0xe92   :  { %v4721_v42 = vadd.f32 %v8930_v41, %v4701_v46 }
 0xe94   :  { %v4737_v31 = vmax.f32 %v4721_v42, 0.0 }
 0xe96   :  { %5091 = vmatpush.xpose.msk.msra.mxu3 %vm9473_vm14, %v4737_v31  ;;  %vm9488_vm14 = vmmov %vm9466_vm0 }
 0xe9a   :  { %5092 = vmatpush.xpose.msk.msra.mxu3 %vm9474_vm11, %v4736_v30 }
 0xe9e   :  { %5093 = vmatpush.xpose.msk.msra.mxu3 %vm9475_vm1, %v4735_v19 }
 0xea2   :  { %5094 = vmatpush.xpose.msk.msra.mxu3 %vm9476_vm3, %v4734_v23 }
 0xea6   :  { %5095 = vmatpush.xpose.msk.msra.mxu3 %vm9477_vm6, %v4733_v34 }
 0xeaa   :  { %5096 = vmatpush.xpose.msk.msra.mxu3 %vm9478_vm8, %v4732_v54 }
 0xeae   :  { %5097 = vmatpush.xpose.msk.msra.mxu3 %vm9479_vm7, %v4731_v18 }
 0xeb2   :  { %5098 = vmatpush.xpose.msk.msra.mxu3 %vm9480_vm13, %v4730_v22 }
 0xeb6   :  { %5099 = vmatpush.xpose.msk.msra.mxu3 %vm9481_vm15, %v4729_v8 }
 0xeba   :  { %5100 = vmatpush.xpose.msk.msra.mxu3 %vm9482_vm9, %v4728_v1 }
 0xebe   :  { %5101 = vmatpush.xpose.msk.msra.mxu3 %vm9483_vm12, %v4727_v36 }
 0xec2   :  { %5102 = vmatpush.xpose.msk.msra.mxu3 %vm9484_vm5, %v4726_v40 }
 0xec6   :  { %5103 = vmatpush.xpose.msk.msra.mxu3 %vm9466_vm0, %v4725_v10 }
 0xeca   :  { %5104 = vmatpush.xpose.msk.msra.mxu3 %vm9485_vm4, %v4724_v0 }
 0xece   :  { %5105 = vmatpush.xpose.msk.msra.mxu3 %vm9486_vm2, %v4723_v39 }
 0xed0   :  { %v4743_v3 = vpop.permute.xlu1 %4742 }
 0xed1   :  { %v4745_v7 = vperm.slane %v4743_v3, 0 }
 0xed2   :  { %5106 = vmatpush.xpose.msk.msra.mxu3 %vm9487_vm10, %v4722_v47 }
 0xed5   :  { %5107 = vmatmul.msk.f32.vlgmr.msra.gmra.mxu3 %vm9488_vm14, %v4738_v5 }
 0xf58   :  { %v4814_v60 = vpop.f32.mrf.mxu3 }
 0xf59   :  { %v4815_v20 = vadd.f32 %v4814_v60, %v4745_v7 }
 0xf5b   :  { %4817 = vst [vmem:[#allocation18] sm:$0x1] %v4815_v20 }
 0xf5c   :  { %4828 = dma.vmem_to_hbm [thread:$0]  %s4824_s10, 16, %s4826_s15, [#allocation5]  }
 0xf5d   :  { %5877 = dma.done.wait [#allocation5], 16  }
 0xf5e   :  { %5878 = vsyncadd [#allocation5], 4294967280 }
 0xf5f   :  { %4833 = vsyncpa [#allocation4], 1 }
 0xf60   :  { %4834 = vsyncpa [#allocation7], 1 }
 0xf61   :  { %4835 = vsyncpa [#allocation10], 1 }
 0xf62   :  { %4836 = vsyncpa [#allocation13], 1 }
 0xf63   :  { %4837 = vsyncpa [#allocation16], 1 }
 0xf64   :  { %4838 = vsyncpa [#allocation5], 1 }

</bundles_post_ra>
